<compile_context>
chip_gen: v7x
topology: tpu7x:2x2x1
jax: 0.10.0
libtpu: 0.0.40
codegen_flags: <defaults>
</compile_context>

<pallas_src>
import jax
import jax.numpy as jnp
from jax.experimental import pallas as pl
from jax.experimental.pallas import tpu as pltpu


def _finn_ac_kernel(prm_ref, dt_ref, hdt_ref, dt6_ref,
                    u0_ref, w1_ref, w2t_ref, w3_ref, out_ref):
    """Integrate the Allen-Cahn FINN ODE over all T time points in one call.

    prm_ref : SMEM (4,)      f32  [D, stencil0, stencil1, p_mult]   (prefetch)
    dt_ref  : SMEM (T,)      f32  t[i] - t[i-1]                     (prefetch)
    hdt_ref : SMEM (T,)      f32  0.5 * dt                          (prefetch)
    dt6_ref : SMEM (T,)      f32  dt / 6                            (prefetch)
    u0_ref  : VMEM (1, Nx)   f32  initial condition u[0] (lane-dense)
    w1_ref  : VMEM (H1, 1)   f32  layer-1 weight, left-acting column
    w2t_ref : VMEM (H2, H1)  f32  layer-2 weight, left-acting (W2^T)
    w3_ref  : VMEM (H2, 1)   f32  layer-3 weight column
    out_ref : VMEM (T, Nx)   f32  full trajectory; row i = u(t_i)
    """
    H1 = w1_ref.shape[0]
    H2 = w2t_ref.shape[0]
    Nx = u0_ref.shape[1]
    T = out_ref.shape[0]

    # Hoisted scalar flux constants.  Reference flux_kernel (periodic wrap):
    #   flux[i] = D/10 * (2*s0*u[i] + s1*(u[i-1] + u[i+1]))
    D = prm_ref[0]
    c0 = 0.2 * D * prm_ref[1]
    c1 = 0.1 * D * prm_ref[2]
    pm = prm_ref[3]

    # Loop-invariant broadcasts / casts, hoisted out of the time loop
    # (JAX does not CSE broadcast_in_dim — previously re-emitted 60x).
    w1_b = jnp.broadcast_to(w1_ref[...], (H1, Nx))      # (H1, Nx) f32
    w3_b = jnp.broadcast_to(w3_ref[...], (H2, Nx))      # (H2, Nx) f32
    w2t_bf = w2t_ref[...].astype(jnp.bfloat16)          # (H2, H1) bf16 MXU operand

    def state_fn(u):
        """du/dt for a (1, Nx) state row."""
        # Only the symmetric neighbor sum u[i-1] + u[i+1] is needed; pltpu.roll
        # requires non-negative shifts (Nx-1 == -1 cyclically).
        u_nbr = (pltpu.roll(u, shift=1, axis=1)
                 + pltpu.roll(u, shift=Nx - 1, axis=1))
        flux = c0 * u + c1 * u_nbr

        # function_learner MLP (bias=False, sigmoid=False -> tanh on every
        # layer, incl. output), transposed so Nx stays on lanes.
        h1 = jnp.tanh(w1_b * u)                                           # (H1, Nx) f32
        h2 = jnp.tanh(jnp.dot(w2t_bf, h1.astype(jnp.bfloat16),
                              preferred_element_type=jnp.float32))        # (H2, Nx) f32
        # Output layer (M=1): VPU multiply + XLU sublane reduce — no MXU trip.
        h3 = jnp.tanh(jnp.sum(w3_b * h2, axis=0, keepdims=True))          # (1, Nx)  f32

        # state = flux + func_nn(u) * p_mult
        return flux + h3 * pm

    # odeint semantics: row 0 of the trajectory is the initial condition.
    out_ref[0:1, :] = u0_ref[...]

    # Fully unrolled RK4 time loop (T small & static).
    u = u0_ref[...]
    for i in range(1, T):
        dt, hdt, dt6 = dt_ref[i], hdt_ref[i], dt6_ref[i]
        k1 = state_fn(u)
        k2 = state_fn(u + hdt * k1)
        k3 = state_fn(u + hdt * k2)
        k4 = state_fn(u + dt * k3)
        u = u + dt6 * (k1 + 2.0 * k2 + 2.0 * k3 + k4)
        # (1, Nx) row store: sublane-masked but off the serial chain and
        # negligible at T=16.  TODO(synk): buffer 8 rows into unmasked (8, Nx)
        # stores if T / Nx are scaled up.
        out_ref[i:i + 1, :] = u


def finn_allen_cahn_forward(t, u, D, stencil, p_mult, W1, W2, W3):
    """Equivalent of FINN_AllenCahn.forward(t, u): integrate u[0] over t.

    t : (T,) f32, u : (T, Nx) f32 (only u[0] is used, like the PyTorch module)
    W1: (1,H1), W2: (H1,H2), W3: (H2,1)  -- x @ W convention (Linear, no bias)
    returns: (T, Nx) f32 trajectory
    """
    T = int(t.shape[0])
    Nx = int(u.shape[1])
    H1 = int(W1.shape[1])
    H2 = int(W2.shape[1])

    # Lane-dense state and left-acting weights.
    u0 = u[0].reshape(1, Nx).astype(jnp.float32)
    w1 = W1.reshape(H1, 1).astype(jnp.float32)       # (1,H1)  -> (H1,1) column
    w2t = W2.T.astype(jnp.float32)                   # (H1,H2) -> (H2,H1)
    w3 = W3.reshape(H2, 1).astype(jnp.float32)       # (H2,1) column

    # Precomputed RK4 step scalars (dt[0] is unused).
    t = t.astype(jnp.float32)
    dt = jnp.concatenate([jnp.zeros((1,), jnp.float32), t[1:] - t[:-1]])
    hdt = 0.5 * dt
    dt6 = dt / 6.0
    prm = jnp.array([D, stencil[0], stencil[1], p_mult], dtype=jnp.float32)

    kernel = pl.pallas_call(
        _finn_ac_kernel,
        out_shape=jax.ShapeDtypeStruct((T, Nx), jnp.float32),
        grid_spec=pltpu.PrefetchScalarGridSpec(
            num_scalar_prefetch=4,          # prm, dt, 0.5*dt, dt/6 land in SMEM
            grid=(1,),                      # whole time loop runs in-kernel
            in_specs=[
                pl.BlockSpec((1, Nx), lambda i, p, d, h, s: (0, 0)),     # u0
                pl.BlockSpec((H1, 1), lambda i, p, d, h, s: (0, 0)),     # W1 col
                pl.BlockSpec((H2, H1), lambda i, p, d, h, s: (0, 0)),    # W2^T
                pl.BlockSpec((H2, 1), lambda i, p, d, h, s: (0, 0)),     # W3 col
            ],
            out_specs=pl.BlockSpec((T, Nx), lambda i, p, d, h, s: (0, 0)),
        ),
        compiler_params=pltpu.CompilerParams(
            dimension_semantics=("arbitrary",)),
    )
    return kernel(prm, dt, hdt, dt6, u0, w1, w2t, w3)


def _finn_ac_reference(t, u0, D, stencil, p_mult, W1, W2, W3):
    """Pure-JAX f32 reference (same fixed-step RK4, x @ W convention)."""
    c0 = 0.2 * D * stencil[0]
    c1 = 0.1 * D * stencil[1]

    def state_fn(u):                        # u: (Nx,)
        flux = c0 * u + c1 * (jnp.roll(u, 1) + jnp.roll(u, -1))
        h = jnp.tanh(u[:, None] @ W1)       # (Nx, H1)
        h = jnp.tanh(h @ W2)                # (Nx, H2)
        h = jnp.tanh(h @ W3)[:, 0]          # (Nx,)
        return flux + h * p_mult

    def step(u, dt):
        k1 = state_fn(u)
        k2 = state_fn(u + 0.5 * dt * k1)
        k3 = state_fn(u + 0.5 * dt * k2)
        k4 = state_fn(u + dt * k3)
        return u + dt / 6.0 * (k1 + 2.0 * k2 + 2.0 * k3 + k4)

    rows = [u0]
    for i in range(1, int(t.shape[0])):
        rows.append(step(rows[-1], t[i] - t[i - 1]))
    return jnp.stack(rows)


if __name__ == "__main__":
    key = jax.random.PRNGKey(0)
    k_u, k_w1, k_w2, k_w3 = jax.random.split(key, 4)

    # Small shapes consistent with the module: 1-D Allen-Cahn field,
    # layer_sizes = [1, 32, 32, 1], bias=False, sigmoid=False.
    T, Nx = 16, 128
    H1, H2 = 32, 32

    # u trajectory tensor (module only consumes u[0]) and time points.
    u = jax.random.uniform(k_u, (T, Nx), jnp.float32, -1.0, 1.0)
    t = jnp.linspace(0.0, 0.15, T).astype(jnp.float32)

    # Deterministic PyTorch-Linear-style init: U(-1/sqrt(fan_in), 1/sqrt(fan_in)).
    def init_w(k, fan_in, fan_out):
        bound = 1.0 / (fan_in ** 0.5)
        return jax.random.uniform(k, (fan_in, fan_out), jnp.float32, -bound, bound)

    W1 = init_w(k_w1, 1, H1)    # (in, out) so that h = x @ W
    W2 = init_w(k_w2, H1, H2)
    W3 = init_w(k_w3, H2, 1)

    D = jnp.float32(0.005)                          # diffusion coefficient (fixed)
    stencil = jnp.array([-1.0, 1.0], jnp.float32)   # fixed numerical stencil
    p_mult = jnp.float32(10.0)                      # reaction multiplier parameter

    pred = finn_allen_cahn_forward(t, u, D, stencil, p_mult, W1, W2, W3)
    pred = jax.block_until_ready(pred)

    assert pred.shape == (T, Nx), pred.shape
    assert bool(jnp.all(jnp.isfinite(pred)))
    # Row 0 of the trajectory must be the initial condition (odeint semantics).
    assert bool(jnp.allclose(pred[0], u[0], atol=1e-6))
    # Validate against the f32 pure-JAX reference (loose tol: one bf16 matmul
    # layer inside the kernel).
    ref = _finn_ac_reference(t, u[0], D, stencil, p_mult, W1, W2, W3)
    assert bool(jnp.allclose(pred, ref, rtol=5e-2, atol=5e-2))
    print("KERNEL_OK")
</pallas_src>

<mosaic_0001>
module attributes {stable_mosaic.version = 11 : i64} {
  func.func @_finn_ac_kernel(%arg0: i32, %arg1: memref<4xf32, #tpu.memory_space<smem>>, %arg2: memref<16xf32, #tpu.memory_space<smem>>, %arg3: memref<16xf32, #tpu.memory_space<smem>>, %arg4: memref<16xf32, #tpu.memory_space<smem>>, %arg5: memref<1x128xf32, #tpu.memory_space<vmem>>, %arg6: memref<32x1xf32, #tpu.memory_space<vmem>>, %arg7: memref<32x32xf32, #tpu.memory_space<vmem>>, %arg8: memref<32x1xf32, #tpu.memory_space<vmem>>, %arg9: memref<16x128xf32, #tpu.memory_space<vmem>>) attributes {dimension_semantics = [#tpu.dimension_semantics<arbitrary>], iteration_bounds = array<i64: 1>, scalar_prefetch = 4 : i64, scratch_operands = 0 : i64, tpu.core_type = #tpu.core_type<tc>, window_params = [{pipeline_mode = #tpu.pipeline_mode<synchronous>, transform_indices = @transform_0, window_bounds = array<i64: 1, 128>}, {pipeline_mode = #tpu.pipeline_mode<synchronous>, transform_indices = @transform_1, window_bounds = array<i64: 32, 1>}, {pipeline_mode = #tpu.pipeline_mode<synchronous>, transform_indices = @transform_2, window_bounds = array<i64: 32, 32>}, {pipeline_mode = #tpu.pipeline_mode<synchronous>, transform_indices = @transform_3, window_bounds = array<i64: 32, 1>}, {pipeline_mode = #tpu.pipeline_mode<synchronous>, transform_indices = @transform_4, window_bounds = array<i64: 16, 128>}]} {
    %c0 = arith.constant 0 : index
    %0 = memref.load %arg1[%c0] : memref<4xf32, #tpu.memory_space<smem>>
    %cst = arith.constant 2.000000e-01 : f32
    %1 = arith.mulf %cst, %0 : f32
    %c1 = arith.constant 1 : index
    %2 = memref.load %arg1[%c1] : memref<4xf32, #tpu.memory_space<smem>>
    %3 = arith.mulf %1, %2 : f32
    %cst_0 = arith.constant 1.000000e-01 : f32
    %4 = arith.mulf %cst_0, %0 : f32
    %c2 = arith.constant 2 : index
    %5 = memref.load %arg1[%c2] : memref<4xf32, #tpu.memory_space<smem>>
    %6 = arith.mulf %4, %5 : f32
    %c3 = arith.constant 3 : index
    %7 = memref.load %arg1[%c3] : memref<4xf32, #tpu.memory_space<smem>>
    %c0_1 = arith.constant 0 : index
    %c0_2 = arith.constant 0 : index
    %8 = vector.load %arg6[%c0_1, %c0_2] : memref<32x1xf32, #tpu.memory_space<vmem>>, vector<32x1xf32>
    %9 = vector.shape_cast %8 : vector<32x1xf32> to vector<32x1xf32>
    %10 = vector.broadcast %9 : vector<32x1xf32> to vector<32x128xf32>
    %c0_3 = arith.constant 0 : index
    %c0_4 = arith.constant 0 : index
    %11 = vector.load %arg8[%c0_3, %c0_4] : memref<32x1xf32, #tpu.memory_space<vmem>>, vector<32x1xf32>
    %12 = vector.shape_cast %11 : vector<32x1xf32> to vector<32x1xf32>
    %13 = vector.broadcast %12 : vector<32x1xf32> to vector<32x128xf32>
    %c0_5 = arith.constant 0 : index
    %c0_6 = arith.constant 0 : index
    %14 = vector.load %arg7[%c0_5, %c0_6] : memref<32x32xf32, #tpu.memory_space<vmem>>, vector<32x32xf32>
    %15 = arith.truncf %14 : vector<32x32xf32> to vector<32x32xbf16>
    %c0_7 = arith.constant 0 : index
    %c0_8 = arith.constant 0 : index
    %16 = vector.load %arg5[%c0_7, %c0_8] : memref<1x128xf32, #tpu.memory_space<vmem>>, vector<1x128xf32>
    %c0_9 = arith.constant 0 : index
    %c0_10 = arith.constant 0 : index
    %17 = vector.load %arg9[%c0_9, %c0_10] : memref<16x128xf32, #tpu.memory_space<vmem>>, vector<1x128xf32>
    tpu.vector_store %arg9[%c0_9, %c0_10], %16 {strides = array<i32>} : memref<16x128xf32, #tpu.memory_space<vmem>>, vector<1x128xf32>,
    %c0_11 = arith.constant 0 : index
    %c0_12 = arith.constant 0 : index
    %18 = vector.load %arg5[%c0_11, %c0_12] : memref<1x128xf32, #tpu.memory_space<vmem>>, vector<1x128xf32>
    %c1_13 = arith.constant 1 : index
    %19 = memref.load %arg2[%c1_13] : memref<16xf32, #tpu.memory_space<smem>>
    %c1_14 = arith.constant 1 : index
    %20 = memref.load %arg3[%c1_14] : memref<16xf32, #tpu.memory_space<smem>>
    %c1_15 = arith.constant 1 : index
    %21 = memref.load %arg4[%c1_15] : memref<16xf32, #tpu.memory_space<smem>>
    %c1_i32 = arith.constant 1 : i32
    %22 = tpu.dynamic_rotate %18 by %c1_i32 dim 1 : vector<1x128xf32>, i32 -> vector<1x128xf32>
    %c127_i32 = arith.constant 127 : i32
    %23 = tpu.dynamic_rotate %18 by %c127_i32 dim 1 : vector<1x128xf32>, i32 -> vector<1x128xf32>
    %24 = arith.addf %22, %23 : vector<1x128xf32>
    %25 = vector.broadcast %3 : f32 to vector<1x128xf32>
    %26 = arith.mulf %25, %18 : vector<1x128xf32>
    %27 = vector.broadcast %6 : f32 to vector<1x128xf32>
    %28 = arith.mulf %27, %24 : vector<1x128xf32>
    %29 = arith.addf %26, %28 : vector<1x128xf32>
    %30 = vector.broadcast %18 : vector<1x128xf32> to vector<32x128xf32>
    %31 = arith.mulf %10, %30 : vector<32x128xf32>
    %32 = math.tanh %31 : vector<32x128xf32>
    %33 = arith.truncf %32 : vector<32x128xf32> to vector<32x128xbf16>
    %cst_16 = arith.constant dense<0.000000e+00> : vector<32x128xf32>
    %34 = tpu.matmul %15, %33, %cst_16 {dimension_numbers = #tpu.dot_dimension_numbers<[1], [0], [0], [1], [0, 0, 1, 1], [], []>} : vector<32x32xbf16>, vector<32x128xbf16>, vector<32x128xf32> -> vector<32x128xf32>
    %35 = math.tanh %34 : vector<32x128xf32>
    %36 = arith.mulf %13, %35 : vector<32x128xf32>
    %cst_17 = arith.constant dense<0.000000e+00> : vector<128xf32>
    %37 = vector.multi_reduction <add>, %36, %cst_17 [0] : vector<32x128xf32> to vector<128xf32>
    %38 = vector.shape_cast %37 : vector<128xf32> to vector<1x128xf32>
    %39 = math.tanh %38 : vector<1x128xf32>
    %40 = vector.broadcast %7 : f32 to vector<1x128xf32>
    %41 = arith.mulf %39, %40 : vector<1x128xf32>
    %42 = arith.addf %29, %41 : vector<1x128xf32>
    %43 = vector.broadcast %20 : f32 to vector<1x128xf32>
    %44 = arith.mulf %43, %42 : vector<1x128xf32>
    %45 = arith.addf %18, %44 : vector<1x128xf32>
    %c1_i32_18 = arith.constant 1 : i32
    %46 = tpu.dynamic_rotate %45 by %c1_i32_18 dim 1 : vector<1x128xf32>, i32 -> vector<1x128xf32>
    %c127_i32_19 = arith.constant 127 : i32
    %47 = tpu.dynamic_rotate %45 by %c127_i32_19 dim 1 : vector<1x128xf32>, i32 -> vector<1x128xf32>
    %48 = arith.addf %46, %47 : vector<1x128xf32>
    %49 = vector.broadcast %3 : f32 to vector<1x128xf32>
    %50 = arith.mulf %49, %45 : vector<1x128xf32>
    %51 = vector.broadcast %6 : f32 to vector<1x128xf32>
    %52 = arith.mulf %51, %48 : vector<1x128xf32>
    %53 = arith.addf %50, %52 : vector<1x128xf32>
    %54 = vector.broadcast %45 : vector<1x128xf32> to vector<32x128xf32>
    %55 = arith.mulf %10, %54 : vector<32x128xf32>
    %56 = math.tanh %55 : vector<32x128xf32>
    %57 = arith.truncf %56 : vector<32x128xf32> to vector<32x128xbf16>
    %cst_20 = arith.constant dense<0.000000e+00> : vector<32x128xf32>
    %58 = tpu.matmul %15, %57, %cst_20 {dimension_numbers = #tpu.dot_dimension_numbers<[1], [0], [0], [1], [0, 0, 1, 1], [], []>} : vector<32x32xbf16>, vector<32x128xbf16>, vector<32x128xf32> -> vector<32x128xf32>
    %59 = math.tanh %58 : vector<32x128xf32>
    %60 = arith.mulf %13, %59 : vector<32x128xf32>
    %cst_21 = arith.constant dense<0.000000e+00> : vector<128xf32>
    %61 = vector.multi_reduction <add>, %60, %cst_21 [0] : vector<32x128xf32> to vector<128xf32>
    %62 = vector.shape_cast %61 : vector<128xf32> to vector<1x128xf32>
    %63 = math.tanh %62 : vector<1x128xf32>
    %64 = vector.broadcast %7 : f32 to vector<1x128xf32>
    %65 = arith.mulf %63, %64 : vector<1x128xf32>
    %66 = arith.addf %53, %65 : vector<1x128xf32>
    %67 = vector.broadcast %20 : f32 to vector<1x128xf32>
    %68 = arith.mulf %67, %66 : vector<1x128xf32>
    %69 = arith.addf %18, %68 : vector<1x128xf32>
    %c1_i32_22 = arith.constant 1 : i32
    %70 = tpu.dynamic_rotate %69 by %c1_i32_22 dim 1 : vector<1x128xf32>, i32 -> vector<1x128xf32>
    %c127_i32_23 = arith.constant 127 : i32
    %71 = tpu.dynamic_rotate %69 by %c127_i32_23 dim 1 : vector<1x128xf32>, i32 -> vector<1x128xf32>
    %72 = arith.addf %70, %71 : vector<1x128xf32>
    %73 = vector.broadcast %3 : f32 to vector<1x128xf32>
    %74 = arith.mulf %73, %69 : vector<1x128xf32>
    %75 = vector.broadcast %6 : f32 to vector<1x128xf32>
    %76 = arith.mulf %75, %72 : vector<1x128xf32>
    %77 = arith.addf %74, %76 : vector<1x128xf32>
    %78 = vector.broadcast %69 : vector<1x128xf32> to vector<32x128xf32>
    %79 = arith.mulf %10, %78 : vector<32x128xf32>
    %80 = math.tanh %79 : vector<32x128xf32>
    %81 = arith.truncf %80 : vector<32x128xf32> to vector<32x128xbf16>
    %cst_24 = arith.constant dense<0.000000e+00> : vector<32x128xf32>
    %82 = tpu.matmul %15, %81, %cst_24 {dimension_numbers = #tpu.dot_dimension_numbers<[1], [0], [0], [1], [0, 0, 1, 1], [], []>} : vector<32x32xbf16>, vector<32x128xbf16>, vector<32x128xf32> -> vector<32x128xf32>
    %83 = math.tanh %82 : vector<32x128xf32>
    %84 = arith.mulf %13, %83 : vector<32x128xf32>
    %cst_25 = arith.constant dense<0.000000e+00> : vector<128xf32>
    %85 = vector.multi_reduction <add>, %84, %cst_25 [0] : vector<32x128xf32> to vector<128xf32>
    %86 = vector.shape_cast %85 : vector<128xf32> to vector<1x128xf32>
    %87 = math.tanh %86 : vector<1x128xf32>
    %88 = vector.broadcast %7 : f32 to vector<1x128xf32>
    %89 = arith.mulf %87, %88 : vector<1x128xf32>
    %90 = arith.addf %77, %89 : vector<1x128xf32>
    %91 = vector.broadcast %19 : f32 to vector<1x128xf32>
    %92 = arith.mulf %91, %90 : vector<1x128xf32>
    %93 = arith.addf %18, %92 : vector<1x128xf32>
    %c1_i32_26 = arith.constant 1 : i32
    %94 = tpu.dynamic_rotate %93 by %c1_i32_26 dim 1 : vector<1x128xf32>, i32 -> vector<1x128xf32>
    %c127_i32_27 = arith.constant 127 : i32
    %95 = tpu.dynamic_rotate %93 by %c127_i32_27 dim 1 : vector<1x128xf32>, i32 -> vector<1x128xf32>
    %96 = arith.addf %94, %95 : vector<1x128xf32>
    %97 = vector.broadcast %3 : f32 to vector<1x128xf32>
    %98 = arith.mulf %97, %93 : vector<1x128xf32>
    %99 = vector.broadcast %6 : f32 to vector<1x128xf32>
    %100 = arith.mulf %99, %96 : vector<1x128xf32>
    %101 = arith.addf %98, %100 : vector<1x128xf32>
    %102 = vector.broadcast %93 : vector<1x128xf32> to vector<32x128xf32>
    %103 = arith.mulf %10, %102 : vector<32x128xf32>
    %104 = math.tanh %103 : vector<32x128xf32>
    %105 = arith.truncf %104 : vector<32x128xf32> to vector<32x128xbf16>
    %cst_28 = arith.constant dense<0.000000e+00> : vector<32x128xf32>
    %106 = tpu.matmul %15, %105, %cst_28 {dimension_numbers = #tpu.dot_dimension_numbers<[1], [0], [0], [1], [0, 0, 1, 1], [], []>} : vector<32x32xbf16>, vector<32x128xbf16>, vector<32x128xf32> -> vector<32x128xf32>
    %107 = math.tanh %106 : vector<32x128xf32>
    %108 = arith.mulf %13, %107 : vector<32x128xf32>
    %cst_29 = arith.constant dense<0.000000e+00> : vector<128xf32>
    %109 = vector.multi_reduction <add>, %108, %cst_29 [0] : vector<32x128xf32> to vector<128xf32>
    %110 = vector.shape_cast %109 : vector<128xf32> to vector<1x128xf32>
    %111 = math.tanh %110 : vector<1x128xf32>
    %112 = vector.broadcast %7 : f32 to vector<1x128xf32>
    %113 = arith.mulf %111, %112 : vector<1x128xf32>
    %114 = arith.addf %101, %113 : vector<1x128xf32>
    %cst_30 = arith.constant 2.000000e+00 : f32
    %115 = vector.broadcast %cst_30 : f32 to vector<1x128xf32>
    %116 = arith.mulf %115, %66 : vector<1x128xf32>
    %117 = arith.addf %42, %116 : vector<1x128xf32>
    %cst_31 = arith.constant 2.000000e+00 : f32
    %118 = vector.broadcast %cst_31 : f32 to vector<1x128xf32>
    %119 = arith.mulf %118, %90 : vector<1x128xf32>
    %120 = arith.addf %117, %119 : vector<1x128xf32>
    %121 = arith.addf %120, %114 : vector<1x128xf32>
    %122 = vector.broadcast %21 : f32 to vector<1x128xf32>
    %123 = arith.mulf %122, %121 : vector<1x128xf32>
    %124 = arith.addf %18, %123 : vector<1x128xf32>
    %c1_32 = arith.constant 1 : index
    %c0_33 = arith.constant 0 : index
    %125 = vector.load %arg9[%c1_32, %c0_33] : memref<16x128xf32, #tpu.memory_space<vmem>>, vector<1x128xf32>
    tpu.vector_store %arg9[%c1_32, %c0_33], %124 {strides = array<i32>} : memref<16x128xf32, #tpu.memory_space<vmem>>, vector<1x128xf32>,
    %c2_34 = arith.constant 2 : index
    %126 = memref.load %arg2[%c2_34] : memref<16xf32, #tpu.memory_space<smem>>
    %c2_35 = arith.constant 2 : index
    %127 = memref.load %arg3[%c2_35] : memref<16xf32, #tpu.memory_space<smem>>
    %c2_36 = arith.constant 2 : index
    %128 = memref.load %arg4[%c2_36] : memref<16xf32, #tpu.memory_space<smem>>
    %c1_i32_37 = arith.constant 1 : i32
    %129 = tpu.dynamic_rotate %124 by %c1_i32_37 dim 1 : vector<1x128xf32>, i32 -> vector<1x128xf32>
    %c127_i32_38 = arith.constant 127 : i32
    %130 = tpu.dynamic_rotate %124 by %c127_i32_38 dim 1 : vector<1x128xf32>, i32 -> vector<1x128xf32>
    %131 = arith.addf %129, %130 : vector<1x128xf32>
    %132 = vector.broadcast %3 : f32 to vector<1x128xf32>
    %133 = arith.mulf %132, %124 : vector<1x128xf32>
    %134 = vector.broadcast %6 : f32 to vector<1x128xf32>
    %135 = arith.mulf %134, %131 : vector<1x128xf32>
    %136 = arith.addf %133, %135 : vector<1x128xf32>
    %137 = vector.broadcast %124 : vector<1x128xf32> to vector<32x128xf32>
    %138 = arith.mulf %10, %137 : vector<32x128xf32>
    %139 = math.tanh %138 : vector<32x128xf32>
    %140 = arith.truncf %139 : vector<32x128xf32> to vector<32x128xbf16>
    %cst_39 = arith.constant dense<0.000000e+00> : vector<32x128xf32>
    %141 = tpu.matmul %15, %140, %cst_39 {dimension_numbers = #tpu.dot_dimension_numbers<[1], [0], [0], [1], [0, 0, 1, 1], [], []>} : vector<32x32xbf16>, vector<32x128xbf16>, vector<32x128xf32> -> vector<32x128xf32>
    %142 = math.tanh %141 : vector<32x128xf32>
    %143 = arith.mulf %13, %142 : vector<32x128xf32>
    %cst_40 = arith.constant dense<0.000000e+00> : vector<128xf32>
    %144 = vector.multi_reduction <add>, %143, %cst_40 [0] : vector<32x128xf32> to vector<128xf32>
    %145 = vector.shape_cast %144 : vector<128xf32> to vector<1x128xf32>
    %146 = math.tanh %145 : vector<1x128xf32>
    %147 = vector.broadcast %7 : f32 to vector<1x128xf32>
    %148 = arith.mulf %146, %147 : vector<1x128xf32>
    %149 = arith.addf %136, %148 : vector<1x128xf32>
    %150 = vector.broadcast %127 : f32 to vector<1x128xf32>
    %151 = arith.mulf %150, %149 : vector<1x128xf32>
    %152 = arith.addf %124, %151 : vector<1x128xf32>
    %c1_i32_41 = arith.constant 1 : i32
    %153 = tpu.dynamic_rotate %152 by %c1_i32_41 dim 1 : vector<1x128xf32>, i32 -> vector<1x128xf32>
    %c127_i32_42 = arith.constant 127 : i32
    %154 = tpu.dynamic_rotate %152 by %c127_i32_42 dim 1 : vector<1x128xf32>, i32 -> vector<1x128xf32>
    %155 = arith.addf %153, %154 : vector<1x128xf32>
    %156 = vector.broadcast %3 : f32 to vector<1x128xf32>
    %157 = arith.mulf %156, %152 : vector<1x128xf32>
    %158 = vector.broadcast %6 : f32 to vector<1x128xf32>
    %159 = arith.mulf %158, %155 : vector<1x128xf32>
    %160 = arith.addf %157, %159 : vector<1x128xf32>
    %161 = vector.broadcast %152 : vector<1x128xf32> to vector<32x128xf32>
    %162 = arith.mulf %10, %161 : vector<32x128xf32>
    %163 = math.tanh %162 : vector<32x128xf32>
    %164 = arith.truncf %163 : vector<32x128xf32> to vector<32x128xbf16>
    %cst_43 = arith.constant dense<0.000000e+00> : vector<32x128xf32>
    %165 = tpu.matmul %15, %164, %cst_43 {dimension_numbers = #tpu.dot_dimension_numbers<[1], [0], [0], [1], [0, 0, 1, 1], [], []>} : vector<32x32xbf16>, vector<32x128xbf16>, vector<32x128xf32> -> vector<32x128xf32>
    %166 = math.tanh %165 : vector<32x128xf32>
    %167 = arith.mulf %13, %166 : vector<32x128xf32>
    %cst_44 = arith.constant dense<0.000000e+00> : vector<128xf32>
    %168 = vector.multi_reduction <add>, %167, %cst_44 [0] : vector<32x128xf32> to vector<128xf32>
    %169 = vector.shape_cast %168 : vector<128xf32> to vector<1x128xf32>
    %170 = math.tanh %169 : vector<1x128xf32>
    %171 = vector.broadcast %7 : f32 to vector<1x128xf32>
    %172 = arith.mulf %170, %171 : vector<1x128xf32>
    %173 = arith.addf %160, %172 : vector<1x128xf32>
    %174 = vector.broadcast %127 : f32 to vector<1x128xf32>
    %175 = arith.mulf %174, %173 : vector<1x128xf32>
    %176 = arith.addf %124, %175 : vector<1x128xf32>
    %c1_i32_45 = arith.constant 1 : i32
    %177 = tpu.dynamic_rotate %176 by %c1_i32_45 dim 1 : vector<1x128xf32>, i32 -> vector<1x128xf32>
    %c127_i32_46 = arith.constant 127 : i32
    %178 = tpu.dynamic_rotate %176 by %c127_i32_46 dim 1 : vector<1x128xf32>, i32 -> vector<1x128xf32>
    %179 = arith.addf %177, %178 : vector<1x128xf32>
    %180 = vector.broadcast %3 : f32 to vector<1x128xf32>
    %181 = arith.mulf %180, %176 : vector<1x128xf32>
    %182 = vector.broadcast %6 : f32 to vector<1x128xf32>
    %183 = arith.mulf %182, %179 : vector<1x128xf32>
    %184 = arith.addf %181, %183 : vector<1x128xf32>
    %185 = vector.broadcast %176 : vector<1x128xf32> to vector<32x128xf32>
    %186 = arith.mulf %10, %185 : vector<32x128xf32>
    %187 = math.tanh %186 : vector<32x128xf32>
    %188 = arith.truncf %187 : vector<32x128xf32> to vector<32x128xbf16>
    %cst_47 = arith.constant dense<0.000000e+00> : vector<32x128xf32>
    %189 = tpu.matmul %15, %188, %cst_47 {dimension_numbers = #tpu.dot_dimension_numbers<[1], [0], [0], [1], [0, 0, 1, 1], [], []>} : vector<32x32xbf16>, vector<32x128xbf16>, vector<32x128xf32> -> vector<32x128xf32>
    %190 = math.tanh %189 : vector<32x128xf32>
    %191 = arith.mulf %13, %190 : vector<32x128xf32>
    %cst_48 = arith.constant dense<0.000000e+00> : vector<128xf32>
    %192 = vector.multi_reduction <add>, %191, %cst_48 [0] : vector<32x128xf32> to vector<128xf32>
    %193 = vector.shape_cast %192 : vector<128xf32> to vector<1x128xf32>
    %194 = math.tanh %193 : vector<1x128xf32>
    %195 = vector.broadcast %7 : f32 to vector<1x128xf32>
    %196 = arith.mulf %194, %195 : vector<1x128xf32>
    %197 = arith.addf %184, %196 : vector<1x128xf32>
    %198 = vector.broadcast %126 : f32 to vector<1x128xf32>
    %199 = arith.mulf %198, %197 : vector<1x128xf32>
    %200 = arith.addf %124, %199 : vector<1x128xf32>
    %c1_i32_49 = arith.constant 1 : i32
    %201 = tpu.dynamic_rotate %200 by %c1_i32_49 dim 1 : vector<1x128xf32>, i32 -> vector<1x128xf32>
    %c127_i32_50 = arith.constant 127 : i32
    %202 = tpu.dynamic_rotate %200 by %c127_i32_50 dim 1 : vector<1x128xf32>, i32 -> vector<1x128xf32>
    %203 = arith.addf %201, %202 : vector<1x128xf32>
    %204 = vector.broadcast %3 : f32 to vector<1x128xf32>
    %205 = arith.mulf %204, %200 : vector<1x128xf32>
    %206 = vector.broadcast %6 : f32 to vector<1x128xf32>
    %207 = arith.mulf %206, %203 : vector<1x128xf32>
    %208 = arith.addf %205, %207 : vector<1x128xf32>
    %209 = vector.broadcast %200 : vector<1x128xf32> to vector<32x128xf32>
    %210 = arith.mulf %10, %209 : vector<32x128xf32>
    %211 = math.tanh %210 : vector<32x128xf32>
    %212 = arith.truncf %211 : vector<32x128xf32> to vector<32x128xbf16>
    %cst_51 = arith.constant dense<0.000000e+00> : vector<32x128xf32>
    %213 = tpu.matmul %15, %212, %cst_51 {dimension_numbers = #tpu.dot_dimension_numbers<[1], [0], [0], [1], [0, 0, 1, 1], [], []>} : vector<32x32xbf16>, vector<32x128xbf16>, vector<32x128xf32> -> vector<32x128xf32>
    %214 = math.tanh %213 : vector<32x128xf32>
    %215 = arith.mulf %13, %214 : vector<32x128xf32>
    %cst_52 = arith.constant dense<0.000000e+00> : vector<128xf32>
    %216 = vector.multi_reduction <add>, %215, %cst_52 [0] : vector<32x128xf32> to vector<128xf32>
    %217 = vector.shape_cast %216 : vector<128xf32> to vector<1x128xf32>
    %218 = math.tanh %217 : vector<1x128xf32>
    %219 = vector.broadcast %7 : f32 to vector<1x128xf32>
    %220 = arith.mulf %218, %219 : vector<1x128xf32>
    %221 = arith.addf %208, %220 : vector<1x128xf32>
    %cst_53 = arith.constant 2.000000e+00 : f32
    %222 = vector.broadcast %cst_53 : f32 to vector<1x128xf32>
    %223 = arith.mulf %222, %173 : vector<1x128xf32>
    %224 = arith.addf %149, %223 : vector<1x128xf32>
    %cst_54 = arith.constant 2.000000e+00 : f32
    %225 = vector.broadcast %cst_54 : f32 to vector<1x128xf32>
    %226 = arith.mulf %225, %197 : vector<1x128xf32>
    %227 = arith.addf %224, %226 : vector<1x128xf32>
    %228 = arith.addf %227, %221 : vector<1x128xf32>
    %229 = vector.broadcast %128 : f32 to vector<1x128xf32>
    %230 = arith.mulf %229, %228 : vector<1x128xf32>
    %231 = arith.addf %124, %230 : vector<1x128xf32>
    %c2_55 = arith.constant 2 : index
    %c0_56 = arith.constant 0 : index
    %232 = vector.load %arg9[%c2_55, %c0_56] : memref<16x128xf32, #tpu.memory_space<vmem>>, vector<1x128xf32>
    tpu.vector_store %arg9[%c2_55, %c0_56], %231 {strides = array<i32>} : memref<16x128xf32, #tpu.memory_space<vmem>>, vector<1x128xf32>,
    %c3_57 = arith.constant 3 : index
    %233 = memref.load %arg2[%c3_57] : memref<16xf32, #tpu.memory_space<smem>>
    %c3_58 = arith.constant 3 : index
    %234 = memref.load %arg3[%c3_58] : memref<16xf32, #tpu.memory_space<smem>>
    %c3_59 = arith.constant 3 : index
    %235 = memref.load %arg4[%c3_59] : memref<16xf32, #tpu.memory_space<smem>>
    %c1_i32_60 = arith.constant 1 : i32
    %236 = tpu.dynamic_rotate %231 by %c1_i32_60 dim 1 : vector<1x128xf32>, i32 -> vector<1x128xf32>
    %c127_i32_61 = arith.constant 127 : i32
    %237 = tpu.dynamic_rotate %231 by %c127_i32_61 dim 1 : vector<1x128xf32>, i32 -> vector<1x128xf32>
    %238 = arith.addf %236, %237 : vector<1x128xf32>
    %239 = vector.broadcast %3 : f32 to vector<1x128xf32>
    %240 = arith.mulf %239, %231 : vector<1x128xf32>
    %241 = vector.broadcast %6 : f32 to vector<1x128xf32>
    %242 = arith.mulf %241, %238 : vector<1x128xf32>
    %243 = arith.addf %240, %242 : vector<1x128xf32>
    %244 = vector.broadcast %231 : vector<1x128xf32> to vector<32x128xf32>
    %245 = arith.mulf %10, %244 : vector<32x128xf32>
    %246 = math.tanh %245 : vector<32x128xf32>
    %247 = arith.truncf %246 : vector<32x128xf32> to vector<32x128xbf16>
    %cst_62 = arith.constant dense<0.000000e+00> : vector<32x128xf32>
    %248 = tpu.matmul %15, %247, %cst_62 {dimension_numbers = #tpu.dot_dimension_numbers<[1], [0], [0], [1], [0, 0, 1, 1], [], []>} : vector<32x32xbf16>, vector<32x128xbf16>, vector<32x128xf32> -> vector<32x128xf32>
    %249 = math.tanh %248 : vector<32x128xf32>
    %250 = arith.mulf %13, %249 : vector<32x128xf32>
    %cst_63 = arith.constant dense<0.000000e+00> : vector<128xf32>
    %251 = vector.multi_reduction <add>, %250, %cst_63 [0] : vector<32x128xf32> to vector<128xf32>
    %252 = vector.shape_cast %251 : vector<128xf32> to vector<1x128xf32>
    %253 = math.tanh %252 : vector<1x128xf32>
    %254 = vector.broadcast %7 : f32 to vector<1x128xf32>
    %255 = arith.mulf %253, %254 : vector<1x128xf32>
    %256 = arith.addf %243, %255 : vector<1x128xf32>
    %257 = vector.broadcast %234 : f32 to vector<1x128xf32>
    %258 = arith.mulf %257, %256 : vector<1x128xf32>
    %259 = arith.addf %231, %258 : vector<1x128xf32>
    %c1_i32_64 = arith.constant 1 : i32
    %260 = tpu.dynamic_rotate %259 by %c1_i32_64 dim 1 : vector<1x128xf32>, i32 -> vector<1x128xf32>
    %c127_i32_65 = arith.constant 127 : i32
    %261 = tpu.dynamic_rotate %259 by %c127_i32_65 dim 1 : vector<1x128xf32>, i32 -> vector<1x128xf32>
    %262 = arith.addf %260, %261 : vector<1x128xf32>
    %263 = vector.broadcast %3 : f32 to vector<1x128xf32>
    %264 = arith.mulf %263, %259 : vector<1x128xf32>
    %265 = vector.broadcast %6 : f32 to vector<1x128xf32>
    %266 = arith.mulf %265, %262 : vector<1x128xf32>
    %267 = arith.addf %264, %266 : vector<1x128xf32>
    %268 = vector.broadcast %259 : vector<1x128xf32> to vector<32x128xf32>
    %269 = arith.mulf %10, %268 : vector<32x128xf32>
    %270 = math.tanh %269 : vector<32x128xf32>
    %271 = arith.truncf %270 : vector<32x128xf32> to vector<32x128xbf16>
    %cst_66 = arith.constant dense<0.000000e+00> : vector<32x128xf32>
    %272 = tpu.matmul %15, %271, %cst_66 {dimension_numbers = #tpu.dot_dimension_numbers<[1], [0], [0], [1], [0, 0, 1, 1], [], []>} : vector<32x32xbf16>, vector<32x128xbf16>, vector<32x128xf32> -> vector<32x128xf32>
    %273 = math.tanh %272 : vector<32x128xf32>
    %274 = arith.mulf %13, %273 : vector<32x128xf32>
    %cst_67 = arith.constant dense<0.000000e+00> : vector<128xf32>
    %275 = vector.multi_reduction <add>, %274, %cst_67 [0] : vector<32x128xf32> to vector<128xf32>
    %276 = vector.shape_cast %275 : vector<128xf32> to vector<1x128xf32>
    %277 = math.tanh %276 : vector<1x128xf32>
    %278 = vector.broadcast %7 : f32 to vector<1x128xf32>
    %279 = arith.mulf %277, %278 : vector<1x128xf32>
    %280 = arith.addf %267, %279 : vector<1x128xf32>
    %281 = vector.broadcast %234 : f32 to vector<1x128xf32>
    %282 = arith.mulf %281, %280 : vector<1x128xf32>
    %283 = arith.addf %231, %282 : vector<1x128xf32>
    %c1_i32_68 = arith.constant 1 : i32
    %284 = tpu.dynamic_rotate %283 by %c1_i32_68 dim 1 : vector<1x128xf32>, i32 -> vector<1x128xf32>
    %c127_i32_69 = arith.constant 127 : i32
    %285 = tpu.dynamic_rotate %283 by %c127_i32_69 dim 1 : vector<1x128xf32>, i32 -> vector<1x128xf32>
    %286 = arith.addf %284, %285 : vector<1x128xf32>
    %287 = vector.broadcast %3 : f32 to vector<1x128xf32>
    %288 = arith.mulf %287, %283 : vector<1x128xf32>
    %289 = vector.broadcast %6 : f32 to vector<1x128xf32>
    %290 = arith.mulf %289, %286 : vector<1x128xf32>
    %291 = arith.addf %288, %290 : vector<1x128xf32>
    %292 = vector.broadcast %283 : vector<1x128xf32> to vector<32x128xf32>
    %293 = arith.mulf %10, %292 : vector<32x128xf32>
    %294 = math.tanh %293 : vector<32x128xf32>
    %295 = arith.truncf %294 : vector<32x128xf32> to vector<32x128xbf16>
    %cst_70 = arith.constant dense<0.000000e+00> : vector<32x128xf32>
    %296 = tpu.matmul %15, %295, %cst_70 {dimension_numbers = #tpu.dot_dimension_numbers<[1], [0], [0], [1], [0, 0, 1, 1], [], []>} : vector<32x32xbf16>, vector<32x128xbf16>, vector<32x128xf32> -> vector<32x128xf32>
    %297 = math.tanh %296 : vector<32x128xf32>
    %298 = arith.mulf %13, %297 : vector<32x128xf32>
    %cst_71 = arith.constant dense<0.000000e+00> : vector<128xf32>
    %299 = vector.multi_reduction <add>, %298, %cst_71 [0] : vector<32x128xf32> to vector<128xf32>
    %300 = vector.shape_cast %299 : vector<128xf32> to vector<1x128xf32>
    %301 = math.tanh %300 : vector<1x128xf32>
    %302 = vector.broadcast %7 : f32 to vector<1x128xf32>
    %303 = arith.mulf %301, %302 : vector<1x128xf32>
    %304 = arith.addf %291, %303 : vector<1x128xf32>
    %305 = vector.broadcast %233 : f32 to vector<1x128xf32>
    %306 = arith.mulf %305, %304 : vector<1x128xf32>
    %307 = arith.addf %231, %306 : vector<1x128xf32>
    %c1_i32_72 = arith.constant 1 : i32
    %308 = tpu.dynamic_rotate %307 by %c1_i32_72 dim 1 : vector<1x128xf32>, i32 -> vector<1x128xf32>
    %c127_i32_73 = arith.constant 127 : i32
    %309 = tpu.dynamic_rotate %307 by %c127_i32_73 dim 1 : vector<1x128xf32>, i32 -> vector<1x128xf32>
    %310 = arith.addf %308, %309 : vector<1x128xf32>
    %311 = vector.broadcast %3 : f32 to vector<1x128xf32>
    %312 = arith.mulf %311, %307 : vector<1x128xf32>
    %313 = vector.broadcast %6 : f32 to vector<1x128xf32>
    %314 = arith.mulf %313, %310 : vector<1x128xf32>
    %315 = arith.addf %312, %314 : vector<1x128xf32>
    %316 = vector.broadcast %307 : vector<1x128xf32> to vector<32x128xf32>
    %317 = arith.mulf %10, %316 : vector<32x128xf32>
    %318 = math.tanh %317 : vector<32x128xf32>
    %319 = arith.truncf %318 : vector<32x128xf32> to vector<32x128xbf16>
    %cst_74 = arith.constant dense<0.000000e+00> : vector<32x128xf32>
    %320 = tpu.matmul %15, %319, %cst_74 {dimension_numbers = #tpu.dot_dimension_numbers<[1], [0], [0], [1], [0, 0, 1, 1], [], []>} : vector<32x32xbf16>, vector<32x128xbf16>, vector<32x128xf32> -> vector<32x128xf32>
    %321 = math.tanh %320 : vector<32x128xf32>
    %322 = arith.mulf %13, %321 : vector<32x128xf32>
    %cst_75 = arith.constant dense<0.000000e+00> : vector<128xf32>
    %323 = vector.multi_reduction <add>, %322, %cst_75 [0] : vector<32x128xf32> to vector<128xf32>
    %324 = vector.shape_cast %323 : vector<128xf32> to vector<1x128xf32>
    %325 = math.tanh %324 : vector<1x128xf32>
    %326 = vector.broadcast %7 : f32 to vector<1x128xf32>
    %327 = arith.mulf %325, %326 : vector<1x128xf32>
    %328 = arith.addf %315, %327 : vector<1x128xf32>
    %cst_76 = arith.constant 2.000000e+00 : f32
    %329 = vector.broadcast %cst_76 : f32 to vector<1x128xf32>
    %330 = arith.mulf %329, %280 : vector<1x128xf32>
    %331 = arith.addf %256, %330 : vector<1x128xf32>
    %cst_77 = arith.constant 2.000000e+00 : f32
    %332 = vector.broadcast %cst_77 : f32 to vector<1x128xf32>
    %333 = arith.mulf %332, %304 : vector<1x128xf32>
    %334 = arith.addf %331, %333 : vector<1x128xf32>
    %335 = arith.addf %334, %328 : vector<1x128xf32>
    %336 = vector.broadcast %235 : f32 to vector<1x128xf32>
    %337 = arith.mulf %336, %335 : vector<1x128xf32>
    %338 = arith.addf %231, %337 : vector<1x128xf32>
    %c3_78 = arith.constant 3 : index
    %c0_79 = arith.constant 0 : index
    %339 = vector.load %arg9[%c3_78, %c0_79] : memref<16x128xf32, #tpu.memory_space<vmem>>, vector<1x128xf32>
    tpu.vector_store %arg9[%c3_78, %c0_79], %338 {strides = array<i32>} : memref<16x128xf32, #tpu.memory_space<vmem>>, vector<1x128xf32>,
    %c4 = arith.constant 4 : index
    %340 = memref.load %arg2[%c4] : memref<16xf32, #tpu.memory_space<smem>>
    %c4_80 = arith.constant 4 : index
    %341 = memref.load %arg3[%c4_80] : memref<16xf32, #tpu.memory_space<smem>>
    %c4_81 = arith.constant 4 : index
    %342 = memref.load %arg4[%c4_81] : memref<16xf32, #tpu.memory_space<smem>>
    %c1_i32_82 = arith.constant 1 : i32
    %343 = tpu.dynamic_rotate %338 by %c1_i32_82 dim 1 : vector<1x128xf32>, i32 -> vector<1x128xf32>
    %c127_i32_83 = arith.constant 127 : i32
    %344 = tpu.dynamic_rotate %338 by %c127_i32_83 dim 1 : vector<1x128xf32>, i32 -> vector<1x128xf32>
    %345 = arith.addf %343, %344 : vector<1x128xf32>
    %346 = vector.broadcast %3 : f32 to vector<1x128xf32>
    %347 = arith.mulf %346, %338 : vector<1x128xf32>
    %348 = vector.broadcast %6 : f32 to vector<1x128xf32>
    %349 = arith.mulf %348, %345 : vector<1x128xf32>
    %350 = arith.addf %347, %349 : vector<1x128xf32>
    %351 = vector.broadcast %338 : vector<1x128xf32> to vector<32x128xf32>
    %352 = arith.mulf %10, %351 : vector<32x128xf32>
    %353 = math.tanh %352 : vector<32x128xf32>
    %354 = arith.truncf %353 : vector<32x128xf32> to vector<32x128xbf16>
    %cst_84 = arith.constant dense<0.000000e+00> : vector<32x128xf32>
    %355 = tpu.matmul %15, %354, %cst_84 {dimension_numbers = #tpu.dot_dimension_numbers<[1], [0], [0], [1], [0, 0, 1, 1], [], []>} : vector<32x32xbf16>, vector<32x128xbf16>, vector<32x128xf32> -> vector<32x128xf32>
    %356 = math.tanh %355 : vector<32x128xf32>
    %357 = arith.mulf %13, %356 : vector<32x128xf32>
    %cst_85 = arith.constant dense<0.000000e+00> : vector<128xf32>
    %358 = vector.multi_reduction <add>, %357, %cst_85 [0] : vector<32x128xf32> to vector<128xf32>
    %359 = vector.shape_cast %358 : vector<128xf32> to vector<1x128xf32>
    %360 = math.tanh %359 : vector<1x128xf32>
    %361 = vector.broadcast %7 : f32 to vector<1x128xf32>
    %362 = arith.mulf %360, %361 : vector<1x128xf32>
    %363 = arith.addf %350, %362 : vector<1x128xf32>
    %364 = vector.broadcast %341 : f32 to vector<1x128xf32>
    %365 = arith.mulf %364, %363 : vector<1x128xf32>
    %366 = arith.addf %338, %365 : vector<1x128xf32>
    %c1_i32_86 = arith.constant 1 : i32
    %367 = tpu.dynamic_rotate %366 by %c1_i32_86 dim 1 : vector<1x128xf32>, i32 -> vector<1x128xf32>
    %c127_i32_87 = arith.constant 127 : i32
    %368 = tpu.dynamic_rotate %366 by %c127_i32_87 dim 1 : vector<1x128xf32>, i32 -> vector<1x128xf32>
    %369 = arith.addf %367, %368 : vector<1x128xf32>
    %370 = vector.broadcast %3 : f32 to vector<1x128xf32>
    %371 = arith.mulf %370, %366 : vector<1x128xf32>
    %372 = vector.broadcast %6 : f32 to vector<1x128xf32>
    %373 = arith.mulf %372, %369 : vector<1x128xf32>
    %374 = arith.addf %371, %373 : vector<1x128xf32>
    %375 = vector.broadcast %366 : vector<1x128xf32> to vector<32x128xf32>
    %376 = arith.mulf %10, %375 : vector<32x128xf32>
    %377 = math.tanh %376 : vector<32x128xf32>
    %378 = arith.truncf %377 : vector<32x128xf32> to vector<32x128xbf16>
    %cst_88 = arith.constant dense<0.000000e+00> : vector<32x128xf32>
    %379 = tpu.matmul %15, %378, %cst_88 {dimension_numbers = #tpu.dot_dimension_numbers<[1], [0], [0], [1], [0, 0, 1, 1], [], []>} : vector<32x32xbf16>, vector<32x128xbf16>, vector<32x128xf32> -> vector<32x128xf32>
    %380 = math.tanh %379 : vector<32x128xf32>
    %381 = arith.mulf %13, %380 : vector<32x128xf32>
    %cst_89 = arith.constant dense<0.000000e+00> : vector<128xf32>
    %382 = vector.multi_reduction <add>, %381, %cst_89 [0] : vector<32x128xf32> to vector<128xf32>
    %383 = vector.shape_cast %382 : vector<128xf32> to vector<1x128xf32>
    %384 = math.tanh %383 : vector<1x128xf32>
    %385 = vector.broadcast %7 : f32 to vector<1x128xf32>
    %386 = arith.mulf %384, %385 : vector<1x128xf32>
    %387 = arith.addf %374, %386 : vector<1x128xf32>
    %388 = vector.broadcast %341 : f32 to vector<1x128xf32>
    %389 = arith.mulf %388, %387 : vector<1x128xf32>
    %390 = arith.addf %338, %389 : vector<1x128xf32>
    %c1_i32_90 = arith.constant 1 : i32
    %391 = tpu.dynamic_rotate %390 by %c1_i32_90 dim 1 : vector<1x128xf32>, i32 -> vector<1x128xf32>
    %c127_i32_91 = arith.constant 127 : i32
    %392 = tpu.dynamic_rotate %390 by %c127_i32_91 dim 1 : vector<1x128xf32>, i32 -> vector<1x128xf32>
    %393 = arith.addf %391, %392 : vector<1x128xf32>
    %394 = vector.broadcast %3 : f32 to vector<1x128xf32>
    %395 = arith.mulf %394, %390 : vector<1x128xf32>
    %396 = vector.broadcast %6 : f32 to vector<1x128xf32>
    %397 = arith.mulf %396, %393 : vector<1x128xf32>
    %398 = arith.addf %395, %397 : vector<1x128xf32>
    %399 = vector.broadcast %390 : vector<1x128xf32> to vector<32x128xf32>
    %400 = arith.mulf %10, %399 : vector<32x128xf32>
    %401 = math.tanh %400 : vector<32x128xf32>
    %402 = arith.truncf %401 : vector<32x128xf32> to vector<32x128xbf16>
    %cst_92 = arith.constant dense<0.000000e+00> : vector<32x128xf32>
    %403 = tpu.matmul %15, %402, %cst_92 {dimension_numbers = #tpu.dot_dimension_numbers<[1], [0], [0], [1], [0, 0, 1, 1], [], []>} : vector<32x32xbf16>, vector<32x128xbf16>, vector<32x128xf32> -> vector<32x128xf32>
    %404 = math.tanh %403 : vector<32x128xf32>
    %405 = arith.mulf %13, %404 : vector<32x128xf32>
    %cst_93 = arith.constant dense<0.000000e+00> : vector<128xf32>
    %406 = vector.multi_reduction <add>, %405, %cst_93 [0] : vector<32x128xf32> to vector<128xf32>
    %407 = vector.shape_cast %406 : vector<128xf32> to vector<1x128xf32>
    %408 = math.tanh %407 : vector<1x128xf32>
    %409 = vector.broadcast %7 : f32 to vector<1x128xf32>
    %410 = arith.mulf %408, %409 : vector<1x128xf32>
    %411 = arith.addf %398, %410 : vector<1x128xf32>
    %412 = vector.broadcast %340 : f32 to vector<1x128xf32>
    %413 = arith.mulf %412, %411 : vector<1x128xf32>
    %414 = arith.addf %338, %413 : vector<1x128xf32>
    %c1_i32_94 = arith.constant 1 : i32
    %415 = tpu.dynamic_rotate %414 by %c1_i32_94 dim 1 : vector<1x128xf32>, i32 -> vector<1x128xf32>
    %c127_i32_95 = arith.constant 127 : i32
    %416 = tpu.dynamic_rotate %414 by %c127_i32_95 dim 1 : vector<1x128xf32>, i32 -> vector<1x128xf32>
    %417 = arith.addf %415, %416 : vector<1x128xf32>
    %418 = vector.broadcast %3 : f32 to vector<1x128xf32>
    %419 = arith.mulf %418, %414 : vector<1x128xf32>
    %420 = vector.broadcast %6 : f32 to vector<1x128xf32>
    %421 = arith.mulf %420, %417 : vector<1x128xf32>
    %422 = arith.addf %419, %421 : vector<1x128xf32>
    %423 = vector.broadcast %414 : vector<1x128xf32> to vector<32x128xf32>
    %424 = arith.mulf %10, %423 : vector<32x128xf32>
    %425 = math.tanh %424 : vector<32x128xf32>
    %426 = arith.truncf %425 : vector<32x128xf32> to vector<32x128xbf16>
    %cst_96 = arith.constant dense<0.000000e+00> : vector<32x128xf32>
    %427 = tpu.matmul %15, %426, %cst_96 {dimension_numbers = #tpu.dot_dimension_numbers<[1], [0], [0], [1], [0, 0, 1, 1], [], []>} : vector<32x32xbf16>, vector<32x128xbf16>, vector<32x128xf32> -> vector<32x128xf32>
    %428 = math.tanh %427 : vector<32x128xf32>
    %429 = arith.mulf %13, %428 : vector<32x128xf32>
    %cst_97 = arith.constant dense<0.000000e+00> : vector<128xf32>
    %430 = vector.multi_reduction <add>, %429, %cst_97 [0] : vector<32x128xf32> to vector<128xf32>
    %431 = vector.shape_cast %430 : vector<128xf32> to vector<1x128xf32>
    %432 = math.tanh %431 : vector<1x128xf32>
    %433 = vector.broadcast %7 : f32 to vector<1x128xf32>
    %434 = arith.mulf %432, %433 : vector<1x128xf32>
    %435 = arith.addf %422, %434 : vector<1x128xf32>
    %cst_98 = arith.constant 2.000000e+00 : f32
    %436 = vector.broadcast %cst_98 : f32 to vector<1x128xf32>
    %437 = arith.mulf %436, %387 : vector<1x128xf32>
    %438 = arith.addf %363, %437 : vector<1x128xf32>
    %cst_99 = arith.constant 2.000000e+00 : f32
    %439 = vector.broadcast %cst_99 : f32 to vector<1x128xf32>
    %440 = arith.mulf %439, %411 : vector<1x128xf32>
    %441 = arith.addf %438, %440 : vector<1x128xf32>
    %442 = arith.addf %441, %435 : vector<1x128xf32>
    %443 = vector.broadcast %342 : f32 to vector<1x128xf32>
    %444 = arith.mulf %443, %442 : vector<1x128xf32>
    %445 = arith.addf %338, %444 : vector<1x128xf32>
    %c4_100 = arith.constant 4 : index
    %c0_101 = arith.constant 0 : index
    %446 = vector.load %arg9[%c4_100, %c0_101] : memref<16x128xf32, #tpu.memory_space<vmem>>, vector<1x128xf32>
    tpu.vector_store %arg9[%c4_100, %c0_101], %445 {strides = array<i32>} : memref<16x128xf32, #tpu.memory_space<vmem>>, vector<1x128xf32>,
    %c5 = arith.constant 5 : index
    %447 = memref.load %arg2[%c5] : memref<16xf32, #tpu.memory_space<smem>>
    %c5_102 = arith.constant 5 : index
    %448 = memref.load %arg3[%c5_102] : memref<16xf32, #tpu.memory_space<smem>>
    %c5_103 = arith.constant 5 : index
    %449 = memref.load %arg4[%c5_103] : memref<16xf32, #tpu.memory_space<smem>>
    %c1_i32_104 = arith.constant 1 : i32
    %450 = tpu.dynamic_rotate %445 by %c1_i32_104 dim 1 : vector<1x128xf32>, i32 -> vector<1x128xf32>
    %c127_i32_105 = arith.constant 127 : i32
    %451 = tpu.dynamic_rotate %445 by %c127_i32_105 dim 1 : vector<1x128xf32>, i32 -> vector<1x128xf32>
    %452 = arith.addf %450, %451 : vector<1x128xf32>
    %453 = vector.broadcast %3 : f32 to vector<1x128xf32>
    %454 = arith.mulf %453, %445 : vector<1x128xf32>
    %455 = vector.broadcast %6 : f32 to vector<1x128xf32>
    %456 = arith.mulf %455, %452 : vector<1x128xf32>
    %457 = arith.addf %454, %456 : vector<1x128xf32>
    %458 = vector.broadcast %445 : vector<1x128xf32> to vector<32x128xf32>
    %459 = arith.mulf %10, %458 : vector<32x128xf32>
    %460 = math.tanh %459 : vector<32x128xf32>
    %461 = arith.truncf %460 : vector<32x128xf32> to vector<32x128xbf16>
    %cst_106 = arith.constant dense<0.000000e+00> : vector<32x128xf32>
    %462 = tpu.matmul %15, %461, %cst_106 {dimension_numbers = #tpu.dot_dimension_numbers<[1], [0], [0], [1], [0, 0, 1, 1], [], []>} : vector<32x32xbf16>, vector<32x128xbf16>, vector<32x128xf32> -> vector<32x128xf32>
    %463 = math.tanh %462 : vector<32x128xf32>
    %464 = arith.mulf %13, %463 : vector<32x128xf32>
    %cst_107 = arith.constant dense<0.000000e+00> : vector<128xf32>
    %465 = vector.multi_reduction <add>, %464, %cst_107 [0] : vector<32x128xf32> to vector<128xf32>
    %466 = vector.shape_cast %465 : vector<128xf32> to vector<1x128xf32>
    %467 = math.tanh %466 : vector<1x128xf32>
    %468 = vector.broadcast %7 : f32 to vector<1x128xf32>
    %469 = arith.mulf %467, %468 : vector<1x128xf32>
    %470 = arith.addf %457, %469 : vector<1x128xf32>
    %471 = vector.broadcast %448 : f32 to vector<1x128xf32>
    %472 = arith.mulf %471, %470 : vector<1x128xf32>
    %473 = arith.addf %445, %472 : vector<1x128xf32>
    %c1_i32_108 = arith.constant 1 : i32
    %474 = tpu.dynamic_rotate %473 by %c1_i32_108 dim 1 : vector<1x128xf32>, i32 -> vector<1x128xf32>
    %c127_i32_109 = arith.constant 127 : i32
    %475 = tpu.dynamic_rotate %473 by %c127_i32_109 dim 1 : vector<1x128xf32>, i32 -> vector<1x128xf32>
    %476 = arith.addf %474, %475 : vector<1x128xf32>
    %477 = vector.broadcast %3 : f32 to vector<1x128xf32>
    %478 = arith.mulf %477, %473 : vector<1x128xf32>
    %479 = vector.broadcast %6 : f32 to vector<1x128xf32>
    %480 = arith.mulf %479, %476 : vector<1x128xf32>
    %481 = arith.addf %478, %480 : vector<1x128xf32>
    %482 = vector.broadcast %473 : vector<1x128xf32> to vector<32x128xf32>
    %483 = arith.mulf %10, %482 : vector<32x128xf32>
    %484 = math.tanh %483 : vector<32x128xf32>
    %485 = arith.truncf %484 : vector<32x128xf32> to vector<32x128xbf16>
    %cst_110 = arith.constant dense<0.000000e+00> : vector<32x128xf32>
    %486 = tpu.matmul %15, %485, %cst_110 {dimension_numbers = #tpu.dot_dimension_numbers<[1], [0], [0], [1], [0, 0, 1, 1], [], []>} : vector<32x32xbf16>, vector<32x128xbf16>, vector<32x128xf32> -> vector<32x128xf32>
    %487 = math.tanh %486 : vector<32x128xf32>
    %488 = arith.mulf %13, %487 : vector<32x128xf32>
    %cst_111 = arith.constant dense<0.000000e+00> : vector<128xf32>
    %489 = vector.multi_reduction <add>, %488, %cst_111 [0] : vector<32x128xf32> to vector<128xf32>
    %490 = vector.shape_cast %489 : vector<128xf32> to vector<1x128xf32>
    %491 = math.tanh %490 : vector<1x128xf32>
    %492 = vector.broadcast %7 : f32 to vector<1x128xf32>
    %493 = arith.mulf %491, %492 : vector<1x128xf32>
    %494 = arith.addf %481, %493 : vector<1x128xf32>
    %495 = vector.broadcast %448 : f32 to vector<1x128xf32>
    %496 = arith.mulf %495, %494 : vector<1x128xf32>
    %497 = arith.addf %445, %496 : vector<1x128xf32>
    %c1_i32_112 = arith.constant 1 : i32
    %498 = tpu.dynamic_rotate %497 by %c1_i32_112 dim 1 : vector<1x128xf32>, i32 -> vector<1x128xf32>
    %c127_i32_113 = arith.constant 127 : i32
    %499 = tpu.dynamic_rotate %497 by %c127_i32_113 dim 1 : vector<1x128xf32>, i32 -> vector<1x128xf32>
    %500 = arith.addf %498, %499 : vector<1x128xf32>
    %501 = vector.broadcast %3 : f32 to vector<1x128xf32>
    %502 = arith.mulf %501, %497 : vector<1x128xf32>
    %503 = vector.broadcast %6 : f32 to vector<1x128xf32>
    %504 = arith.mulf %503, %500 : vector<1x128xf32>
    %505 = arith.addf %502, %504 : vector<1x128xf32>
    %506 = vector.broadcast %497 : vector<1x128xf32> to vector<32x128xf32>
    %507 = arith.mulf %10, %506 : vector<32x128xf32>
    %508 = math.tanh %507 : vector<32x128xf32>
    %509 = arith.truncf %508 : vector<32x128xf32> to vector<32x128xbf16>
    %cst_114 = arith.constant dense<0.000000e+00> : vector<32x128xf32>
    %510 = tpu.matmul %15, %509, %cst_114 {dimension_numbers = #tpu.dot_dimension_numbers<[1], [0], [0], [1], [0, 0, 1, 1], [], []>} : vector<32x32xbf16>, vector<32x128xbf16>, vector<32x128xf32> -> vector<32x128xf32>
    %511 = math.tanh %510 : vector<32x128xf32>
    %512 = arith.mulf %13, %511 : vector<32x128xf32>
    %cst_115 = arith.constant dense<0.000000e+00> : vector<128xf32>
    %513 = vector.multi_reduction <add>, %512, %cst_115 [0] : vector<32x128xf32> to vector<128xf32>
    %514 = vector.shape_cast %513 : vector<128xf32> to vector<1x128xf32>
    %515 = math.tanh %514 : vector<1x128xf32>
    %516 = vector.broadcast %7 : f32 to vector<1x128xf32>
    %517 = arith.mulf %515, %516 : vector<1x128xf32>
    %518 = arith.addf %505, %517 : vector<1x128xf32>
    %519 = vector.broadcast %447 : f32 to vector<1x128xf32>
    %520 = arith.mulf %519, %518 : vector<1x128xf32>
    %521 = arith.addf %445, %520 : vector<1x128xf32>
    %c1_i32_116 = arith.constant 1 : i32
    %522 = tpu.dynamic_rotate %521 by %c1_i32_116 dim 1 : vector<1x128xf32>, i32 -> vector<1x128xf32>
    %c127_i32_117 = arith.constant 127 : i32
    %523 = tpu.dynamic_rotate %521 by %c127_i32_117 dim 1 : vector<1x128xf32>, i32 -> vector<1x128xf32>
    %524 = arith.addf %522, %523 : vector<1x128xf32>
    %525 = vector.broadcast %3 : f32 to vector<1x128xf32>
    %526 = arith.mulf %525, %521 : vector<1x128xf32>
    %527 = vector.broadcast %6 : f32 to vector<1x128xf32>
    %528 = arith.mulf %527, %524 : vector<1x128xf32>
    %529 = arith.addf %526, %528 : vector<1x128xf32>
    %530 = vector.broadcast %521 : vector<1x128xf32> to vector<32x128xf32>
    %531 = arith.mulf %10, %530 : vector<32x128xf32>
    %532 = math.tanh %531 : vector<32x128xf32>
    %533 = arith.truncf %532 : vector<32x128xf32> to vector<32x128xbf16>
    %cst_118 = arith.constant dense<0.000000e+00> : vector<32x128xf32>
    %534 = tpu.matmul %15, %533, %cst_118 {dimension_numbers = #tpu.dot_dimension_numbers<[1], [0], [0], [1], [0, 0, 1, 1], [], []>} : vector<32x32xbf16>, vector<32x128xbf16>, vector<32x128xf32> -> vector<32x128xf32>
    %535 = math.tanh %534 : vector<32x128xf32>
    %536 = arith.mulf %13, %535 : vector<32x128xf32>
    %cst_119 = arith.constant dense<0.000000e+00> : vector<128xf32>
    %537 = vector.multi_reduction <add>, %536, %cst_119 [0] : vector<32x128xf32> to vector<128xf32>
    %538 = vector.shape_cast %537 : vector<128xf32> to vector<1x128xf32>
    %539 = math.tanh %538 : vector<1x128xf32>
    %540 = vector.broadcast %7 : f32 to vector<1x128xf32>
    %541 = arith.mulf %539, %540 : vector<1x128xf32>
    %542 = arith.addf %529, %541 : vector<1x128xf32>
    %cst_120 = arith.constant 2.000000e+00 : f32
    %543 = vector.broadcast %cst_120 : f32 to vector<1x128xf32>
    %544 = arith.mulf %543, %494 : vector<1x128xf32>
    %545 = arith.addf %470, %544 : vector<1x128xf32>
    %cst_121 = arith.constant 2.000000e+00 : f32
    %546 = vector.broadcast %cst_121 : f32 to vector<1x128xf32>
    %547 = arith.mulf %546, %518 : vector<1x128xf32>
    %548 = arith.addf %545, %547 : vector<1x128xf32>
    %549 = arith.addf %548, %542 : vector<1x128xf32>
    %550 = vector.broadcast %449 : f32 to vector<1x128xf32>
    %551 = arith.mulf %550, %549 : vector<1x128xf32>
    %552 = arith.addf %445, %551 : vector<1x128xf32>
    %c5_122 = arith.constant 5 : index
    %c0_123 = arith.constant 0 : index
    %553 = vector.load %arg9[%c5_122, %c0_123] : memref<16x128xf32, #tpu.memory_space<vmem>>, vector<1x128xf32>
    tpu.vector_store %arg9[%c5_122, %c0_123], %552 {strides = array<i32>} : memref<16x128xf32, #tpu.memory_space<vmem>>, vector<1x128xf32>,
    %c6 = arith.constant 6 : index
    %554 = memref.load %arg2[%c6] : memref<16xf32, #tpu.memory_space<smem>>
    %c6_124 = arith.constant 6 : index
    %555 = memref.load %arg3[%c6_124] : memref<16xf32, #tpu.memory_space<smem>>
    %c6_125 = arith.constant 6 : index
    %556 = memref.load %arg4[%c6_125] : memref<16xf32, #tpu.memory_space<smem>>
    %c1_i32_126 = arith.constant 1 : i32
    %557 = tpu.dynamic_rotate %552 by %c1_i32_126 dim 1 : vector<1x128xf32>, i32 -> vector<1x128xf32>
    %c127_i32_127 = arith.constant 127 : i32
    %558 = tpu.dynamic_rotate %552 by %c127_i32_127 dim 1 : vector<1x128xf32>, i32 -> vector<1x128xf32>
    %559 = arith.addf %557, %558 : vector<1x128xf32>
    %560 = vector.broadcast %3 : f32 to vector<1x128xf32>
    %561 = arith.mulf %560, %552 : vector<1x128xf32>
    %562 = vector.broadcast %6 : f32 to vector<1x128xf32>
    %563 = arith.mulf %562, %559 : vector<1x128xf32>
    %564 = arith.addf %561, %563 : vector<1x128xf32>
    %565 = vector.broadcast %552 : vector<1x128xf32> to vector<32x128xf32>
    %566 = arith.mulf %10, %565 : vector<32x128xf32>
    %567 = math.tanh %566 : vector<32x128xf32>
    %568 = arith.truncf %567 : vector<32x128xf32> to vector<32x128xbf16>
    %cst_128 = arith.constant dense<0.000000e+00> : vector<32x128xf32>
    %569 = tpu.matmul %15, %568, %cst_128 {dimension_numbers = #tpu.dot_dimension_numbers<[1], [0], [0], [1], [0, 0, 1, 1], [], []>} : vector<32x32xbf16>, vector<32x128xbf16>, vector<32x128xf32> -> vector<32x128xf32>
    %570 = math.tanh %569 : vector<32x128xf32>
    %571 = arith.mulf %13, %570 : vector<32x128xf32>
    %cst_129 = arith.constant dense<0.000000e+00> : vector<128xf32>
    %572 = vector.multi_reduction <add>, %571, %cst_129 [0] : vector<32x128xf32> to vector<128xf32>
    %573 = vector.shape_cast %572 : vector<128xf32> to vector<1x128xf32>
    %574 = math.tanh %573 : vector<1x128xf32>
    %575 = vector.broadcast %7 : f32 to vector<1x128xf32>
    %576 = arith.mulf %574, %575 : vector<1x128xf32>
    %577 = arith.addf %564, %576 : vector<1x128xf32>
    %578 = vector.broadcast %555 : f32 to vector<1x128xf32>
    %579 = arith.mulf %578, %577 : vector<1x128xf32>
    %580 = arith.addf %552, %579 : vector<1x128xf32>
    %c1_i32_130 = arith.constant 1 : i32
    %581 = tpu.dynamic_rotate %580 by %c1_i32_130 dim 1 : vector<1x128xf32>, i32 -> vector<1x128xf32>
    %c127_i32_131 = arith.constant 127 : i32
    %582 = tpu.dynamic_rotate %580 by %c127_i32_131 dim 1 : vector<1x128xf32>, i32 -> vector<1x128xf32>
    %583 = arith.addf %581, %582 : vector<1x128xf32>
    %584 = vector.broadcast %3 : f32 to vector<1x128xf32>
    %585 = arith.mulf %584, %580 : vector<1x128xf32>
    %586 = vector.broadcast %6 : f32 to vector<1x128xf32>
    %587 = arith.mulf %586, %583 : vector<1x128xf32>
    %588 = arith.addf %585, %587 : vector<1x128xf32>
    %589 = vector.broadcast %580 : vector<1x128xf32> to vector<32x128xf32>
    %590 = arith.mulf %10, %589 : vector<32x128xf32>
    %591 = math.tanh %590 : vector<32x128xf32>
    %592 = arith.truncf %591 : vector<32x128xf32> to vector<32x128xbf16>
    %cst_132 = arith.constant dense<0.000000e+00> : vector<32x128xf32>
    %593 = tpu.matmul %15, %592, %cst_132 {dimension_numbers = #tpu.dot_dimension_numbers<[1], [0], [0], [1], [0, 0, 1, 1], [], []>} : vector<32x32xbf16>, vector<32x128xbf16>, vector<32x128xf32> -> vector<32x128xf32>
    %594 = math.tanh %593 : vector<32x128xf32>
    %595 = arith.mulf %13, %594 : vector<32x128xf32>
    %cst_133 = arith.constant dense<0.000000e+00> : vector<128xf32>
    %596 = vector.multi_reduction <add>, %595, %cst_133 [0] : vector<32x128xf32> to vector<128xf32>
    %597 = vector.shape_cast %596 : vector<128xf32> to vector<1x128xf32>
    %598 = math.tanh %597 : vector<1x128xf32>
    %599 = vector.broadcast %7 : f32 to vector<1x128xf32>
    %600 = arith.mulf %598, %599 : vector<1x128xf32>
    %601 = arith.addf %588, %600 : vector<1x128xf32>
    %602 = vector.broadcast %555 : f32 to vector<1x128xf32>
    %603 = arith.mulf %602, %601 : vector<1x128xf32>
    %604 = arith.addf %552, %603 : vector<1x128xf32>
    %c1_i32_134 = arith.constant 1 : i32
    %605 = tpu.dynamic_rotate %604 by %c1_i32_134 dim 1 : vector<1x128xf32>, i32 -> vector<1x128xf32>
    %c127_i32_135 = arith.constant 127 : i32
    %606 = tpu.dynamic_rotate %604 by %c127_i32_135 dim 1 : vector<1x128xf32>, i32 -> vector<1x128xf32>
    %607 = arith.addf %605, %606 : vector<1x128xf32>
    %608 = vector.broadcast %3 : f32 to vector<1x128xf32>
    %609 = arith.mulf %608, %604 : vector<1x128xf32>
    %610 = vector.broadcast %6 : f32 to vector<1x128xf32>
    %611 = arith.mulf %610, %607 : vector<1x128xf32>
    %612 = arith.addf %609, %611 : vector<1x128xf32>
    %613 = vector.broadcast %604 : vector<1x128xf32> to vector<32x128xf32>
    %614 = arith.mulf %10, %613 : vector<32x128xf32>
    %615 = math.tanh %614 : vector<32x128xf32>
    %616 = arith.truncf %615 : vector<32x128xf32> to vector<32x128xbf16>
    %cst_136 = arith.constant dense<0.000000e+00> : vector<32x128xf32>
    %617 = tpu.matmul %15, %616, %cst_136 {dimension_numbers = #tpu.dot_dimension_numbers<[1], [0], [0], [1], [0, 0, 1, 1], [], []>} : vector<32x32xbf16>, vector<32x128xbf16>, vector<32x128xf32> -> vector<32x128xf32>
    %618 = math.tanh %617 : vector<32x128xf32>
    %619 = arith.mulf %13, %618 : vector<32x128xf32>
    %cst_137 = arith.constant dense<0.000000e+00> : vector<128xf32>
    %620 = vector.multi_reduction <add>, %619, %cst_137 [0] : vector<32x128xf32> to vector<128xf32>
    %621 = vector.shape_cast %620 : vector<128xf32> to vector<1x128xf32>
    %622 = math.tanh %621 : vector<1x128xf32>
    %623 = vector.broadcast %7 : f32 to vector<1x128xf32>
    %624 = arith.mulf %622, %623 : vector<1x128xf32>
    %625 = arith.addf %612, %624 : vector<1x128xf32>
    %626 = vector.broadcast %554 : f32 to vector<1x128xf32>
    %627 = arith.mulf %626, %625 : vector<1x128xf32>
    %628 = arith.addf %552, %627 : vector<1x128xf32>
    %c1_i32_138 = arith.constant 1 : i32
    %629 = tpu.dynamic_rotate %628 by %c1_i32_138 dim 1 : vector<1x128xf32>, i32 -> vector<1x128xf32>
    %c127_i32_139 = arith.constant 127 : i32
    %630 = tpu.dynamic_rotate %628 by %c127_i32_139 dim 1 : vector<1x128xf32>, i32 -> vector<1x128xf32>
    %631 = arith.addf %629, %630 : vector<1x128xf32>
    %632 = vector.broadcast %3 : f32 to vector<1x128xf32>
    %633 = arith.mulf %632, %628 : vector<1x128xf32>
    %634 = vector.broadcast %6 : f32 to vector<1x128xf32>
    %635 = arith.mulf %634, %631 : vector<1x128xf32>
    %636 = arith.addf %633, %635 : vector<1x128xf32>
    %637 = vector.broadcast %628 : vector<1x128xf32> to vector<32x128xf32>
    %638 = arith.mulf %10, %637 : vector<32x128xf32>
    %639 = math.tanh %638 : vector<32x128xf32>
    %640 = arith.truncf %639 : vector<32x128xf32> to vector<32x128xbf16>
    %cst_140 = arith.constant dense<0.000000e+00> : vector<32x128xf32>
    %641 = tpu.matmul %15, %640, %cst_140 {dimension_numbers = #tpu.dot_dimension_numbers<[1], [0], [0], [1], [0, 0, 1, 1], [], []>} : vector<32x32xbf16>, vector<32x128xbf16>, vector<32x128xf32> -> vector<32x128xf32>
    %642 = math.tanh %641 : vector<32x128xf32>
    %643 = arith.mulf %13, %642 : vector<32x128xf32>
    %cst_141 = arith.constant dense<0.000000e+00> : vector<128xf32>
    %644 = vector.multi_reduction <add>, %643, %cst_141 [0] : vector<32x128xf32> to vector<128xf32>
    %645 = vector.shape_cast %644 : vector<128xf32> to vector<1x128xf32>
    %646 = math.tanh %645 : vector<1x128xf32>
    %647 = vector.broadcast %7 : f32 to vector<1x128xf32>
    %648 = arith.mulf %646, %647 : vector<1x128xf32>
    %649 = arith.addf %636, %648 : vector<1x128xf32>
    %cst_142 = arith.constant 2.000000e+00 : f32
    %650 = vector.broadcast %cst_142 : f32 to vector<1x128xf32>
    %651 = arith.mulf %650, %601 : vector<1x128xf32>
    %652 = arith.addf %577, %651 : vector<1x128xf32>
    %cst_143 = arith.constant 2.000000e+00 : f32
    %653 = vector.broadcast %cst_143 : f32 to vector<1x128xf32>
    %654 = arith.mulf %653, %625 : vector<1x128xf32>
    %655 = arith.addf %652, %654 : vector<1x128xf32>
    %656 = arith.addf %655, %649 : vector<1x128xf32>
    %657 = vector.broadcast %556 : f32 to vector<1x128xf32>
    %658 = arith.mulf %657, %656 : vector<1x128xf32>
    %659 = arith.addf %552, %658 : vector<1x128xf32>
    %c6_144 = arith.constant 6 : index
    %c0_145 = arith.constant 0 : index
    %660 = vector.load %arg9[%c6_144, %c0_145] : memref<16x128xf32, #tpu.memory_space<vmem>>, vector<1x128xf32>
    tpu.vector_store %arg9[%c6_144, %c0_145], %659 {strides = array<i32>} : memref<16x128xf32, #tpu.memory_space<vmem>>, vector<1x128xf32>,
    %c7 = arith.constant 7 : index
    %661 = memref.load %arg2[%c7] : memref<16xf32, #tpu.memory_space<smem>>
    %c7_146 = arith.constant 7 : index
    %662 = memref.load %arg3[%c7_146] : memref<16xf32, #tpu.memory_space<smem>>
    %c7_147 = arith.constant 7 : index
    %663 = memref.load %arg4[%c7_147] : memref<16xf32, #tpu.memory_space<smem>>
    %c1_i32_148 = arith.constant 1 : i32
    %664 = tpu.dynamic_rotate %659 by %c1_i32_148 dim 1 : vector<1x128xf32>, i32 -> vector<1x128xf32>
    %c127_i32_149 = arith.constant 127 : i32
    %665 = tpu.dynamic_rotate %659 by %c127_i32_149 dim 1 : vector<1x128xf32>, i32 -> vector<1x128xf32>
    %666 = arith.addf %664, %665 : vector<1x128xf32>
    %667 = vector.broadcast %3 : f32 to vector<1x128xf32>
    %668 = arith.mulf %667, %659 : vector<1x128xf32>
    %669 = vector.broadcast %6 : f32 to vector<1x128xf32>
    %670 = arith.mulf %669, %666 : vector<1x128xf32>
    %671 = arith.addf %668, %670 : vector<1x128xf32>
    %672 = vector.broadcast %659 : vector<1x128xf32> to vector<32x128xf32>
    %673 = arith.mulf %10, %672 : vector<32x128xf32>
    %674 = math.tanh %673 : vector<32x128xf32>
    %675 = arith.truncf %674 : vector<32x128xf32> to vector<32x128xbf16>
    %cst_150 = arith.constant dense<0.000000e+00> : vector<32x128xf32>
    %676 = tpu.matmul %15, %675, %cst_150 {dimension_numbers = #tpu.dot_dimension_numbers<[1], [0], [0], [1], [0, 0, 1, 1], [], []>} : vector<32x32xbf16>, vector<32x128xbf16>, vector<32x128xf32> -> vector<32x128xf32>
    %677 = math.tanh %676 : vector<32x128xf32>
    %678 = arith.mulf %13, %677 : vector<32x128xf32>
    %cst_151 = arith.constant dense<0.000000e+00> : vector<128xf32>
    %679 = vector.multi_reduction <add>, %678, %cst_151 [0] : vector<32x128xf32> to vector<128xf32>
    %680 = vector.shape_cast %679 : vector<128xf32> to vector<1x128xf32>
    %681 = math.tanh %680 : vector<1x128xf32>
    %682 = vector.broadcast %7 : f32 to vector<1x128xf32>
    %683 = arith.mulf %681, %682 : vector<1x128xf32>
    %684 = arith.addf %671, %683 : vector<1x128xf32>
    %685 = vector.broadcast %662 : f32 to vector<1x128xf32>
    %686 = arith.mulf %685, %684 : vector<1x128xf32>
    %687 = arith.addf %659, %686 : vector<1x128xf32>
    %c1_i32_152 = arith.constant 1 : i32
    %688 = tpu.dynamic_rotate %687 by %c1_i32_152 dim 1 : vector<1x128xf32>, i32 -> vector<1x128xf32>
    %c127_i32_153 = arith.constant 127 : i32
    %689 = tpu.dynamic_rotate %687 by %c127_i32_153 dim 1 : vector<1x128xf32>, i32 -> vector<1x128xf32>
    %690 = arith.addf %688, %689 : vector<1x128xf32>
    %691 = vector.broadcast %3 : f32 to vector<1x128xf32>
    %692 = arith.mulf %691, %687 : vector<1x128xf32>
    %693 = vector.broadcast %6 : f32 to vector<1x128xf32>
    %694 = arith.mulf %693, %690 : vector<1x128xf32>
    %695 = arith.addf %692, %694 : vector<1x128xf32>
    %696 = vector.broadcast %687 : vector<1x128xf32> to vector<32x128xf32>
    %697 = arith.mulf %10, %696 : vector<32x128xf32>
    %698 = math.tanh %697 : vector<32x128xf32>
    %699 = arith.truncf %698 : vector<32x128xf32> to vector<32x128xbf16>
    %cst_154 = arith.constant dense<0.000000e+00> : vector<32x128xf32>
    %700 = tpu.matmul %15, %699, %cst_154 {dimension_numbers = #tpu.dot_dimension_numbers<[1], [0], [0], [1], [0, 0, 1, 1], [], []>} : vector<32x32xbf16>, vector<32x128xbf16>, vector<32x128xf32> -> vector<32x128xf32>
    %701 = math.tanh %700 : vector<32x128xf32>
    %702 = arith.mulf %13, %701 : vector<32x128xf32>
    %cst_155 = arith.constant dense<0.000000e+00> : vector<128xf32>
    %703 = vector.multi_reduction <add>, %702, %cst_155 [0] : vector<32x128xf32> to vector<128xf32>
    %704 = vector.shape_cast %703 : vector<128xf32> to vector<1x128xf32>
    %705 = math.tanh %704 : vector<1x128xf32>
    %706 = vector.broadcast %7 : f32 to vector<1x128xf32>
    %707 = arith.mulf %705, %706 : vector<1x128xf32>
    %708 = arith.addf %695, %707 : vector<1x128xf32>
    %709 = vector.broadcast %662 : f32 to vector<1x128xf32>
    %710 = arith.mulf %709, %708 : vector<1x128xf32>
    %711 = arith.addf %659, %710 : vector<1x128xf32>
    %c1_i32_156 = arith.constant 1 : i32
    %712 = tpu.dynamic_rotate %711 by %c1_i32_156 dim 1 : vector<1x128xf32>, i32 -> vector<1x128xf32>
    %c127_i32_157 = arith.constant 127 : i32
    %713 = tpu.dynamic_rotate %711 by %c127_i32_157 dim 1 : vector<1x128xf32>, i32 -> vector<1x128xf32>
    %714 = arith.addf %712, %713 : vector<1x128xf32>
    %715 = vector.broadcast %3 : f32 to vector<1x128xf32>
    %716 = arith.mulf %715, %711 : vector<1x128xf32>
    %717 = vector.broadcast %6 : f32 to vector<1x128xf32>
    %718 = arith.mulf %717, %714 : vector<1x128xf32>
    %719 = arith.addf %716, %718 : vector<1x128xf32>
    %720 = vector.broadcast %711 : vector<1x128xf32> to vector<32x128xf32>
    %721 = arith.mulf %10, %720 : vector<32x128xf32>
    %722 = math.tanh %721 : vector<32x128xf32>
    %723 = arith.truncf %722 : vector<32x128xf32> to vector<32x128xbf16>
    %cst_158 = arith.constant dense<0.000000e+00> : vector<32x128xf32>
    %724 = tpu.matmul %15, %723, %cst_158 {dimension_numbers = #tpu.dot_dimension_numbers<[1], [0], [0], [1], [0, 0, 1, 1], [], []>} : vector<32x32xbf16>, vector<32x128xbf16>, vector<32x128xf32> -> vector<32x128xf32>
    %725 = math.tanh %724 : vector<32x128xf32>
    %726 = arith.mulf %13, %725 : vector<32x128xf32>
    %cst_159 = arith.constant dense<0.000000e+00> : vector<128xf32>
    %727 = vector.multi_reduction <add>, %726, %cst_159 [0] : vector<32x128xf32> to vector<128xf32>
    %728 = vector.shape_cast %727 : vector<128xf32> to vector<1x128xf32>
    %729 = math.tanh %728 : vector<1x128xf32>
    %730 = vector.broadcast %7 : f32 to vector<1x128xf32>
    %731 = arith.mulf %729, %730 : vector<1x128xf32>
    %732 = arith.addf %719, %731 : vector<1x128xf32>
    %733 = vector.broadcast %661 : f32 to vector<1x128xf32>
    %734 = arith.mulf %733, %732 : vector<1x128xf32>
    %735 = arith.addf %659, %734 : vector<1x128xf32>
    %c1_i32_160 = arith.constant 1 : i32
    %736 = tpu.dynamic_rotate %735 by %c1_i32_160 dim 1 : vector<1x128xf32>, i32 -> vector<1x128xf32>
    %c127_i32_161 = arith.constant 127 : i32
    %737 = tpu.dynamic_rotate %735 by %c127_i32_161 dim 1 : vector<1x128xf32>, i32 -> vector<1x128xf32>
    %738 = arith.addf %736, %737 : vector<1x128xf32>
    %739 = vector.broadcast %3 : f32 to vector<1x128xf32>
    %740 = arith.mulf %739, %735 : vector<1x128xf32>
    %741 = vector.broadcast %6 : f32 to vector<1x128xf32>
    %742 = arith.mulf %741, %738 : vector<1x128xf32>
    %743 = arith.addf %740, %742 : vector<1x128xf32>
    %744 = vector.broadcast %735 : vector<1x128xf32> to vector<32x128xf32>
    %745 = arith.mulf %10, %744 : vector<32x128xf32>
    %746 = math.tanh %745 : vector<32x128xf32>
    %747 = arith.truncf %746 : vector<32x128xf32> to vector<32x128xbf16>
    %cst_162 = arith.constant dense<0.000000e+00> : vector<32x128xf32>
    %748 = tpu.matmul %15, %747, %cst_162 {dimension_numbers = #tpu.dot_dimension_numbers<[1], [0], [0], [1], [0, 0, 1, 1], [], []>} : vector<32x32xbf16>, vector<32x128xbf16>, vector<32x128xf32> -> vector<32x128xf32>
    %749 = math.tanh %748 : vector<32x128xf32>
    %750 = arith.mulf %13, %749 : vector<32x128xf32>
    %cst_163 = arith.constant dense<0.000000e+00> : vector<128xf32>
    %751 = vector.multi_reduction <add>, %750, %cst_163 [0] : vector<32x128xf32> to vector<128xf32>
    %752 = vector.shape_cast %751 : vector<128xf32> to vector<1x128xf32>
    %753 = math.tanh %752 : vector<1x128xf32>
    %754 = vector.broadcast %7 : f32 to vector<1x128xf32>
    %755 = arith.mulf %753, %754 : vector<1x128xf32>
    %756 = arith.addf %743, %755 : vector<1x128xf32>
    %cst_164 = arith.constant 2.000000e+00 : f32
    %757 = vector.broadcast %cst_164 : f32 to vector<1x128xf32>
    %758 = arith.mulf %757, %708 : vector<1x128xf32>
    %759 = arith.addf %684, %758 : vector<1x128xf32>
    %cst_165 = arith.constant 2.000000e+00 : f32
    %760 = vector.broadcast %cst_165 : f32 to vector<1x128xf32>
    %761 = arith.mulf %760, %732 : vector<1x128xf32>
    %762 = arith.addf %759, %761 : vector<1x128xf32>
    %763 = arith.addf %762, %756 : vector<1x128xf32>
    %764 = vector.broadcast %663 : f32 to vector<1x128xf32>
    %765 = arith.mulf %764, %763 : vector<1x128xf32>
    %766 = arith.addf %659, %765 : vector<1x128xf32>
    %c7_166 = arith.constant 7 : index
    %c0_167 = arith.constant 0 : index
    %767 = vector.load %arg9[%c7_166, %c0_167] : memref<16x128xf32, #tpu.memory_space<vmem>>, vector<1x128xf32>
    tpu.vector_store %arg9[%c7_166, %c0_167], %766 {strides = array<i32>} : memref<16x128xf32, #tpu.memory_space<vmem>>, vector<1x128xf32>,
    %c8 = arith.constant 8 : index
    %768 = memref.load %arg2[%c8] : memref<16xf32, #tpu.memory_space<smem>>
    %c8_168 = arith.constant 8 : index
    %769 = memref.load %arg3[%c8_168] : memref<16xf32, #tpu.memory_space<smem>>
    %c8_169 = arith.constant 8 : index
    %770 = memref.load %arg4[%c8_169] : memref<16xf32, #tpu.memory_space<smem>>
    %c1_i32_170 = arith.constant 1 : i32
    %771 = tpu.dynamic_rotate %766 by %c1_i32_170 dim 1 : vector<1x128xf32>, i32 -> vector<1x128xf32>
    %c127_i32_171 = arith.constant 127 : i32
    %772 = tpu.dynamic_rotate %766 by %c127_i32_171 dim 1 : vector<1x128xf32>, i32 -> vector<1x128xf32>
    %773 = arith.addf %771, %772 : vector<1x128xf32>
    %774 = vector.broadcast %3 : f32 to vector<1x128xf32>
    %775 = arith.mulf %774, %766 : vector<1x128xf32>
    %776 = vector.broadcast %6 : f32 to vector<1x128xf32>
    %777 = arith.mulf %776, %773 : vector<1x128xf32>
    %778 = arith.addf %775, %777 : vector<1x128xf32>
    %779 = vector.broadcast %766 : vector<1x128xf32> to vector<32x128xf32>
    %780 = arith.mulf %10, %779 : vector<32x128xf32>
    %781 = math.tanh %780 : vector<32x128xf32>
    %782 = arith.truncf %781 : vector<32x128xf32> to vector<32x128xbf16>
    %cst_172 = arith.constant dense<0.000000e+00> : vector<32x128xf32>
    %783 = tpu.matmul %15, %782, %cst_172 {dimension_numbers = #tpu.dot_dimension_numbers<[1], [0], [0], [1], [0, 0, 1, 1], [], []>} : vector<32x32xbf16>, vector<32x128xbf16>, vector<32x128xf32> -> vector<32x128xf32>
    %784 = math.tanh %783 : vector<32x128xf32>
    %785 = arith.mulf %13, %784 : vector<32x128xf32>
    %cst_173 = arith.constant dense<0.000000e+00> : vector<128xf32>
    %786 = vector.multi_reduction <add>, %785, %cst_173 [0] : vector<32x128xf32> to vector<128xf32>
    %787 = vector.shape_cast %786 : vector<128xf32> to vector<1x128xf32>
    %788 = math.tanh %787 : vector<1x128xf32>
    %789 = vector.broadcast %7 : f32 to vector<1x128xf32>
    %790 = arith.mulf %788, %789 : vector<1x128xf32>
    %791 = arith.addf %778, %790 : vector<1x128xf32>
    %792 = vector.broadcast %769 : f32 to vector<1x128xf32>
    %793 = arith.mulf %792, %791 : vector<1x128xf32>
    %794 = arith.addf %766, %793 : vector<1x128xf32>
    %c1_i32_174 = arith.constant 1 : i32
    %795 = tpu.dynamic_rotate %794 by %c1_i32_174 dim 1 : vector<1x128xf32>, i32 -> vector<1x128xf32>
    %c127_i32_175 = arith.constant 127 : i32
    %796 = tpu.dynamic_rotate %794 by %c127_i32_175 dim 1 : vector<1x128xf32>, i32 -> vector<1x128xf32>
    %797 = arith.addf %795, %796 : vector<1x128xf32>
    %798 = vector.broadcast %3 : f32 to vector<1x128xf32>
    %799 = arith.mulf %798, %794 : vector<1x128xf32>
    %800 = vector.broadcast %6 : f32 to vector<1x128xf32>
    %801 = arith.mulf %800, %797 : vector<1x128xf32>
    %802 = arith.addf %799, %801 : vector<1x128xf32>
    %803 = vector.broadcast %794 : vector<1x128xf32> to vector<32x128xf32>
    %804 = arith.mulf %10, %803 : vector<32x128xf32>
    %805 = math.tanh %804 : vector<32x128xf32>
    %806 = arith.truncf %805 : vector<32x128xf32> to vector<32x128xbf16>
    %cst_176 = arith.constant dense<0.000000e+00> : vector<32x128xf32>
    %807 = tpu.matmul %15, %806, %cst_176 {dimension_numbers = #tpu.dot_dimension_numbers<[1], [0], [0], [1], [0, 0, 1, 1], [], []>} : vector<32x32xbf16>, vector<32x128xbf16>, vector<32x128xf32> -> vector<32x128xf32>
    %808 = math.tanh %807 : vector<32x128xf32>
    %809 = arith.mulf %13, %808 : vector<32x128xf32>
    %cst_177 = arith.constant dense<0.000000e+00> : vector<128xf32>
    %810 = vector.multi_reduction <add>, %809, %cst_177 [0] : vector<32x128xf32> to vector<128xf32>
    %811 = vector.shape_cast %810 : vector<128xf32> to vector<1x128xf32>
    %812 = math.tanh %811 : vector<1x128xf32>
    %813 = vector.broadcast %7 : f32 to vector<1x128xf32>
    %814 = arith.mulf %812, %813 : vector<1x128xf32>
    %815 = arith.addf %802, %814 : vector<1x128xf32>
    %816 = vector.broadcast %769 : f32 to vector<1x128xf32>
    %817 = arith.mulf %816, %815 : vector<1x128xf32>
    %818 = arith.addf %766, %817 : vector<1x128xf32>
    %c1_i32_178 = arith.constant 1 : i32
    %819 = tpu.dynamic_rotate %818 by %c1_i32_178 dim 1 : vector<1x128xf32>, i32 -> vector<1x128xf32>
    %c127_i32_179 = arith.constant 127 : i32
    %820 = tpu.dynamic_rotate %818 by %c127_i32_179 dim 1 : vector<1x128xf32>, i32 -> vector<1x128xf32>
    %821 = arith.addf %819, %820 : vector<1x128xf32>
    %822 = vector.broadcast %3 : f32 to vector<1x128xf32>
    %823 = arith.mulf %822, %818 : vector<1x128xf32>
    %824 = vector.broadcast %6 : f32 to vector<1x128xf32>
    %825 = arith.mulf %824, %821 : vector<1x128xf32>
    %826 = arith.addf %823, %825 : vector<1x128xf32>
    %827 = vector.broadcast %818 : vector<1x128xf32> to vector<32x128xf32>
    %828 = arith.mulf %10, %827 : vector<32x128xf32>
    %829 = math.tanh %828 : vector<32x128xf32>
    %830 = arith.truncf %829 : vector<32x128xf32> to vector<32x128xbf16>
    %cst_180 = arith.constant dense<0.000000e+00> : vector<32x128xf32>
    %831 = tpu.matmul %15, %830, %cst_180 {dimension_numbers = #tpu.dot_dimension_numbers<[1], [0], [0], [1], [0, 0, 1, 1], [], []>} : vector<32x32xbf16>, vector<32x128xbf16>, vector<32x128xf32> -> vector<32x128xf32>
    %832 = math.tanh %831 : vector<32x128xf32>
    %833 = arith.mulf %13, %832 : vector<32x128xf32>
    %cst_181 = arith.constant dense<0.000000e+00> : vector<128xf32>
    %834 = vector.multi_reduction <add>, %833, %cst_181 [0] : vector<32x128xf32> to vector<128xf32>
    %835 = vector.shape_cast %834 : vector<128xf32> to vector<1x128xf32>
    %836 = math.tanh %835 : vector<1x128xf32>
    %837 = vector.broadcast %7 : f32 to vector<1x128xf32>
    %838 = arith.mulf %836, %837 : vector<1x128xf32>
    %839 = arith.addf %826, %838 : vector<1x128xf32>
    %840 = vector.broadcast %768 : f32 to vector<1x128xf32>
    %841 = arith.mulf %840, %839 : vector<1x128xf32>
    %842 = arith.addf %766, %841 : vector<1x128xf32>
    %c1_i32_182 = arith.constant 1 : i32
    %843 = tpu.dynamic_rotate %842 by %c1_i32_182 dim 1 : vector<1x128xf32>, i32 -> vector<1x128xf32>
    %c127_i32_183 = arith.constant 127 : i32
    %844 = tpu.dynamic_rotate %842 by %c127_i32_183 dim 1 : vector<1x128xf32>, i32 -> vector<1x128xf32>
    %845 = arith.addf %843, %844 : vector<1x128xf32>
    %846 = vector.broadcast %3 : f32 to vector<1x128xf32>
    %847 = arith.mulf %846, %842 : vector<1x128xf32>
    %848 = vector.broadcast %6 : f32 to vector<1x128xf32>
    %849 = arith.mulf %848, %845 : vector<1x128xf32>
    %850 = arith.addf %847, %849 : vector<1x128xf32>
    %851 = vector.broadcast %842 : vector<1x128xf32> to vector<32x128xf32>
    %852 = arith.mulf %10, %851 : vector<32x128xf32>
    %853 = math.tanh %852 : vector<32x128xf32>
    %854 = arith.truncf %853 : vector<32x128xf32> to vector<32x128xbf16>
    %cst_184 = arith.constant dense<0.000000e+00> : vector<32x128xf32>
    %855 = tpu.matmul %15, %854, %cst_184 {dimension_numbers = #tpu.dot_dimension_numbers<[1], [0], [0], [1], [0, 0, 1, 1], [], []>} : vector<32x32xbf16>, vector<32x128xbf16>, vector<32x128xf32> -> vector<32x128xf32>
    %856 = math.tanh %855 : vector<32x128xf32>
    %857 = arith.mulf %13, %856 : vector<32x128xf32>
    %cst_185 = arith.constant dense<0.000000e+00> : vector<128xf32>
    %858 = vector.multi_reduction <add>, %857, %cst_185 [0] : vector<32x128xf32> to vector<128xf32>
    %859 = vector.shape_cast %858 : vector<128xf32> to vector<1x128xf32>
    %860 = math.tanh %859 : vector<1x128xf32>
    %861 = vector.broadcast %7 : f32 to vector<1x128xf32>
    %862 = arith.mulf %860, %861 : vector<1x128xf32>
    %863 = arith.addf %850, %862 : vector<1x128xf32>
    %cst_186 = arith.constant 2.000000e+00 : f32
    %864 = vector.broadcast %cst_186 : f32 to vector<1x128xf32>
    %865 = arith.mulf %864, %815 : vector<1x128xf32>
    %866 = arith.addf %791, %865 : vector<1x128xf32>
    %cst_187 = arith.constant 2.000000e+00 : f32
    %867 = vector.broadcast %cst_187 : f32 to vector<1x128xf32>
    %868 = arith.mulf %867, %839 : vector<1x128xf32>
    %869 = arith.addf %866, %868 : vector<1x128xf32>
    %870 = arith.addf %869, %863 : vector<1x128xf32>
    %871 = vector.broadcast %770 : f32 to vector<1x128xf32>
    %872 = arith.mulf %871, %870 : vector<1x128xf32>
    %873 = arith.addf %766, %872 : vector<1x128xf32>
    %c8_188 = arith.constant 8 : index
    %c0_189 = arith.constant 0 : index
    %874 = vector.load %arg9[%c8_188, %c0_189] : memref<16x128xf32, #tpu.memory_space<vmem>>, vector<1x128xf32>
    tpu.vector_store %arg9[%c8_188, %c0_189], %873 {strides = array<i32>} : memref<16x128xf32, #tpu.memory_space<vmem>>, vector<1x128xf32>,
    %c9 = arith.constant 9 : index
    %875 = memref.load %arg2[%c9] : memref<16xf32, #tpu.memory_space<smem>>
    %c9_190 = arith.constant 9 : index
    %876 = memref.load %arg3[%c9_190] : memref<16xf32, #tpu.memory_space<smem>>
    %c9_191 = arith.constant 9 : index
    %877 = memref.load %arg4[%c9_191] : memref<16xf32, #tpu.memory_space<smem>>
    %c1_i32_192 = arith.constant 1 : i32
    %878 = tpu.dynamic_rotate %873 by %c1_i32_192 dim 1 : vector<1x128xf32>, i32 -> vector<1x128xf32>
    %c127_i32_193 = arith.constant 127 : i32
    %879 = tpu.dynamic_rotate %873 by %c127_i32_193 dim 1 : vector<1x128xf32>, i32 -> vector<1x128xf32>
    %880 = arith.addf %878, %879 : vector<1x128xf32>
    %881 = vector.broadcast %3 : f32 to vector<1x128xf32>
    %882 = arith.mulf %881, %873 : vector<1x128xf32>
    %883 = vector.broadcast %6 : f32 to vector<1x128xf32>
    %884 = arith.mulf %883, %880 : vector<1x128xf32>
    %885 = arith.addf %882, %884 : vector<1x128xf32>
    %886 = vector.broadcast %873 : vector<1x128xf32> to vector<32x128xf32>
    %887 = arith.mulf %10, %886 : vector<32x128xf32>
    %888 = math.tanh %887 : vector<32x128xf32>
    %889 = arith.truncf %888 : vector<32x128xf32> to vector<32x128xbf16>
    %cst_194 = arith.constant dense<0.000000e+00> : vector<32x128xf32>
    %890 = tpu.matmul %15, %889, %cst_194 {dimension_numbers = #tpu.dot_dimension_numbers<[1], [0], [0], [1], [0, 0, 1, 1], [], []>} : vector<32x32xbf16>, vector<32x128xbf16>, vector<32x128xf32> -> vector<32x128xf32>
    %891 = math.tanh %890 : vector<32x128xf32>
    %892 = arith.mulf %13, %891 : vector<32x128xf32>
    %cst_195 = arith.constant dense<0.000000e+00> : vector<128xf32>
    %893 = vector.multi_reduction <add>, %892, %cst_195 [0] : vector<32x128xf32> to vector<128xf32>
    %894 = vector.shape_cast %893 : vector<128xf32> to vector<1x128xf32>
    %895 = math.tanh %894 : vector<1x128xf32>
    %896 = vector.broadcast %7 : f32 to vector<1x128xf32>
    %897 = arith.mulf %895, %896 : vector<1x128xf32>
    %898 = arith.addf %885, %897 : vector<1x128xf32>
    %899 = vector.broadcast %876 : f32 to vector<1x128xf32>
    %900 = arith.mulf %899, %898 : vector<1x128xf32>
    %901 = arith.addf %873, %900 : vector<1x128xf32>
    %c1_i32_196 = arith.constant 1 : i32
    %902 = tpu.dynamic_rotate %901 by %c1_i32_196 dim 1 : vector<1x128xf32>, i32 -> vector<1x128xf32>
    %c127_i32_197 = arith.constant 127 : i32
    %903 = tpu.dynamic_rotate %901 by %c127_i32_197 dim 1 : vector<1x128xf32>, i32 -> vector<1x128xf32>
    %904 = arith.addf %902, %903 : vector<1x128xf32>
    %905 = vector.broadcast %3 : f32 to vector<1x128xf32>
    %906 = arith.mulf %905, %901 : vector<1x128xf32>
    %907 = vector.broadcast %6 : f32 to vector<1x128xf32>
    %908 = arith.mulf %907, %904 : vector<1x128xf32>
    %909 = arith.addf %906, %908 : vector<1x128xf32>
    %910 = vector.broadcast %901 : vector<1x128xf32> to vector<32x128xf32>
    %911 = arith.mulf %10, %910 : vector<32x128xf32>
    %912 = math.tanh %911 : vector<32x128xf32>
    %913 = arith.truncf %912 : vector<32x128xf32> to vector<32x128xbf16>
    %cst_198 = arith.constant dense<0.000000e+00> : vector<32x128xf32>
    %914 = tpu.matmul %15, %913, %cst_198 {dimension_numbers = #tpu.dot_dimension_numbers<[1], [0], [0], [1], [0, 0, 1, 1], [], []>} : vector<32x32xbf16>, vector<32x128xbf16>, vector<32x128xf32> -> vector<32x128xf32>
    %915 = math.tanh %914 : vector<32x128xf32>
    %916 = arith.mulf %13, %915 : vector<32x128xf32>
    %cst_199 = arith.constant dense<0.000000e+00> : vector<128xf32>
    %917 = vector.multi_reduction <add>, %916, %cst_199 [0] : vector<32x128xf32> to vector<128xf32>
    %918 = vector.shape_cast %917 : vector<128xf32> to vector<1x128xf32>
    %919 = math.tanh %918 : vector<1x128xf32>
    %920 = vector.broadcast %7 : f32 to vector<1x128xf32>
    %921 = arith.mulf %919, %920 : vector<1x128xf32>
    %922 = arith.addf %909, %921 : vector<1x128xf32>
    %923 = vector.broadcast %876 : f32 to vector<1x128xf32>
    %924 = arith.mulf %923, %922 : vector<1x128xf32>
    %925 = arith.addf %873, %924 : vector<1x128xf32>
    %c1_i32_200 = arith.constant 1 : i32
    %926 = tpu.dynamic_rotate %925 by %c1_i32_200 dim 1 : vector<1x128xf32>, i32 -> vector<1x128xf32>
    %c127_i32_201 = arith.constant 127 : i32
    %927 = tpu.dynamic_rotate %925 by %c127_i32_201 dim 1 : vector<1x128xf32>, i32 -> vector<1x128xf32>
    %928 = arith.addf %926, %927 : vector<1x128xf32>
    %929 = vector.broadcast %3 : f32 to vector<1x128xf32>
    %930 = arith.mulf %929, %925 : vector<1x128xf32>
    %931 = vector.broadcast %6 : f32 to vector<1x128xf32>
    %932 = arith.mulf %931, %928 : vector<1x128xf32>
    %933 = arith.addf %930, %932 : vector<1x128xf32>
    %934 = vector.broadcast %925 : vector<1x128xf32> to vector<32x128xf32>
    %935 = arith.mulf %10, %934 : vector<32x128xf32>
    %936 = math.tanh %935 : vector<32x128xf32>
    %937 = arith.truncf %936 : vector<32x128xf32> to vector<32x128xbf16>
    %cst_202 = arith.constant dense<0.000000e+00> : vector<32x128xf32>
    %938 = tpu.matmul %15, %937, %cst_202 {dimension_numbers = #tpu.dot_dimension_numbers<[1], [0], [0], [1], [0, 0, 1, 1], [], []>} : vector<32x32xbf16>, vector<32x128xbf16>, vector<32x128xf32> -> vector<32x128xf32>
    %939 = math.tanh %938 : vector<32x128xf32>
    %940 = arith.mulf %13, %939 : vector<32x128xf32>
    %cst_203 = arith.constant dense<0.000000e+00> : vector<128xf32>
    %941 = vector.multi_reduction <add>, %940, %cst_203 [0] : vector<32x128xf32> to vector<128xf32>
    %942 = vector.shape_cast %941 : vector<128xf32> to vector<1x128xf32>
    %943 = math.tanh %942 : vector<1x128xf32>
    %944 = vector.broadcast %7 : f32 to vector<1x128xf32>
    %945 = arith.mulf %943, %944 : vector<1x128xf32>
    %946 = arith.addf %933, %945 : vector<1x128xf32>
    %947 = vector.broadcast %875 : f32 to vector<1x128xf32>
    %948 = arith.mulf %947, %946 : vector<1x128xf32>
    %949 = arith.addf %873, %948 : vector<1x128xf32>
    %c1_i32_204 = arith.constant 1 : i32
    %950 = tpu.dynamic_rotate %949 by %c1_i32_204 dim 1 : vector<1x128xf32>, i32 -> vector<1x128xf32>
    %c127_i32_205 = arith.constant 127 : i32
    %951 = tpu.dynamic_rotate %949 by %c127_i32_205 dim 1 : vector<1x128xf32>, i32 -> vector<1x128xf32>
    %952 = arith.addf %950, %951 : vector<1x128xf32>
    %953 = vector.broadcast %3 : f32 to vector<1x128xf32>
    %954 = arith.mulf %953, %949 : vector<1x128xf32>
    %955 = vector.broadcast %6 : f32 to vector<1x128xf32>
    %956 = arith.mulf %955, %952 : vector<1x128xf32>
    %957 = arith.addf %954, %956 : vector<1x128xf32>
    %958 = vector.broadcast %949 : vector<1x128xf32> to vector<32x128xf32>
    %959 = arith.mulf %10, %958 : vector<32x128xf32>
    %960 = math.tanh %959 : vector<32x128xf32>
    %961 = arith.truncf %960 : vector<32x128xf32> to vector<32x128xbf16>
    %cst_206 = arith.constant dense<0.000000e+00> : vector<32x128xf32>
    %962 = tpu.matmul %15, %961, %cst_206 {dimension_numbers = #tpu.dot_dimension_numbers<[1], [0], [0], [1], [0, 0, 1, 1], [], []>} : vector<32x32xbf16>, vector<32x128xbf16>, vector<32x128xf32> -> vector<32x128xf32>
    %963 = math.tanh %962 : vector<32x128xf32>
    %964 = arith.mulf %13, %963 : vector<32x128xf32>
    %cst_207 = arith.constant dense<0.000000e+00> : vector<128xf32>
    %965 = vector.multi_reduction <add>, %964, %cst_207 [0] : vector<32x128xf32> to vector<128xf32>
    %966 = vector.shape_cast %965 : vector<128xf32> to vector<1x128xf32>
    %967 = math.tanh %966 : vector<1x128xf32>
    %968 = vector.broadcast %7 : f32 to vector<1x128xf32>
    %969 = arith.mulf %967, %968 : vector<1x128xf32>
    %970 = arith.addf %957, %969 : vector<1x128xf32>
    %cst_208 = arith.constant 2.000000e+00 : f32
    %971 = vector.broadcast %cst_208 : f32 to vector<1x128xf32>
    %972 = arith.mulf %971, %922 : vector<1x128xf32>
    %973 = arith.addf %898, %972 : vector<1x128xf32>
    %cst_209 = arith.constant 2.000000e+00 : f32
    %974 = vector.broadcast %cst_209 : f32 to vector<1x128xf32>
    %975 = arith.mulf %974, %946 : vector<1x128xf32>
    %976 = arith.addf %973, %975 : vector<1x128xf32>
    %977 = arith.addf %976, %970 : vector<1x128xf32>
    %978 = vector.broadcast %877 : f32 to vector<1x128xf32>
    %979 = arith.mulf %978, %977 : vector<1x128xf32>
    %980 = arith.addf %873, %979 : vector<1x128xf32>
    %c9_210 = arith.constant 9 : index
    %c0_211 = arith.constant 0 : index
    %981 = vector.load %arg9[%c9_210, %c0_211] : memref<16x128xf32, #tpu.memory_space<vmem>>, vector<1x128xf32>
    tpu.vector_store %arg9[%c9_210, %c0_211], %980 {strides = array<i32>} : memref<16x128xf32, #tpu.memory_space<vmem>>, vector<1x128xf32>,
    %c10 = arith.constant 10 : index
    %982 = memref.load %arg2[%c10] : memref<16xf32, #tpu.memory_space<smem>>
    %c10_212 = arith.constant 10 : index
    %983 = memref.load %arg3[%c10_212] : memref<16xf32, #tpu.memory_space<smem>>
    %c10_213 = arith.constant 10 : index
    %984 = memref.load %arg4[%c10_213] : memref<16xf32, #tpu.memory_space<smem>>
    %c1_i32_214 = arith.constant 1 : i32
    %985 = tpu.dynamic_rotate %980 by %c1_i32_214 dim 1 : vector<1x128xf32>, i32 -> vector<1x128xf32>
    %c127_i32_215 = arith.constant 127 : i32
    %986 = tpu.dynamic_rotate %980 by %c127_i32_215 dim 1 : vector<1x128xf32>, i32 -> vector<1x128xf32>
    %987 = arith.addf %985, %986 : vector<1x128xf32>
    %988 = vector.broadcast %3 : f32 to vector<1x128xf32>
    %989 = arith.mulf %988, %980 : vector<1x128xf32>
    %990 = vector.broadcast %6 : f32 to vector<1x128xf32>
    %991 = arith.mulf %990, %987 : vector<1x128xf32>
    %992 = arith.addf %989, %991 : vector<1x128xf32>
    %993 = vector.broadcast %980 : vector<1x128xf32> to vector<32x128xf32>
    %994 = arith.mulf %10, %993 : vector<32x128xf32>
    %995 = math.tanh %994 : vector<32x128xf32>
    %996 = arith.truncf %995 : vector<32x128xf32> to vector<32x128xbf16>
    %cst_216 = arith.constant dense<0.000000e+00> : vector<32x128xf32>
    %997 = tpu.matmul %15, %996, %cst_216 {dimension_numbers = #tpu.dot_dimension_numbers<[1], [0], [0], [1], [0, 0, 1, 1], [], []>} : vector<32x32xbf16>, vector<32x128xbf16>, vector<32x128xf32> -> vector<32x128xf32>
    %998 = math.tanh %997 : vector<32x128xf32>
    %999 = arith.mulf %13, %998 : vector<32x128xf32>
    %cst_217 = arith.constant dense<0.000000e+00> : vector<128xf32>
    %1000 = vector.multi_reduction <add>, %999, %cst_217 [0] : vector<32x128xf32> to vector<128xf32>
    %1001 = vector.shape_cast %1000 : vector<128xf32> to vector<1x128xf32>
    %1002 = math.tanh %1001 : vector<1x128xf32>
    %1003 = vector.broadcast %7 : f32 to vector<1x128xf32>
    %1004 = arith.mulf %1002, %1003 : vector<1x128xf32>
    %1005 = arith.addf %992, %1004 : vector<1x128xf32>
    %1006 = vector.broadcast %983 : f32 to vector<1x128xf32>
    %1007 = arith.mulf %1006, %1005 : vector<1x128xf32>
    %1008 = arith.addf %980, %1007 : vector<1x128xf32>
    %c1_i32_218 = arith.constant 1 : i32
    %1009 = tpu.dynamic_rotate %1008 by %c1_i32_218 dim 1 : vector<1x128xf32>, i32 -> vector<1x128xf32>
    %c127_i32_219 = arith.constant 127 : i32
    %1010 = tpu.dynamic_rotate %1008 by %c127_i32_219 dim 1 : vector<1x128xf32>, i32 -> vector<1x128xf32>
    %1011 = arith.addf %1009, %1010 : vector<1x128xf32>
    %1012 = vector.broadcast %3 : f32 to vector<1x128xf32>
    %1013 = arith.mulf %1012, %1008 : vector<1x128xf32>
    %1014 = vector.broadcast %6 : f32 to vector<1x128xf32>
    %1015 = arith.mulf %1014, %1011 : vector<1x128xf32>
    %1016 = arith.addf %1013, %1015 : vector<1x128xf32>
    %1017 = vector.broadcast %1008 : vector<1x128xf32> to vector<32x128xf32>
    %1018 = arith.mulf %10, %1017 : vector<32x128xf32>
    %1019 = math.tanh %1018 : vector<32x128xf32>
    %1020 = arith.truncf %1019 : vector<32x128xf32> to vector<32x128xbf16>
    %cst_220 = arith.constant dense<0.000000e+00> : vector<32x128xf32>
    %1021 = tpu.matmul %15, %1020, %cst_220 {dimension_numbers = #tpu.dot_dimension_numbers<[1], [0], [0], [1], [0, 0, 1, 1], [], []>} : vector<32x32xbf16>, vector<32x128xbf16>, vector<32x128xf32> -> vector<32x128xf32>
    %1022 = math.tanh %1021 : vector<32x128xf32>
    %1023 = arith.mulf %13, %1022 : vector<32x128xf32>
    %cst_221 = arith.constant dense<0.000000e+00> : vector<128xf32>
    %1024 = vector.multi_reduction <add>, %1023, %cst_221 [0] : vector<32x128xf32> to vector<128xf32>
    %1025 = vector.shape_cast %1024 : vector<128xf32> to vector<1x128xf32>
    %1026 = math.tanh %1025 : vector<1x128xf32>
    %1027 = vector.broadcast %7 : f32 to vector<1x128xf32>
    %1028 = arith.mulf %1026, %1027 : vector<1x128xf32>
    %1029 = arith.addf %1016, %1028 : vector<1x128xf32>
    %1030 = vector.broadcast %983 : f32 to vector<1x128xf32>
    %1031 = arith.mulf %1030, %1029 : vector<1x128xf32>
    %1032 = arith.addf %980, %1031 : vector<1x128xf32>
    %c1_i32_222 = arith.constant 1 : i32
    %1033 = tpu.dynamic_rotate %1032 by %c1_i32_222 dim 1 : vector<1x128xf32>, i32 -> vector<1x128xf32>
    %c127_i32_223 = arith.constant 127 : i32
    %1034 = tpu.dynamic_rotate %1032 by %c127_i32_223 dim 1 : vector<1x128xf32>, i32 -> vector<1x128xf32>
    %1035 = arith.addf %1033, %1034 : vector<1x128xf32>
    %1036 = vector.broadcast %3 : f32 to vector<1x128xf32>
    %1037 = arith.mulf %1036, %1032 : vector<1x128xf32>
    %1038 = vector.broadcast %6 : f32 to vector<1x128xf32>
    %1039 = arith.mulf %1038, %1035 : vector<1x128xf32>
    %1040 = arith.addf %1037, %1039 : vector<1x128xf32>
    %1041 = vector.broadcast %1032 : vector<1x128xf32> to vector<32x128xf32>
    %1042 = arith.mulf %10, %1041 : vector<32x128xf32>
    %1043 = math.tanh %1042 : vector<32x128xf32>
    %1044 = arith.truncf %1043 : vector<32x128xf32> to vector<32x128xbf16>
    %cst_224 = arith.constant dense<0.000000e+00> : vector<32x128xf32>
    %1045 = tpu.matmul %15, %1044, %cst_224 {dimension_numbers = #tpu.dot_dimension_numbers<[1], [0], [0], [1], [0, 0, 1, 1], [], []>} : vector<32x32xbf16>, vector<32x128xbf16>, vector<32x128xf32> -> vector<32x128xf32>
    %1046 = math.tanh %1045 : vector<32x128xf32>
    %1047 = arith.mulf %13, %1046 : vector<32x128xf32>
    %cst_225 = arith.constant dense<0.000000e+00> : vector<128xf32>
    %1048 = vector.multi_reduction <add>, %1047, %cst_225 [0] : vector<32x128xf32> to vector<128xf32>
    %1049 = vector.shape_cast %1048 : vector<128xf32> to vector<1x128xf32>
    %1050 = math.tanh %1049 : vector<1x128xf32>
    %1051 = vector.broadcast %7 : f32 to vector<1x128xf32>
    %1052 = arith.mulf %1050, %1051 : vector<1x128xf32>
    %1053 = arith.addf %1040, %1052 : vector<1x128xf32>
    %1054 = vector.broadcast %982 : f32 to vector<1x128xf32>
    %1055 = arith.mulf %1054, %1053 : vector<1x128xf32>
    %1056 = arith.addf %980, %1055 : vector<1x128xf32>
    %c1_i32_226 = arith.constant 1 : i32
    %1057 = tpu.dynamic_rotate %1056 by %c1_i32_226 dim 1 : vector<1x128xf32>, i32 -> vector<1x128xf32>
    %c127_i32_227 = arith.constant 127 : i32
    %1058 = tpu.dynamic_rotate %1056 by %c127_i32_227 dim 1 : vector<1x128xf32>, i32 -> vector<1x128xf32>
    %1059 = arith.addf %1057, %1058 : vector<1x128xf32>
    %1060 = vector.broadcast %3 : f32 to vector<1x128xf32>
    %1061 = arith.mulf %1060, %1056 : vector<1x128xf32>
    %1062 = vector.broadcast %6 : f32 to vector<1x128xf32>
    %1063 = arith.mulf %1062, %1059 : vector<1x128xf32>
    %1064 = arith.addf %1061, %1063 : vector<1x128xf32>
    %1065 = vector.broadcast %1056 : vector<1x128xf32> to vector<32x128xf32>
    %1066 = arith.mulf %10, %1065 : vector<32x128xf32>
    %1067 = math.tanh %1066 : vector<32x128xf32>
    %1068 = arith.truncf %1067 : vector<32x128xf32> to vector<32x128xbf16>
    %cst_228 = arith.constant dense<0.000000e+00> : vector<32x128xf32>
    %1069 = tpu.matmul %15, %1068, %cst_228 {dimension_numbers = #tpu.dot_dimension_numbers<[1], [0], [0], [1], [0, 0, 1, 1], [], []>} : vector<32x32xbf16>, vector<32x128xbf16>, vector<32x128xf32> -> vector<32x128xf32>
    %1070 = math.tanh %1069 : vector<32x128xf32>
    %1071 = arith.mulf %13, %1070 : vector<32x128xf32>
    %cst_229 = arith.constant dense<0.000000e+00> : vector<128xf32>
    %1072 = vector.multi_reduction <add>, %1071, %cst_229 [0] : vector<32x128xf32> to vector<128xf32>
    %1073 = vector.shape_cast %1072 : vector<128xf32> to vector<1x128xf32>
    %1074 = math.tanh %1073 : vector<1x128xf32>
    %1075 = vector.broadcast %7 : f32 to vector<1x128xf32>
    %1076 = arith.mulf %1074, %1075 : vector<1x128xf32>
    %1077 = arith.addf %1064, %1076 : vector<1x128xf32>
    %cst_230 = arith.constant 2.000000e+00 : f32
    %1078 = vector.broadcast %cst_230 : f32 to vector<1x128xf32>
    %1079 = arith.mulf %1078, %1029 : vector<1x128xf32>
    %1080 = arith.addf %1005, %1079 : vector<1x128xf32>
    %cst_231 = arith.constant 2.000000e+00 : f32
    %1081 = vector.broadcast %cst_231 : f32 to vector<1x128xf32>
    %1082 = arith.mulf %1081, %1053 : vector<1x128xf32>
    %1083 = arith.addf %1080, %1082 : vector<1x128xf32>
    %1084 = arith.addf %1083, %1077 : vector<1x128xf32>
    %1085 = vector.broadcast %984 : f32 to vector<1x128xf32>
    %1086 = arith.mulf %1085, %1084 : vector<1x128xf32>
    %1087 = arith.addf %980, %1086 : vector<1x128xf32>
    %c10_232 = arith.constant 10 : index
    %c0_233 = arith.constant 0 : index
    %1088 = vector.load %arg9[%c10_232, %c0_233] : memref<16x128xf32, #tpu.memory_space<vmem>>, vector<1x128xf32>
    tpu.vector_store %arg9[%c10_232, %c0_233], %1087 {strides = array<i32>} : memref<16x128xf32, #tpu.memory_space<vmem>>, vector<1x128xf32>,
    %c11 = arith.constant 11 : index
    %1089 = memref.load %arg2[%c11] : memref<16xf32, #tpu.memory_space<smem>>
    %c11_234 = arith.constant 11 : index
    %1090 = memref.load %arg3[%c11_234] : memref<16xf32, #tpu.memory_space<smem>>
    %c11_235 = arith.constant 11 : index
    %1091 = memref.load %arg4[%c11_235] : memref<16xf32, #tpu.memory_space<smem>>
    %c1_i32_236 = arith.constant 1 : i32
    %1092 = tpu.dynamic_rotate %1087 by %c1_i32_236 dim 1 : vector<1x128xf32>, i32 -> vector<1x128xf32>
    %c127_i32_237 = arith.constant 127 : i32
    %1093 = tpu.dynamic_rotate %1087 by %c127_i32_237 dim 1 : vector<1x128xf32>, i32 -> vector<1x128xf32>
    %1094 = arith.addf %1092, %1093 : vector<1x128xf32>
    %1095 = vector.broadcast %3 : f32 to vector<1x128xf32>
    %1096 = arith.mulf %1095, %1087 : vector<1x128xf32>
    %1097 = vector.broadcast %6 : f32 to vector<1x128xf32>
    %1098 = arith.mulf %1097, %1094 : vector<1x128xf32>
    %1099 = arith.addf %1096, %1098 : vector<1x128xf32>
    %1100 = vector.broadcast %1087 : vector<1x128xf32> to vector<32x128xf32>
    %1101 = arith.mulf %10, %1100 : vector<32x128xf32>
    %1102 = math.tanh %1101 : vector<32x128xf32>
    %1103 = arith.truncf %1102 : vector<32x128xf32> to vector<32x128xbf16>
    %cst_238 = arith.constant dense<0.000000e+00> : vector<32x128xf32>
    %1104 = tpu.matmul %15, %1103, %cst_238 {dimension_numbers = #tpu.dot_dimension_numbers<[1], [0], [0], [1], [0, 0, 1, 1], [], []>} : vector<32x32xbf16>, vector<32x128xbf16>, vector<32x128xf32> -> vector<32x128xf32>
    %1105 = math.tanh %1104 : vector<32x128xf32>
    %1106 = arith.mulf %13, %1105 : vector<32x128xf32>
    %cst_239 = arith.constant dense<0.000000e+00> : vector<128xf32>
    %1107 = vector.multi_reduction <add>, %1106, %cst_239 [0] : vector<32x128xf32> to vector<128xf32>
    %1108 = vector.shape_cast %1107 : vector<128xf32> to vector<1x128xf32>
    %1109 = math.tanh %1108 : vector<1x128xf32>
    %1110 = vector.broadcast %7 : f32 to vector<1x128xf32>
    %1111 = arith.mulf %1109, %1110 : vector<1x128xf32>
    %1112 = arith.addf %1099, %1111 : vector<1x128xf32>
    %1113 = vector.broadcast %1090 : f32 to vector<1x128xf32>
    %1114 = arith.mulf %1113, %1112 : vector<1x128xf32>
    %1115 = arith.addf %1087, %1114 : vector<1x128xf32>
    %c1_i32_240 = arith.constant 1 : i32
    %1116 = tpu.dynamic_rotate %1115 by %c1_i32_240 dim 1 : vector<1x128xf32>, i32 -> vector<1x128xf32>
    %c127_i32_241 = arith.constant 127 : i32
    %1117 = tpu.dynamic_rotate %1115 by %c127_i32_241 dim 1 : vector<1x128xf32>, i32 -> vector<1x128xf32>
    %1118 = arith.addf %1116, %1117 : vector<1x128xf32>
    %1119 = vector.broadcast %3 : f32 to vector<1x128xf32>
    %1120 = arith.mulf %1119, %1115 : vector<1x128xf32>
    %1121 = vector.broadcast %6 : f32 to vector<1x128xf32>
    %1122 = arith.mulf %1121, %1118 : vector<1x128xf32>
    %1123 = arith.addf %1120, %1122 : vector<1x128xf32>
    %1124 = vector.broadcast %1115 : vector<1x128xf32> to vector<32x128xf32>
    %1125 = arith.mulf %10, %1124 : vector<32x128xf32>
    %1126 = math.tanh %1125 : vector<32x128xf32>
    %1127 = arith.truncf %1126 : vector<32x128xf32> to vector<32x128xbf16>
    %cst_242 = arith.constant dense<0.000000e+00> : vector<32x128xf32>
    %1128 = tpu.matmul %15, %1127, %cst_242 {dimension_numbers = #tpu.dot_dimension_numbers<[1], [0], [0], [1], [0, 0, 1, 1], [], []>} : vector<32x32xbf16>, vector<32x128xbf16>, vector<32x128xf32> -> vector<32x128xf32>
    %1129 = math.tanh %1128 : vector<32x128xf32>
    %1130 = arith.mulf %13, %1129 : vector<32x128xf32>
    %cst_243 = arith.constant dense<0.000000e+00> : vector<128xf32>
    %1131 = vector.multi_reduction <add>, %1130, %cst_243 [0] : vector<32x128xf32> to vector<128xf32>
    %1132 = vector.shape_cast %1131 : vector<128xf32> to vector<1x128xf32>
    %1133 = math.tanh %1132 : vector<1x128xf32>
    %1134 = vector.broadcast %7 : f32 to vector<1x128xf32>
    %1135 = arith.mulf %1133, %1134 : vector<1x128xf32>
    %1136 = arith.addf %1123, %1135 : vector<1x128xf32>
    %1137 = vector.broadcast %1090 : f32 to vector<1x128xf32>
    %1138 = arith.mulf %1137, %1136 : vector<1x128xf32>
    %1139 = arith.addf %1087, %1138 : vector<1x128xf32>
    %c1_i32_244 = arith.constant 1 : i32
    %1140 = tpu.dynamic_rotate %1139 by %c1_i32_244 dim 1 : vector<1x128xf32>, i32 -> vector<1x128xf32>
    %c127_i32_245 = arith.constant 127 : i32
    %1141 = tpu.dynamic_rotate %1139 by %c127_i32_245 dim 1 : vector<1x128xf32>, i32 -> vector<1x128xf32>
    %1142 = arith.addf %1140, %1141 : vector<1x128xf32>
    %1143 = vector.broadcast %3 : f32 to vector<1x128xf32>
    %1144 = arith.mulf %1143, %1139 : vector<1x128xf32>
    %1145 = vector.broadcast %6 : f32 to vector<1x128xf32>
    %1146 = arith.mulf %1145, %1142 : vector<1x128xf32>
    %1147 = arith.addf %1144, %1146 : vector<1x128xf32>
    %1148 = vector.broadcast %1139 : vector<1x128xf32> to vector<32x128xf32>
    %1149 = arith.mulf %10, %1148 : vector<32x128xf32>
    %1150 = math.tanh %1149 : vector<32x128xf32>
    %1151 = arith.truncf %1150 : vector<32x128xf32> to vector<32x128xbf16>
    %cst_246 = arith.constant dense<0.000000e+00> : vector<32x128xf32>
    %1152 = tpu.matmul %15, %1151, %cst_246 {dimension_numbers = #tpu.dot_dimension_numbers<[1], [0], [0], [1], [0, 0, 1, 1], [], []>} : vector<32x32xbf16>, vector<32x128xbf16>, vector<32x128xf32> -> vector<32x128xf32>
    %1153 = math.tanh %1152 : vector<32x128xf32>
    %1154 = arith.mulf %13, %1153 : vector<32x128xf32>
    %cst_247 = arith.constant dense<0.000000e+00> : vector<128xf32>
    %1155 = vector.multi_reduction <add>, %1154, %cst_247 [0] : vector<32x128xf32> to vector<128xf32>
    %1156 = vector.shape_cast %1155 : vector<128xf32> to vector<1x128xf32>
    %1157 = math.tanh %1156 : vector<1x128xf32>
    %1158 = vector.broadcast %7 : f32 to vector<1x128xf32>
    %1159 = arith.mulf %1157, %1158 : vector<1x128xf32>
    %1160 = arith.addf %1147, %1159 : vector<1x128xf32>
    %1161 = vector.broadcast %1089 : f32 to vector<1x128xf32>
    %1162 = arith.mulf %1161, %1160 : vector<1x128xf32>
    %1163 = arith.addf %1087, %1162 : vector<1x128xf32>
    %c1_i32_248 = arith.constant 1 : i32
    %1164 = tpu.dynamic_rotate %1163 by %c1_i32_248 dim 1 : vector<1x128xf32>, i32 -> vector<1x128xf32>
    %c127_i32_249 = arith.constant 127 : i32
    %1165 = tpu.dynamic_rotate %1163 by %c127_i32_249 dim 1 : vector<1x128xf32>, i32 -> vector<1x128xf32>
    %1166 = arith.addf %1164, %1165 : vector<1x128xf32>
    %1167 = vector.broadcast %3 : f32 to vector<1x128xf32>
    %1168 = arith.mulf %1167, %1163 : vector<1x128xf32>
    %1169 = vector.broadcast %6 : f32 to vector<1x128xf32>
    %1170 = arith.mulf %1169, %1166 : vector<1x128xf32>
    %1171 = arith.addf %1168, %1170 : vector<1x128xf32>
    %1172 = vector.broadcast %1163 : vector<1x128xf32> to vector<32x128xf32>
    %1173 = arith.mulf %10, %1172 : vector<32x128xf32>
    %1174 = math.tanh %1173 : vector<32x128xf32>
    %1175 = arith.truncf %1174 : vector<32x128xf32> to vector<32x128xbf16>
    %cst_250 = arith.constant dense<0.000000e+00> : vector<32x128xf32>
    %1176 = tpu.matmul %15, %1175, %cst_250 {dimension_numbers = #tpu.dot_dimension_numbers<[1], [0], [0], [1], [0, 0, 1, 1], [], []>} : vector<32x32xbf16>, vector<32x128xbf16>, vector<32x128xf32> -> vector<32x128xf32>
    %1177 = math.tanh %1176 : vector<32x128xf32>
    %1178 = arith.mulf %13, %1177 : vector<32x128xf32>
    %cst_251 = arith.constant dense<0.000000e+00> : vector<128xf32>
    %1179 = vector.multi_reduction <add>, %1178, %cst_251 [0] : vector<32x128xf32> to vector<128xf32>
    %1180 = vector.shape_cast %1179 : vector<128xf32> to vector<1x128xf32>
    %1181 = math.tanh %1180 : vector<1x128xf32>
    %1182 = vector.broadcast %7 : f32 to vector<1x128xf32>
    %1183 = arith.mulf %1181, %1182 : vector<1x128xf32>
    %1184 = arith.addf %1171, %1183 : vector<1x128xf32>
    %cst_252 = arith.constant 2.000000e+00 : f32
    %1185 = vector.broadcast %cst_252 : f32 to vector<1x128xf32>
    %1186 = arith.mulf %1185, %1136 : vector<1x128xf32>
    %1187 = arith.addf %1112, %1186 : vector<1x128xf32>
    %cst_253 = arith.constant 2.000000e+00 : f32
    %1188 = vector.broadcast %cst_253 : f32 to vector<1x128xf32>
    %1189 = arith.mulf %1188, %1160 : vector<1x128xf32>
    %1190 = arith.addf %1187, %1189 : vector<1x128xf32>
    %1191 = arith.addf %1190, %1184 : vector<1x128xf32>
    %1192 = vector.broadcast %1091 : f32 to vector<1x128xf32>
    %1193 = arith.mulf %1192, %1191 : vector<1x128xf32>
    %1194 = arith.addf %1087, %1193 : vector<1x128xf32>
    %c11_254 = arith.constant 11 : index
    %c0_255 = arith.constant 0 : index
    %1195 = vector.load %arg9[%c11_254, %c0_255] : memref<16x128xf32, #tpu.memory_space<vmem>>, vector<1x128xf32>
    tpu.vector_store %arg9[%c11_254, %c0_255], %1194 {strides = array<i32>} : memref<16x128xf32, #tpu.memory_space<vmem>>, vector<1x128xf32>,
    %c12 = arith.constant 12 : index
    %1196 = memref.load %arg2[%c12] : memref<16xf32, #tpu.memory_space<smem>>
    %c12_256 = arith.constant 12 : index
    %1197 = memref.load %arg3[%c12_256] : memref<16xf32, #tpu.memory_space<smem>>
    %c12_257 = arith.constant 12 : index
    %1198 = memref.load %arg4[%c12_257] : memref<16xf32, #tpu.memory_space<smem>>
    %c1_i32_258 = arith.constant 1 : i32
    %1199 = tpu.dynamic_rotate %1194 by %c1_i32_258 dim 1 : vector<1x128xf32>, i32 -> vector<1x128xf32>
    %c127_i32_259 = arith.constant 127 : i32
    %1200 = tpu.dynamic_rotate %1194 by %c127_i32_259 dim 1 : vector<1x128xf32>, i32 -> vector<1x128xf32>
    %1201 = arith.addf %1199, %1200 : vector<1x128xf32>
    %1202 = vector.broadcast %3 : f32 to vector<1x128xf32>
    %1203 = arith.mulf %1202, %1194 : vector<1x128xf32>
    %1204 = vector.broadcast %6 : f32 to vector<1x128xf32>
    %1205 = arith.mulf %1204, %1201 : vector<1x128xf32>
    %1206 = arith.addf %1203, %1205 : vector<1x128xf32>
    %1207 = vector.broadcast %1194 : vector<1x128xf32> to vector<32x128xf32>
    %1208 = arith.mulf %10, %1207 : vector<32x128xf32>
    %1209 = math.tanh %1208 : vector<32x128xf32>
    %1210 = arith.truncf %1209 : vector<32x128xf32> to vector<32x128xbf16>
    %cst_260 = arith.constant dense<0.000000e+00> : vector<32x128xf32>
    %1211 = tpu.matmul %15, %1210, %cst_260 {dimension_numbers = #tpu.dot_dimension_numbers<[1], [0], [0], [1], [0, 0, 1, 1], [], []>} : vector<32x32xbf16>, vector<32x128xbf16>, vector<32x128xf32> -> vector<32x128xf32>
    %1212 = math.tanh %1211 : vector<32x128xf32>
    %1213 = arith.mulf %13, %1212 : vector<32x128xf32>
    %cst_261 = arith.constant dense<0.000000e+00> : vector<128xf32>
    %1214 = vector.multi_reduction <add>, %1213, %cst_261 [0] : vector<32x128xf32> to vector<128xf32>
    %1215 = vector.shape_cast %1214 : vector<128xf32> to vector<1x128xf32>
    %1216 = math.tanh %1215 : vector<1x128xf32>
    %1217 = vector.broadcast %7 : f32 to vector<1x128xf32>
    %1218 = arith.mulf %1216, %1217 : vector<1x128xf32>
    %1219 = arith.addf %1206, %1218 : vector<1x128xf32>
    %1220 = vector.broadcast %1197 : f32 to vector<1x128xf32>
    %1221 = arith.mulf %1220, %1219 : vector<1x128xf32>
    %1222 = arith.addf %1194, %1221 : vector<1x128xf32>
    %c1_i32_262 = arith.constant 1 : i32
    %1223 = tpu.dynamic_rotate %1222 by %c1_i32_262 dim 1 : vector<1x128xf32>, i32 -> vector<1x128xf32>
    %c127_i32_263 = arith.constant 127 : i32
    %1224 = tpu.dynamic_rotate %1222 by %c127_i32_263 dim 1 : vector<1x128xf32>, i32 -> vector<1x128xf32>
    %1225 = arith.addf %1223, %1224 : vector<1x128xf32>
    %1226 = vector.broadcast %3 : f32 to vector<1x128xf32>
    %1227 = arith.mulf %1226, %1222 : vector<1x128xf32>
    %1228 = vector.broadcast %6 : f32 to vector<1x128xf32>
    %1229 = arith.mulf %1228, %1225 : vector<1x128xf32>
    %1230 = arith.addf %1227, %1229 : vector<1x128xf32>
    %1231 = vector.broadcast %1222 : vector<1x128xf32> to vector<32x128xf32>
    %1232 = arith.mulf %10, %1231 : vector<32x128xf32>
    %1233 = math.tanh %1232 : vector<32x128xf32>
    %1234 = arith.truncf %1233 : vector<32x128xf32> to vector<32x128xbf16>
    %cst_264 = arith.constant dense<0.000000e+00> : vector<32x128xf32>
    %1235 = tpu.matmul %15, %1234, %cst_264 {dimension_numbers = #tpu.dot_dimension_numbers<[1], [0], [0], [1], [0, 0, 1, 1], [], []>} : vector<32x32xbf16>, vector<32x128xbf16>, vector<32x128xf32> -> vector<32x128xf32>
    %1236 = math.tanh %1235 : vector<32x128xf32>
    %1237 = arith.mulf %13, %1236 : vector<32x128xf32>
    %cst_265 = arith.constant dense<0.000000e+00> : vector<128xf32>
    %1238 = vector.multi_reduction <add>, %1237, %cst_265 [0] : vector<32x128xf32> to vector<128xf32>
    %1239 = vector.shape_cast %1238 : vector<128xf32> to vector<1x128xf32>
    %1240 = math.tanh %1239 : vector<1x128xf32>
    %1241 = vector.broadcast %7 : f32 to vector<1x128xf32>
    %1242 = arith.mulf %1240, %1241 : vector<1x128xf32>
    %1243 = arith.addf %1230, %1242 : vector<1x128xf32>
    %1244 = vector.broadcast %1197 : f32 to vector<1x128xf32>
    %1245 = arith.mulf %1244, %1243 : vector<1x128xf32>
    %1246 = arith.addf %1194, %1245 : vector<1x128xf32>
    %c1_i32_266 = arith.constant 1 : i32
    %1247 = tpu.dynamic_rotate %1246 by %c1_i32_266 dim 1 : vector<1x128xf32>, i32 -> vector<1x128xf32>
    %c127_i32_267 = arith.constant 127 : i32
    %1248 = tpu.dynamic_rotate %1246 by %c127_i32_267 dim 1 : vector<1x128xf32>, i32 -> vector<1x128xf32>
    %1249 = arith.addf %1247, %1248 : vector<1x128xf32>
    %1250 = vector.broadcast %3 : f32 to vector<1x128xf32>
    %1251 = arith.mulf %1250, %1246 : vector<1x128xf32>
    %1252 = vector.broadcast %6 : f32 to vector<1x128xf32>
    %1253 = arith.mulf %1252, %1249 : vector<1x128xf32>
    %1254 = arith.addf %1251, %1253 : vector<1x128xf32>
    %1255 = vector.broadcast %1246 : vector<1x128xf32> to vector<32x128xf32>
    %1256 = arith.mulf %10, %1255 : vector<32x128xf32>
    %1257 = math.tanh %1256 : vector<32x128xf32>
    %1258 = arith.truncf %1257 : vector<32x128xf32> to vector<32x128xbf16>
    %cst_268 = arith.constant dense<0.000000e+00> : vector<32x128xf32>
    %1259 = tpu.matmul %15, %1258, %cst_268 {dimension_numbers = #tpu.dot_dimension_numbers<[1], [0], [0], [1], [0, 0, 1, 1], [], []>} : vector<32x32xbf16>, vector<32x128xbf16>, vector<32x128xf32> -> vector<32x128xf32>
    %1260 = math.tanh %1259 : vector<32x128xf32>
    %1261 = arith.mulf %13, %1260 : vector<32x128xf32>
    %cst_269 = arith.constant dense<0.000000e+00> : vector<128xf32>
    %1262 = vector.multi_reduction <add>, %1261, %cst_269 [0] : vector<32x128xf32> to vector<128xf32>
    %1263 = vector.shape_cast %1262 : vector<128xf32> to vector<1x128xf32>
    %1264 = math.tanh %1263 : vector<1x128xf32>
    %1265 = vector.broadcast %7 : f32 to vector<1x128xf32>
    %1266 = arith.mulf %1264, %1265 : vector<1x128xf32>
    %1267 = arith.addf %1254, %1266 : vector<1x128xf32>
    %1268 = vector.broadcast %1196 : f32 to vector<1x128xf32>
    %1269 = arith.mulf %1268, %1267 : vector<1x128xf32>
    %1270 = arith.addf %1194, %1269 : vector<1x128xf32>
    %c1_i32_270 = arith.constant 1 : i32
    %1271 = tpu.dynamic_rotate %1270 by %c1_i32_270 dim 1 : vector<1x128xf32>, i32 -> vector<1x128xf32>
    %c127_i32_271 = arith.constant 127 : i32
    %1272 = tpu.dynamic_rotate %1270 by %c127_i32_271 dim 1 : vector<1x128xf32>, i32 -> vector<1x128xf32>
    %1273 = arith.addf %1271, %1272 : vector<1x128xf32>
    %1274 = vector.broadcast %3 : f32 to vector<1x128xf32>
    %1275 = arith.mulf %1274, %1270 : vector<1x128xf32>
    %1276 = vector.broadcast %6 : f32 to vector<1x128xf32>
    %1277 = arith.mulf %1276, %1273 : vector<1x128xf32>
    %1278 = arith.addf %1275, %1277 : vector<1x128xf32>
    %1279 = vector.broadcast %1270 : vector<1x128xf32> to vector<32x128xf32>
    %1280 = arith.mulf %10, %1279 : vector<32x128xf32>
    %1281 = math.tanh %1280 : vector<32x128xf32>
    %1282 = arith.truncf %1281 : vector<32x128xf32> to vector<32x128xbf16>
    %cst_272 = arith.constant dense<0.000000e+00> : vector<32x128xf32>
    %1283 = tpu.matmul %15, %1282, %cst_272 {dimension_numbers = #tpu.dot_dimension_numbers<[1], [0], [0], [1], [0, 0, 1, 1], [], []>} : vector<32x32xbf16>, vector<32x128xbf16>, vector<32x128xf32> -> vector<32x128xf32>
    %1284 = math.tanh %1283 : vector<32x128xf32>
    %1285 = arith.mulf %13, %1284 : vector<32x128xf32>
    %cst_273 = arith.constant dense<0.000000e+00> : vector<128xf32>
    %1286 = vector.multi_reduction <add>, %1285, %cst_273 [0] : vector<32x128xf32> to vector<128xf32>
    %1287 = vector.shape_cast %1286 : vector<128xf32> to vector<1x128xf32>
    %1288 = math.tanh %1287 : vector<1x128xf32>
    %1289 = vector.broadcast %7 : f32 to vector<1x128xf32>
    %1290 = arith.mulf %1288, %1289 : vector<1x128xf32>
    %1291 = arith.addf %1278, %1290 : vector<1x128xf32>
    %cst_274 = arith.constant 2.000000e+00 : f32
    %1292 = vector.broadcast %cst_274 : f32 to vector<1x128xf32>
    %1293 = arith.mulf %1292, %1243 : vector<1x128xf32>
    %1294 = arith.addf %1219, %1293 : vector<1x128xf32>
    %cst_275 = arith.constant 2.000000e+00 : f32
    %1295 = vector.broadcast %cst_275 : f32 to vector<1x128xf32>
    %1296 = arith.mulf %1295, %1267 : vector<1x128xf32>
    %1297 = arith.addf %1294, %1296 : vector<1x128xf32>
    %1298 = arith.addf %1297, %1291 : vector<1x128xf32>
    %1299 = vector.broadcast %1198 : f32 to vector<1x128xf32>
    %1300 = arith.mulf %1299, %1298 : vector<1x128xf32>
    %1301 = arith.addf %1194, %1300 : vector<1x128xf32>
    %c12_276 = arith.constant 12 : index
    %c0_277 = arith.constant 0 : index
    %1302 = vector.load %arg9[%c12_276, %c0_277] : memref<16x128xf32, #tpu.memory_space<vmem>>, vector<1x128xf32>
    tpu.vector_store %arg9[%c12_276, %c0_277], %1301 {strides = array<i32>} : memref<16x128xf32, #tpu.memory_space<vmem>>, vector<1x128xf32>,
    %c13 = arith.constant 13 : index
    %1303 = memref.load %arg2[%c13] : memref<16xf32, #tpu.memory_space<smem>>
    %c13_278 = arith.constant 13 : index
    %1304 = memref.load %arg3[%c13_278] : memref<16xf32, #tpu.memory_space<smem>>
    %c13_279 = arith.constant 13 : index
    %1305 = memref.load %arg4[%c13_279] : memref<16xf32, #tpu.memory_space<smem>>
    %c1_i32_280 = arith.constant 1 : i32
    %1306 = tpu.dynamic_rotate %1301 by %c1_i32_280 dim 1 : vector<1x128xf32>, i32 -> vector<1x128xf32>
    %c127_i32_281 = arith.constant 127 : i32
    %1307 = tpu.dynamic_rotate %1301 by %c127_i32_281 dim 1 : vector<1x128xf32>, i32 -> vector<1x128xf32>
    %1308 = arith.addf %1306, %1307 : vector<1x128xf32>
    %1309 = vector.broadcast %3 : f32 to vector<1x128xf32>
    %1310 = arith.mulf %1309, %1301 : vector<1x128xf32>
    %1311 = vector.broadcast %6 : f32 to vector<1x128xf32>
    %1312 = arith.mulf %1311, %1308 : vector<1x128xf32>
    %1313 = arith.addf %1310, %1312 : vector<1x128xf32>
    %1314 = vector.broadcast %1301 : vector<1x128xf32> to vector<32x128xf32>
    %1315 = arith.mulf %10, %1314 : vector<32x128xf32>
    %1316 = math.tanh %1315 : vector<32x128xf32>
    %1317 = arith.truncf %1316 : vector<32x128xf32> to vector<32x128xbf16>
    %cst_282 = arith.constant dense<0.000000e+00> : vector<32x128xf32>
    %1318 = tpu.matmul %15, %1317, %cst_282 {dimension_numbers = #tpu.dot_dimension_numbers<[1], [0], [0], [1], [0, 0, 1, 1], [], []>} : vector<32x32xbf16>, vector<32x128xbf16>, vector<32x128xf32> -> vector<32x128xf32>
    %1319 = math.tanh %1318 : vector<32x128xf32>
    %1320 = arith.mulf %13, %1319 : vector<32x128xf32>
    %cst_283 = arith.constant dense<0.000000e+00> : vector<128xf32>
    %1321 = vector.multi_reduction <add>, %1320, %cst_283 [0] : vector<32x128xf32> to vector<128xf32>
    %1322 = vector.shape_cast %1321 : vector<128xf32> to vector<1x128xf32>
    %1323 = math.tanh %1322 : vector<1x128xf32>
    %1324 = vector.broadcast %7 : f32 to vector<1x128xf32>
    %1325 = arith.mulf %1323, %1324 : vector<1x128xf32>
    %1326 = arith.addf %1313, %1325 : vector<1x128xf32>
    %1327 = vector.broadcast %1304 : f32 to vector<1x128xf32>
    %1328 = arith.mulf %1327, %1326 : vector<1x128xf32>
    %1329 = arith.addf %1301, %1328 : vector<1x128xf32>
    %c1_i32_284 = arith.constant 1 : i32
    %1330 = tpu.dynamic_rotate %1329 by %c1_i32_284 dim 1 : vector<1x128xf32>, i32 -> vector<1x128xf32>
    %c127_i32_285 = arith.constant 127 : i32
    %1331 = tpu.dynamic_rotate %1329 by %c127_i32_285 dim 1 : vector<1x128xf32>, i32 -> vector<1x128xf32>
    %1332 = arith.addf %1330, %1331 : vector<1x128xf32>
    %1333 = vector.broadcast %3 : f32 to vector<1x128xf32>
    %1334 = arith.mulf %1333, %1329 : vector<1x128xf32>
    %1335 = vector.broadcast %6 : f32 to vector<1x128xf32>
    %1336 = arith.mulf %1335, %1332 : vector<1x128xf32>
    %1337 = arith.addf %1334, %1336 : vector<1x128xf32>
    %1338 = vector.broadcast %1329 : vector<1x128xf32> to vector<32x128xf32>
    %1339 = arith.mulf %10, %1338 : vector<32x128xf32>
    %1340 = math.tanh %1339 : vector<32x128xf32>
    %1341 = arith.truncf %1340 : vector<32x128xf32> to vector<32x128xbf16>
    %cst_286 = arith.constant dense<0.000000e+00> : vector<32x128xf32>
    %1342 = tpu.matmul %15, %1341, %cst_286 {dimension_numbers = #tpu.dot_dimension_numbers<[1], [0], [0], [1], [0, 0, 1, 1], [], []>} : vector<32x32xbf16>, vector<32x128xbf16>, vector<32x128xf32> -> vector<32x128xf32>
    %1343 = math.tanh %1342 : vector<32x128xf32>
    %1344 = arith.mulf %13, %1343 : vector<32x128xf32>
    %cst_287 = arith.constant dense<0.000000e+00> : vector<128xf32>
    %1345 = vector.multi_reduction <add>, %1344, %cst_287 [0] : vector<32x128xf32> to vector<128xf32>
    %1346 = vector.shape_cast %1345 : vector<128xf32> to vector<1x128xf32>
    %1347 = math.tanh %1346 : vector<1x128xf32>
    %1348 = vector.broadcast %7 : f32 to vector<1x128xf32>
    %1349 = arith.mulf %1347, %1348 : vector<1x128xf32>
    %1350 = arith.addf %1337, %1349 : vector<1x128xf32>
    %1351 = vector.broadcast %1304 : f32 to vector<1x128xf32>
    %1352 = arith.mulf %1351, %1350 : vector<1x128xf32>
    %1353 = arith.addf %1301, %1352 : vector<1x128xf32>
    %c1_i32_288 = arith.constant 1 : i32
    %1354 = tpu.dynamic_rotate %1353 by %c1_i32_288 dim 1 : vector<1x128xf32>, i32 -> vector<1x128xf32>
    %c127_i32_289 = arith.constant 127 : i32
    %1355 = tpu.dynamic_rotate %1353 by %c127_i32_289 dim 1 : vector<1x128xf32>, i32 -> vector<1x128xf32>
    %1356 = arith.addf %1354, %1355 : vector<1x128xf32>
    %1357 = vector.broadcast %3 : f32 to vector<1x128xf32>
    %1358 = arith.mulf %1357, %1353 : vector<1x128xf32>
    %1359 = vector.broadcast %6 : f32 to vector<1x128xf32>
    %1360 = arith.mulf %1359, %1356 : vector<1x128xf32>
    %1361 = arith.addf %1358, %1360 : vector<1x128xf32>
    %1362 = vector.broadcast %1353 : vector<1x128xf32> to vector<32x128xf32>
    %1363 = arith.mulf %10, %1362 : vector<32x128xf32>
    %1364 = math.tanh %1363 : vector<32x128xf32>
    %1365 = arith.truncf %1364 : vector<32x128xf32> to vector<32x128xbf16>
    %cst_290 = arith.constant dense<0.000000e+00> : vector<32x128xf32>
    %1366 = tpu.matmul %15, %1365, %cst_290 {dimension_numbers = #tpu.dot_dimension_numbers<[1], [0], [0], [1], [0, 0, 1, 1], [], []>} : vector<32x32xbf16>, vector<32x128xbf16>, vector<32x128xf32> -> vector<32x128xf32>
    %1367 = math.tanh %1366 : vector<32x128xf32>
    %1368 = arith.mulf %13, %1367 : vector<32x128xf32>
    %cst_291 = arith.constant dense<0.000000e+00> : vector<128xf32>
    %1369 = vector.multi_reduction <add>, %1368, %cst_291 [0] : vector<32x128xf32> to vector<128xf32>
    %1370 = vector.shape_cast %1369 : vector<128xf32> to vector<1x128xf32>
    %1371 = math.tanh %1370 : vector<1x128xf32>
    %1372 = vector.broadcast %7 : f32 to vector<1x128xf32>
    %1373 = arith.mulf %1371, %1372 : vector<1x128xf32>
    %1374 = arith.addf %1361, %1373 : vector<1x128xf32>
    %1375 = vector.broadcast %1303 : f32 to vector<1x128xf32>
    %1376 = arith.mulf %1375, %1374 : vector<1x128xf32>
    %1377 = arith.addf %1301, %1376 : vector<1x128xf32>
    %c1_i32_292 = arith.constant 1 : i32
    %1378 = tpu.dynamic_rotate %1377 by %c1_i32_292 dim 1 : vector<1x128xf32>, i32 -> vector<1x128xf32>
    %c127_i32_293 = arith.constant 127 : i32
    %1379 = tpu.dynamic_rotate %1377 by %c127_i32_293 dim 1 : vector<1x128xf32>, i32 -> vector<1x128xf32>
    %1380 = arith.addf %1378, %1379 : vector<1x128xf32>
    %1381 = vector.broadcast %3 : f32 to vector<1x128xf32>
    %1382 = arith.mulf %1381, %1377 : vector<1x128xf32>
    %1383 = vector.broadcast %6 : f32 to vector<1x128xf32>
    %1384 = arith.mulf %1383, %1380 : vector<1x128xf32>
    %1385 = arith.addf %1382, %1384 : vector<1x128xf32>
    %1386 = vector.broadcast %1377 : vector<1x128xf32> to vector<32x128xf32>
    %1387 = arith.mulf %10, %1386 : vector<32x128xf32>
    %1388 = math.tanh %1387 : vector<32x128xf32>
    %1389 = arith.truncf %1388 : vector<32x128xf32> to vector<32x128xbf16>
    %cst_294 = arith.constant dense<0.000000e+00> : vector<32x128xf32>
    %1390 = tpu.matmul %15, %1389, %cst_294 {dimension_numbers = #tpu.dot_dimension_numbers<[1], [0], [0], [1], [0, 0, 1, 1], [], []>} : vector<32x32xbf16>, vector<32x128xbf16>, vector<32x128xf32> -> vector<32x128xf32>
    %1391 = math.tanh %1390 : vector<32x128xf32>
    %1392 = arith.mulf %13, %1391 : vector<32x128xf32>
    %cst_295 = arith.constant dense<0.000000e+00> : vector<128xf32>
    %1393 = vector.multi_reduction <add>, %1392, %cst_295 [0] : vector<32x128xf32> to vector<128xf32>
    %1394 = vector.shape_cast %1393 : vector<128xf32> to vector<1x128xf32>
    %1395 = math.tanh %1394 : vector<1x128xf32>
    %1396 = vector.broadcast %7 : f32 to vector<1x128xf32>
    %1397 = arith.mulf %1395, %1396 : vector<1x128xf32>
    %1398 = arith.addf %1385, %1397 : vector<1x128xf32>
    %cst_296 = arith.constant 2.000000e+00 : f32
    %1399 = vector.broadcast %cst_296 : f32 to vector<1x128xf32>
    %1400 = arith.mulf %1399, %1350 : vector<1x128xf32>
    %1401 = arith.addf %1326, %1400 : vector<1x128xf32>
    %cst_297 = arith.constant 2.000000e+00 : f32
    %1402 = vector.broadcast %cst_297 : f32 to vector<1x128xf32>
    %1403 = arith.mulf %1402, %1374 : vector<1x128xf32>
    %1404 = arith.addf %1401, %1403 : vector<1x128xf32>
    %1405 = arith.addf %1404, %1398 : vector<1x128xf32>
    %1406 = vector.broadcast %1305 : f32 to vector<1x128xf32>
    %1407 = arith.mulf %1406, %1405 : vector<1x128xf32>
    %1408 = arith.addf %1301, %1407 : vector<1x128xf32>
    %c13_298 = arith.constant 13 : index
    %c0_299 = arith.constant 0 : index
    %1409 = vector.load %arg9[%c13_298, %c0_299] : memref<16x128xf32, #tpu.memory_space<vmem>>, vector<1x128xf32>
    tpu.vector_store %arg9[%c13_298, %c0_299], %1408 {strides = array<i32>} : memref<16x128xf32, #tpu.memory_space<vmem>>, vector<1x128xf32>,
    %c14 = arith.constant 14 : index
    %1410 = memref.load %arg2[%c14] : memref<16xf32, #tpu.memory_space<smem>>
    %c14_300 = arith.constant 14 : index
    %1411 = memref.load %arg3[%c14_300] : memref<16xf32, #tpu.memory_space<smem>>
    %c14_301 = arith.constant 14 : index
    %1412 = memref.load %arg4[%c14_301] : memref<16xf32, #tpu.memory_space<smem>>
    %c1_i32_302 = arith.constant 1 : i32
    %1413 = tpu.dynamic_rotate %1408 by %c1_i32_302 dim 1 : vector<1x128xf32>, i32 -> vector<1x128xf32>
    %c127_i32_303 = arith.constant 127 : i32
    %1414 = tpu.dynamic_rotate %1408 by %c127_i32_303 dim 1 : vector<1x128xf32>, i32 -> vector<1x128xf32>
    %1415 = arith.addf %1413, %1414 : vector<1x128xf32>
    %1416 = vector.broadcast %3 : f32 to vector<1x128xf32>
    %1417 = arith.mulf %1416, %1408 : vector<1x128xf32>
    %1418 = vector.broadcast %6 : f32 to vector<1x128xf32>
    %1419 = arith.mulf %1418, %1415 : vector<1x128xf32>
    %1420 = arith.addf %1417, %1419 : vector<1x128xf32>
    %1421 = vector.broadcast %1408 : vector<1x128xf32> to vector<32x128xf32>
    %1422 = arith.mulf %10, %1421 : vector<32x128xf32>
    %1423 = math.tanh %1422 : vector<32x128xf32>
    %1424 = arith.truncf %1423 : vector<32x128xf32> to vector<32x128xbf16>
    %cst_304 = arith.constant dense<0.000000e+00> : vector<32x128xf32>
    %1425 = tpu.matmul %15, %1424, %cst_304 {dimension_numbers = #tpu.dot_dimension_numbers<[1], [0], [0], [1], [0, 0, 1, 1], [], []>} : vector<32x32xbf16>, vector<32x128xbf16>, vector<32x128xf32> -> vector<32x128xf32>
    %1426 = math.tanh %1425 : vector<32x128xf32>
    %1427 = arith.mulf %13, %1426 : vector<32x128xf32>
    %cst_305 = arith.constant dense<0.000000e+00> : vector<128xf32>
    %1428 = vector.multi_reduction <add>, %1427, %cst_305 [0] : vector<32x128xf32> to vector<128xf32>
    %1429 = vector.shape_cast %1428 : vector<128xf32> to vector<1x128xf32>
    %1430 = math.tanh %1429 : vector<1x128xf32>
    %1431 = vector.broadcast %7 : f32 to vector<1x128xf32>
    %1432 = arith.mulf %1430, %1431 : vector<1x128xf32>
    %1433 = arith.addf %1420, %1432 : vector<1x128xf32>
    %1434 = vector.broadcast %1411 : f32 to vector<1x128xf32>
    %1435 = arith.mulf %1434, %1433 : vector<1x128xf32>
    %1436 = arith.addf %1408, %1435 : vector<1x128xf32>
    %c1_i32_306 = arith.constant 1 : i32
    %1437 = tpu.dynamic_rotate %1436 by %c1_i32_306 dim 1 : vector<1x128xf32>, i32 -> vector<1x128xf32>
    %c127_i32_307 = arith.constant 127 : i32
    %1438 = tpu.dynamic_rotate %1436 by %c127_i32_307 dim 1 : vector<1x128xf32>, i32 -> vector<1x128xf32>
    %1439 = arith.addf %1437, %1438 : vector<1x128xf32>
    %1440 = vector.broadcast %3 : f32 to vector<1x128xf32>
    %1441 = arith.mulf %1440, %1436 : vector<1x128xf32>
    %1442 = vector.broadcast %6 : f32 to vector<1x128xf32>
    %1443 = arith.mulf %1442, %1439 : vector<1x128xf32>
    %1444 = arith.addf %1441, %1443 : vector<1x128xf32>
    %1445 = vector.broadcast %1436 : vector<1x128xf32> to vector<32x128xf32>
    %1446 = arith.mulf %10, %1445 : vector<32x128xf32>
    %1447 = math.tanh %1446 : vector<32x128xf32>
    %1448 = arith.truncf %1447 : vector<32x128xf32> to vector<32x128xbf16>
    %cst_308 = arith.constant dense<0.000000e+00> : vector<32x128xf32>
    %1449 = tpu.matmul %15, %1448, %cst_308 {dimension_numbers = #tpu.dot_dimension_numbers<[1], [0], [0], [1], [0, 0, 1, 1], [], []>} : vector<32x32xbf16>, vector<32x128xbf16>, vector<32x128xf32> -> vector<32x128xf32>
    %1450 = math.tanh %1449 : vector<32x128xf32>
    %1451 = arith.mulf %13, %1450 : vector<32x128xf32>
    %cst_309 = arith.constant dense<0.000000e+00> : vector<128xf32>
    %1452 = vector.multi_reduction <add>, %1451, %cst_309 [0] : vector<32x128xf32> to vector<128xf32>
    %1453 = vector.shape_cast %1452 : vector<128xf32> to vector<1x128xf32>
    %1454 = math.tanh %1453 : vector<1x128xf32>
    %1455 = vector.broadcast %7 : f32 to vector<1x128xf32>
    %1456 = arith.mulf %1454, %1455 : vector<1x128xf32>
    %1457 = arith.addf %1444, %1456 : vector<1x128xf32>
    %1458 = vector.broadcast %1411 : f32 to vector<1x128xf32>
    %1459 = arith.mulf %1458, %1457 : vector<1x128xf32>
    %1460 = arith.addf %1408, %1459 : vector<1x128xf32>
    %c1_i32_310 = arith.constant 1 : i32
    %1461 = tpu.dynamic_rotate %1460 by %c1_i32_310 dim 1 : vector<1x128xf32>, i32 -> vector<1x128xf32>
    %c127_i32_311 = arith.constant 127 : i32
    %1462 = tpu.dynamic_rotate %1460 by %c127_i32_311 dim 1 : vector<1x128xf32>, i32 -> vector<1x128xf32>
    %1463 = arith.addf %1461, %1462 : vector<1x128xf32>
    %1464 = vector.broadcast %3 : f32 to vector<1x128xf32>
    %1465 = arith.mulf %1464, %1460 : vector<1x128xf32>
    %1466 = vector.broadcast %6 : f32 to vector<1x128xf32>
    %1467 = arith.mulf %1466, %1463 : vector<1x128xf32>
    %1468 = arith.addf %1465, %1467 : vector<1x128xf32>
    %1469 = vector.broadcast %1460 : vector<1x128xf32> to vector<32x128xf32>
    %1470 = arith.mulf %10, %1469 : vector<32x128xf32>
    %1471 = math.tanh %1470 : vector<32x128xf32>
    %1472 = arith.truncf %1471 : vector<32x128xf32> to vector<32x128xbf16>
    %cst_312 = arith.constant dense<0.000000e+00> : vector<32x128xf32>
    %1473 = tpu.matmul %15, %1472, %cst_312 {dimension_numbers = #tpu.dot_dimension_numbers<[1], [0], [0], [1], [0, 0, 1, 1], [], []>} : vector<32x32xbf16>, vector<32x128xbf16>, vector<32x128xf32> -> vector<32x128xf32>
    %1474 = math.tanh %1473 : vector<32x128xf32>
    %1475 = arith.mulf %13, %1474 : vector<32x128xf32>
    %cst_313 = arith.constant dense<0.000000e+00> : vector<128xf32>
    %1476 = vector.multi_reduction <add>, %1475, %cst_313 [0] : vector<32x128xf32> to vector<128xf32>
    %1477 = vector.shape_cast %1476 : vector<128xf32> to vector<1x128xf32>
    %1478 = math.tanh %1477 : vector<1x128xf32>
    %1479 = vector.broadcast %7 : f32 to vector<1x128xf32>
    %1480 = arith.mulf %1478, %1479 : vector<1x128xf32>
    %1481 = arith.addf %1468, %1480 : vector<1x128xf32>
    %1482 = vector.broadcast %1410 : f32 to vector<1x128xf32>
    %1483 = arith.mulf %1482, %1481 : vector<1x128xf32>
    %1484 = arith.addf %1408, %1483 : vector<1x128xf32>
    %c1_i32_314 = arith.constant 1 : i32
    %1485 = tpu.dynamic_rotate %1484 by %c1_i32_314 dim 1 : vector<1x128xf32>, i32 -> vector<1x128xf32>
    %c127_i32_315 = arith.constant 127 : i32
    %1486 = tpu.dynamic_rotate %1484 by %c127_i32_315 dim 1 : vector<1x128xf32>, i32 -> vector<1x128xf32>
    %1487 = arith.addf %1485, %1486 : vector<1x128xf32>
    %1488 = vector.broadcast %3 : f32 to vector<1x128xf32>
    %1489 = arith.mulf %1488, %1484 : vector<1x128xf32>
    %1490 = vector.broadcast %6 : f32 to vector<1x128xf32>
    %1491 = arith.mulf %1490, %1487 : vector<1x128xf32>
    %1492 = arith.addf %1489, %1491 : vector<1x128xf32>
    %1493 = vector.broadcast %1484 : vector<1x128xf32> to vector<32x128xf32>
    %1494 = arith.mulf %10, %1493 : vector<32x128xf32>
    %1495 = math.tanh %1494 : vector<32x128xf32>
    %1496 = arith.truncf %1495 : vector<32x128xf32> to vector<32x128xbf16>
    %cst_316 = arith.constant dense<0.000000e+00> : vector<32x128xf32>
    %1497 = tpu.matmul %15, %1496, %cst_316 {dimension_numbers = #tpu.dot_dimension_numbers<[1], [0], [0], [1], [0, 0, 1, 1], [], []>} : vector<32x32xbf16>, vector<32x128xbf16>, vector<32x128xf32> -> vector<32x128xf32>
    %1498 = math.tanh %1497 : vector<32x128xf32>
    %1499 = arith.mulf %13, %1498 : vector<32x128xf32>
    %cst_317 = arith.constant dense<0.000000e+00> : vector<128xf32>
    %1500 = vector.multi_reduction <add>, %1499, %cst_317 [0] : vector<32x128xf32> to vector<128xf32>
    %1501 = vector.shape_cast %1500 : vector<128xf32> to vector<1x128xf32>
    %1502 = math.tanh %1501 : vector<1x128xf32>
    %1503 = vector.broadcast %7 : f32 to vector<1x128xf32>
    %1504 = arith.mulf %1502, %1503 : vector<1x128xf32>
    %1505 = arith.addf %1492, %1504 : vector<1x128xf32>
    %cst_318 = arith.constant 2.000000e+00 : f32
    %1506 = vector.broadcast %cst_318 : f32 to vector<1x128xf32>
    %1507 = arith.mulf %1506, %1457 : vector<1x128xf32>
    %1508 = arith.addf %1433, %1507 : vector<1x128xf32>
    %cst_319 = arith.constant 2.000000e+00 : f32
    %1509 = vector.broadcast %cst_319 : f32 to vector<1x128xf32>
    %1510 = arith.mulf %1509, %1481 : vector<1x128xf32>
    %1511 = arith.addf %1508, %1510 : vector<1x128xf32>
    %1512 = arith.addf %1511, %1505 : vector<1x128xf32>
    %1513 = vector.broadcast %1412 : f32 to vector<1x128xf32>
    %1514 = arith.mulf %1513, %1512 : vector<1x128xf32>
    %1515 = arith.addf %1408, %1514 : vector<1x128xf32>
    %c14_320 = arith.constant 14 : index
    %c0_321 = arith.constant 0 : index
    %1516 = vector.load %arg9[%c14_320, %c0_321] : memref<16x128xf32, #tpu.memory_space<vmem>>, vector<1x128xf32>
    tpu.vector_store %arg9[%c14_320, %c0_321], %1515 {strides = array<i32>} : memref<16x128xf32, #tpu.memory_space<vmem>>, vector<1x128xf32>,
    %c15 = arith.constant 15 : index
    %1517 = memref.load %arg2[%c15] : memref<16xf32, #tpu.memory_space<smem>>
    %c15_322 = arith.constant 15 : index
    %1518 = memref.load %arg3[%c15_322] : memref<16xf32, #tpu.memory_space<smem>>
    %c15_323 = arith.constant 15 : index
    %1519 = memref.load %arg4[%c15_323] : memref<16xf32, #tpu.memory_space<smem>>
    %c1_i32_324 = arith.constant 1 : i32
    %1520 = tpu.dynamic_rotate %1515 by %c1_i32_324 dim 1 : vector<1x128xf32>, i32 -> vector<1x128xf32>
    %c127_i32_325 = arith.constant 127 : i32
    %1521 = tpu.dynamic_rotate %1515 by %c127_i32_325 dim 1 : vector<1x128xf32>, i32 -> vector<1x128xf32>
    %1522 = arith.addf %1520, %1521 : vector<1x128xf32>
    %1523 = vector.broadcast %3 : f32 to vector<1x128xf32>
    %1524 = arith.mulf %1523, %1515 : vector<1x128xf32>
    %1525 = vector.broadcast %6 : f32 to vector<1x128xf32>
    %1526 = arith.mulf %1525, %1522 : vector<1x128xf32>
    %1527 = arith.addf %1524, %1526 : vector<1x128xf32>
    %1528 = vector.broadcast %1515 : vector<1x128xf32> to vector<32x128xf32>
    %1529 = arith.mulf %10, %1528 : vector<32x128xf32>
    %1530 = math.tanh %1529 : vector<32x128xf32>
    %1531 = arith.truncf %1530 : vector<32x128xf32> to vector<32x128xbf16>
    %cst_326 = arith.constant dense<0.000000e+00> : vector<32x128xf32>
    %1532 = tpu.matmul %15, %1531, %cst_326 {dimension_numbers = #tpu.dot_dimension_numbers<[1], [0], [0], [1], [0, 0, 1, 1], [], []>} : vector<32x32xbf16>, vector<32x128xbf16>, vector<32x128xf32> -> vector<32x128xf32>
    %1533 = math.tanh %1532 : vector<32x128xf32>
    %1534 = arith.mulf %13, %1533 : vector<32x128xf32>
    %cst_327 = arith.constant dense<0.000000e+00> : vector<128xf32>
    %1535 = vector.multi_reduction <add>, %1534, %cst_327 [0] : vector<32x128xf32> to vector<128xf32>
    %1536 = vector.shape_cast %1535 : vector<128xf32> to vector<1x128xf32>
    %1537 = math.tanh %1536 : vector<1x128xf32>
    %1538 = vector.broadcast %7 : f32 to vector<1x128xf32>
    %1539 = arith.mulf %1537, %1538 : vector<1x128xf32>
    %1540 = arith.addf %1527, %1539 : vector<1x128xf32>
    %1541 = vector.broadcast %1518 : f32 to vector<1x128xf32>
    %1542 = arith.mulf %1541, %1540 : vector<1x128xf32>
    %1543 = arith.addf %1515, %1542 : vector<1x128xf32>
    %c1_i32_328 = arith.constant 1 : i32
    %1544 = tpu.dynamic_rotate %1543 by %c1_i32_328 dim 1 : vector<1x128xf32>, i32 -> vector<1x128xf32>
    %c127_i32_329 = arith.constant 127 : i32
    %1545 = tpu.dynamic_rotate %1543 by %c127_i32_329 dim 1 : vector<1x128xf32>, i32 -> vector<1x128xf32>
    %1546 = arith.addf %1544, %1545 : vector<1x128xf32>
    %1547 = vector.broadcast %3 : f32 to vector<1x128xf32>
    %1548 = arith.mulf %1547, %1543 : vector<1x128xf32>
    %1549 = vector.broadcast %6 : f32 to vector<1x128xf32>
    %1550 = arith.mulf %1549, %1546 : vector<1x128xf32>
    %1551 = arith.addf %1548, %1550 : vector<1x128xf32>
    %1552 = vector.broadcast %1543 : vector<1x128xf32> to vector<32x128xf32>
    %1553 = arith.mulf %10, %1552 : vector<32x128xf32>
    %1554 = math.tanh %1553 : vector<32x128xf32>
    %1555 = arith.truncf %1554 : vector<32x128xf32> to vector<32x128xbf16>
    %cst_330 = arith.constant dense<0.000000e+00> : vector<32x128xf32>
    %1556 = tpu.matmul %15, %1555, %cst_330 {dimension_numbers = #tpu.dot_dimension_numbers<[1], [0], [0], [1], [0, 0, 1, 1], [], []>} : vector<32x32xbf16>, vector<32x128xbf16>, vector<32x128xf32> -> vector<32x128xf32>
    %1557 = math.tanh %1556 : vector<32x128xf32>
    %1558 = arith.mulf %13, %1557 : vector<32x128xf32>
    %cst_331 = arith.constant dense<0.000000e+00> : vector<128xf32>
    %1559 = vector.multi_reduction <add>, %1558, %cst_331 [0] : vector<32x128xf32> to vector<128xf32>
    %1560 = vector.shape_cast %1559 : vector<128xf32> to vector<1x128xf32>
    %1561 = math.tanh %1560 : vector<1x128xf32>
    %1562 = vector.broadcast %7 : f32 to vector<1x128xf32>
    %1563 = arith.mulf %1561, %1562 : vector<1x128xf32>
    %1564 = arith.addf %1551, %1563 : vector<1x128xf32>
    %1565 = vector.broadcast %1518 : f32 to vector<1x128xf32>
    %1566 = arith.mulf %1565, %1564 : vector<1x128xf32>
    %1567 = arith.addf %1515, %1566 : vector<1x128xf32>
    %c1_i32_332 = arith.constant 1 : i32
    %1568 = tpu.dynamic_rotate %1567 by %c1_i32_332 dim 1 : vector<1x128xf32>, i32 -> vector<1x128xf32>
    %c127_i32_333 = arith.constant 127 : i32
    %1569 = tpu.dynamic_rotate %1567 by %c127_i32_333 dim 1 : vector<1x128xf32>, i32 -> vector<1x128xf32>
    %1570 = arith.addf %1568, %1569 : vector<1x128xf32>
    %1571 = vector.broadcast %3 : f32 to vector<1x128xf32>
    %1572 = arith.mulf %1571, %1567 : vector<1x128xf32>
    %1573 = vector.broadcast %6 : f32 to vector<1x128xf32>
    %1574 = arith.mulf %1573, %1570 : vector<1x128xf32>
    %1575 = arith.addf %1572, %1574 : vector<1x128xf32>
    %1576 = vector.broadcast %1567 : vector<1x128xf32> to vector<32x128xf32>
    %1577 = arith.mulf %10, %1576 : vector<32x128xf32>
    %1578 = math.tanh %1577 : vector<32x128xf32>
    %1579 = arith.truncf %1578 : vector<32x128xf32> to vector<32x128xbf16>
    %cst_334 = arith.constant dense<0.000000e+00> : vector<32x128xf32>
    %1580 = tpu.matmul %15, %1579, %cst_334 {dimension_numbers = #tpu.dot_dimension_numbers<[1], [0], [0], [1], [0, 0, 1, 1], [], []>} : vector<32x32xbf16>, vector<32x128xbf16>, vector<32x128xf32> -> vector<32x128xf32>
    %1581 = math.tanh %1580 : vector<32x128xf32>
    %1582 = arith.mulf %13, %1581 : vector<32x128xf32>
    %cst_335 = arith.constant dense<0.000000e+00> : vector<128xf32>
    %1583 = vector.multi_reduction <add>, %1582, %cst_335 [0] : vector<32x128xf32> to vector<128xf32>
    %1584 = vector.shape_cast %1583 : vector<128xf32> to vector<1x128xf32>
    %1585 = math.tanh %1584 : vector<1x128xf32>
    %1586 = vector.broadcast %7 : f32 to vector<1x128xf32>
    %1587 = arith.mulf %1585, %1586 : vector<1x128xf32>
    %1588 = arith.addf %1575, %1587 : vector<1x128xf32>
    %1589 = vector.broadcast %1517 : f32 to vector<1x128xf32>
    %1590 = arith.mulf %1589, %1588 : vector<1x128xf32>
    %1591 = arith.addf %1515, %1590 : vector<1x128xf32>
    %c1_i32_336 = arith.constant 1 : i32
    %1592 = tpu.dynamic_rotate %1591 by %c1_i32_336 dim 1 : vector<1x128xf32>, i32 -> vector<1x128xf32>
    %c127_i32_337 = arith.constant 127 : i32
    %1593 = tpu.dynamic_rotate %1591 by %c127_i32_337 dim 1 : vector<1x128xf32>, i32 -> vector<1x128xf32>
    %1594 = arith.addf %1592, %1593 : vector<1x128xf32>
    %1595 = vector.broadcast %3 : f32 to vector<1x128xf32>
    %1596 = arith.mulf %1595, %1591 : vector<1x128xf32>
    %1597 = vector.broadcast %6 : f32 to vector<1x128xf32>
    %1598 = arith.mulf %1597, %1594 : vector<1x128xf32>
    %1599 = arith.addf %1596, %1598 : vector<1x128xf32>
    %1600 = vector.broadcast %1591 : vector<1x128xf32> to vector<32x128xf32>
    %1601 = arith.mulf %10, %1600 : vector<32x128xf32>
    %1602 = math.tanh %1601 : vector<32x128xf32>
    %1603 = arith.truncf %1602 : vector<32x128xf32> to vector<32x128xbf16>
    %cst_338 = arith.constant dense<0.000000e+00> : vector<32x128xf32>
    %1604 = tpu.matmul %15, %1603, %cst_338 {dimension_numbers = #tpu.dot_dimension_numbers<[1], [0], [0], [1], [0, 0, 1, 1], [], []>} : vector<32x32xbf16>, vector<32x128xbf16>, vector<32x128xf32> -> vector<32x128xf32>
    %1605 = math.tanh %1604 : vector<32x128xf32>
    %1606 = arith.mulf %13, %1605 : vector<32x128xf32>
    %cst_339 = arith.constant dense<0.000000e+00> : vector<128xf32>
    %1607 = vector.multi_reduction <add>, %1606, %cst_339 [0] : vector<32x128xf32> to vector<128xf32>
    %1608 = vector.shape_cast %1607 : vector<128xf32> to vector<1x128xf32>
    %1609 = math.tanh %1608 : vector<1x128xf32>
    %1610 = vector.broadcast %7 : f32 to vector<1x128xf32>
    %1611 = arith.mulf %1609, %1610 : vector<1x128xf32>
    %1612 = arith.addf %1599, %1611 : vector<1x128xf32>
    %cst_340 = arith.constant 2.000000e+00 : f32
    %1613 = vector.broadcast %cst_340 : f32 to vector<1x128xf32>
    %1614 = arith.mulf %1613, %1564 : vector<1x128xf32>
    %1615 = arith.addf %1540, %1614 : vector<1x128xf32>
    %cst_341 = arith.constant 2.000000e+00 : f32
    %1616 = vector.broadcast %cst_341 : f32 to vector<1x128xf32>
    %1617 = arith.mulf %1616, %1588 : vector<1x128xf32>
    %1618 = arith.addf %1615, %1617 : vector<1x128xf32>
    %1619 = arith.addf %1618, %1612 : vector<1x128xf32>
    %1620 = vector.broadcast %1519 : f32 to vector<1x128xf32>
    %1621 = arith.mulf %1620, %1619 : vector<1x128xf32>
    %1622 = arith.addf %1515, %1621 : vector<1x128xf32>
    %c15_342 = arith.constant 15 : index
    %c0_343 = arith.constant 0 : index
    %1623 = vector.load %arg9[%c15_342, %c0_343] : memref<16x128xf32, #tpu.memory_space<vmem>>, vector<1x128xf32>
    tpu.vector_store %arg9[%c15_342, %c0_343], %1622 {strides = array<i32>} : memref<16x128xf32, #tpu.memory_space<vmem>>, vector<1x128xf32>,
    return
  }
  func.func @transform_0(%arg0: i32, %arg1: memref<4xf32, #tpu.memory_space<smem>>, %arg2: memref<16xf32, #tpu.memory_space<smem>>, %arg3: memref<16xf32, #tpu.memory_space<smem>>, %arg4: memref<16xf32, #tpu.memory_space<smem>>) -> (i32, i32) {
    %c0_i32 = arith.constant 0 : i32
    %c0_i32_0 = arith.constant 0 : i32
    %c0_i32_1 = arith.constant 0 : i32
    return %c0_i32, %c0_i32_0 : i32, i32
  }
  func.func @transform_1(%arg0: i32, %arg1: memref<4xf32, #tpu.memory_space<smem>>, %arg2: memref<16xf32, #tpu.memory_space<smem>>, %arg3: memref<16xf32, #tpu.memory_space<smem>>, %arg4: memref<16xf32, #tpu.memory_space<smem>>) -> (i32, i32) {
    %c0_i32 = arith.constant 0 : i32
    %c0_i32_0 = arith.constant 0 : i32
    %c0_i32_1 = arith.constant 0 : i32
    return %c0_i32, %c0_i32_0 : i32, i32
  }
  func.func @transform_2(%arg0: i32, %arg1: memref<4xf32, #tpu.memory_space<smem>>, %arg2: memref<16xf32, #tpu.memory_space<smem>>, %arg3: memref<16xf32, #tpu.memory_space<smem>>, %arg4: memref<16xf32, #tpu.memory_space<smem>>) -> (i32, i32) {
    %c0_i32 = arith.constant 0 : i32
    %c0_i32_0 = arith.constant 0 : i32
    %c0_i32_1 = arith.constant 0 : i32
    return %c0_i32, %c0_i32_0 : i32, i32
  }
  func.func @transform_3(%arg0: i32, %arg1: memref<4xf32, #tpu.memory_space<smem>>, %arg2: memref<16xf32, #tpu.memory_space<smem>>, %arg3: memref<16xf32, #tpu.memory_space<smem>>, %arg4: memref<16xf32, #tpu.memory_space<smem>>) -> (i32, i32) {
    %c0_i32 = arith.constant 0 : i32
    %c0_i32_0 = arith.constant 0 : i32
    %c0_i32_1 = arith.constant 0 : i32
    return %c0_i32, %c0_i32_0 : i32, i32
  }
  func.func @transform_4(%arg0: i32, %arg1: memref<4xf32, #tpu.memory_space<smem>>, %arg2: memref<16xf32, #tpu.memory_space<smem>>, %arg3: memref<16xf32, #tpu.memory_space<smem>>, %arg4: memref<16xf32, #tpu.memory_space<smem>>) -> (i32, i32) {
    %c0_i32 = arith.constant 0 : i32
    %c0_i32_0 = arith.constant 0 : i32
    %c0_i32_1 = arith.constant 0 : i32
    return %c0_i32, %c0_i32_0 : i32, i32
  }
}

</mosaic_0001>

<bundles_post_ra>
// kernel: tpu_custom_call.1
= control target key start
LH: loop header
LB: loop body
LE: loop exit
PB: predicated region body
PF: predicated region fallthrough
CT: control target
= control target key end

     0   :  { %s9564_s0 = inlined_call_operand.vmem [shape: f32[4], index: 0, kind: input, shape index: {}]   ;;  %s9565_s4 = inlined_call_operand.vmem [shape: f32[1,128], index: 4, kind: input, shape index: {}]   ;;  %s9566_s5 = inlined_call_operand.vmem [shape: f32[32,1], index: 5, kind: input, shape index: {}]   ;;  %s9567_s6 = inlined_call_operand.vmem [shape: f32[32,32], index: 6, kind: input, shape index: {}]   ;;  %s9568_s7 = inlined_call_operand.vmem [shape: f32[32,1], index: 7, kind: input, shape index: {}]   ;;  %s9569_s8 = inlined_call_operand.hbm [shape: f32[16,128], index: 8, kind: output, shape index: {}]   ;;  %s9570_s1 = inlined_call_operand.vmem [shape: f32[16], index: 1, kind: input, shape index: {}]   ;;  %s9571_s2 = inlined_call_operand.vmem [shape: f32[16], index: 2, kind: input, shape index: {}]   ;;  %s9572_s3 = inlined_call_operand.vmem [shape: f32[16], index: 3, kind: input, shape index: {}]  }
   0x1   :  { %s13_s29 = sshll.u32 %s9564_s0, 4  ;;  %s17_s10 = sshll.u32 %s9570_s1, 4  ;;  %s14_s29 = int_to_ptr.vmem [resolvable:$true] %s13_s29  ;;  %s18_s10 = int_to_ptr.vmem [resolvable:$true] %s17_s10 }
   0x2   :  { %s7992_s11 = scalar_lea.vmem %s14_s29, 16  ;;  %p7997_p1 = scmp.lt.s32.totalorder %s14_s29, %s14_s29 }
   0x3   :  { %p7993_p0 = scmp.ne.s32.totalorder %s14_s29, %s7992_s11  ;;  %p7998_p2 = scmp.lt.s32.totalorder %s7992_s11, %s7992_s11 }
   0x5   :  { %p7999_p3 = por %p7998_p2, %p7997_p1 }
   0x7   :  { %p8000_p4 = pnand %p7999_p3, %p7993_p0 }
   0x9   :  { %8003 = shalt.err (!%p8000_p4)  }
   0xa   :  { %s8066_s12 = smov [#allocation3]   ;;  %s8004_s13 = scalar_lea.vmem %s18_s10, 16 }
   0xb   :  { %16 = dma.vmem_to_smem %s14_s29, 16, %s8066_s12, [#allocation2] }
   0xc   :  { %p8005_p5 = scmp.ne.s32.totalorder %s18_s10, %s8004_s13  ;;  %p8009_p6 = scmp.lt.s32.totalorder %s18_s10, %s18_s10 }
   0xd   :  { %p8010_p7 = scmp.lt.s32.totalorder %s8004_s13, %s8004_s13 }
   0xf   :  { %p8011_p8 = por %p8010_p7, %p8009_p6 }
  0x11   :  { %p8012_p9 = pnand %p8011_p8, %p8005_p5 }
  0x13   :  { %8015 = shalt.err (!%p8012_p9)  }
  0x14   :  { %s8067_s0 = smov [#allocation4]   ;;  %s21_s15 = sshll.u32 %s9571_s2, 4  ;;  %s22_s15 = int_to_ptr.vmem [resolvable:$true] %s21_s15 }
  0x15   :  { %20 = dma.vmem_to_smem %s18_s10, 16, %s8067_s0, [#allocation2] }
  0x16   :  { %s25_s18 = sshll.u32 %s9572_s3, 4  ;;  %s8016_s19 = scalar_lea.vmem %s22_s15, 16  ;;  %s26_s18 = int_to_ptr.vmem [resolvable:$true] %s25_s18 }
  0x17   :  { %p8017_p10 = scmp.ne.s32.totalorder %s22_s15, %s8016_s19  ;;  %p8021_p11 = scmp.lt.s32.totalorder %s22_s15, %s22_s15 }
  0x18   :  { %p8022_p12 = scmp.lt.s32.totalorder %s8016_s19, %s8016_s19 }
  0x1a   :  { %p8023_p13 = por %p8022_p12, %p8021_p11 }
  0x1c   :  { %p8024_p0 = pnand %p8023_p13, %p8017_p10 }
  0x1e   :  { %8027 = shalt.err (!%p8024_p0)  }
  0x1f   :  { %s8068_s20 = smov [#allocation5]   ;;  %s8028_s21 = scalar_lea.vmem %s26_s18, 16 }
  0x20   :  { %24 = dma.vmem_to_smem %s22_s15, 16, %s8068_s20, [#allocation2] }
  0x21   :  { %p8029_p1 = scmp.ne.s32.totalorder %s26_s18, %s8028_s21  ;;  %p8033_p2 = scmp.lt.s32.totalorder %s26_s18, %s26_s18 }
  0x22   :  { %p8034_p3 = scmp.lt.s32.totalorder %s8028_s21, %s8028_s21 }
  0x24   :  { %p8035_p4 = por %p8034_p3, %p8033_p2 }
  0x26   :  { %p8036_p5 = pnand %p8035_p4, %p8029_p1 }
  0x28   :  { %8039 = shalt.err (!%p8036_p5)  }
  0x29   :  { %s8069_s2 = smov [#allocation6]  }
  0x2a   :  { %28 = dma.vmem_to_smem %s26_s18, 16, %s8069_s2, [#allocation2] }
  0x2b   :  { %8062 = dma.done.wait [#allocation2], 64 }
  0x2c   :  { %8063 = vsyncadd [#allocation2], 4294967232 }
  0x2d   :  { %30 = sfence }
  0x2e   :  { %v51_v0 = vld [vmem:[%s9566_s5 + $0x10] sm:$0xff]  ;;  %v49_v1 = vld [vmem:[%s9566_s5] sm:$0xff]  ;;  %v8070_v2 = vmov 0   ;;  %v52_v3 = vld [vmem:[%s9566_s5 + $0x18] sm:$0xff] }
  0x2f   :  { %6911 = vset.pattern.permute.xlu1 %v8070_v2  ;;  %6910 = vset.pattern.permute.xlu0 %v8070_v2  ;;  %v50_v4 = vld [vmem:[%s9566_s5 + $0x8] sm:$0xff] }
  0x30   :  { %65 = vperm.xlu1 %6911, %v51_v0   ;;  %55 = vperm.xlu0 %6910, %v49_v1  }
  0x31   :  { %31 = vsyncpa [#allocation8], 0  ;;  %v74_v5 = vld [vmem:[%s9568_s7 + $0x8] sm:$0xff]  ;;  %v73_v6 = vld [vmem:[%s9568_s7] sm:$0xff]  ;;  %vm135_vm0 = vcmask 261120   ;;  %s8072_s18 = smov 1   ;;  %v120_v13 = vlaneseq }
  0x32   :  { %v76_v7 = vld [vmem:[%s9568_s7 + $0x18] sm:$0xff]  ;;  %v75_v8 = vld [vmem:[%s9568_s7 + $0x10] sm:$0xff]  ;;  %v97_v9 = vld [vmem:[%s9567_s6] sm:$0xff]  ;;  %s8071_s7 = smov 127   ;;  %s6012_s3 = sld [smem:[#allocation3 + $0x1]] }
  0x33   :  { %v98_v10 = vld [vmem:[%s9567_s6 + $0x8] sm:$0xff]  ;;  %v8168_v12 = vld [vmem:[%s9565_s4] sm:$0x1]  ;;  %v121_v14 = vshrl.u32 %v120_v13, 7  ;;  %v99_v31 = vld [vmem:[%s9567_s6 + $0x10] sm:$0xff]  ;;  %s6013_s22 = sld [smem:[#allocation3 + $0x2]] }
  0x34   :  { %70 = vperm.xlu1 %6911, %v52_v3   ;;  %60 = vperm.xlu0 %6910, %v50_v4   ;;  %v8163_v11 = vpack.c.bf16 %v98_v10, %v97_v9  ;;  %v100_v32 = vld [vmem:[%s9567_s6 + $0x18] sm:$0xff]  ;;  %s41_s6 = sld [smem:[#allocation3]]  ;;  %s6014_s27 = sld [smem:[#allocation3 + $0x3]] }
  0x35   :  { %v8178_v15 = vsub.s32 0, %v121_v14  ;;  %v8200_v33 = vpack.c.bf16 %v100_v32, %v99_v31  ;;  %s8222_s28 = sld [smem:[#allocation5 + $0x1]]  ;;  %s8314_s9 = sld [smem:[#allocation5 + $0x2]] }
  0x36   :  { %6424 = vmatprep.mubr.msk.bf16.mxu0 %vm135_vm0, %v8163_v11  ;;  %6432 = vmatprep.mubr.msk.bf16.mxu1 %vm135_vm0, %v8163_v11  ;;  %s6015_s29 = sld [smem:[#allocation4 + $0x1]]  ;;  %s6026_s10 = sld [smem:[#allocation4 + $0x2]] }
  0x37   :  { %v123_v16 = vrot.slane %v8168_v12, %v8178_v15  ;;  %s6017_s30 = sld [smem:[#allocation6 + $0x1]]  ;;  %s6028_s11 = sld [smem:[#allocation6 + $0x2]] }
  0x38   :  { %84 = vperm.xlu1 %6911, %v74_v5   ;;  %79 = vperm.xlu0 %6910, %v73_v6   ;;  %s8404_s12 = sld [smem:[#allocation5 + $0x3]]  ;;  %s8494_s5 = sld [smem:[#allocation5 + $0x4]] }
  0x39   :  { %s6037_s13 = sld [smem:[#allocation4 + $0x3]]  ;;  %s6048_s1 = sld [smem:[#allocation4 + $0x4]] }
  0x3a   :  { %s42_s23 = smul.f32 0.2, %s41_s6  ;;  %v8227_v2 = vstv %s6014_s27  ;;  %s6039_s0 = sld [smem:[#allocation6 + $0x3]] }
  0x3b   :  { %s45_s24 = smul.f32 0.1, %s41_s6  ;;  %v212_v6 = vstv %s8222_s28  ;;  %s6050_s14 = sld [smem:[#allocation6 + $0x4]] }
  0x3c   :  { %94 = vperm.xlu1 %6911, %v76_v7   ;;  %89 = vperm.xlu0 %6910, %v75_v8   ;;  %s44_s25 = smul.f32 %s6012_s3, %s42_s23  ;;  %s8584_s15 = sld [smem:[#allocation5 + $0x5]] }
  0x3d   :  { %s47_s26 = smul.f32 %s6013_s22, %s45_s24  ;;  %s6059_s16 = sld [smem:[#allocation4 + $0x5]] }
  0x3e   :  { %v8218_v62 = vstv %s44_s25  ;;  %s6061_s17 = sld [smem:[#allocation6 + $0x5]]  ;;  %s8674_s19 = sld [smem:[#allocation5 + $0x6]] }
  0x3f   :  { %v8220_v63 = vstv %s47_s26  ;;  %v115_v0 = vmul.f32 %v8218_v62, %v8168_v12  ;;  %s6070_s20 = sld [smem:[#allocation4 + $0x6]]  ;;  %s8764_s2 = sld [smem:[#allocation5 + $0x7]] }
  0x40   :  { %111 = vrot.lane.b32.xlu1 %v8168_v12, %s8071_s7  ;;  %109 = vrot.lane.b32.xlu0 %v8168_v12, %s8072_s18  ;;  %s6072_s21 = sld [smem:[#allocation6 + $0x6]]  ;;  %s6081_s6 = sld [smem:[#allocation4 + $0x7]] }
  0x41   :  { %s6083_s3 = sld [smem:[#allocation6 + $0x7]]  ;;  %s8854_s22 = sld [smem:[#allocation5 + $0x8]] }
  0x42   :  { %s6092_s23 = sld [smem:[#allocation4 + $0x8]]  ;;  %s8944_s25 = sld [smem:[#allocation5 + $0x9]] }
  0x43   :  { %s6094_s24 = sld [smem:[#allocation6 + $0x8]]  ;;  %s6103_s26 = sld [smem:[#allocation4 + $0x9]] }
  0x44   :  { %s6105_s27 = sld [smem:[#allocation6 + $0x9]]  ;;  %s9034_s28 = sld [smem:[#allocation5 + $0xa]] }
  0xaf   :  { %v8182_v17 = vpop.permute.xlu1 %65  ;;  %v8184_v18 = vpop.permute.xlu0 %55 }
  0xb0   :  { %v125_v19 = vmul.f32 %v123_v16, %v8184_v18  ;;  %v127_v20 = vmul.f32 %v123_v16, %v8182_v17 }
  0xb2   :  { %6912 = vtanh.f32 %v125_v19 }
  0xb3   :  { %v8188_v21 = vpop.permute.xlu1 %70  ;;  %v8190_v22 = vpop.permute.xlu0 %60  ;;  %6914 = vtanh.f32 %v127_v20 }
  0xb4   :  { %v126_v23 = vmul.f32 %v123_v16, %v8190_v22  ;;  %v128_v24 = vmul.f32 %v123_v16, %v8188_v21 }
  0xb6   :  { %6916 = vtanh.f32 %v126_v23 }
  0xb7   :  { %6918 = vtanh.f32 %v128_v24  ;;  %v8206_v38 = vpop.permute.xlu0 %79  ;;  %v8208_v40 = vpop.permute.xlu1 %84 }
  0xbb   :  { %v8212_v46 = vpop.permute.xlu0 %89  ;;  %v8215_v49 = vpop.permute.xlu1 %94 }
  0xbc   :  { %v6913_v25 = vpop.eup %6912 }
  0xbd   :  { %v6915_v26 = vpop.eup %6914 }
  0xbf   :  { %v112_v58 = vpop.permute.xlu1 %111  ;;  %v110_v60 = vpop.permute.xlu0 %109 }
  0xc0   :  { %v6917_v27 = vpop.eup %6916  ;;  %v113_v61 = vadd.f32 %v112_v58, %v110_v60 }
  0xc1   :  { %v6919_v28 = vpop.eup %6918  ;;  %v133_v29 = vpack.c.bf16 %v6917_v27, %v6913_v25 }
  0xc2   :  { %v134_v30 = vpack.c.bf16 %v6919_v28, %v6915_v26  ;;  %v117_v1 = vmul.f32 %v8220_v63, %v113_v61 }
  0xc3   :  { %6420 = vmatprep.subr.bf16.mxu0 %v133_v29 }
  0xc4   :  { %6421 = vmatpush3.bf16.msra.mxu0 %v133_v29  ;;  %v118_v3 = vadd.f32 %v117_v1, %v115_v0 }
  0xc5   :  { %6422 = vmatprep.subr.bf16.mxu0 %v134_v30 }
  0xc8   :  { %6423 = vmatpush3.bf16.msra.mxu0 %v134_v30 }
  0xcb   :  { %6425 = vmatmul.mubr.msk.bf16.vlgmr.msra.gmra.mrb[0].mxu0 %vm135_vm0, %v8200_v33 }
  0xcc   :  { %6440 = vmatprep.mubr.msk.bf16.mxu0 %vm135_vm0, %v8163_v11 }
 0x19e   :  { %v6426_v34 = vpop.f32.mrb[0].mxu0 }
 0x19f   :  { %v176_v35 = vpop.f32.mrb[1].mxu0 }
 0x1a0   :  { %6920 = vtanh.f32 %v176_v35  ;;  %v6427_v36 = vpop.f32.mrb[2].mxu0 }
 0x1a1   :  { %6922 = vtanh.f32 %v6426_v34  ;;  %v179_v37 = vpop.f32.mrb[3].mxu0 }
 0x1a2   :  { %6924 = vtanh.f32 %v179_v37 }
 0x1a3   :  { %6926 = vtanh.f32 %v6427_v36 }
 0x1aa   :  { %v6921_v39 = vpop.eup %6920 }
 0x1ab   :  { %v6923_v41 = vpop.eup %6922  ;;  %v195_v43 = vmul.f32 %v6921_v39, %v8206_v38 }
 0x1ac   :  { %v6925_v42 = vpop.eup %6924  ;;  %v197_v47 = vmul.f32 %v6923_v41, %v8212_v46 }
 0x1ad   :  { %v196_v44 = vmul.f32 %v6925_v42, %v8208_v40  ;;  %v6927_v45 = vpop.eup %6926 }
 0x1ae   :  { %v198_v50 = vmul.f32 %v6927_v45, %v8215_v49 }
 0x1af   :  { %v199_v48 = vadd.f32 %v196_v44, %v195_v43 }
 0x1b1   :  { %v200_v51 = vadd.f32 %v199_v48, %v197_v47 }
 0x1b3   :  { %v201_v52 = vadd.f32 %v200_v51, %v198_v50 }
 0x1b5   :  { %v202_v53 = vrot.slane %v201_v52, 4 }
 0x1b7   :  { %v203_v54 = vadd.f32 %v202_v53, %v201_v52 }
 0x1b9   :  { %v204_v55 = vrot.slane %v203_v54, 2 }
 0x1bb   :  { %v205_v56 = vadd.f32 %v204_v55, %v203_v54 }
 0x1bd   :  { %v206_v57 = vrot.slane %v205_v56, 1 }
 0x1bf   :  { %v207_v59 = vadd.f32 %v206_v57, %v205_v56 }
 0x1c1   :  { %6928 = vtanh.f32 %v207_v59 }
 0x1cb   :  { %v6929_v4 = vpop.eup %6928 }
 0x1cc   :  { %v210_v5 = vmul.f32 %v6929_v4, %v8227_v2 }
 0x1ce   :  { %v8231_v7 = vadd.f32 %v210_v5, %v118_v3 }
 0x1d0   :  { %v213_v8 = vmul.f32 %v212_v6, %v8231_v7 }
 0x1d2   :  { %v214_v9 = vadd.f32 %v213_v8, %v8168_v12 }
 0x1d4   :  { %217 = vrot.lane.b32.xlu1 %v214_v9, %s8071_s7  ;;  %v227_v10 = vrot.slane %v214_v9, %v8178_v15  ;;  %215 = vrot.lane.b32.xlu0 %v214_v9, %s8072_s18  ;;  %v220_v58 = vmul.f32 %v214_v9, %v8218_v62 }
 0x1d6   :  { %v229_v13 = vmul.f32 %v227_v10, %v8184_v18  ;;  %v230_v14 = vmul.f32 %v227_v10, %v8190_v22  ;;  %v231_v16 = vmul.f32 %v227_v10, %v8182_v17  ;;  %v232_v19 = vmul.f32 %v227_v10, %v8188_v21 }
 0x1d8   :  { %6930 = vtanh.f32 %v229_v13 }
 0x1d9   :  { %6932 = vtanh.f32 %v230_v14 }
 0x1da   :  { %6934 = vtanh.f32 %v231_v16 }
 0x1db   :  { %6936 = vtanh.f32 %v232_v19 }
 0x1e2   :  { %v6931_v20 = vpop.eup %6930 }
 0x1e3   :  { %v6933_v23 = vpop.eup %6932 }
 0x1e4   :  { %v6935_v24 = vpop.eup %6934  ;;  %v237_v25 = vpack.c.bf16 %v6933_v23, %v6931_v20 }
 0x1e5   :  { %v6937_v26 = vpop.eup %6936 }
 0x1e6   :  { %6428 = vmatprep.subr.bf16.mxu1 %v237_v25  ;;  %v238_v27 = vpack.c.bf16 %v6937_v26, %v6935_v24 }
 0x1e7   :  { %6429 = vmatpush3.bf16.msra.mxu1 %v237_v25 }
 0x1e8   :  { %6430 = vmatprep.subr.bf16.mxu1 %v238_v27 }
 0x1eb   :  { %6431 = vmatpush3.bf16.msra.mxu1 %v238_v27 }
 0x1ee   :  { %6433 = vmatmul.mubr.msk.bf16.vlgmr.msra.gmra.mrb[0].mxu1 %vm135_vm0, %v8200_v33 }
 0x1ef   :  { %6448 = vmatprep.mubr.msk.bf16.mxu1 %vm135_vm0, %v8163_v11 }
 0x246   :  { %v218_v54 = vpop.permute.xlu1 %217  ;;  %v216_v55 = vpop.permute.xlu0 %215 }
 0x247   :  { %v219_v56 = vadd.f32 %v218_v54, %v216_v55 }
 0x249   :  { %v221_v57 = vmul.f32 %v219_v56, %v8220_v63 }
 0x24b   :  { %v222_v60 = vadd.f32 %v221_v57, %v220_v58  ;;  %v403_v58 = vstv %s6015_s29  ;;  %s6114_s29 = sld [smem:[#allocation4 + $0xa]] }
 0x2c1   :  { %v6434_v28 = vpop.f32.mrb[0].mxu1 }
 0x2c2   :  { %v273_v29 = vpop.f32.mrb[1].mxu1 }
 0x2c3   :  { %6938 = vtanh.f32 %v273_v29  ;;  %v6435_v30 = vpop.f32.mrb[2].mxu1 }
 0x2c4   :  { %6940 = vtanh.f32 %v6434_v28  ;;  %v276_v31 = vpop.f32.mrb[3].mxu1 }
 0x2c5   :  { %6942 = vtanh.f32 %v276_v31 }
 0x2c6   :  { %6944 = vtanh.f32 %v6435_v30 }
 0x2cd   :  { %v6939_v32 = vpop.eup %6938 }
 0x2ce   :  { %v6941_v34 = vpop.eup %6940  ;;  %v292_v36 = vmul.f32 %v6939_v32, %v8206_v38 }
 0x2cf   :  { %v6943_v35 = vpop.eup %6942  ;;  %v294_v41 = vmul.f32 %v6941_v34, %v8212_v46 }
 0x2d0   :  { %v293_v37 = vmul.f32 %v6943_v35, %v8208_v40  ;;  %v6945_v39 = vpop.eup %6944 }
 0x2d1   :  { %v295_v43 = vmul.f32 %v6945_v39, %v8215_v49 }
 0x2d2   :  { %v296_v42 = vadd.f32 %v293_v37, %v292_v36 }
 0x2d4   :  { %v297_v44 = vadd.f32 %v296_v42, %v294_v41 }
 0x2d6   :  { %v298_v45 = vadd.f32 %v297_v44, %v295_v43 }
 0x2d8   :  { %v299_v47 = vrot.slane %v298_v45, 4 }
 0x2da   :  { %v300_v48 = vadd.f32 %v299_v47, %v298_v45 }
 0x2dc   :  { %v301_v50 = vrot.slane %v300_v48, 2 }
 0x2de   :  { %v302_v51 = vadd.f32 %v301_v50, %v300_v48 }
 0x2e0   :  { %v303_v52 = vrot.slane %v302_v51, 1 }
 0x2e2   :  { %v304_v53 = vadd.f32 %v303_v52, %v302_v51 }
 0x2e4   :  { %6946 = vtanh.f32 %v304_v53 }
 0x2ee   :  { %v6947_v59 = vpop.eup %6946 }
 0x2ef   :  { %v306_v61 = vmul.f32 %v6947_v59, %v8227_v2 }
 0x2f1   :  { %v307_v0 = vadd.f32 %v306_v61, %v222_v60 }
 0x2f3   :  { %v308_v1 = vmul.f32 %v307_v0, %v212_v6  ;;  %v499_v55 = vmul.f32 2.0, %v307_v0 }
 0x2f5   :  { %v309_v3 = vadd.f32 %v308_v1, %v8168_v12  ;;  %v500_v60 = vadd.f32 %v499_v55, %v8231_v7 }
 0x2f7   :  { %312 = vrot.lane.b32.xlu1 %v309_v3, %s8071_s7  ;;  %v322_v4 = vrot.slane %v309_v3, %v8178_v15  ;;  %310 = vrot.lane.b32.xlu0 %v309_v3, %s8072_s18  ;;  %v315_v53 = vmul.f32 %v309_v3, %v8218_v62 }
 0x2f9   :  { %v324_v5 = vmul.f32 %v322_v4, %v8184_v18  ;;  %v325_v8 = vmul.f32 %v322_v4, %v8190_v22  ;;  %v326_v9 = vmul.f32 %v322_v4, %v8182_v17  ;;  %v327_v10 = vmul.f32 %v322_v4, %v8188_v21 }
 0x2fb   :  { %6948 = vtanh.f32 %v324_v5 }
 0x2fc   :  { %6950 = vtanh.f32 %v325_v8 }
 0x2fd   :  { %6952 = vtanh.f32 %v326_v9 }
 0x2fe   :  { %6954 = vtanh.f32 %v327_v10 }
 0x305   :  { %v6949_v6 = vpop.eup %6948 }
 0x306   :  { %v6951_v13 = vpop.eup %6950 }
 0x307   :  { %v6953_v14 = vpop.eup %6952  ;;  %v332_v16 = vpack.c.bf16 %v6951_v13, %v6949_v6 }
 0x308   :  { %v6955_v19 = vpop.eup %6954 }
 0x309   :  { %6436 = vmatprep.subr.bf16.mxu0 %v332_v16  ;;  %v333_v20 = vpack.c.bf16 %v6955_v19, %v6953_v14 }
 0x30a   :  { %6437 = vmatpush3.bf16.msra.mxu0 %v332_v16 }
 0x30b   :  { %6438 = vmatprep.subr.bf16.mxu0 %v333_v20 }
 0x30e   :  { %6439 = vmatpush3.bf16.msra.mxu0 %v333_v20 }
 0x311   :  { %6441 = vmatmul.mubr.msk.bf16.vlgmr.msra.gmra.mrb[4].mxu0 %vm135_vm0, %v8200_v33 }
 0x312   :  { %6456 = vmatprep.mubr.msk.bf16.mxu0 %vm135_vm0, %v8163_v11 }
 0x369   :  { %v313_v48 = vpop.permute.xlu1 %312  ;;  %v311_v50 = vpop.permute.xlu0 %310 }
 0x36a   :  { %v314_v51 = vadd.f32 %v313_v48, %v311_v50 }
 0x36c   :  { %v316_v52 = vmul.f32 %v314_v51, %v8220_v63 }
 0x36e   :  { %v317_v56 = vadd.f32 %v316_v52, %v315_v53 }
 0x3e4   :  { %v6442_v23 = vpop.f32.mrb[4].mxu0 }
 0x3e5   :  { %v368_v24 = vpop.f32.mrb[5].mxu0 }
 0x3e6   :  { %6956 = vtanh.f32 %v368_v24  ;;  %v6443_v25 = vpop.f32.mrb[6].mxu0 }
 0x3e7   :  { %6958 = vtanh.f32 %v6442_v23  ;;  %v371_v26 = vpop.f32.mrb[7].mxu0 }
 0x3e8   :  { %6960 = vtanh.f32 %v371_v26 }
 0x3e9   :  { %6962 = vtanh.f32 %v6443_v25 }
 0x3f0   :  { %v6957_v27 = vpop.eup %6956 }
 0x3f1   :  { %v6959_v28 = vpop.eup %6958  ;;  %v387_v30 = vmul.f32 %v6957_v27, %v8206_v38 }
 0x3f2   :  { %v6961_v29 = vpop.eup %6960  ;;  %v389_v34 = vmul.f32 %v6959_v28, %v8212_v46 }
 0x3f3   :  { %v388_v31 = vmul.f32 %v6961_v29, %v8208_v40  ;;  %v6963_v32 = vpop.eup %6962 }
 0x3f4   :  { %v390_v36 = vmul.f32 %v6963_v32, %v8215_v49 }
 0x3f5   :  { %v391_v35 = vadd.f32 %v388_v31, %v387_v30 }
 0x3f7   :  { %v392_v37 = vadd.f32 %v391_v35, %v389_v34 }
 0x3f9   :  { %v393_v39 = vadd.f32 %v392_v37, %v390_v36 }
 0x3fb   :  { %v394_v41 = vrot.slane %v393_v39, 4 }
 0x3fd   :  { %v395_v42 = vadd.f32 %v394_v41, %v393_v39 }
 0x3ff   :  { %v396_v43 = vrot.slane %v395_v42, 2 }
 0x401   :  { %v397_v44 = vadd.f32 %v396_v43, %v395_v42 }
 0x403   :  { %v398_v45 = vrot.slane %v397_v44, 1 }
 0x405   :  { %v399_v47 = vadd.f32 %v398_v45, %v397_v44 }
 0x407   :  { %6964 = vtanh.f32 %v399_v47 }
 0x411   :  { %v6965_v54 = vpop.eup %6964 }
 0x412   :  { %v401_v57 = vmul.f32 %v6965_v54, %v8227_v2 }
 0x414   :  { %v402_v59 = vadd.f32 %v401_v57, %v317_v56  ;;  %v504_v57 = vstv %s6017_s30  ;;  %s6116_s30 = sld [smem:[#allocation6 + $0xa]] }
 0x416   :  { %v404_v61 = vmul.f32 %v403_v58, %v402_v59  ;;  %v501_v1 = vmul.f32 2.0, %v402_v59 }
 0x418   :  { %v405_v4 = vadd.f32 %v404_v61, %v8168_v12  ;;  %v502_v5 = vadd.f32 %v501_v1, %v500_v60 }
 0x41a   :  { %408 = vrot.lane.b32.xlu1 %v405_v4, %s8071_s7  ;;  %v418_v8 = vrot.slane %v405_v4, %v8178_v15  ;;  %406 = vrot.lane.b32.xlu0 %v405_v4, %s8072_s18  ;;  %v411_v52 = vmul.f32 %v405_v4, %v8218_v62 }
 0x41c   :  { %v420_v0 = vmul.f32 %v418_v8, %v8184_v18  ;;  %v421_v3 = vmul.f32 %v418_v8, %v8190_v22  ;;  %v422_v9 = vmul.f32 %v418_v8, %v8182_v17  ;;  %v423_v10 = vmul.f32 %v418_v8, %v8188_v21 }
 0x41e   :  { %6966 = vtanh.f32 %v420_v0 }
 0x41f   :  { %6968 = vtanh.f32 %v421_v3 }
 0x420   :  { %6970 = vtanh.f32 %v422_v9 }
 0x421   :  { %6972 = vtanh.f32 %v423_v10 }
 0x428   :  { %v6967_v7 = vpop.eup %6966 }
 0x429   :  { %v6969_v6 = vpop.eup %6968 }
 0x42a   :  { %v6971_v13 = vpop.eup %6970  ;;  %v428_v14 = vpack.c.bf16 %v6969_v6, %v6967_v7 }
 0x42b   :  { %v6973_v16 = vpop.eup %6972 }
 0x42c   :  { %6444 = vmatprep.subr.bf16.mxu1 %v428_v14  ;;  %v429_v19 = vpack.c.bf16 %v6973_v16, %v6971_v13 }
 0x42d   :  { %6445 = vmatpush3.bf16.msra.mxu1 %v428_v14 }
 0x42e   :  { %6446 = vmatprep.subr.bf16.mxu1 %v429_v19 }
 0x431   :  { %6447 = vmatpush3.bf16.msra.mxu1 %v429_v19 }
 0x434   :  { %6449 = vmatmul.mubr.msk.bf16.vlgmr.msra.gmra.mrb[4].mxu1 %vm135_vm0, %v8200_v33 }
 0x435   :  { %6464 = vmatprep.mubr.msk.bf16.mxu1 %vm135_vm0, %v8163_v11 }
 0x48c   :  { %v409_v47 = vpop.permute.xlu1 %408  ;;  %v407_v48 = vpop.permute.xlu0 %406 }
 0x48d   :  { %v410_v50 = vadd.f32 %v409_v47, %v407_v48 }
 0x48f   :  { %v412_v51 = vmul.f32 %v410_v50, %v8220_v63 }
 0x491   :  { %v413_v54 = vadd.f32 %v412_v51, %v411_v52  ;;  %v604_v51 = vstv %s8314_s9  ;;  %s9124_s9 = sld [smem:[#allocation5 + $0xb]] }
 0x507   :  { %v6450_v20 = vpop.f32.mrb[4].mxu1 }
 0x508   :  { %v464_v23 = vpop.f32.mrb[5].mxu1 }
 0x509   :  { %6974 = vtanh.f32 %v464_v23  ;;  %v6451_v24 = vpop.f32.mrb[6].mxu1 }
 0x50a   :  { %6976 = vtanh.f32 %v6450_v20  ;;  %v467_v25 = vpop.f32.mrb[7].mxu1 }
 0x50b   :  { %6978 = vtanh.f32 %v467_v25 }
 0x50c   :  { %6980 = vtanh.f32 %v6451_v24 }
 0x513   :  { %v6975_v26 = vpop.eup %6974 }
 0x514   :  { %v6977_v27 = vpop.eup %6976  ;;  %v483_v29 = vmul.f32 %v6975_v26, %v8206_v38 }
 0x515   :  { %v6979_v28 = vpop.eup %6978  ;;  %v485_v32 = vmul.f32 %v6977_v27, %v8212_v46 }
 0x516   :  { %v484_v30 = vmul.f32 %v6979_v28, %v8208_v40  ;;  %v6981_v31 = vpop.eup %6980 }
 0x517   :  { %v486_v35 = vmul.f32 %v6981_v31, %v8215_v49 }
 0x518   :  { %v487_v34 = vadd.f32 %v484_v30, %v483_v29 }
 0x51a   :  { %v488_v36 = vadd.f32 %v487_v34, %v485_v32 }
 0x51c   :  { %v489_v37 = vadd.f32 %v488_v36, %v486_v35 }
 0x51e   :  { %v490_v39 = vrot.slane %v489_v37, 4 }
 0x520   :  { %v491_v41 = vadd.f32 %v490_v39, %v489_v37 }
 0x522   :  { %v492_v42 = vrot.slane %v491_v41, 2 }
 0x524   :  { %v493_v43 = vadd.f32 %v492_v42, %v491_v41 }
 0x526   :  { %v494_v44 = vrot.slane %v493_v43, 1 }
 0x528   :  { %v495_v45 = vadd.f32 %v494_v44, %v493_v43 }
 0x52a   :  { %6982 = vtanh.f32 %v495_v45 }
 0x534   :  { %v6983_v53 = vpop.eup %6982 }
 0x535   :  { %v497_v55 = vmul.f32 %v6983_v53, %v8227_v2 }
 0x537   :  { %v498_v56 = vadd.f32 %v497_v55, %v413_v54 }
 0x539   :  { %v503_v58 = vadd.f32 %v502_v5, %v498_v56 }
 0x53b   :  { %v505_v59 = vmul.f32 %v504_v57, %v503_v58 }
 0x53d   :  { %v8293_v60 = vadd.f32 %v505_v59, %v8168_v12 }
 0x53f   :  { %513 = vrot.lane.b32.xlu1 %v8293_v60, %s8071_s7  ;;  %507 = vst [vmem:[#allocation7 + $0x1] sm:$0x1] %v8293_v60  ;;  %511 = vrot.lane.b32.xlu0 %v8293_v60, %s8072_s18  ;;  %v523_v61 = vrot.slane %v8293_v60, %v8178_v15  ;;  %v516_v45 = vmul.f32 %v8293_v60, %v8218_v62 }
 0x541   :  { %v525_v1 = vmul.f32 %v523_v61, %v8184_v18  ;;  %v526_v4 = vmul.f32 %v523_v61, %v8190_v22  ;;  %v527_v5 = vmul.f32 %v523_v61, %v8182_v17  ;;  %v528_v12 = vmul.f32 %v523_v61, %v8188_v21 }
 0x543   :  { %6984 = vtanh.f32 %v525_v1 }
 0x544   :  { %6986 = vtanh.f32 %v526_v4 }
 0x545   :  { %6988 = vtanh.f32 %v527_v5 }
 0x546   :  { %6990 = vtanh.f32 %v528_v12 }
 0x54d   :  { %v6985_v8 = vpop.eup %6984 }
 0x54e   :  { %v6987_v0 = vpop.eup %6986 }
 0x54f   :  { %v6989_v3 = vpop.eup %6988  ;;  %v533_v9 = vpack.c.bf16 %v6987_v0, %v6985_v8 }
 0x550   :  { %v6991_v10 = vpop.eup %6990 }
 0x551   :  { %6452 = vmatprep.subr.bf16.mxu0 %v533_v9  ;;  %v534_v7 = vpack.c.bf16 %v6991_v10, %v6989_v3 }
 0x552   :  { %6453 = vmatpush3.bf16.msra.mxu0 %v533_v9 }
 0x553   :  { %6454 = vmatprep.subr.bf16.mxu0 %v534_v7 }
 0x556   :  { %6455 = vmatpush3.bf16.msra.mxu0 %v534_v7 }
 0x559   :  { %6457 = vmatmul.mubr.msk.bf16.vlgmr.msra.gmra.mrb[8].mxu0 %vm135_vm0, %v8200_v33 }
 0x55a   :  { %6472 = vmatprep.mubr.msk.bf16.mxu0 %vm135_vm0, %v8163_v11 }
 0x5b1   :  { %v514_v41 = vpop.permute.xlu1 %513  ;;  %v512_v42 = vpop.permute.xlu0 %511 }
 0x5b2   :  { %v515_v43 = vadd.f32 %v514_v41, %v512_v42 }
 0x5b4   :  { %v517_v44 = vmul.f32 %v515_v43, %v8220_v63 }
 0x5b6   :  { %v518_v48 = vadd.f32 %v517_v44, %v516_v45 }
 0x62c   :  { %v6458_v6 = vpop.f32.mrb[8].mxu0 }
 0x62d   :  { %v569_v13 = vpop.f32.mrb[9].mxu0 }
 0x62e   :  { %6992 = vtanh.f32 %v569_v13  ;;  %v6459_v14 = vpop.f32.mrb[10].mxu0 }
 0x62f   :  { %6994 = vtanh.f32 %v6458_v6  ;;  %v572_v16 = vpop.f32.mrb[11].mxu0 }
 0x630   :  { %6996 = vtanh.f32 %v572_v16 }
 0x631   :  { %6998 = vtanh.f32 %v6459_v14 }
 0x638   :  { %v6993_v19 = vpop.eup %6992 }
 0x639   :  { %v6995_v20 = vpop.eup %6994  ;;  %v588_v24 = vmul.f32 %v6993_v19, %v8206_v38 }
 0x63a   :  { %v6997_v23 = vpop.eup %6996  ;;  %v590_v27 = vmul.f32 %v6995_v20, %v8212_v46 }
 0x63b   :  { %v589_v25 = vmul.f32 %v6997_v23, %v8208_v40  ;;  %v6999_v26 = vpop.eup %6998 }
 0x63c   :  { %v591_v29 = vmul.f32 %v6999_v26, %v8215_v49 }
 0x63d   :  { %v592_v28 = vadd.f32 %v589_v25, %v588_v24 }
 0x63f   :  { %v593_v30 = vadd.f32 %v592_v28, %v590_v27 }
 0x641   :  { %v594_v31 = vadd.f32 %v593_v30, %v591_v29 }
 0x643   :  { %v595_v32 = vrot.slane %v594_v31, 4 }
 0x645   :  { %v596_v34 = vadd.f32 %v595_v32, %v594_v31 }
 0x647   :  { %v597_v35 = vrot.slane %v596_v34, 2 }
 0x649   :  { %v598_v36 = vadd.f32 %v597_v35, %v596_v34 }
 0x64b   :  { %v599_v37 = vrot.slane %v598_v36, 1 }
 0x64d   :  { %v600_v39 = vadd.f32 %v599_v37, %v598_v36 }
 0x64f   :  { %7000 = vtanh.f32 %v600_v39 }
 0x659   :  { %v7001_v47 = vpop.eup %7000 }
 0x65a   :  { %v602_v50 = vmul.f32 %v7001_v47, %v8227_v2 }
 0x65c   :  { %v8321_v52 = vadd.f32 %v602_v50, %v518_v48 }
 0x65e   :  { %v605_v53 = vmul.f32 %v604_v51, %v8321_v52 }
 0x660   :  { %v606_v54 = vadd.f32 %v605_v53, %v8293_v60 }
 0x662   :  { %609 = vrot.lane.b32.xlu1 %v606_v54, %s8071_s7  ;;  %v619_v55 = vrot.slane %v606_v54, %v8178_v15  ;;  %607 = vrot.lane.b32.xlu0 %v606_v54, %s8072_s18  ;;  %v612_v39 = vmul.f32 %v606_v54, %v8218_v62 }
 0x664   :  { %v621_v56 = vmul.f32 %v619_v55, %v8184_v18  ;;  %v622_v57 = vmul.f32 %v619_v55, %v8190_v22  ;;  %v623_v58 = vmul.f32 %v619_v55, %v8182_v17  ;;  %v624_v59 = vmul.f32 %v619_v55, %v8188_v21 }
 0x666   :  { %7002 = vtanh.f32 %v621_v56 }
 0x667   :  { %7004 = vtanh.f32 %v622_v57 }
 0x668   :  { %7006 = vtanh.f32 %v623_v58 }
 0x669   :  { %7008 = vtanh.f32 %v624_v59 }
 0x670   :  { %v7003_v61 = vpop.eup %7002 }
 0x671   :  { %v7005_v1 = vpop.eup %7004 }
 0x672   :  { %v7007_v4 = vpop.eup %7006  ;;  %v629_v5 = vpack.c.bf16 %v7005_v1, %v7003_v61 }
 0x673   :  { %v7009_v12 = vpop.eup %7008 }
 0x674   :  { %6460 = vmatprep.subr.bf16.mxu1 %v629_v5  ;;  %v630_v8 = vpack.c.bf16 %v7009_v12, %v7007_v4 }
 0x675   :  { %6461 = vmatpush3.bf16.msra.mxu1 %v629_v5 }
 0x676   :  { %6462 = vmatprep.subr.bf16.mxu1 %v630_v8 }
 0x679   :  { %6463 = vmatpush3.bf16.msra.mxu1 %v630_v8 }
 0x67c   :  { %6465 = vmatmul.mubr.msk.bf16.vlgmr.msra.gmra.mrb[8].mxu1 %vm135_vm0, %v8200_v33 }
 0x67d   :  { %6480 = vmatprep.mubr.msk.bf16.mxu1 %vm135_vm0, %v8163_v11 }
 0x6d4   :  { %v610_v34 = vpop.permute.xlu1 %609  ;;  %v608_v35 = vpop.permute.xlu0 %607 }
 0x6d5   :  { %v611_v36 = vadd.f32 %v610_v34, %v608_v35 }
 0x6d7   :  { %v613_v37 = vmul.f32 %v611_v36, %v8220_v63 }
 0x6d9   :  { %v614_v42 = vadd.f32 %v613_v37, %v612_v39  ;;  %v795_v39 = vstv %s6026_s10  ;;  %s6125_s10 = sld [smem:[#allocation4 + $0xb]] }
 0x74f   :  { %v6466_v0 = vpop.f32.mrb[8].mxu1 }
 0x750   :  { %v665_v3 = vpop.f32.mrb[9].mxu1 }
 0x751   :  { %7010 = vtanh.f32 %v665_v3  ;;  %v6467_v9 = vpop.f32.mrb[10].mxu1 }
 0x752   :  { %7012 = vtanh.f32 %v6466_v0  ;;  %v668_v10 = vpop.f32.mrb[11].mxu1 }
 0x753   :  { %7014 = vtanh.f32 %v668_v10 }
 0x754   :  { %7016 = vtanh.f32 %v6467_v9 }
 0x75b   :  { %v7011_v7 = vpop.eup %7010 }
 0x75c   :  { %v7013_v6 = vpop.eup %7012  ;;  %v684_v14 = vmul.f32 %v7011_v7, %v8206_v38 }
 0x75d   :  { %v7015_v13 = vpop.eup %7014  ;;  %v686_v20 = vmul.f32 %v7013_v6, %v8212_v46 }
 0x75e   :  { %v685_v16 = vmul.f32 %v7015_v13, %v8208_v40  ;;  %v7017_v19 = vpop.eup %7016 }
 0x75f   :  { %v687_v24 = vmul.f32 %v7017_v19, %v8215_v49 }
 0x760   :  { %v688_v23 = vadd.f32 %v685_v16, %v684_v14 }
 0x762   :  { %v689_v25 = vadd.f32 %v688_v23, %v686_v20 }
 0x764   :  { %v690_v26 = vadd.f32 %v689_v25, %v687_v24 }
 0x766   :  { %v691_v27 = vrot.slane %v690_v26, 4 }
 0x768   :  { %v692_v28 = vadd.f32 %v691_v27, %v690_v26 }
 0x76a   :  { %v693_v29 = vrot.slane %v692_v28, 2 }
 0x76c   :  { %v694_v30 = vadd.f32 %v693_v29, %v692_v28 }
 0x76e   :  { %v695_v31 = vrot.slane %v694_v30, 1 }
 0x770   :  { %v696_v32 = vadd.f32 %v695_v31, %v694_v30 }
 0x772   :  { %7018 = vtanh.f32 %v696_v32 }
 0x77c   :  { %v7019_v41 = vpop.eup %7018 }
 0x77d   :  { %v698_v43 = vmul.f32 %v7019_v41, %v8227_v2 }
 0x77f   :  { %v699_v44 = vadd.f32 %v698_v43, %v614_v42 }
 0x781   :  { %v700_v45 = vmul.f32 %v699_v44, %v604_v51  ;;  %v891_v35 = vmul.f32 2.0, %v699_v44 }
 0x783   :  { %v701_v47 = vadd.f32 %v700_v45, %v8293_v60  ;;  %v892_v42 = vadd.f32 %v891_v35, %v8321_v52 }
 0x785   :  { %704 = vrot.lane.b32.xlu1 %v701_v47, %s8071_s7  ;;  %v714_v48 = vrot.slane %v701_v47, %v8178_v15  ;;  %702 = vrot.lane.b32.xlu0 %v701_v47, %s8072_s18  ;;  %v707_v32 = vmul.f32 %v701_v47, %v8218_v62 }
 0x787   :  { %v716_v50 = vmul.f32 %v714_v48, %v8184_v18  ;;  %v717_v53 = vmul.f32 %v714_v48, %v8190_v22  ;;  %v718_v54 = vmul.f32 %v714_v48, %v8182_v17  ;;  %v719_v55 = vmul.f32 %v714_v48, %v8188_v21 }
 0x789   :  { %7020 = vtanh.f32 %v716_v50 }
 0x78a   :  { %7022 = vtanh.f32 %v717_v53 }
 0x78b   :  { %7024 = vtanh.f32 %v718_v54 }
 0x78c   :  { %7026 = vtanh.f32 %v719_v55 }
 0x793   :  { %v7021_v51 = vpop.eup %7020 }
 0x794   :  { %v7023_v56 = vpop.eup %7022 }
 0x795   :  { %v7025_v57 = vpop.eup %7024  ;;  %v724_v58 = vpack.c.bf16 %v7023_v56, %v7021_v51 }
 0x796   :  { %v7027_v59 = vpop.eup %7026 }
 0x797   :  { %6468 = vmatprep.subr.bf16.mxu0 %v724_v58  ;;  %v725_v61 = vpack.c.bf16 %v7027_v59, %v7025_v57 }
 0x798   :  { %6469 = vmatpush3.bf16.msra.mxu0 %v724_v58 }
 0x799   :  { %6470 = vmatprep.subr.bf16.mxu0 %v725_v61 }
 0x79c   :  { %6471 = vmatpush3.bf16.msra.mxu0 %v725_v61 }
 0x79f   :  { %6473 = vmatmul.mubr.msk.bf16.vlgmr.msra.gmra.mrb[12].mxu0 %vm135_vm0, %v8200_v33 }
 0x7a0   :  { %6488 = vmatprep.mubr.msk.bf16.mxu0 %vm135_vm0, %v8163_v11 }
 0x7f7   :  { %v705_v28 = vpop.permute.xlu1 %704  ;;  %v703_v29 = vpop.permute.xlu0 %702 }
 0x7f8   :  { %v706_v30 = vadd.f32 %v705_v28, %v703_v29 }
 0x7fa   :  { %v708_v31 = vmul.f32 %v706_v30, %v8220_v63 }
 0x7fc   :  { %v709_v36 = vadd.f32 %v708_v31, %v707_v32 }
 0x872   :  { %v6474_v1 = vpop.f32.mrb[12].mxu0 }
 0x873   :  { %v760_v4 = vpop.f32.mrb[13].mxu0 }
 0x874   :  { %7028 = vtanh.f32 %v760_v4  ;;  %v6475_v5 = vpop.f32.mrb[14].mxu0 }
 0x875   :  { %7030 = vtanh.f32 %v6474_v1  ;;  %v763_v12 = vpop.f32.mrb[15].mxu0 }
 0x876   :  { %7032 = vtanh.f32 %v763_v12 }
 0x877   :  { %7034 = vtanh.f32 %v6475_v5 }
 0x87e   :  { %v7029_v8 = vpop.eup %7028 }
 0x87f   :  { %v7031_v0 = vpop.eup %7030  ;;  %v779_v9 = vmul.f32 %v7029_v8, %v8206_v38 }
 0x880   :  { %v7033_v3 = vpop.eup %7032  ;;  %v781_v6 = vmul.f32 %v7031_v0, %v8212_v46 }
 0x881   :  { %v780_v10 = vmul.f32 %v7033_v3, %v8208_v40  ;;  %v7035_v7 = vpop.eup %7034 }
 0x882   :  { %v782_v14 = vmul.f32 %v7035_v7, %v8215_v49 }
 0x883   :  { %v783_v13 = vadd.f32 %v780_v10, %v779_v9 }
 0x885   :  { %v784_v16 = vadd.f32 %v783_v13, %v781_v6 }
 0x887   :  { %v785_v19 = vadd.f32 %v784_v16, %v782_v14 }
 0x889   :  { %v786_v20 = vrot.slane %v785_v19, 4 }
 0x88b   :  { %v787_v23 = vadd.f32 %v786_v20, %v785_v19 }
 0x88d   :  { %v788_v24 = vrot.slane %v787_v23, 2 }
 0x88f   :  { %v789_v25 = vadd.f32 %v788_v24, %v787_v23 }
 0x891   :  { %v790_v26 = vrot.slane %v789_v25, 1 }
 0x893   :  { %v791_v27 = vadd.f32 %v790_v26, %v789_v25 }
 0x895   :  { %7036 = vtanh.f32 %v791_v27 }
 0x89f   :  { %v7037_v34 = vpop.eup %7036 }
 0x8a0   :  { %v793_v37 = vmul.f32 %v7037_v34, %v8227_v2 }
 0x8a2   :  { %v794_v41 = vadd.f32 %v793_v37, %v709_v36  ;;  %v896_v37 = vstv %s6028_s11  ;;  %s6127_s11 = sld [smem:[#allocation6 + $0xb]] }
 0x8a4   :  { %v796_v43 = vmul.f32 %v795_v39, %v794_v41  ;;  %v893_v45 = vmul.f32 2.0, %v794_v41 }
 0x8a6   :  { %v797_v48 = vadd.f32 %v796_v43, %v8293_v60  ;;  %v894_v50 = vadd.f32 %v893_v45, %v892_v42 }
 0x8a8   :  { %800 = vrot.lane.b32.xlu1 %v797_v48, %s8071_s7  ;;  %v810_v53 = vrot.slane %v797_v48, %v8178_v15  ;;  %798 = vrot.lane.b32.xlu0 %v797_v48, %s8072_s18  ;;  %v803_v31 = vmul.f32 %v797_v48, %v8218_v62 }
 0x8aa   :  { %v812_v44 = vmul.f32 %v810_v53, %v8184_v18  ;;  %v813_v47 = vmul.f32 %v810_v53, %v8190_v22  ;;  %v814_v54 = vmul.f32 %v810_v53, %v8182_v17  ;;  %v815_v55 = vmul.f32 %v810_v53, %v8188_v21 }
 0x8ac   :  { %7038 = vtanh.f32 %v812_v44 }
 0x8ad   :  { %7040 = vtanh.f32 %v813_v47 }
 0x8ae   :  { %7042 = vtanh.f32 %v814_v54 }
 0x8af   :  { %7044 = vtanh.f32 %v815_v55 }
 0x8b6   :  { %v7039_v52 = vpop.eup %7038 }
 0x8b7   :  { %v7041_v51 = vpop.eup %7040 }
 0x8b8   :  { %v7043_v56 = vpop.eup %7042  ;;  %v820_v57 = vpack.c.bf16 %v7041_v51, %v7039_v52 }
 0x8b9   :  { %v7045_v58 = vpop.eup %7044 }
 0x8ba   :  { %6476 = vmatprep.subr.bf16.mxu1 %v820_v57  ;;  %v821_v59 = vpack.c.bf16 %v7045_v58, %v7043_v56 }
 0x8bb   :  { %6477 = vmatpush3.bf16.msra.mxu1 %v820_v57 }
 0x8bc   :  { %6478 = vmatprep.subr.bf16.mxu1 %v821_v59 }
 0x8bf   :  { %6479 = vmatpush3.bf16.msra.mxu1 %v821_v59 }
 0x8c2   :  { %6481 = vmatmul.mubr.msk.bf16.vlgmr.msra.gmra.mrb[12].mxu1 %vm135_vm0, %v8200_v33 }
 0x8c3   :  { %6496 = vmatprep.mubr.msk.bf16.mxu1 %vm135_vm0, %v8163_v11 }
 0x91a   :  { %v801_v27 = vpop.permute.xlu1 %800  ;;  %v799_v28 = vpop.permute.xlu0 %798 }
 0x91b   :  { %v802_v29 = vadd.f32 %v801_v27, %v799_v28 }
 0x91d   :  { %v804_v30 = vmul.f32 %v802_v29, %v8220_v63 }
 0x91f   :  { %v805_v34 = vadd.f32 %v804_v30, %v803_v31  ;;  %v996_v30 = vstv %s8404_s12  ;;  %s9214_s12 = sld [smem:[#allocation5 + $0xc]] }
 0x995   :  { %v6482_v61 = vpop.f32.mrb[12].mxu1 }
 0x996   :  { %v856_v1 = vpop.f32.mrb[13].mxu1 }
 0x997   :  { %7046 = vtanh.f32 %v856_v1  ;;  %v6483_v4 = vpop.f32.mrb[14].mxu1 }
 0x998   :  { %7048 = vtanh.f32 %v6482_v61  ;;  %v859_v5 = vpop.f32.mrb[15].mxu1 }
 0x999   :  { %7050 = vtanh.f32 %v859_v5 }
 0x99a   :  { %7052 = vtanh.f32 %v6483_v4 }
 0x9a1   :  { %v7047_v12 = vpop.eup %7046 }
 0x9a2   :  { %v7049_v8 = vpop.eup %7048  ;;  %v875_v3 = vmul.f32 %v7047_v12, %v8206_v38 }
 0x9a3   :  { %v7051_v0 = vpop.eup %7050  ;;  %v877_v7 = vmul.f32 %v7049_v8, %v8212_v46 }
 0x9a4   :  { %v876_v9 = vmul.f32 %v7051_v0, %v8208_v40  ;;  %v7053_v10 = vpop.eup %7052 }
 0x9a5   :  { %v878_v13 = vmul.f32 %v7053_v10, %v8215_v49 }
 0x9a6   :  { %v879_v6 = vadd.f32 %v876_v9, %v875_v3 }
 0x9a8   :  { %v880_v14 = vadd.f32 %v879_v6, %v877_v7 }
 0x9aa   :  { %v881_v16 = vadd.f32 %v880_v14, %v878_v13 }
 0x9ac   :  { %v882_v19 = vrot.slane %v881_v16, 4 }
 0x9ae   :  { %v883_v20 = vadd.f32 %v882_v19, %v881_v16 }
 0x9b0   :  { %v884_v23 = vrot.slane %v883_v20, 2 }
 0x9b2   :  { %v885_v24 = vadd.f32 %v884_v23, %v883_v20 }
 0x9b4   :  { %v886_v25 = vrot.slane %v885_v24, 1 }
 0x9b6   :  { %v887_v26 = vadd.f32 %v886_v25, %v885_v24 }
 0x9b8   :  { %7054 = vtanh.f32 %v887_v26 }
 0x9c2   :  { %v7055_v32 = vpop.eup %7054 }
 0x9c3   :  { %v889_v35 = vmul.f32 %v7055_v32, %v8227_v2 }
 0x9c5   :  { %v890_v36 = vadd.f32 %v889_v35, %v805_v34 }
 0x9c7   :  { %v895_v39 = vadd.f32 %v894_v50, %v890_v36 }
 0x9c9   :  { %v897_v41 = vmul.f32 %v896_v37, %v895_v39 }
 0x9cb   :  { %v8383_v42 = vadd.f32 %v897_v41, %v8293_v60 }
 0x9cd   :  { %905 = vrot.lane.b32.xlu1 %v8383_v42, %s8071_s7  ;;  %899 = vst [vmem:[#allocation7 + $0x2] sm:$0x1] %v8383_v42  ;;  %903 = vrot.lane.b32.xlu0 %v8383_v42, %s8072_s18  ;;  %v915_v43 = vrot.slane %v8383_v42, %v8178_v15  ;;  %v908_v26 = vmul.f32 %v8383_v42, %v8218_v62 }
 0x9cf   :  { %v917_v45 = vmul.f32 %v915_v43, %v8184_v18  ;;  %v918_v48 = vmul.f32 %v915_v43, %v8190_v22  ;;  %v919_v50 = vmul.f32 %v915_v43, %v8182_v17  ;;  %v920_v60 = vmul.f32 %v915_v43, %v8188_v21 }
 0x9d1   :  { %7056 = vtanh.f32 %v917_v45 }
 0x9d2   :  { %7058 = vtanh.f32 %v918_v48 }
 0x9d3   :  { %7060 = vtanh.f32 %v919_v50 }
 0x9d4   :  { %7062 = vtanh.f32 %v920_v60 }
 0x9db   :  { %v7057_v53 = vpop.eup %7056 }
 0x9dc   :  { %v7059_v44 = vpop.eup %7058 }
 0x9dd   :  { %v7061_v47 = vpop.eup %7060  ;;  %v925_v54 = vpack.c.bf16 %v7059_v44, %v7057_v53 }
 0x9de   :  { %v7063_v55 = vpop.eup %7062 }
 0x9df   :  { %6484 = vmatprep.subr.bf16.mxu0 %v925_v54  ;;  %v926_v52 = vpack.c.bf16 %v7063_v55, %v7061_v47 }
 0x9e0   :  { %6485 = vmatpush3.bf16.msra.mxu0 %v925_v54 }
 0x9e1   :  { %6486 = vmatprep.subr.bf16.mxu0 %v926_v52 }
 0x9e4   :  { %6487 = vmatpush3.bf16.msra.mxu0 %v926_v52 }
 0x9e7   :  { %6489 = vmatmul.mubr.msk.bf16.vlgmr.msra.gmra.mrb[16].mxu0 %vm135_vm0, %v8200_v33 }
 0x9e8   :  { %6504 = vmatprep.mubr.msk.bf16.mxu0 %vm135_vm0, %v8163_v11 }
 0xa3f   :  { %v906_v20 = vpop.permute.xlu1 %905  ;;  %v904_v23 = vpop.permute.xlu0 %903 }
 0xa40   :  { %v907_v24 = vadd.f32 %v906_v20, %v904_v23 }
 0xa42   :  { %v909_v25 = vmul.f32 %v907_v24, %v8220_v63 }
 0xa44   :  { %v910_v28 = vadd.f32 %v909_v25, %v908_v26 }
 0xaba   :  { %v6490_v51 = vpop.f32.mrb[16].mxu0 }
 0xabb   :  { %v961_v56 = vpop.f32.mrb[17].mxu0 }
 0xabc   :  { %7064 = vtanh.f32 %v961_v56  ;;  %v6491_v57 = vpop.f32.mrb[18].mxu0 }
 0xabd   :  { %7066 = vtanh.f32 %v6490_v51  ;;  %v964_v58 = vpop.f32.mrb[19].mxu0 }
 0xabe   :  { %7068 = vtanh.f32 %v964_v58 }
 0xabf   :  { %7070 = vtanh.f32 %v6491_v57 }
 0xac6   :  { %v7065_v59 = vpop.eup %7064 }
 0xac7   :  { %v7067_v61 = vpop.eup %7066  ;;  %v980_v4 = vmul.f32 %v7065_v59, %v8206_v38 }
 0xac8   :  { %v7069_v1 = vpop.eup %7068  ;;  %v982_v8 = vmul.f32 %v7067_v61, %v8212_v46 }
 0xac9   :  { %v981_v5 = vmul.f32 %v7069_v1, %v8208_v40  ;;  %v7071_v12 = vpop.eup %7070 }
 0xaca   :  { %v983_v3 = vmul.f32 %v7071_v12, %v8215_v49 }
 0xacb   :  { %v984_v0 = vadd.f32 %v981_v5, %v980_v4 }
 0xacd   :  { %v985_v9 = vadd.f32 %v984_v0, %v982_v8 }
 0xacf   :  { %v986_v10 = vadd.f32 %v985_v9, %v983_v3 }
 0xad1   :  { %v987_v7 = vrot.slane %v986_v10, 4 }
 0xad3   :  { %v988_v6 = vadd.f32 %v987_v7, %v986_v10 }
 0xad5   :  { %v989_v13 = vrot.slane %v988_v6, 2 }
 0xad7   :  { %v990_v14 = vadd.f32 %v989_v13, %v988_v6 }
 0xad9   :  { %v991_v16 = vrot.slane %v990_v14, 1 }
 0xadb   :  { %v992_v19 = vadd.f32 %v991_v16, %v990_v14 }
 0xadd   :  { %7072 = vtanh.f32 %v992_v19 }
 0xae7   :  { %v7073_v27 = vpop.eup %7072 }
 0xae8   :  { %v994_v29 = vmul.f32 %v7073_v27, %v8227_v2 }
 0xaea   :  { %v8411_v31 = vadd.f32 %v994_v29, %v910_v28 }
 0xaec   :  { %v997_v32 = vmul.f32 %v996_v30, %v8411_v31 }
 0xaee   :  { %v998_v34 = vadd.f32 %v997_v32, %v8383_v42 }
 0xaf0   :  { %1001 = vrot.lane.b32.xlu1 %v998_v34, %s8071_s7  ;;  %v1011_v35 = vrot.slane %v998_v34, %v8178_v15  ;;  %999 = vrot.lane.b32.xlu0 %v998_v34, %s8072_s18  ;;  %v1004_v19 = vmul.f32 %v998_v34, %v8218_v62 }
 0xaf2   :  { %v1013_v36 = vmul.f32 %v1011_v35, %v8184_v18  ;;  %v1014_v37 = vmul.f32 %v1011_v35, %v8190_v22  ;;  %v1015_v39 = vmul.f32 %v1011_v35, %v8182_v17  ;;  %v1016_v41 = vmul.f32 %v1011_v35, %v8188_v21 }
 0xaf4   :  { %7074 = vtanh.f32 %v1013_v36 }
 0xaf5   :  { %7076 = vtanh.f32 %v1014_v37 }
 0xaf6   :  { %7078 = vtanh.f32 %v1015_v39 }
 0xaf7   :  { %7080 = vtanh.f32 %v1016_v41 }
 0xafe   :  { %v7075_v43 = vpop.eup %7074 }
 0xaff   :  { %v7077_v45 = vpop.eup %7076 }
 0xb00   :  { %v7079_v48 = vpop.eup %7078  ;;  %v1021_v50 = vpack.c.bf16 %v7077_v45, %v7075_v43 }
 0xb01   :  { %v7081_v60 = vpop.eup %7080 }
 0xb02   :  { %6492 = vmatprep.subr.bf16.mxu1 %v1021_v50  ;;  %v1022_v53 = vpack.c.bf16 %v7081_v60, %v7079_v48 }
 0xb03   :  { %6493 = vmatpush3.bf16.msra.mxu1 %v1021_v50 }
 0xb04   :  { %6494 = vmatprep.subr.bf16.mxu1 %v1022_v53 }
 0xb07   :  { %6495 = vmatpush3.bf16.msra.mxu1 %v1022_v53 }
 0xb0a   :  { %6497 = vmatmul.mubr.msk.bf16.vlgmr.msra.gmra.mrb[16].mxu1 %vm135_vm0, %v8200_v33 }
 0xb0b   :  { %6512 = vmatprep.mubr.msk.bf16.mxu1 %vm135_vm0, %v8163_v11 }
 0xb62   :  { %v1002_v6 = vpop.permute.xlu1 %1001  ;;  %v1000_v13 = vpop.permute.xlu0 %999 }
 0xb63   :  { %v1003_v14 = vadd.f32 %v1002_v6, %v1000_v13 }
 0xb65   :  { %v1005_v16 = vmul.f32 %v1003_v14, %v8220_v63 }
 0xb67   :  { %v1006_v23 = vadd.f32 %v1005_v16, %v1004_v19  ;;  %v1187_v19 = vstv %s6037_s13  ;;  %s6136_s13 = sld [smem:[#allocation4 + $0xc]] }
 0xbdd   :  { %v6498_v44 = vpop.f32.mrb[16].mxu1 }
 0xbde   :  { %v1057_v47 = vpop.f32.mrb[17].mxu1 }
 0xbdf   :  { %7082 = vtanh.f32 %v1057_v47  ;;  %v6499_v54 = vpop.f32.mrb[18].mxu1 }
 0xbe0   :  { %7084 = vtanh.f32 %v6498_v44  ;;  %v1060_v55 = vpop.f32.mrb[19].mxu1 }
 0xbe1   :  { %7086 = vtanh.f32 %v1060_v55 }
 0xbe2   :  { %7088 = vtanh.f32 %v6499_v54 }
 0xbe9   :  { %v7083_v52 = vpop.eup %7082 }
 0xbea   :  { %v7085_v51 = vpop.eup %7084  ;;  %v1076_v57 = vmul.f32 %v7083_v52, %v8206_v38 }
 0xbeb   :  { %v7087_v56 = vpop.eup %7086  ;;  %v1078_v61 = vmul.f32 %v7085_v51, %v8212_v46 }
 0xbec   :  { %v1077_v58 = vmul.f32 %v7087_v56, %v8208_v40  ;;  %v7089_v59 = vpop.eup %7088 }
 0xbed   :  { %v1079_v4 = vmul.f32 %v7089_v59, %v8215_v49 }
 0xbee   :  { %v1080_v1 = vadd.f32 %v1077_v58, %v1076_v57 }
 0xbf0   :  { %v1081_v5 = vadd.f32 %v1080_v1, %v1078_v61 }
 0xbf2   :  { %v1082_v12 = vadd.f32 %v1081_v5, %v1079_v4 }
 0xbf4   :  { %v1083_v8 = vrot.slane %v1082_v12, 4 }
 0xbf6   :  { %v1084_v0 = vadd.f32 %v1083_v8, %v1082_v12 }
 0xbf8   :  { %v1085_v3 = vrot.slane %v1084_v0, 2 }
 0xbfa   :  { %v1086_v9 = vadd.f32 %v1085_v3, %v1084_v0 }
 0xbfc   :  { %v1087_v10 = vrot.slane %v1086_v9, 1 }
 0xbfe   :  { %v1088_v7 = vadd.f32 %v1087_v10, %v1086_v9 }
 0xc00   :  { %7090 = vtanh.f32 %v1088_v7 }
 0xc0a   :  { %v7091_v20 = vpop.eup %7090 }
 0xc0b   :  { %v1090_v24 = vmul.f32 %v7091_v20, %v8227_v2 }
 0xc0d   :  { %v1091_v25 = vadd.f32 %v1090_v24, %v1006_v23 }
 0xc0f   :  { %v1092_v26 = vmul.f32 %v1091_v25, %v996_v30  ;;  %v1283_v13 = vmul.f32 2.0, %v1091_v25 }
 0xc11   :  { %v1093_v27 = vadd.f32 %v1092_v26, %v8383_v42  ;;  %v1284_v23 = vadd.f32 %v1283_v13, %v8411_v31 }
 0xc13   :  { %1096 = vrot.lane.b32.xlu1 %v1093_v27, %s8071_s7  ;;  %v1106_v28 = vrot.slane %v1093_v27, %v8178_v15  ;;  %1094 = vrot.lane.b32.xlu0 %v1093_v27, %s8072_s18  ;;  %v1099_v7 = vmul.f32 %v1093_v27, %v8218_v62 }
 0xc15   :  { %v1108_v29 = vmul.f32 %v1106_v28, %v8184_v18  ;;  %v1109_v32 = vmul.f32 %v1106_v28, %v8190_v22  ;;  %v1110_v34 = vmul.f32 %v1106_v28, %v8182_v17  ;;  %v1111_v35 = vmul.f32 %v1106_v28, %v8188_v21 }
 0xc17   :  { %7092 = vtanh.f32 %v1108_v29 }
 0xc18   :  { %7094 = vtanh.f32 %v1109_v32 }
 0xc19   :  { %7096 = vtanh.f32 %v1110_v34 }
 0xc1a   :  { %7098 = vtanh.f32 %v1111_v35 }
 0xc21   :  { %v7093_v30 = vpop.eup %7092 }
 0xc22   :  { %v7095_v36 = vpop.eup %7094 }
 0xc23   :  { %v7097_v37 = vpop.eup %7096  ;;  %v1116_v39 = vpack.c.bf16 %v7095_v36, %v7093_v30 }
 0xc24   :  { %v7099_v41 = vpop.eup %7098 }
 0xc25   :  { %6500 = vmatprep.subr.bf16.mxu0 %v1116_v39  ;;  %v1117_v43 = vpack.c.bf16 %v7099_v41, %v7097_v37 }
 0xc26   :  { %6501 = vmatpush3.bf16.msra.mxu0 %v1116_v39 }
 0xc27   :  { %6502 = vmatprep.subr.bf16.mxu0 %v1117_v43 }
 0xc2a   :  { %6503 = vmatpush3.bf16.msra.mxu0 %v1117_v43 }
 0xc2d   :  { %6505 = vmatmul.mubr.msk.bf16.vlgmr.msra.gmra.mrb[20].mxu0 %vm135_vm0, %v8200_v33 }
 0xc2e   :  { %6520 = vmatprep.mubr.msk.bf16.mxu0 %vm135_vm0, %v8163_v11 }
 0xc85   :  { %v1097_v0 = vpop.permute.xlu1 %1096  ;;  %v1095_v3 = vpop.permute.xlu0 %1094 }
 0xc86   :  { %v1098_v9 = vadd.f32 %v1097_v0, %v1095_v3 }
 0xc88   :  { %v1100_v10 = vmul.f32 %v1098_v9, %v8220_v63 }
 0xc8a   :  { %v1101_v14 = vadd.f32 %v1100_v10, %v1099_v7 }
 0xd00   :  { %v6506_v45 = vpop.f32.mrb[20].mxu0 }
 0xd01   :  { %v1152_v48 = vpop.f32.mrb[21].mxu0 }
 0xd02   :  { %7100 = vtanh.f32 %v1152_v48  ;;  %v6507_v50 = vpop.f32.mrb[22].mxu0 }
 0xd03   :  { %7102 = vtanh.f32 %v6506_v45  ;;  %v1155_v60 = vpop.f32.mrb[23].mxu0 }
 0xd04   :  { %7104 = vtanh.f32 %v1155_v60 }
 0xd05   :  { %7106 = vtanh.f32 %v6507_v50 }
 0xd0c   :  { %v7101_v53 = vpop.eup %7100 }
 0xd0d   :  { %v7103_v44 = vpop.eup %7102  ;;  %v1171_v54 = vmul.f32 %v7101_v53, %v8206_v38 }
 0xd0e   :  { %v7105_v47 = vpop.eup %7104  ;;  %v1173_v51 = vmul.f32 %v7103_v44, %v8212_v46 }
 0xd0f   :  { %v1172_v55 = vmul.f32 %v7105_v47, %v8208_v40  ;;  %v7107_v52 = vpop.eup %7106 }
 0xd10   :  { %v1174_v57 = vmul.f32 %v7107_v52, %v8215_v49 }
 0xd11   :  { %v1175_v56 = vadd.f32 %v1172_v55, %v1171_v54 }
 0xd13   :  { %v1176_v58 = vadd.f32 %v1175_v56, %v1173_v51 }
 0xd15   :  { %v1177_v59 = vadd.f32 %v1176_v58, %v1174_v57 }
 0xd17   :  { %v1178_v61 = vrot.slane %v1177_v59, 4 }
 0xd19   :  { %v1179_v1 = vadd.f32 %v1178_v61, %v1177_v59 }
 0xd1b   :  { %v1180_v4 = vrot.slane %v1179_v1, 2 }
 0xd1d   :  { %v1181_v5 = vadd.f32 %v1180_v4, %v1179_v1 }
 0xd1f   :  { %v1182_v12 = vrot.slane %v1181_v5, 1 }
 0xd21   :  { %v1183_v8 = vadd.f32 %v1182_v12, %v1181_v5 }
 0xd23   :  { %7108 = vtanh.f32 %v1183_v8 }
 0xd2d   :  { %v7109_v6 = vpop.eup %7108 }
 0xd2e   :  { %v1185_v16 = vmul.f32 %v7109_v6, %v8227_v2 }
 0xd30   :  { %v1186_v20 = vadd.f32 %v1185_v16, %v1101_v14  ;;  %v1288_v16 = vstv %s6039_s0  ;;  %s6138_s0 = sld [smem:[#allocation6 + $0xc]] }
 0xd32   :  { %v1188_v24 = vmul.f32 %v1187_v19, %v1186_v20  ;;  %v1285_v26 = vmul.f32 2.0, %v1186_v20 }
 0xd34   :  { %v1189_v28 = vadd.f32 %v1188_v24, %v8383_v42  ;;  %v1286_v29 = vadd.f32 %v1285_v26, %v1284_v23 }
 0xd36   :  { %1192 = vrot.lane.b32.xlu1 %v1189_v28, %s8071_s7  ;;  %v1202_v32 = vrot.slane %v1189_v28, %v8178_v15  ;;  %1190 = vrot.lane.b32.xlu0 %v1189_v28, %s8072_s18  ;;  %v1195_v10 = vmul.f32 %v1189_v28, %v8218_v62 }
 0xd38   :  { %v1204_v25 = vmul.f32 %v1202_v32, %v8184_v18  ;;  %v1205_v27 = vmul.f32 %v1202_v32, %v8190_v22  ;;  %v1206_v34 = vmul.f32 %v1202_v32, %v8182_v17  ;;  %v1207_v35 = vmul.f32 %v1202_v32, %v8188_v21 }
 0xd3a   :  { %7110 = vtanh.f32 %v1204_v25 }
 0xd3b   :  { %7112 = vtanh.f32 %v1205_v27 }
 0xd3c   :  { %7114 = vtanh.f32 %v1206_v34 }
 0xd3d   :  { %7116 = vtanh.f32 %v1207_v35 }
 0xd44   :  { %v7111_v31 = vpop.eup %7110 }
 0xd45   :  { %v7113_v30 = vpop.eup %7112 }
 0xd46   :  { %v7115_v36 = vpop.eup %7114  ;;  %v1212_v37 = vpack.c.bf16 %v7113_v30, %v7111_v31 }
 0xd47   :  { %v7117_v39 = vpop.eup %7116 }
 0xd48   :  { %6508 = vmatprep.subr.bf16.mxu1 %v1212_v37  ;;  %v1213_v41 = vpack.c.bf16 %v7117_v39, %v7115_v36 }
 0xd49   :  { %6509 = vmatpush3.bf16.msra.mxu1 %v1212_v37 }
 0xd4a   :  { %6510 = vmatprep.subr.bf16.mxu1 %v1213_v41 }
 0xd4d   :  { %6511 = vmatpush3.bf16.msra.mxu1 %v1213_v41 }
 0xd50   :  { %6513 = vmatmul.mubr.msk.bf16.vlgmr.msra.gmra.mrb[20].mxu1 %vm135_vm0, %v8200_v33 }
 0xd51   :  { %6528 = vmatprep.mubr.msk.bf16.mxu1 %vm135_vm0, %v8163_v11 }
 0xda8   :  { %v1193_v8 = vpop.permute.xlu1 %1192  ;;  %v1191_v0 = vpop.permute.xlu0 %1190 }
 0xda9   :  { %v1194_v3 = vadd.f32 %v1193_v8, %v1191_v0 }
 0xdab   :  { %v1196_v9 = vmul.f32 %v1194_v3, %v8220_v63 }
 0xdad   :  { %v1197_v6 = vadd.f32 %v1196_v9, %v1195_v10  ;;  %v1388_v9 = vstv %s8494_s5  ;;  %s9304_s5 = sld [smem:[#allocation5 + $0xd]] }
 0xe23   :  { %v6514_v43 = vpop.f32.mrb[20].mxu1 }
 0xe24   :  { %v1248_v45 = vpop.f32.mrb[21].mxu1 }
 0xe25   :  { %7118 = vtanh.f32 %v1248_v45  ;;  %v6515_v48 = vpop.f32.mrb[22].mxu1 }
 0xe26   :  { %7120 = vtanh.f32 %v6514_v43  ;;  %v1251_v50 = vpop.f32.mrb[23].mxu1 }
 0xe27   :  { %7122 = vtanh.f32 %v1251_v50 }
 0xe28   :  { %7124 = vtanh.f32 %v6515_v48 }
 0xe2f   :  { %v7119_v60 = vpop.eup %7118 }
 0xe30   :  { %v7121_v53 = vpop.eup %7120  ;;  %v1267_v47 = vmul.f32 %v7119_v60, %v8206_v38 }
 0xe31   :  { %v7123_v44 = vpop.eup %7122  ;;  %v1269_v52 = vmul.f32 %v7121_v53, %v8212_v46 }
 0xe32   :  { %v1268_v54 = vmul.f32 %v7123_v44, %v8208_v40  ;;  %v7125_v55 = vpop.eup %7124 }
 0xe33   :  { %v1270_v56 = vmul.f32 %v7125_v55, %v8215_v49 }
 0xe34   :  { %v1271_v51 = vadd.f32 %v1268_v54, %v1267_v47 }
 0xe36   :  { %v1272_v57 = vadd.f32 %v1271_v51, %v1269_v52 }
 0xe38   :  { %v1273_v58 = vadd.f32 %v1272_v57, %v1270_v56 }
 0xe3a   :  { %v1274_v59 = vrot.slane %v1273_v58, 4 }
 0xe3c   :  { %v1275_v61 = vadd.f32 %v1274_v59, %v1273_v58 }
 0xe3e   :  { %v1276_v1 = vrot.slane %v1275_v61, 2 }
 0xe40   :  { %v1277_v4 = vadd.f32 %v1276_v1, %v1275_v61 }
 0xe42   :  { %v1278_v5 = vrot.slane %v1277_v4, 1 }
 0xe44   :  { %v1279_v12 = vadd.f32 %v1278_v5, %v1277_v4 }
 0xe46   :  { %7126 = vtanh.f32 %v1279_v12 }
 0xe50   :  { %v7127_v7 = vpop.eup %7126 }
 0xe51   :  { %v1281_v13 = vmul.f32 %v7127_v7, %v8227_v2 }
 0xe53   :  { %v1282_v14 = vadd.f32 %v1281_v13, %v1197_v6 }
 0xe55   :  { %v1287_v19 = vadd.f32 %v1286_v29, %v1282_v14 }
 0xe57   :  { %v1289_v20 = vmul.f32 %v1288_v16, %v1287_v19 }
 0xe59   :  { %v8473_v23 = vadd.f32 %v1289_v20, %v8383_v42 }
 0xe5b   :  { %1297 = vrot.lane.b32.xlu1 %v8473_v23, %s8071_s7  ;;  %1291 = vst [vmem:[#allocation7 + $0x3] sm:$0x1] %v8473_v23  ;;  %1295 = vrot.lane.b32.xlu0 %v8473_v23, %s8072_s18  ;;  %v1307_v24 = vrot.slane %v8473_v23, %v8178_v15  ;;  %v1300_v12 = vmul.f32 %v8473_v23, %v8218_v62 }
 0xe5d   :  { %v1309_v26 = vmul.f32 %v1307_v24, %v8184_v18  ;;  %v1310_v28 = vmul.f32 %v1307_v24, %v8190_v22  ;;  %v1311_v29 = vmul.f32 %v1307_v24, %v8182_v17  ;;  %v1312_v42 = vmul.f32 %v1307_v24, %v8188_v21 }
 0xe5f   :  { %7128 = vtanh.f32 %v1309_v26 }
 0xe60   :  { %7130 = vtanh.f32 %v1310_v28 }
 0xe61   :  { %7132 = vtanh.f32 %v1311_v29 }
 0xe62   :  { %7134 = vtanh.f32 %v1312_v42 }
 0xe69   :  { %v7129_v32 = vpop.eup %7128 }
 0xe6a   :  { %v7131_v25 = vpop.eup %7130 }
 0xe6b   :  { %v7133_v27 = vpop.eup %7132  ;;  %v1317_v34 = vpack.c.bf16 %v7131_v25, %v7129_v32 }
 0xe6c   :  { %v7135_v35 = vpop.eup %7134 }
 0xe6d   :  { %6516 = vmatprep.subr.bf16.mxu0 %v1317_v34  ;;  %v1318_v31 = vpack.c.bf16 %v7135_v35, %v7133_v27 }
 0xe6e   :  { %6517 = vmatpush3.bf16.msra.mxu0 %v1317_v34 }
 0xe6f   :  { %6518 = vmatprep.subr.bf16.mxu0 %v1318_v31 }
 0xe72   :  { %6519 = vmatpush3.bf16.msra.mxu0 %v1318_v31 }
 0xe75   :  { %6521 = vmatmul.mubr.msk.bf16.vlgmr.msra.gmra.mrb[24].mxu0 %vm135_vm0, %v8200_v33 }
 0xe76   :  { %6536 = vmatprep.mubr.msk.bf16.mxu0 %vm135_vm0, %v8163_v11 }
 0xecd   :  { %v1298_v61 = vpop.permute.xlu1 %1297  ;;  %v1296_v1 = vpop.permute.xlu0 %1295 }
 0xece   :  { %v1299_v4 = vadd.f32 %v1298_v61, %v1296_v1 }
 0xed0   :  { %v1301_v5 = vmul.f32 %v1299_v4, %v8220_v63 }
 0xed2   :  { %v1302_v0 = vadd.f32 %v1301_v5, %v1300_v12 }
 0xf48   :  { %v6522_v30 = vpop.f32.mrb[24].mxu0 }
 0xf49   :  { %v1353_v36 = vpop.f32.mrb[25].mxu0 }
 0xf4a   :  { %7136 = vtanh.f32 %v1353_v36  ;;  %v6523_v37 = vpop.f32.mrb[26].mxu0 }
 0xf4b   :  { %7138 = vtanh.f32 %v6522_v30  ;;  %v1356_v39 = vpop.f32.mrb[27].mxu0 }
 0xf4c   :  { %7140 = vtanh.f32 %v1356_v39 }
 0xf4d   :  { %7142 = vtanh.f32 %v6523_v37 }
 0xf54   :  { %v7137_v41 = vpop.eup %7136 }
 0xf55   :  { %v7139_v43 = vpop.eup %7138  ;;  %v1372_v48 = vmul.f32 %v7137_v41, %v8206_v38 }
 0xf56   :  { %v7141_v45 = vpop.eup %7140  ;;  %v1374_v53 = vmul.f32 %v7139_v43, %v8212_v46 }
 0xf57   :  { %v1373_v50 = vmul.f32 %v7141_v45, %v8208_v40  ;;  %v7143_v60 = vpop.eup %7142 }
 0xf58   :  { %v1375_v47 = vmul.f32 %v7143_v60, %v8215_v49 }
 0xf59   :  { %v1376_v44 = vadd.f32 %v1373_v50, %v1372_v48 }
 0xf5b   :  { %v1377_v54 = vadd.f32 %v1376_v44, %v1374_v53 }
 0xf5d   :  { %v1378_v55 = vadd.f32 %v1377_v54, %v1375_v47 }
 0xf5f   :  { %v1379_v52 = vrot.slane %v1378_v55, 4 }
 0xf61   :  { %v1380_v51 = vadd.f32 %v1379_v52, %v1378_v55 }
 0xf63   :  { %v1381_v56 = vrot.slane %v1380_v51, 2 }
 0xf65   :  { %v1382_v57 = vadd.f32 %v1381_v56, %v1380_v51 }
 0xf67   :  { %v1383_v58 = vrot.slane %v1382_v57, 1 }
 0xf69   :  { %v1384_v59 = vadd.f32 %v1383_v58, %v1382_v57 }
 0xf6b   :  { %7144 = vtanh.f32 %v1384_v59 }
 0xf75   :  { %v7145_v8 = vpop.eup %7144 }
 0xf76   :  { %v1386_v3 = vmul.f32 %v7145_v8, %v8227_v2 }
 0xf78   :  { %v8501_v10 = vadd.f32 %v1386_v3, %v1302_v0 }
 0xf7a   :  { %v1389_v7 = vmul.f32 %v1388_v9, %v8501_v10 }
 0xf7c   :  { %v1390_v6 = vadd.f32 %v1389_v7, %v8473_v23 }
 0xf7e   :  { %1393 = vrot.lane.b32.xlu1 %v1390_v6, %s8071_s7  ;;  %v1403_v13 = vrot.slane %v1390_v6, %v8178_v15  ;;  %1391 = vrot.lane.b32.xlu0 %v1390_v6, %s8072_s18  ;;  %v1396_v59 = vmul.f32 %v1390_v6, %v8218_v62 }
 0xf80   :  { %v1405_v14 = vmul.f32 %v1403_v13, %v8184_v18  ;;  %v1406_v16 = vmul.f32 %v1403_v13, %v8190_v22  ;;  %v1407_v19 = vmul.f32 %v1403_v13, %v8182_v17  ;;  %v1408_v20 = vmul.f32 %v1403_v13, %v8188_v21 }
 0xf82   :  { %7146 = vtanh.f32 %v1405_v14 }
 0xf83   :  { %7148 = vtanh.f32 %v1406_v16 }
 0xf84   :  { %7150 = vtanh.f32 %v1407_v19 }
 0xf85   :  { %7152 = vtanh.f32 %v1408_v20 }
 0xf8c   :  { %v7147_v24 = vpop.eup %7146 }
 0xf8d   :  { %v7149_v26 = vpop.eup %7148 }
 0xf8e   :  { %v7151_v28 = vpop.eup %7150  ;;  %v1413_v29 = vpack.c.bf16 %v7149_v26, %v7147_v24 }
 0xf8f   :  { %v7153_v42 = vpop.eup %7152 }
 0xf90   :  { %6524 = vmatprep.subr.bf16.mxu1 %v1413_v29  ;;  %v1414_v32 = vpack.c.bf16 %v7153_v42, %v7151_v28 }
 0xf91   :  { %6525 = vmatpush3.bf16.msra.mxu1 %v1413_v29 }
 0xf92   :  { %6526 = vmatprep.subr.bf16.mxu1 %v1414_v32 }
 0xf95   :  { %6527 = vmatpush3.bf16.msra.mxu1 %v1414_v32 }
 0xf98   :  { %6529 = vmatmul.mubr.msk.bf16.vlgmr.msra.gmra.mrb[24].mxu1 %vm135_vm0, %v8200_v33 }
 0xf99   :  { %6544 = vmatprep.mubr.msk.bf16.mxu1 %vm135_vm0, %v8163_v11 }
 0xff0   :  { %v1394_v51 = vpop.permute.xlu1 %1393  ;;  %v1392_v56 = vpop.permute.xlu0 %1391 }
 0xff1   :  { %v1395_v57 = vadd.f32 %v1394_v51, %v1392_v56 }
 0xff3   :  { %v1397_v58 = vmul.f32 %v1395_v57, %v8220_v63 }
 0xff5   :  { %v1398_v1 = vadd.f32 %v1397_v58, %v1396_v59  ;;  %v1579_v59 = vstv %s6048_s1  ;;  %s6147_s1 = sld [smem:[#allocation4 + $0xd]] }
0x106b   :  { %v6530_v25 = vpop.f32.mrb[24].mxu1 }
0x106c   :  { %v1449_v27 = vpop.f32.mrb[25].mxu1 }
0x106d   :  { %7154 = vtanh.f32 %v1449_v27  ;;  %v6531_v34 = vpop.f32.mrb[26].mxu1 }
0x106e   :  { %7156 = vtanh.f32 %v6530_v25  ;;  %v1452_v35 = vpop.f32.mrb[27].mxu1 }
0x106f   :  { %7158 = vtanh.f32 %v1452_v35 }
0x1070   :  { %7160 = vtanh.f32 %v6531_v34 }
0x1077   :  { %v7155_v31 = vpop.eup %7154 }
0x1078   :  { %v7157_v30 = vpop.eup %7156  ;;  %v1468_v37 = vmul.f32 %v7155_v31, %v8206_v38 }
0x1079   :  { %v7159_v36 = vpop.eup %7158  ;;  %v1470_v43 = vmul.f32 %v7157_v30, %v8212_v46 }
0x107a   :  { %v1469_v39 = vmul.f32 %v7159_v36, %v8208_v40  ;;  %v7161_v41 = vpop.eup %7160 }
0x107b   :  { %v1471_v48 = vmul.f32 %v7161_v41, %v8215_v49 }
0x107c   :  { %v1472_v45 = vadd.f32 %v1469_v39, %v1468_v37 }
0x107e   :  { %v1473_v50 = vadd.f32 %v1472_v45, %v1470_v43 }
0x1080   :  { %v1474_v60 = vadd.f32 %v1473_v50, %v1471_v48 }
0x1082   :  { %v1475_v53 = vrot.slane %v1474_v60, 4 }
0x1084   :  { %v1476_v44 = vadd.f32 %v1475_v53, %v1474_v60 }
0x1086   :  { %v1477_v47 = vrot.slane %v1476_v44, 2 }
0x1088   :  { %v1478_v54 = vadd.f32 %v1477_v47, %v1476_v44 }
0x108a   :  { %v1479_v55 = vrot.slane %v1478_v54, 1 }
0x108c   :  { %v1480_v52 = vadd.f32 %v1479_v55, %v1478_v54 }
0x108e   :  { %7162 = vtanh.f32 %v1480_v52 }
0x1098   :  { %v7163_v61 = vpop.eup %7162 }
0x1099   :  { %v1482_v4 = vmul.f32 %v7163_v61, %v8227_v2 }
0x109b   :  { %v1483_v5 = vadd.f32 %v1482_v4, %v1398_v1 }
0x109d   :  { %v1484_v12 = vmul.f32 %v1483_v5, %v1388_v9  ;;  %v1675_v56 = vmul.f32 2.0, %v1483_v5 }
0x109f   :  { %v1485_v8 = vadd.f32 %v1484_v12, %v8473_v23  ;;  %v1676_v1 = vadd.f32 %v1675_v56, %v8501_v10 }
0x10a1   :  { %1488 = vrot.lane.b32.xlu1 %v1485_v8, %s8071_s7  ;;  %v1498_v0 = vrot.slane %v1485_v8, %v8178_v15  ;;  %1486 = vrot.lane.b32.xlu0 %v1485_v8, %s8072_s18  ;;  %v1491_v52 = vmul.f32 %v1485_v8, %v8218_v62 }
0x10a3   :  { %v1500_v3 = vmul.f32 %v1498_v0, %v8184_v18  ;;  %v1501_v7 = vmul.f32 %v1498_v0, %v8190_v22  ;;  %v1502_v6 = vmul.f32 %v1498_v0, %v8182_v17  ;;  %v1503_v13 = vmul.f32 %v1498_v0, %v8188_v21 }
0x10a5   :  { %7164 = vtanh.f32 %v1500_v3 }
0x10a6   :  { %7166 = vtanh.f32 %v1501_v7 }
0x10a7   :  { %7168 = vtanh.f32 %v1502_v6 }
0x10a8   :  { %7170 = vtanh.f32 %v1503_v13 }
0x10af   :  { %v7165_v9 = vpop.eup %7164 }
0x10b0   :  { %v7167_v14 = vpop.eup %7166 }
0x10b1   :  { %v7169_v16 = vpop.eup %7168  ;;  %v1508_v19 = vpack.c.bf16 %v7167_v14, %v7165_v9 }
0x10b2   :  { %v7171_v20 = vpop.eup %7170 }
0x10b3   :  { %6532 = vmatprep.subr.bf16.mxu0 %v1508_v19  ;;  %v1509_v24 = vpack.c.bf16 %v7171_v20, %v7169_v16 }
0x10b4   :  { %6533 = vmatpush3.bf16.msra.mxu0 %v1508_v19 }
0x10b5   :  { %6534 = vmatprep.subr.bf16.mxu0 %v1509_v24 }
0x10b8   :  { %6535 = vmatpush3.bf16.msra.mxu0 %v1509_v24 }
0x10bb   :  { %6537 = vmatmul.mubr.msk.bf16.vlgmr.msra.gmra.mrb[28].mxu0 %vm135_vm0, %v8200_v33 }
0x10bc   :  { %6552 = vmatprep.mubr.msk.bf16.mxu0 %vm135_vm0, %v8163_v11 }
0x1113   :  { %v1489_v44 = vpop.permute.xlu1 %1488  ;;  %v1487_v47 = vpop.permute.xlu0 %1486 }
0x1114   :  { %v1490_v54 = vadd.f32 %v1489_v44, %v1487_v47 }
0x1116   :  { %v1492_v55 = vmul.f32 %v1490_v54, %v8220_v63 }
0x1118   :  { %v1493_v57 = vadd.f32 %v1492_v55, %v1491_v52 }
0x118e   :  { %v6538_v26 = vpop.f32.mrb[28].mxu0 }
0x118f   :  { %v1544_v28 = vpop.f32.mrb[29].mxu0 }
0x1190   :  { %7172 = vtanh.f32 %v1544_v28  ;;  %v6539_v29 = vpop.f32.mrb[30].mxu0 }
0x1191   :  { %7174 = vtanh.f32 %v6538_v26  ;;  %v1547_v42 = vpop.f32.mrb[31].mxu0 }
0x1192   :  { %7176 = vtanh.f32 %v1547_v42 }
0x1193   :  { %7178 = vtanh.f32 %v6539_v29 }
0x119a   :  { %v7173_v32 = vpop.eup %7172 }
0x119b   :  { %v7175_v25 = vpop.eup %7174  ;;  %v1563_v34 = vmul.f32 %v7173_v32, %v8206_v38 }
0x119c   :  { %v7177_v27 = vpop.eup %7176  ;;  %v1565_v30 = vmul.f32 %v7175_v25, %v8212_v46 }
0x119d   :  { %v1564_v35 = vmul.f32 %v7177_v27, %v8208_v40  ;;  %v7179_v31 = vpop.eup %7178 }
0x119e   :  { %v1566_v37 = vmul.f32 %v7179_v31, %v8215_v49 }
0x119f   :  { %v1567_v36 = vadd.f32 %v1564_v35, %v1563_v34 }
0x11a1   :  { %v1568_v39 = vadd.f32 %v1567_v36, %v1565_v30 }
0x11a3   :  { %v1569_v41 = vadd.f32 %v1568_v39, %v1566_v37 }
0x11a5   :  { %v1570_v43 = vrot.slane %v1569_v41, 4 }
0x11a7   :  { %v1571_v45 = vadd.f32 %v1570_v43, %v1569_v41 }
0x11a9   :  { %v1572_v48 = vrot.slane %v1571_v45, 2 }
0x11ab   :  { %v1573_v50 = vadd.f32 %v1572_v48, %v1571_v45 }
0x11ad   :  { %v1574_v60 = vrot.slane %v1573_v50, 1 }
0x11af   :  { %v1575_v53 = vadd.f32 %v1574_v60, %v1573_v50 }
0x11b1   :  { %7180 = vtanh.f32 %v1575_v53 }
0x11bb   :  { %v7181_v51 = vpop.eup %7180 }
0x11bc   :  { %v1577_v58 = vmul.f32 %v7181_v51, %v8227_v2 }
0x11be   :  { %v1578_v61 = vadd.f32 %v1577_v58, %v1493_v57  ;;  %v1680_v58 = vstv %s6050_s14  ;;  %s6149_s14 = sld [smem:[#allocation6 + $0xd]] }
0x11c0   :  { %v1580_v4 = vmul.f32 %v1579_v59, %v1578_v61  ;;  %v1677_v12 = vmul.f32 2.0, %v1578_v61 }
0x11c2   :  { %v1581_v0 = vadd.f32 %v1580_v4, %v8473_v23  ;;  %v1678_v3 = vadd.f32 %v1677_v12, %v1676_v1 }
0x11c4   :  { %1584 = vrot.lane.b32.xlu1 %v1581_v0, %s8071_s7  ;;  %v1594_v7 = vrot.slane %v1581_v0, %v8178_v15  ;;  %1582 = vrot.lane.b32.xlu0 %v1581_v0, %s8072_s18  ;;  %v1587_v55 = vmul.f32 %v1581_v0, %v8218_v62 }
0x11c6   :  { %v1596_v5 = vmul.f32 %v1594_v7, %v8184_v18  ;;  %v1597_v8 = vmul.f32 %v1594_v7, %v8190_v22  ;;  %v1598_v6 = vmul.f32 %v1594_v7, %v8182_v17  ;;  %v1599_v13 = vmul.f32 %v1594_v7, %v8188_v21 }
0x11c8   :  { %7182 = vtanh.f32 %v1596_v5 }
0x11c9   :  { %7184 = vtanh.f32 %v1597_v8 }
0x11ca   :  { %7186 = vtanh.f32 %v1598_v6 }
0x11cb   :  { %7188 = vtanh.f32 %v1599_v13 }
0x11d2   :  { %v7183_v10 = vpop.eup %7182 }
0x11d3   :  { %v7185_v9 = vpop.eup %7184 }
0x11d4   :  { %v7187_v14 = vpop.eup %7186  ;;  %v1604_v16 = vpack.c.bf16 %v7185_v9, %v7183_v10 }
0x11d5   :  { %v7189_v19 = vpop.eup %7188 }
0x11d6   :  { %6540 = vmatprep.subr.bf16.mxu1 %v1604_v16  ;;  %v1605_v20 = vpack.c.bf16 %v7189_v19, %v7187_v14 }
0x11d7   :  { %6541 = vmatpush3.bf16.msra.mxu1 %v1604_v16 }
0x11d8   :  { %6542 = vmatprep.subr.bf16.mxu1 %v1605_v20 }
0x11db   :  { %6543 = vmatpush3.bf16.msra.mxu1 %v1605_v20 }
0x11de   :  { %6545 = vmatmul.mubr.msk.bf16.vlgmr.msra.gmra.mrb[28].mxu1 %vm135_vm0, %v8200_v33 }
0x11df   :  { %6560 = vmatprep.mubr.msk.bf16.mxu1 %vm135_vm0, %v8163_v11 }
0x1236   :  { %v1585_v53 = vpop.permute.xlu1 %1584  ;;  %v1583_v44 = vpop.permute.xlu0 %1582 }
0x1237   :  { %v1586_v47 = vadd.f32 %v1585_v53, %v1583_v44 }
0x1239   :  { %v1588_v54 = vmul.f32 %v1586_v47, %v8220_v63 }
0x123b   :  { %v1589_v51 = vadd.f32 %v1588_v54, %v1587_v55  ;;  %v1780_v54 = vstv %s8584_s15  ;;  %s9394_s15 = sld [smem:[#allocation5 + $0xe]] }
0x12b1   :  { %v6546_v24 = vpop.f32.mrb[28].mxu1 }
0x12b2   :  { %v1640_v26 = vpop.f32.mrb[29].mxu1 }
0x12b3   :  { %7190 = vtanh.f32 %v1640_v26  ;;  %v6547_v28 = vpop.f32.mrb[30].mxu1 }
0x12b4   :  { %7192 = vtanh.f32 %v6546_v24  ;;  %v1643_v29 = vpop.f32.mrb[31].mxu1 }
0x12b5   :  { %7194 = vtanh.f32 %v1643_v29 }
0x12b6   :  { %7196 = vtanh.f32 %v6547_v28 }
0x12bd   :  { %v7191_v42 = vpop.eup %7190 }
0x12be   :  { %v7193_v32 = vpop.eup %7192  ;;  %v1659_v27 = vmul.f32 %v7191_v42, %v8206_v38 }
0x12bf   :  { %v7195_v25 = vpop.eup %7194  ;;  %v1661_v31 = vmul.f32 %v7193_v32, %v8212_v46 }
0x12c0   :  { %v1660_v34 = vmul.f32 %v7195_v25, %v8208_v40  ;;  %v7197_v35 = vpop.eup %7196 }
0x12c1   :  { %v1662_v36 = vmul.f32 %v7197_v35, %v8215_v49 }
0x12c2   :  { %v1663_v30 = vadd.f32 %v1660_v34, %v1659_v27 }
0x12c4   :  { %v1664_v37 = vadd.f32 %v1663_v30, %v1661_v31 }
0x12c6   :  { %v1665_v39 = vadd.f32 %v1664_v37, %v1662_v36 }
0x12c8   :  { %v1666_v41 = vrot.slane %v1665_v39, 4 }
0x12ca   :  { %v1667_v43 = vadd.f32 %v1666_v41, %v1665_v39 }
0x12cc   :  { %v1668_v45 = vrot.slane %v1667_v43, 2 }
0x12ce   :  { %v1669_v48 = vadd.f32 %v1668_v45, %v1667_v43 }
0x12d0   :  { %v1670_v50 = vrot.slane %v1669_v48, 1 }
0x12d2   :  { %v1671_v60 = vadd.f32 %v1670_v50, %v1669_v48 }
0x12d4   :  { %7198 = vtanh.f32 %v1671_v60 }
0x12de   :  { %v7199_v52 = vpop.eup %7198 }
0x12df   :  { %v1673_v56 = vmul.f32 %v7199_v52, %v8227_v2 }
0x12e1   :  { %v1674_v57 = vadd.f32 %v1673_v56, %v1589_v51 }
0x12e3   :  { %v1679_v59 = vadd.f32 %v1678_v3, %v1674_v57 }
0x12e5   :  { %v1681_v61 = vmul.f32 %v1680_v58, %v1679_v59 }
0x12e7   :  { %v8563_v1 = vadd.f32 %v1681_v61, %v8473_v23 }
0x12e9   :  { %1689 = vrot.lane.b32.xlu1 %v8563_v1, %s8071_s7  ;;  %1683 = vst [vmem:[#allocation7 + $0x4] sm:$0x1] %v8563_v1  ;;  %1687 = vrot.lane.b32.xlu0 %v8563_v1, %s8072_s18  ;;  %v1699_v4 = vrot.slane %v8563_v1, %v8178_v15  ;;  %v1692_v60 = vmul.f32 %v8563_v1, %v8218_v62 }
0x12eb   :  { %v1701_v12 = vmul.f32 %v1699_v4, %v8184_v18  ;;  %v1702_v0 = vmul.f32 %v1699_v4, %v8190_v22  ;;  %v1703_v3 = vmul.f32 %v1699_v4, %v8182_v17  ;;  %v1704_v23 = vmul.f32 %v1699_v4, %v8188_v21 }
0x12ed   :  { %7200 = vtanh.f32 %v1701_v12 }
0x12ee   :  { %7202 = vtanh.f32 %v1702_v0 }
0x12ef   :  { %7204 = vtanh.f32 %v1703_v3 }
0x12f0   :  { %7206 = vtanh.f32 %v1704_v23 }
0x12f7   :  { %v7201_v7 = vpop.eup %7200 }
0x12f8   :  { %v7203_v5 = vpop.eup %7202 }
0x12f9   :  { %v7205_v8 = vpop.eup %7204  ;;  %v1709_v6 = vpack.c.bf16 %v7203_v5, %v7201_v7 }
0x12fa   :  { %v7207_v13 = vpop.eup %7206 }
0x12fb   :  { %6548 = vmatprep.subr.bf16.mxu0 %v1709_v6  ;;  %v1710_v10 = vpack.c.bf16 %v7207_v13, %v7205_v8 }
0x12fc   :  { %6549 = vmatpush3.bf16.msra.mxu0 %v1709_v6 }
0x12fd   :  { %6550 = vmatprep.subr.bf16.mxu0 %v1710_v10 }
0x1300   :  { %6551 = vmatpush3.bf16.msra.mxu0 %v1710_v10 }
0x1303   :  { %6553 = vmatmul.mubr.msk.bf16.vlgmr.msra.gmra.mrb[32].mxu0 %vm135_vm0, %v8200_v33 }
0x1304   :  { %6568 = vmatprep.mubr.msk.bf16.mxu0 %vm135_vm0, %v8163_v11 }
0x135b   :  { %v1690_v43 = vpop.permute.xlu1 %1689  ;;  %v1688_v45 = vpop.permute.xlu0 %1687 }
0x135c   :  { %v1691_v48 = vadd.f32 %v1690_v43, %v1688_v45 }
0x135e   :  { %v1693_v50 = vmul.f32 %v1691_v48, %v8220_v63 }
0x1360   :  { %v1694_v44 = vadd.f32 %v1693_v50, %v1692_v60 }
0x13d6   :  { %v6554_v9 = vpop.f32.mrb[32].mxu0 }
0x13d7   :  { %v1745_v14 = vpop.f32.mrb[33].mxu0 }
0x13d8   :  { %7208 = vtanh.f32 %v1745_v14  ;;  %v6555_v16 = vpop.f32.mrb[34].mxu0 }
0x13d9   :  { %7210 = vtanh.f32 %v6554_v9  ;;  %v1748_v19 = vpop.f32.mrb[35].mxu0 }
0x13da   :  { %7212 = vtanh.f32 %v1748_v19 }
0x13db   :  { %7214 = vtanh.f32 %v6555_v16 }
0x13e2   :  { %v7209_v20 = vpop.eup %7208 }
0x13e3   :  { %v7211_v24 = vpop.eup %7210  ;;  %v1764_v28 = vmul.f32 %v7209_v20, %v8206_v38 }
0x13e4   :  { %v7213_v26 = vpop.eup %7212  ;;  %v1766_v32 = vmul.f32 %v7211_v24, %v8212_v46 }
0x13e5   :  { %v1765_v29 = vmul.f32 %v7213_v26, %v8208_v40  ;;  %v7215_v42 = vpop.eup %7214 }
0x13e6   :  { %v1767_v27 = vmul.f32 %v7215_v42, %v8215_v49 }
0x13e7   :  { %v1768_v25 = vadd.f32 %v1765_v29, %v1764_v28 }
0x13e9   :  { %v1769_v34 = vadd.f32 %v1768_v25, %v1766_v32 }
0x13eb   :  { %v1770_v35 = vadd.f32 %v1769_v34, %v1767_v27 }
0x13ed   :  { %v1771_v31 = vrot.slane %v1770_v35, 4 }
0x13ef   :  { %v1772_v30 = vadd.f32 %v1771_v31, %v1770_v35 }
0x13f1   :  { %v1773_v36 = vrot.slane %v1772_v30, 2 }
0x13f3   :  { %v1774_v37 = vadd.f32 %v1773_v36, %v1772_v30 }
0x13f5   :  { %v1775_v39 = vrot.slane %v1774_v37, 1 }
0x13f7   :  { %v1776_v41 = vadd.f32 %v1775_v39, %v1774_v37 }
0x13f9   :  { %7216 = vtanh.f32 %v1776_v41 }
0x1403   :  { %v7217_v53 = vpop.eup %7216 }
0x1404   :  { %v1778_v47 = vmul.f32 %v7217_v53, %v8227_v2 }
0x1406   :  { %v8591_v55 = vadd.f32 %v1778_v47, %v1694_v44 }
0x1408   :  { %v1781_v52 = vmul.f32 %v1780_v54, %v8591_v55 }
0x140a   :  { %v1782_v51 = vadd.f32 %v1781_v52, %v8563_v1 }
0x140c   :  { %1785 = vrot.lane.b32.xlu1 %v1782_v51, %s8071_s7  ;;  %v1795_v56 = vrot.slane %v1782_v51, %v8178_v15  ;;  %1783 = vrot.lane.b32.xlu0 %v1782_v51, %s8072_s18  ;;  %v1788_v41 = vmul.f32 %v1782_v51, %v8218_v62 }
0x140e   :  { %v1797_v57 = vmul.f32 %v1795_v56, %v8184_v18  ;;  %v1798_v58 = vmul.f32 %v1795_v56, %v8190_v22  ;;  %v1799_v59 = vmul.f32 %v1795_v56, %v8182_v17  ;;  %v1800_v61 = vmul.f32 %v1795_v56, %v8188_v21 }
0x1410   :  { %7218 = vtanh.f32 %v1797_v57 }
0x1411   :  { %7220 = vtanh.f32 %v1798_v58 }
0x1412   :  { %7222 = vtanh.f32 %v1799_v59 }
0x1413   :  { %7224 = vtanh.f32 %v1800_v61 }
0x141a   :  { %v7219_v4 = vpop.eup %7218 }
0x141b   :  { %v7221_v12 = vpop.eup %7220 }
0x141c   :  { %v7223_v0 = vpop.eup %7222  ;;  %v1805_v3 = vpack.c.bf16 %v7221_v12, %v7219_v4 }
0x141d   :  { %v7225_v23 = vpop.eup %7224 }
0x141e   :  { %6556 = vmatprep.subr.bf16.mxu1 %v1805_v3  ;;  %v1806_v7 = vpack.c.bf16 %v7225_v23, %v7223_v0 }
0x141f   :  { %6557 = vmatpush3.bf16.msra.mxu1 %v1805_v3 }
0x1420   :  { %6558 = vmatprep.subr.bf16.mxu1 %v1806_v7 }
0x1423   :  { %6559 = vmatpush3.bf16.msra.mxu1 %v1806_v7 }
0x1426   :  { %6561 = vmatmul.mubr.msk.bf16.vlgmr.msra.gmra.mrb[32].mxu1 %vm135_vm0, %v8200_v33 }
0x1427   :  { %6576 = vmatprep.mubr.msk.bf16.mxu1 %vm135_vm0, %v8163_v11 }
0x147e   :  { %v1786_v30 = vpop.permute.xlu1 %1785  ;;  %v1784_v36 = vpop.permute.xlu0 %1783 }
0x147f   :  { %v1787_v37 = vadd.f32 %v1786_v30, %v1784_v36 }
0x1481   :  { %v1789_v39 = vmul.f32 %v1787_v37, %v8220_v63 }
0x1483   :  { %v1790_v45 = vadd.f32 %v1789_v39, %v1788_v41  ;;  %v1971_v41 = vstv %s6059_s16  ;;  %s6158_s16 = sld [smem:[#allocation4 + $0xe]] }
0x14f9   :  { %v6562_v5 = vpop.f32.mrb[32].mxu1 }
0x14fa   :  { %v1841_v8 = vpop.f32.mrb[33].mxu1 }
0x14fb   :  { %7226 = vtanh.f32 %v1841_v8  ;;  %v6563_v6 = vpop.f32.mrb[34].mxu1 }
0x14fc   :  { %7228 = vtanh.f32 %v6562_v5  ;;  %v1844_v13 = vpop.f32.mrb[35].mxu1 }
0x14fd   :  { %7230 = vtanh.f32 %v1844_v13 }
0x14fe   :  { %7232 = vtanh.f32 %v6563_v6 }
0x1505   :  { %v7227_v10 = vpop.eup %7226 }
0x1506   :  { %v7229_v9 = vpop.eup %7228  ;;  %v1860_v16 = vmul.f32 %v7227_v10, %v8206_v38 }
0x1507   :  { %v7231_v14 = vpop.eup %7230  ;;  %v1862_v24 = vmul.f32 %v7229_v9, %v8212_v46 }
0x1508   :  { %v1861_v19 = vmul.f32 %v7231_v14, %v8208_v40  ;;  %v7233_v20 = vpop.eup %7232 }
0x1509   :  { %v1863_v28 = vmul.f32 %v7233_v20, %v8215_v49 }
0x150a   :  { %v1864_v26 = vadd.f32 %v1861_v19, %v1860_v16 }
0x150c   :  { %v1865_v29 = vadd.f32 %v1864_v26, %v1862_v24 }
0x150e   :  { %v1866_v42 = vadd.f32 %v1865_v29, %v1863_v28 }
0x1510   :  { %v1867_v32 = vrot.slane %v1866_v42, 4 }
0x1512   :  { %v1868_v25 = vadd.f32 %v1867_v32, %v1866_v42 }
0x1514   :  { %v1869_v27 = vrot.slane %v1868_v25, 2 }
0x1516   :  { %v1870_v34 = vadd.f32 %v1869_v27, %v1868_v25 }
0x1518   :  { %v1871_v35 = vrot.slane %v1870_v34, 1 }
0x151a   :  { %v1872_v31 = vadd.f32 %v1871_v35, %v1870_v34 }
0x151c   :  { %7234 = vtanh.f32 %v1872_v31 }
0x1526   :  { %v7235_v43 = vpop.eup %7234 }
0x1527   :  { %v1874_v48 = vmul.f32 %v7235_v43, %v8227_v2 }
0x1529   :  { %v1875_v50 = vadd.f32 %v1874_v48, %v1790_v45 }
0x152b   :  { %v1876_v60 = vmul.f32 %v1875_v50, %v1780_v54  ;;  %v2067_v36 = vmul.f32 2.0, %v1875_v50 }
0x152d   :  { %v1877_v53 = vadd.f32 %v1876_v60, %v8563_v1  ;;  %v2068_v45 = vadd.f32 %v2067_v36, %v8591_v55 }
0x152f   :  { %1880 = vrot.lane.b32.xlu1 %v1877_v53, %s8071_s7  ;;  %v1890_v44 = vrot.slane %v1877_v53, %v8178_v15  ;;  %1878 = vrot.lane.b32.xlu0 %v1877_v53, %s8072_s18  ;;  %v1883_v31 = vmul.f32 %v1877_v53, %v8218_v62 }
0x1531   :  { %v1892_v47 = vmul.f32 %v1890_v44, %v8184_v18  ;;  %v1893_v52 = vmul.f32 %v1890_v44, %v8190_v22  ;;  %v1894_v51 = vmul.f32 %v1890_v44, %v8182_v17  ;;  %v1895_v56 = vmul.f32 %v1890_v44, %v8188_v21 }
0x1533   :  { %7236 = vtanh.f32 %v1892_v47 }
0x1534   :  { %7238 = vtanh.f32 %v1893_v52 }
0x1535   :  { %7240 = vtanh.f32 %v1894_v51 }
0x1536   :  { %7242 = vtanh.f32 %v1895_v56 }
0x153d   :  { %v7237_v54 = vpop.eup %7236 }
0x153e   :  { %v7239_v57 = vpop.eup %7238 }
0x153f   :  { %v7241_v58 = vpop.eup %7240  ;;  %v1900_v59 = vpack.c.bf16 %v7239_v57, %v7237_v54 }
0x1540   :  { %v7243_v61 = vpop.eup %7242 }
0x1541   :  { %6564 = vmatprep.subr.bf16.mxu0 %v1900_v59  ;;  %v1901_v4 = vpack.c.bf16 %v7243_v61, %v7241_v58 }
0x1542   :  { %6565 = vmatpush3.bf16.msra.mxu0 %v1900_v59 }
0x1543   :  { %6566 = vmatprep.subr.bf16.mxu0 %v1901_v4 }
0x1546   :  { %6567 = vmatpush3.bf16.msra.mxu0 %v1901_v4 }
0x1549   :  { %6569 = vmatmul.mubr.msk.bf16.vlgmr.msra.gmra.mrb[36].mxu0 %vm135_vm0, %v8200_v33 }
0x154a   :  { %6584 = vmatprep.mubr.msk.bf16.mxu0 %vm135_vm0, %v8163_v11 }
0x15a1   :  { %v1881_v25 = vpop.permute.xlu1 %1880  ;;  %v1879_v27 = vpop.permute.xlu0 %1878 }
0x15a2   :  { %v1882_v34 = vadd.f32 %v1881_v25, %v1879_v27 }
0x15a4   :  { %v1884_v35 = vmul.f32 %v1882_v34, %v8220_v63 }
0x15a6   :  { %v1885_v37 = vadd.f32 %v1884_v35, %v1883_v31 }
0x161c   :  { %v6570_v12 = vpop.f32.mrb[36].mxu0 }
0x161d   :  { %v1936_v0 = vpop.f32.mrb[37].mxu0 }
0x161e   :  { %7244 = vtanh.f32 %v1936_v0  ;;  %v6571_v3 = vpop.f32.mrb[38].mxu0 }
0x161f   :  { %7246 = vtanh.f32 %v6570_v12  ;;  %v1939_v23 = vpop.f32.mrb[39].mxu0 }
0x1620   :  { %7248 = vtanh.f32 %v1939_v23 }
0x1621   :  { %7250 = vtanh.f32 %v6571_v3 }
0x1628   :  { %v7245_v7 = vpop.eup %7244 }
0x1629   :  { %v7247_v5 = vpop.eup %7246  ;;  %v1955_v6 = vmul.f32 %v7245_v7, %v8206_v38 }
0x162a   :  { %v7249_v8 = vpop.eup %7248  ;;  %v1957_v9 = vmul.f32 %v7247_v5, %v8212_v46 }
0x162b   :  { %v1956_v13 = vmul.f32 %v7249_v8, %v8208_v40  ;;  %v7251_v10 = vpop.eup %7250 }
0x162c   :  { %v1958_v16 = vmul.f32 %v7251_v10, %v8215_v49 }
0x162d   :  { %v1959_v14 = vadd.f32 %v1956_v13, %v1955_v6 }
0x162f   :  { %v1960_v19 = vadd.f32 %v1959_v14, %v1957_v9 }
0x1631   :  { %v1961_v20 = vadd.f32 %v1960_v19, %v1958_v16 }
0x1633   :  { %v1962_v24 = vrot.slane %v1961_v20, 4 }
0x1635   :  { %v1963_v26 = vadd.f32 %v1962_v24, %v1961_v20 }
0x1637   :  { %v1964_v28 = vrot.slane %v1963_v26, 2 }
0x1639   :  { %v1965_v29 = vadd.f32 %v1964_v28, %v1963_v26 }
0x163b   :  { %v1966_v42 = vrot.slane %v1965_v29, 1 }
0x163d   :  { %v1967_v32 = vadd.f32 %v1966_v42, %v1965_v29 }
0x163f   :  { %7252 = vtanh.f32 %v1967_v32 }
0x1649   :  { %v7253_v30 = vpop.eup %7252 }
0x164a   :  { %v1969_v39 = vmul.f32 %v7253_v30, %v8227_v2 }
0x164c   :  { %v1970_v43 = vadd.f32 %v1969_v39, %v1885_v37  ;;  %v2072_v39 = vstv %s6061_s17  ;;  %s6160_s17 = sld [smem:[#allocation6 + $0xe]] }
0x164e   :  { %v1972_v48 = vmul.f32 %v1971_v41, %v1970_v43  ;;  %v2069_v60 = vmul.f32 2.0, %v1970_v43 }
0x1650   :  { %v1973_v44 = vadd.f32 %v1972_v48, %v8563_v1  ;;  %v2070_v47 = vadd.f32 %v2069_v60, %v2068_v45 }
0x1652   :  { %1976 = vrot.lane.b32.xlu1 %v1973_v44, %s8071_s7  ;;  %v1986_v52 = vrot.slane %v1973_v44, %v8178_v15  ;;  %1974 = vrot.lane.b32.xlu0 %v1973_v44, %s8072_s18  ;;  %v1979_v35 = vmul.f32 %v1973_v44, %v8218_v62 }
0x1654   :  { %v1988_v50 = vmul.f32 %v1986_v52, %v8184_v18  ;;  %v1989_v53 = vmul.f32 %v1986_v52, %v8190_v22  ;;  %v1990_v51 = vmul.f32 %v1986_v52, %v8182_v17  ;;  %v1991_v56 = vmul.f32 %v1986_v52, %v8188_v21 }
0x1656   :  { %7254 = vtanh.f32 %v1988_v50 }
0x1657   :  { %7256 = vtanh.f32 %v1989_v53 }
0x1658   :  { %7258 = vtanh.f32 %v1990_v51 }
0x1659   :  { %7260 = vtanh.f32 %v1991_v56 }
0x1660   :  { %v7255_v55 = vpop.eup %7254 }
0x1661   :  { %v7257_v54 = vpop.eup %7256 }
0x1662   :  { %v7259_v57 = vpop.eup %7258  ;;  %v1996_v58 = vpack.c.bf16 %v7257_v54, %v7255_v55 }
0x1663   :  { %v7261_v59 = vpop.eup %7260 }
0x1664   :  { %6572 = vmatprep.subr.bf16.mxu1 %v1996_v58  ;;  %v1997_v61 = vpack.c.bf16 %v7261_v59, %v7259_v57 }
0x1665   :  { %6573 = vmatpush3.bf16.msra.mxu1 %v1996_v58 }
0x1666   :  { %6574 = vmatprep.subr.bf16.mxu1 %v1997_v61 }
0x1669   :  { %6575 = vmatpush3.bf16.msra.mxu1 %v1997_v61 }
0x166c   :  { %6577 = vmatmul.mubr.msk.bf16.vlgmr.msra.gmra.mrb[36].mxu1 %vm135_vm0, %v8200_v33 }
0x166d   :  { %6592 = vmatprep.mubr.msk.bf16.mxu1 %vm135_vm0, %v8163_v11 }
0x16c4   :  { %v1977_v32 = vpop.permute.xlu1 %1976  ;;  %v1975_v25 = vpop.permute.xlu0 %1974 }
0x16c5   :  { %v1978_v27 = vadd.f32 %v1977_v32, %v1975_v25 }
0x16c7   :  { %v1980_v34 = vmul.f32 %v1978_v27, %v8220_v63 }
0x16c9   :  { %v1981_v30 = vadd.f32 %v1980_v34, %v1979_v35  ;;  %v2172_v34 = vstv %s8674_s19  ;;  %s9484_s19 = sld [smem:[#allocation5 + $0xf]] }
0x173f   :  { %v6578_v4 = vpop.f32.mrb[36].mxu1 }
0x1740   :  { %v2032_v12 = vpop.f32.mrb[37].mxu1 }
0x1741   :  { %7262 = vtanh.f32 %v2032_v12  ;;  %v6579_v0 = vpop.f32.mrb[38].mxu1 }
0x1742   :  { %7264 = vtanh.f32 %v6578_v4  ;;  %v2035_v3 = vpop.f32.mrb[39].mxu1 }
0x1743   :  { %7266 = vtanh.f32 %v2035_v3 }
0x1744   :  { %7268 = vtanh.f32 %v6579_v0 }
0x174b   :  { %v7263_v23 = vpop.eup %7262 }
0x174c   :  { %v7265_v7 = vpop.eup %7264  ;;  %v2051_v8 = vmul.f32 %v7263_v23, %v8206_v38 }
0x174d   :  { %v7267_v5 = vpop.eup %7266  ;;  %v2053_v10 = vmul.f32 %v7265_v7, %v8212_v46 }
0x174e   :  { %v2052_v6 = vmul.f32 %v7267_v5, %v8208_v40  ;;  %v7269_v13 = vpop.eup %7268 }
0x174f   :  { %v2054_v14 = vmul.f32 %v7269_v13, %v8215_v49 }
0x1750   :  { %v2055_v9 = vadd.f32 %v2052_v6, %v2051_v8 }
0x1752   :  { %v2056_v16 = vadd.f32 %v2055_v9, %v2053_v10 }
0x1754   :  { %v2057_v19 = vadd.f32 %v2056_v16, %v2054_v14 }
0x1756   :  { %v2058_v20 = vrot.slane %v2057_v19, 4 }
0x1758   :  { %v2059_v24 = vadd.f32 %v2058_v20, %v2057_v19 }
0x175a   :  { %v2060_v26 = vrot.slane %v2059_v24, 2 }
0x175c   :  { %v2061_v28 = vadd.f32 %v2060_v26, %v2059_v24 }
0x175e   :  { %v2062_v29 = vrot.slane %v2061_v28, 1 }
0x1760   :  { %v2063_v42 = vadd.f32 %v2062_v29, %v2061_v28 }
0x1762   :  { %7270 = vtanh.f32 %v2063_v42 }
0x176c   :  { %v7271_v31 = vpop.eup %7270 }
0x176d   :  { %v2065_v36 = vmul.f32 %v7271_v31, %v8227_v2 }
0x176f   :  { %v2066_v37 = vadd.f32 %v2065_v36, %v1981_v30 }
0x1771   :  { %v2071_v41 = vadd.f32 %v2070_v47, %v2066_v37 }
0x1773   :  { %v2073_v43 = vmul.f32 %v2072_v39, %v2071_v41 }
0x1775   :  { %v8653_v45 = vadd.f32 %v2073_v43, %v8563_v1 }
0x1777   :  { %2081 = vrot.lane.b32.xlu1 %v8653_v45, %s8071_s7  ;;  %2075 = vst [vmem:[#allocation7 + $0x5] sm:$0x1] %v8653_v45  ;;  %2079 = vrot.lane.b32.xlu0 %v8653_v45, %s8072_s18  ;;  %v2091_v48 = vrot.slane %v8653_v45, %v8178_v15  ;;  %v2084_v42 = vmul.f32 %v8653_v45, %v8218_v62 }
0x1779   :  { %v2093_v60 = vmul.f32 %v2091_v48, %v8184_v18  ;;  %v2094_v44 = vmul.f32 %v2091_v48, %v8190_v22  ;;  %v2095_v47 = vmul.f32 %v2091_v48, %v8182_v17  ;;  %v2096_v1 = vmul.f32 %v2091_v48, %v8188_v21 }
0x177b   :  { %7272 = vtanh.f32 %v2093_v60 }
0x177c   :  { %7274 = vtanh.f32 %v2094_v44 }
0x177d   :  { %7276 = vtanh.f32 %v2095_v47 }
0x177e   :  { %7278 = vtanh.f32 %v2096_v1 }
0x1785   :  { %v7273_v52 = vpop.eup %7272 }
0x1786   :  { %v7275_v50 = vpop.eup %7274 }
0x1787   :  { %v7277_v53 = vpop.eup %7276  ;;  %v2101_v51 = vpack.c.bf16 %v7275_v50, %v7273_v52 }
0x1788   :  { %v7279_v56 = vpop.eup %7278 }
0x1789   :  { %6580 = vmatprep.subr.bf16.mxu0 %v2101_v51  ;;  %v2102_v55 = vpack.c.bf16 %v7279_v56, %v7277_v53 }
0x178a   :  { %6581 = vmatpush3.bf16.msra.mxu0 %v2101_v51 }
0x178b   :  { %6582 = vmatprep.subr.bf16.mxu0 %v2102_v55 }
0x178e   :  { %6583 = vmatpush3.bf16.msra.mxu0 %v2102_v55 }
0x1791   :  { %6585 = vmatmul.mubr.msk.bf16.vlgmr.msra.gmra.mrb[40].mxu0 %vm135_vm0, %v8200_v33 }
0x1792   :  { %6600 = vmatprep.mubr.msk.bf16.mxu0 %vm135_vm0, %v8163_v11 }
0x17e9   :  { %v2082_v24 = vpop.permute.xlu1 %2081  ;;  %v2080_v26 = vpop.permute.xlu0 %2079 }
0x17ea   :  { %v2083_v28 = vadd.f32 %v2082_v24, %v2080_v26 }
0x17ec   :  { %v2085_v29 = vmul.f32 %v2083_v28, %v8220_v63 }
0x17ee   :  { %v2086_v25 = vadd.f32 %v2085_v29, %v2084_v42 }
0x1864   :  { %v6586_v54 = vpop.f32.mrb[40].mxu0 }
0x1865   :  { %v2137_v57 = vpop.f32.mrb[41].mxu0 }
0x1866   :  { %7280 = vtanh.f32 %v2137_v57  ;;  %v6587_v58 = vpop.f32.mrb[42].mxu0 }
0x1867   :  { %7282 = vtanh.f32 %v6586_v54  ;;  %v2140_v59 = vpop.f32.mrb[43].mxu0 }
0x1868   :  { %7284 = vtanh.f32 %v2140_v59 }
0x1869   :  { %7286 = vtanh.f32 %v6587_v58 }
0x1870   :  { %v7281_v61 = vpop.eup %7280 }
0x1871   :  { %v7283_v4 = vpop.eup %7282  ;;  %v2156_v0 = vmul.f32 %v7281_v61, %v8206_v38 }
0x1872   :  { %v7285_v12 = vpop.eup %7284  ;;  %v2158_v7 = vmul.f32 %v7283_v4, %v8212_v46 }
0x1873   :  { %v2157_v3 = vmul.f32 %v7285_v12, %v8208_v40  ;;  %v7287_v23 = vpop.eup %7286 }
0x1874   :  { %v2159_v8 = vmul.f32 %v7287_v23, %v8215_v49 }
0x1875   :  { %v2160_v5 = vadd.f32 %v2157_v3, %v2156_v0 }
0x1877   :  { %v2161_v6 = vadd.f32 %v2160_v5, %v2158_v7 }
0x1879   :  { %v2162_v13 = vadd.f32 %v2161_v6, %v2159_v8 }
0x187b   :  { %v2163_v10 = vrot.slane %v2162_v13, 4 }
0x187d   :  { %v2164_v9 = vadd.f32 %v2163_v10, %v2162_v13 }
0x187f   :  { %v2165_v14 = vrot.slane %v2164_v9, 2 }
0x1881   :  { %v2166_v16 = vadd.f32 %v2165_v14, %v2164_v9 }
0x1883   :  { %v2167_v19 = vrot.slane %v2166_v16, 1 }
0x1885   :  { %v2168_v20 = vadd.f32 %v2167_v19, %v2166_v16 }
0x1887   :  { %7288 = vtanh.f32 %v2168_v20 }
0x1891   :  { %v7289_v32 = vpop.eup %7288 }
0x1892   :  { %v2170_v27 = vmul.f32 %v7289_v32, %v8227_v2 }
0x1894   :  { %v8681_v35 = vadd.f32 %v2170_v27, %v2086_v25 }
0x1896   :  { %v2173_v31 = vmul.f32 %v2172_v34, %v8681_v35 }
0x1898   :  { %v2174_v30 = vadd.f32 %v2173_v31, %v8653_v45 }
0x189a   :  { %2177 = vrot.lane.b32.xlu1 %v2174_v30, %s8071_s7  ;;  %v2187_v36 = vrot.slane %v2174_v30, %v8178_v15  ;;  %2175 = vrot.lane.b32.xlu0 %v2174_v30, %s8072_s18  ;;  %v2180_v20 = vmul.f32 %v2174_v30, %v8218_v62 }
0x189c   :  { %v2189_v37 = vmul.f32 %v2187_v36, %v8184_v18  ;;  %v2190_v39 = vmul.f32 %v2187_v36, %v8190_v22  ;;  %v2191_v41 = vmul.f32 %v2187_v36, %v8182_v17  ;;  %v2192_v43 = vmul.f32 %v2187_v36, %v8188_v21 }
0x189e   :  { %7290 = vtanh.f32 %v2189_v37 }
0x189f   :  { %7292 = vtanh.f32 %v2190_v39 }
0x18a0   :  { %7294 = vtanh.f32 %v2191_v41 }
0x18a1   :  { %7296 = vtanh.f32 %v2192_v43 }
0x18a8   :  { %v7291_v48 = vpop.eup %7290 }
0x18a9   :  { %v7293_v60 = vpop.eup %7292 }
0x18aa   :  { %v7295_v44 = vpop.eup %7294  ;;  %v2197_v47 = vpack.c.bf16 %v7293_v60, %v7291_v48 }
0x18ab   :  { %v7297_v1 = vpop.eup %7296 }
0x18ac   :  { %6588 = vmatprep.subr.bf16.mxu1 %v2197_v47  ;;  %v2198_v52 = vpack.c.bf16 %v7297_v1, %v7295_v44 }
0x18ad   :  { %6589 = vmatpush3.bf16.msra.mxu1 %v2197_v47 }
0x18ae   :  { %6590 = vmatprep.subr.bf16.mxu1 %v2198_v52 }
0x18b1   :  { %6591 = vmatpush3.bf16.msra.mxu1 %v2198_v52 }
0x18b4   :  { %6593 = vmatmul.mubr.msk.bf16.vlgmr.msra.gmra.mrb[40].mxu1 %vm135_vm0, %v8200_v33 }
0x18b5   :  { %6608 = vmatprep.mubr.msk.bf16.mxu1 %vm135_vm0, %v8163_v11 }
0x190c   :  { %v2178_v9 = vpop.permute.xlu1 %2177  ;;  %v2176_v14 = vpop.permute.xlu0 %2175 }
0x190d   :  { %v2179_v16 = vadd.f32 %v2178_v9, %v2176_v14 }
0x190f   :  { %v2181_v19 = vmul.f32 %v2179_v16, %v8220_v63 }
0x1911   :  { %v2182_v26 = vadd.f32 %v2181_v19, %v2180_v20  ;;  %v2363_v20 = vstv %s6070_s20  ;;  %s6169_s20 = sld [smem:[#allocation4 + $0xf]] }
0x1987   :  { %v6594_v50 = vpop.f32.mrb[40].mxu1 }
0x1988   :  { %v2233_v53 = vpop.f32.mrb[41].mxu1 }
0x1989   :  { %7298 = vtanh.f32 %v2233_v53  ;;  %v6595_v51 = vpop.f32.mrb[42].mxu1 }
0x198a   :  { %7300 = vtanh.f32 %v6594_v50  ;;  %v2236_v56 = vpop.f32.mrb[43].mxu1 }
0x198b   :  { %7302 = vtanh.f32 %v2236_v56 }
0x198c   :  { %7304 = vtanh.f32 %v6595_v51 }
0x1993   :  { %v7299_v55 = vpop.eup %7298 }
0x1994   :  { %v7301_v54 = vpop.eup %7300  ;;  %v2252_v58 = vmul.f32 %v7299_v55, %v8206_v38 }
0x1995   :  { %v7303_v57 = vpop.eup %7302  ;;  %v2254_v4 = vmul.f32 %v7301_v54, %v8212_v46 }
0x1996   :  { %v2253_v59 = vmul.f32 %v7303_v57, %v8208_v40  ;;  %v7305_v61 = vpop.eup %7304 }
0x1997   :  { %v2255_v0 = vmul.f32 %v7305_v61, %v8215_v49 }
0x1998   :  { %v2256_v12 = vadd.f32 %v2253_v59, %v2252_v58 }
0x199a   :  { %v2257_v3 = vadd.f32 %v2256_v12, %v2254_v4 }
0x199c   :  { %v2258_v23 = vadd.f32 %v2257_v3, %v2255_v0 }
0x199e   :  { %v2259_v7 = vrot.slane %v2258_v23, 4 }
0x19a0   :  { %v2260_v5 = vadd.f32 %v2259_v7, %v2258_v23 }
0x19a2   :  { %v2261_v8 = vrot.slane %v2260_v5, 2 }
0x19a4   :  { %v2262_v6 = vadd.f32 %v2261_v8, %v2260_v5 }
0x19a6   :  { %v2263_v13 = vrot.slane %v2262_v6, 1 }
0x19a8   :  { %v2264_v10 = vadd.f32 %v2263_v13, %v2262_v6 }
0x19aa   :  { %7306 = vtanh.f32 %v2264_v10 }
0x19b4   :  { %v7307_v24 = vpop.eup %7306 }
0x19b5   :  { %v2266_v28 = vmul.f32 %v7307_v24, %v8227_v2 }
0x19b7   :  { %v2267_v29 = vadd.f32 %v2266_v28, %v2182_v26 }
0x19b9   :  { %v2268_v42 = vmul.f32 %v2267_v29, %v2172_v34  ;;  %v2459_v14 = vmul.f32 2.0, %v2267_v29 }
0x19bb   :  { %v2269_v32 = vadd.f32 %v2268_v42, %v8653_v45  ;;  %v2460_v26 = vadd.f32 %v2459_v14, %v8681_v35 }
0x19bd   :  { %2272 = vrot.lane.b32.xlu1 %v2269_v32, %s8071_s7  ;;  %v2282_v25 = vrot.slane %v2269_v32, %v8178_v15  ;;  %2270 = vrot.lane.b32.xlu0 %v2269_v32, %s8072_s18  ;;  %v2275_v10 = vmul.f32 %v2269_v32, %v8218_v62 }
0x19bf   :  { %v2284_v27 = vmul.f32 %v2282_v25, %v8184_v18  ;;  %v2285_v31 = vmul.f32 %v2282_v25, %v8190_v22  ;;  %v2286_v30 = vmul.f32 %v2282_v25, %v8182_v17  ;;  %v2287_v36 = vmul.f32 %v2282_v25, %v8188_v21 }
0x19c1   :  { %7308 = vtanh.f32 %v2284_v27 }
0x19c2   :  { %7310 = vtanh.f32 %v2285_v31 }
0x19c3   :  { %7312 = vtanh.f32 %v2286_v30 }
0x19c4   :  { %7314 = vtanh.f32 %v2287_v36 }
0x19cb   :  { %v7309_v34 = vpop.eup %7308 }
0x19cc   :  { %v7311_v37 = vpop.eup %7310 }
0x19cd   :  { %v7313_v39 = vpop.eup %7312  ;;  %v2292_v41 = vpack.c.bf16 %v7311_v37, %v7309_v34 }
0x19ce   :  { %v7315_v43 = vpop.eup %7314 }
0x19cf   :  { %6596 = vmatprep.subr.bf16.mxu0 %v2292_v41  ;;  %v2293_v48 = vpack.c.bf16 %v7315_v43, %v7313_v39 }
0x19d0   :  { %6597 = vmatpush3.bf16.msra.mxu0 %v2292_v41 }
0x19d1   :  { %6598 = vmatprep.subr.bf16.mxu0 %v2293_v48 }
0x19d4   :  { %6599 = vmatpush3.bf16.msra.mxu0 %v2293_v48 }
0x19d7   :  { %6601 = vmatmul.mubr.msk.bf16.vlgmr.msra.gmra.mrb[44].mxu0 %vm135_vm0, %v8200_v33 }
0x19d8   :  { %6616 = vmatprep.mubr.msk.bf16.mxu0 %vm135_vm0, %v8163_v11 }
0x1a2f   :  { %v2273_v5 = vpop.permute.xlu1 %2272  ;;  %v2271_v8 = vpop.permute.xlu0 %2270 }
0x1a30   :  { %v2274_v6 = vadd.f32 %v2273_v5, %v2271_v8 }
0x1a32   :  { %v2276_v13 = vmul.f32 %v2274_v6, %v8220_v63 }
0x1a34   :  { %v2277_v16 = vadd.f32 %v2276_v13, %v2275_v10 }
0x1aaa   :  { %v6602_v60 = vpop.f32.mrb[44].mxu0 }
0x1aab   :  { %v2328_v44 = vpop.f32.mrb[45].mxu0 }
0x1aac   :  { %7316 = vtanh.f32 %v2328_v44  ;;  %v6603_v47 = vpop.f32.mrb[46].mxu0 }
0x1aad   :  { %7318 = vtanh.f32 %v6602_v60  ;;  %v2331_v1 = vpop.f32.mrb[47].mxu0 }
0x1aae   :  { %7320 = vtanh.f32 %v2331_v1 }
0x1aaf   :  { %7322 = vtanh.f32 %v6603_v47 }
0x1ab6   :  { %v7317_v52 = vpop.eup %7316 }
0x1ab7   :  { %v7319_v50 = vpop.eup %7318  ;;  %v2347_v51 = vmul.f32 %v7317_v52, %v8206_v38 }
0x1ab8   :  { %v7321_v53 = vpop.eup %7320  ;;  %v2349_v54 = vmul.f32 %v7319_v50, %v8212_v46 }
0x1ab9   :  { %v2348_v56 = vmul.f32 %v7321_v53, %v8208_v40  ;;  %v7323_v55 = vpop.eup %7322 }
0x1aba   :  { %v2350_v58 = vmul.f32 %v7323_v55, %v8215_v49 }
0x1abb   :  { %v2351_v57 = vadd.f32 %v2348_v56, %v2347_v51 }
0x1abd   :  { %v2352_v59 = vadd.f32 %v2351_v57, %v2349_v54 }
0x1abf   :  { %v2353_v61 = vadd.f32 %v2352_v59, %v2350_v58 }
0x1ac1   :  { %v2354_v4 = vrot.slane %v2353_v61, 4 }
0x1ac3   :  { %v2355_v12 = vadd.f32 %v2354_v4, %v2353_v61 }
0x1ac5   :  { %v2356_v0 = vrot.slane %v2355_v12, 2 }
0x1ac7   :  { %v2357_v3 = vadd.f32 %v2356_v0, %v2355_v12 }
0x1ac9   :  { %v2358_v23 = vrot.slane %v2357_v3, 1 }
0x1acb   :  { %v2359_v7 = vadd.f32 %v2358_v23, %v2357_v3 }
0x1acd   :  { %7324 = vtanh.f32 %v2359_v7 }
0x1ad7   :  { %v7325_v9 = vpop.eup %7324 }
0x1ad8   :  { %v2361_v19 = vmul.f32 %v7325_v9, %v8227_v2 }
0x1ada   :  { %v2362_v24 = vadd.f32 %v2361_v19, %v2277_v16  ;;  %v2464_v19 = vstv %s6072_s21  ;;  %s8073_s21 = smov [#allocation7]  }
0x1adc   :  { %v2364_v28 = vmul.f32 %v2363_v20, %v2362_v24  ;;  %v2461_v42 = vmul.f32 2.0, %v2362_v24 }
0x1ade   :  { %v2365_v25 = vadd.f32 %v2364_v28, %v8653_v45  ;;  %v2462_v27 = vadd.f32 %v2461_v42, %v2460_v26 }
0x1ae0   :  { %2368 = vrot.lane.b32.xlu1 %v2365_v25, %s8071_s7  ;;  %v2378_v31 = vrot.slane %v2365_v25, %v8178_v15  ;;  %2366 = vrot.lane.b32.xlu0 %v2365_v25, %s8072_s18  ;;  %v2371_v13 = vmul.f32 %v2365_v25, %v8218_v62 }
0x1ae2   :  { %v2380_v29 = vmul.f32 %v2378_v31, %v8184_v18  ;;  %v2381_v32 = vmul.f32 %v2378_v31, %v8190_v22  ;;  %v2382_v30 = vmul.f32 %v2378_v31, %v8182_v17  ;;  %v2383_v36 = vmul.f32 %v2378_v31, %v8188_v21 }
0x1ae4   :  { %7326 = vtanh.f32 %v2380_v29 }
0x1ae5   :  { %7328 = vtanh.f32 %v2381_v32 }
0x1ae6   :  { %7330 = vtanh.f32 %v2382_v30 }
0x1ae7   :  { %7332 = vtanh.f32 %v2383_v36 }
0x1aee   :  { %v7327_v35 = vpop.eup %7326 }
0x1aef   :  { %v7329_v34 = vpop.eup %7328 }
0x1af0   :  { %v7331_v37 = vpop.eup %7330  ;;  %v2388_v39 = vpack.c.bf16 %v7329_v34, %v7327_v35 }
0x1af1   :  { %v7333_v41 = vpop.eup %7332 }
0x1af2   :  { %6604 = vmatprep.subr.bf16.mxu1 %v2388_v39  ;;  %v2389_v43 = vpack.c.bf16 %v7333_v41, %v7331_v37 }
0x1af3   :  { %6605 = vmatpush3.bf16.msra.mxu1 %v2388_v39 }
0x1af4   :  { %6606 = vmatprep.subr.bf16.mxu1 %v2389_v43 }
0x1af7   :  { %6607 = vmatpush3.bf16.msra.mxu1 %v2389_v43 }
0x1afa   :  { %6609 = vmatmul.mubr.msk.bf16.vlgmr.msra.gmra.mrb[44].mxu1 %vm135_vm0, %v8200_v33 }
0x1afb   :  { %6624 = vmatprep.mubr.msk.bf16.mxu1 %vm135_vm0, %v8163_v11 }
0x1b52   :  { %v2369_v7 = vpop.permute.xlu1 %2368  ;;  %v2367_v5 = vpop.permute.xlu0 %2366 }
0x1b53   :  { %v2370_v8 = vadd.f32 %v2369_v7, %v2367_v5 }
0x1b55   :  { %v2372_v6 = vmul.f32 %v2370_v8, %v8220_v63 }
0x1b57   :  { %v2373_v9 = vadd.f32 %v2372_v6, %v2371_v13  ;;  %v2564_v6 = vstv %s8764_s2  ;;  %s6001_s2 = sshll.u32 %s8073_s21, 4  ;;  %s6002_s2 = int_to_ptr.vmem [resolvable:$true] %s6001_s2 }
0x1b58   :  { %p8045_p7 = scmp.lt.s32.totalorder %s6002_s2, %s6002_s2 }
0x1bcd   :  { %v6610_v48 = vpop.f32.mrb[44].mxu1 }
0x1bce   :  { %v2424_v60 = vpop.f32.mrb[45].mxu1 }
0x1bcf   :  { %7334 = vtanh.f32 %v2424_v60  ;;  %v6611_v44 = vpop.f32.mrb[46].mxu1 }
0x1bd0   :  { %7336 = vtanh.f32 %v6610_v48  ;;  %v2427_v47 = vpop.f32.mrb[47].mxu1 }
0x1bd1   :  { %7338 = vtanh.f32 %v2427_v47 }
0x1bd2   :  { %7340 = vtanh.f32 %v6611_v44 }
0x1bd9   :  { %v7335_v1 = vpop.eup %7334 }
0x1bda   :  { %v7337_v52 = vpop.eup %7336  ;;  %v2443_v53 = vmul.f32 %v7335_v1, %v8206_v38 }
0x1bdb   :  { %v7339_v50 = vpop.eup %7338  ;;  %v2445_v55 = vmul.f32 %v7337_v52, %v8212_v46 }
0x1bdc   :  { %v2444_v51 = vmul.f32 %v7339_v50, %v8208_v40  ;;  %v7341_v56 = vpop.eup %7340 }
0x1bdd   :  { %v2446_v57 = vmul.f32 %v7341_v56, %v8215_v49 }
0x1bde   :  { %v2447_v54 = vadd.f32 %v2444_v51, %v2443_v53 }
0x1be0   :  { %v2448_v58 = vadd.f32 %v2447_v54, %v2445_v55 }
0x1be2   :  { %v2449_v59 = vadd.f32 %v2448_v58, %v2446_v57 }
0x1be4   :  { %v2450_v61 = vrot.slane %v2449_v59, 4 }
0x1be6   :  { %v2451_v4 = vadd.f32 %v2450_v61, %v2449_v59 }
0x1be8   :  { %v2452_v12 = vrot.slane %v2451_v4, 2 }
0x1bea   :  { %v2453_v0 = vadd.f32 %v2452_v12, %v2451_v4 }
0x1bec   :  { %v2454_v3 = vrot.slane %v2453_v0, 1 }
0x1bee   :  { %v2455_v23 = vadd.f32 %v2454_v3, %v2453_v0 }
0x1bf0   :  { %7342 = vtanh.f32 %v2455_v23 }
0x1bfa   :  { %v7343_v10 = vpop.eup %7342 }
0x1bfb   :  { %v2457_v14 = vmul.f32 %v7343_v10, %v8227_v2 }
0x1bfd   :  { %v2458_v16 = vadd.f32 %v2457_v14, %v2373_v9 }
0x1bff   :  { %v2463_v20 = vadd.f32 %v2462_v27, %v2458_v16 }
0x1c01   :  { %v2465_v24 = vmul.f32 %v2464_v19, %v2463_v20 }
0x1c03   :  { %v8743_v26 = vadd.f32 %v2465_v24, %v8653_v45 }
0x1c05   :  { %2473 = vrot.lane.b32.xlu1 %v8743_v26, %s8071_s7  ;;  %2467 = vst [vmem:[#allocation7 + $0x6] sm:$0x1] %v8743_v26  ;;  %2471 = vrot.lane.b32.xlu0 %v8743_v26, %s8072_s18  ;;  %v2483_v28 = vrot.slane %v8743_v26, %v8178_v15  ;;  %v2476_v23 = vmul.f32 %v8743_v26, %v8218_v62 }
0x1c07   :  { %v2485_v42 = vmul.f32 %v2483_v28, %v8184_v18  ;;  %v2486_v25 = vmul.f32 %v2483_v28, %v8190_v22  ;;  %v2487_v27 = vmul.f32 %v2483_v28, %v8182_v17  ;;  %v2488_v45 = vmul.f32 %v2483_v28, %v8188_v21 }
0x1c09   :  { %7344 = vtanh.f32 %v2485_v42 }
0x1c0a   :  { %7346 = vtanh.f32 %v2486_v25 }
0x1c0b   :  { %7348 = vtanh.f32 %v2487_v27 }
0x1c0c   :  { %7350 = vtanh.f32 %v2488_v45 }
0x1c13   :  { %v7345_v31 = vpop.eup %7344 }
0x1c14   :  { %v7347_v29 = vpop.eup %7346 }
0x1c15   :  { %v7349_v32 = vpop.eup %7348  ;;  %v2493_v30 = vpack.c.bf16 %v7347_v29, %v7345_v31 }
0x1c16   :  { %v7351_v36 = vpop.eup %7350 }
0x1c17   :  { %6612 = vmatprep.subr.bf16.mxu0 %v2493_v30  ;;  %v2494_v35 = vpack.c.bf16 %v7351_v36, %v7349_v32 }
0x1c18   :  { %6613 = vmatpush3.bf16.msra.mxu0 %v2493_v30 }
0x1c19   :  { %6614 = vmatprep.subr.bf16.mxu0 %v2494_v35 }
0x1c1c   :  { %6615 = vmatpush3.bf16.msra.mxu0 %v2494_v35 }
0x1c1f   :  { %6617 = vmatmul.mubr.msk.bf16.vlgmr.msra.gmra.mrb[48].mxu0 %vm135_vm0, %v8200_v33 }
0x1c20   :  { %6632 = vmatprep.mubr.msk.bf16.mxu0 %vm135_vm0, %v8163_v11 }
0x1c77   :  { %v2474_v4 = vpop.permute.xlu1 %2473  ;;  %v2472_v12 = vpop.permute.xlu0 %2471 }
0x1c78   :  { %v2475_v0 = vadd.f32 %v2474_v4, %v2472_v12 }
0x1c7a   :  { %v2477_v3 = vmul.f32 %v2475_v0, %v8220_v63 }
0x1c7c   :  { %v2478_v5 = vadd.f32 %v2477_v3, %v2476_v23 }
0x1cf2   :  { %v6618_v34 = vpop.f32.mrb[48].mxu0 }
0x1cf3   :  { %v2529_v37 = vpop.f32.mrb[49].mxu0 }
0x1cf4   :  { %7352 = vtanh.f32 %v2529_v37  ;;  %v6619_v39 = vpop.f32.mrb[50].mxu0 }
0x1cf5   :  { %7354 = vtanh.f32 %v6618_v34  ;;  %v2532_v41 = vpop.f32.mrb[51].mxu0 }
0x1cf6   :  { %7356 = vtanh.f32 %v2532_v41 }
0x1cf7   :  { %7358 = vtanh.f32 %v6619_v39 }
0x1cfe   :  { %v7353_v43 = vpop.eup %7352 }
0x1cff   :  { %v7355_v48 = vpop.eup %7354  ;;  %v2548_v44 = vmul.f32 %v7353_v43, %v8206_v38 }
0x1d00   :  { %v7357_v60 = vpop.eup %7356  ;;  %v2550_v52 = vmul.f32 %v7355_v48, %v8212_v46 }
0x1d01   :  { %v2549_v47 = vmul.f32 %v7357_v60, %v8208_v40  ;;  %v7359_v1 = vpop.eup %7358 }
0x1d02   :  { %v2551_v53 = vmul.f32 %v7359_v1, %v8215_v49 }
0x1d03   :  { %v2552_v50 = vadd.f32 %v2549_v47, %v2548_v44 }
0x1d05   :  { %v2553_v51 = vadd.f32 %v2552_v50, %v2550_v52 }
0x1d07   :  { %v2554_v56 = vadd.f32 %v2553_v51, %v2551_v53 }
0x1d09   :  { %v2555_v55 = vrot.slane %v2554_v56, 4 }
0x1d0b   :  { %v2556_v54 = vadd.f32 %v2555_v55, %v2554_v56 }
0x1d0d   :  { %v2557_v57 = vrot.slane %v2556_v54, 2 }
0x1d0f   :  { %v2558_v58 = vadd.f32 %v2557_v57, %v2556_v54 }
0x1d11   :  { %v2559_v59 = vrot.slane %v2558_v58, 1 }
0x1d13   :  { %v2560_v61 = vadd.f32 %v2559_v59, %v2558_v58 }
0x1d15   :  { %7360 = vtanh.f32 %v2560_v61 }
0x1d1f   :  { %v7361_v7 = vpop.eup %7360 }
0x1d20   :  { %v2562_v8 = vmul.f32 %v7361_v7, %v8227_v2 }
0x1d22   :  { %v8771_v13 = vadd.f32 %v2562_v8, %v2478_v5 }
0x1d24   :  { %v2565_v10 = vmul.f32 %v2564_v6, %v8771_v13 }
0x1d26   :  { %v2566_v9 = vadd.f32 %v2565_v10, %v8743_v26 }
0x1d28   :  { %2569 = vrot.lane.b32.xlu1 %v2566_v9, %s8071_s7  ;;  %v2579_v14 = vrot.slane %v2566_v9, %v8178_v15  ;;  %2567 = vrot.lane.b32.xlu0 %v2566_v9, %s8072_s18  ;;  %v2572_v61 = vmul.f32 %v2566_v9, %v8218_v62 }
0x1d2a   :  { %v2581_v16 = vmul.f32 %v2579_v14, %v8184_v18  ;;  %v2582_v19 = vmul.f32 %v2579_v14, %v8190_v22  ;;  %v2583_v20 = vmul.f32 %v2579_v14, %v8182_v17  ;;  %v2584_v24 = vmul.f32 %v2579_v14, %v8188_v21 }
0x1d2c   :  { %7362 = vtanh.f32 %v2581_v16 }
0x1d2d   :  { %7364 = vtanh.f32 %v2582_v19 }
0x1d2e   :  { %7366 = vtanh.f32 %v2583_v20 }
0x1d2f   :  { %7368 = vtanh.f32 %v2584_v24 }
0x1d36   :  { %v7363_v28 = vpop.eup %7362 }
0x1d37   :  { %v7365_v42 = vpop.eup %7364 }
0x1d38   :  { %v7367_v25 = vpop.eup %7366  ;;  %v2589_v27 = vpack.c.bf16 %v7365_v42, %v7363_v28 }
0x1d39   :  { %v7369_v45 = vpop.eup %7368 }
0x1d3a   :  { %6620 = vmatprep.subr.bf16.mxu1 %v2589_v27  ;;  %v2590_v31 = vpack.c.bf16 %v7369_v45, %v7367_v25 }
0x1d3b   :  { %6621 = vmatpush3.bf16.msra.mxu1 %v2589_v27 }
0x1d3c   :  { %6622 = vmatprep.subr.bf16.mxu1 %v2590_v31 }
0x1d3f   :  { %6623 = vmatpush3.bf16.msra.mxu1 %v2590_v31 }
0x1d42   :  { %6625 = vmatmul.mubr.msk.bf16.vlgmr.msra.gmra.mrb[48].mxu1 %vm135_vm0, %v8200_v33 }
0x1d43   :  { %6640 = vmatprep.mubr.msk.bf16.mxu1 %vm135_vm0, %v8163_v11 }
0x1d9a   :  { %v2570_v54 = vpop.permute.xlu1 %2569  ;;  %v2568_v57 = vpop.permute.xlu0 %2567 }
0x1d9b   :  { %v2571_v58 = vadd.f32 %v2570_v54, %v2568_v57 }
0x1d9d   :  { %v2573_v59 = vmul.f32 %v2571_v58, %v8220_v63 }
0x1d9f   :  { %v2574_v12 = vadd.f32 %v2573_v59, %v2572_v61  ;;  %v2755_v61 = vstv %s6081_s6  ;;  %s8040_s6 = scalar_lea.vmem %s6002_s2, 256 }
0x1da0   :  { %p8041_p6 = scmp.ne.s32.totalorder %s6002_s2, %s8040_s6  ;;  %p8046_p8 = scmp.lt.s32.totalorder %s8040_s6, %s8040_s6 }
0x1da2   :  { %p8047_p9 = por %p8046_p8, %p8045_p7 }
0x1da4   :  { %p8048_p10 = pnand %p8047_p9, %p8041_p6 }
0x1e15   :  { %v6626_v29 = vpop.f32.mrb[48].mxu1 }
0x1e16   :  { %v2625_v32 = vpop.f32.mrb[49].mxu1 }
0x1e17   :  { %7370 = vtanh.f32 %v2625_v32  ;;  %v6627_v30 = vpop.f32.mrb[50].mxu1 }
0x1e18   :  { %7372 = vtanh.f32 %v6626_v29  ;;  %v2628_v36 = vpop.f32.mrb[51].mxu1 }
0x1e19   :  { %7374 = vtanh.f32 %v2628_v36 }
0x1e1a   :  { %7376 = vtanh.f32 %v6627_v30 }
0x1e21   :  { %v7371_v35 = vpop.eup %7370 }
0x1e22   :  { %v7373_v34 = vpop.eup %7372  ;;  %v2644_v39 = vmul.f32 %v7371_v35, %v8206_v38 }
0x1e23   :  { %v7375_v37 = vpop.eup %7374  ;;  %v2646_v48 = vmul.f32 %v7373_v34, %v8212_v46 }
0x1e24   :  { %v2645_v41 = vmul.f32 %v7375_v37, %v8208_v40  ;;  %v7377_v43 = vpop.eup %7376 }
0x1e25   :  { %v2647_v44 = vmul.f32 %v7377_v43, %v8215_v49 }
0x1e26   :  { %v2648_v60 = vadd.f32 %v2645_v41, %v2644_v39 }
0x1e28   :  { %v2649_v47 = vadd.f32 %v2648_v60, %v2646_v48 }
0x1e2a   :  { %v2650_v1 = vadd.f32 %v2649_v47, %v2647_v44 }
0x1e2c   :  { %v2651_v52 = vrot.slane %v2650_v1, 4 }
0x1e2e   :  { %v2652_v50 = vadd.f32 %v2651_v52, %v2650_v1 }
0x1e30   :  { %v2653_v53 = vrot.slane %v2652_v50, 2 }
0x1e32   :  { %v2654_v51 = vadd.f32 %v2653_v53, %v2652_v50 }
0x1e34   :  { %v2655_v56 = vrot.slane %v2654_v51, 1 }
0x1e36   :  { %v2656_v55 = vadd.f32 %v2655_v56, %v2654_v51 }
0x1e38   :  { %7378 = vtanh.f32 %v2656_v55 }
0x1e42   :  { %v7379_v4 = vpop.eup %7378 }
0x1e43   :  { %v2658_v0 = vmul.f32 %v7379_v4, %v8227_v2 }
0x1e45   :  { %v2659_v3 = vadd.f32 %v2658_v0, %v2574_v12 }
0x1e47   :  { %v2660_v23 = vmul.f32 %v2659_v3, %v2564_v6  ;;  %v2851_v57 = vmul.f32 2.0, %v2659_v3 }
0x1e49   :  { %v2661_v7 = vadd.f32 %v2660_v23, %v8743_v26  ;;  %v2852_v12 = vadd.f32 %v2851_v57, %v8771_v13 }
0x1e4b   :  { %2664 = vrot.lane.b32.xlu1 %v2661_v7, %s8071_s7  ;;  %v2674_v5 = vrot.slane %v2661_v7, %v8178_v15  ;;  %2662 = vrot.lane.b32.xlu0 %v2661_v7, %s8072_s18  ;;  %v2667_v55 = vmul.f32 %v2661_v7, %v8218_v62 }
0x1e4d   :  { %v2676_v8 = vmul.f32 %v2674_v5, %v8184_v18  ;;  %v2677_v10 = vmul.f32 %v2674_v5, %v8190_v22  ;;  %v2678_v9 = vmul.f32 %v2674_v5, %v8182_v17  ;;  %v2679_v14 = vmul.f32 %v2674_v5, %v8188_v21 }
0x1e4f   :  { %7380 = vtanh.f32 %v2676_v8 }
0x1e50   :  { %7382 = vtanh.f32 %v2677_v10 }
0x1e51   :  { %7384 = vtanh.f32 %v2678_v9 }
0x1e52   :  { %7386 = vtanh.f32 %v2679_v14 }
0x1e59   :  { %v7381_v6 = vpop.eup %7380 }
0x1e5a   :  { %v7383_v16 = vpop.eup %7382 }
0x1e5b   :  { %v7385_v19 = vpop.eup %7384  ;;  %v2684_v20 = vpack.c.bf16 %v7383_v16, %v7381_v6 }
0x1e5c   :  { %v7387_v24 = vpop.eup %7386 }
0x1e5d   :  { %6628 = vmatprep.subr.bf16.mxu0 %v2684_v20  ;;  %v2685_v28 = vpack.c.bf16 %v7387_v24, %v7385_v19 }
0x1e5e   :  { %6629 = vmatpush3.bf16.msra.mxu0 %v2684_v20 }
0x1e5f   :  { %6630 = vmatprep.subr.bf16.mxu0 %v2685_v28 }
0x1e62   :  { %6631 = vmatpush3.bf16.msra.mxu0 %v2685_v28 }
0x1e65   :  { %6633 = vmatmul.mubr.msk.bf16.vlgmr.msra.gmra.mrb[52].mxu0 %vm135_vm0, %v8200_v33 }
0x1e66   :  { %6648 = vmatprep.mubr.msk.bf16.mxu0 %vm135_vm0, %v8163_v11 }
0x1ebd   :  { %v2665_v50 = vpop.permute.xlu1 %2664  ;;  %v2663_v53 = vpop.permute.xlu0 %2662 }
0x1ebe   :  { %v2666_v51 = vadd.f32 %v2665_v50, %v2663_v53 }
0x1ec0   :  { %v2668_v56 = vmul.f32 %v2666_v51, %v8220_v63 }
0x1ec2   :  { %v2669_v58 = vadd.f32 %v2668_v56, %v2667_v55 }
0x1f38   :  { %v6634_v42 = vpop.f32.mrb[52].mxu0 }
0x1f39   :  { %v2720_v25 = vpop.f32.mrb[53].mxu0 }
0x1f3a   :  { %7388 = vtanh.f32 %v2720_v25  ;;  %v6635_v27 = vpop.f32.mrb[54].mxu0 }
0x1f3b   :  { %7390 = vtanh.f32 %v6634_v42  ;;  %v2723_v45 = vpop.f32.mrb[55].mxu0 }
0x1f3c   :  { %7392 = vtanh.f32 %v2723_v45 }
0x1f3d   :  { %7394 = vtanh.f32 %v6635_v27 }
0x1f44   :  { %v7389_v31 = vpop.eup %7388 }
0x1f45   :  { %v7391_v29 = vpop.eup %7390  ;;  %v2739_v30 = vmul.f32 %v7389_v31, %v8206_v38 }
0x1f46   :  { %v7393_v32 = vpop.eup %7392  ;;  %v2741_v34 = vmul.f32 %v7391_v29, %v8212_v46 }
0x1f47   :  { %v2740_v36 = vmul.f32 %v7393_v32, %v8208_v40  ;;  %v7395_v35 = vpop.eup %7394 }
0x1f48   :  { %v2742_v39 = vmul.f32 %v7395_v35, %v8215_v49 }
0x1f49   :  { %v2743_v37 = vadd.f32 %v2740_v36, %v2739_v30 }
0x1f4b   :  { %v2744_v41 = vadd.f32 %v2743_v37, %v2741_v34 }
0x1f4d   :  { %v2745_v43 = vadd.f32 %v2744_v41, %v2742_v39 }
0x1f4f   :  { %v2746_v48 = vrot.slane %v2745_v43, 4 }
0x1f51   :  { %v2747_v60 = vadd.f32 %v2746_v48, %v2745_v43 }
0x1f53   :  { %v2748_v44 = vrot.slane %v2747_v60, 2 }
0x1f55   :  { %v2749_v47 = vadd.f32 %v2748_v44, %v2747_v60 }
0x1f57   :  { %v2750_v1 = vrot.slane %v2749_v47, 1 }
0x1f59   :  { %v2751_v52 = vadd.f32 %v2750_v1, %v2749_v47 }
0x1f5b   :  { %7396 = vtanh.f32 %v2751_v52 }
0x1f65   :  { %v7397_v54 = vpop.eup %7396 }
0x1f66   :  { %v2753_v59 = vmul.f32 %v7397_v54, %v8227_v2 }
0x1f68   :  { %v2754_v4 = vadd.f32 %v2753_v59, %v2669_v58  ;;  %v2856_v59 = vstv %s6083_s3 }
0x1f6a   :  { %v2756_v0 = vmul.f32 %v2755_v61, %v2754_v4  ;;  %v2853_v23 = vmul.f32 2.0, %v2754_v4 }
0x1f6c   :  { %v2757_v5 = vadd.f32 %v2756_v0, %v8743_v26  ;;  %v2854_v8 = vadd.f32 %v2853_v23, %v2852_v12 }
0x1f6e   :  { %2760 = vrot.lane.b32.xlu1 %v2757_v5, %s8071_s7  ;;  %v2770_v10 = vrot.slane %v2757_v5, %v8178_v15  ;;  %2758 = vrot.lane.b32.xlu0 %v2757_v5, %s8072_s18  ;;  %v2763_v56 = vmul.f32 %v2757_v5, %v8218_v62 }
0x1f70   :  { %v2772_v3 = vmul.f32 %v2770_v10, %v8184_v18  ;;  %v2773_v7 = vmul.f32 %v2770_v10, %v8190_v22  ;;  %v2774_v9 = vmul.f32 %v2770_v10, %v8182_v17  ;;  %v2775_v14 = vmul.f32 %v2770_v10, %v8188_v21 }
0x1f72   :  { %7398 = vtanh.f32 %v2772_v3 }
0x1f73   :  { %7400 = vtanh.f32 %v2773_v7 }
0x1f74   :  { %7402 = vtanh.f32 %v2774_v9 }
0x1f75   :  { %7404 = vtanh.f32 %v2775_v14 }
0x1f7c   :  { %v7399_v13 = vpop.eup %7398 }
0x1f7d   :  { %v7401_v6 = vpop.eup %7400 }
0x1f7e   :  { %v7403_v16 = vpop.eup %7402  ;;  %v2780_v19 = vpack.c.bf16 %v7401_v6, %v7399_v13 }
0x1f7f   :  { %v7405_v20 = vpop.eup %7404 }
0x1f80   :  { %6636 = vmatprep.subr.bf16.mxu1 %v2780_v19  ;;  %v2781_v24 = vpack.c.bf16 %v7405_v20, %v7403_v16 }
0x1f81   :  { %6637 = vmatpush3.bf16.msra.mxu1 %v2780_v19 }
0x1f82   :  { %6638 = vmatprep.subr.bf16.mxu1 %v2781_v24 }
0x1f85   :  { %6639 = vmatpush3.bf16.msra.mxu1 %v2781_v24 }
0x1f88   :  { %6641 = vmatmul.mubr.msk.bf16.vlgmr.msra.gmra.mrb[52].mxu1 %vm135_vm0, %v8200_v33 }
0x1f89   :  { %6656 = vmatprep.mubr.msk.bf16.mxu1 %vm135_vm0, %v8163_v11 }
0x1fe0   :  { %v2761_v52 = vpop.permute.xlu1 %2760  ;;  %v2759_v50 = vpop.permute.xlu0 %2758 }
0x1fe1   :  { %v2762_v53 = vadd.f32 %v2761_v52, %v2759_v50 }
0x1fe3   :  { %v2764_v51 = vmul.f32 %v2762_v53, %v8220_v63 }
0x1fe5   :  { %v2765_v54 = vadd.f32 %v2764_v51, %v2763_v56  ;;  %v2956_v51 = vstv %s8854_s22 }
0x205b   :  { %v6642_v28 = vpop.f32.mrb[52].mxu1 }
0x205c   :  { %v2816_v42 = vpop.f32.mrb[53].mxu1 }
0x205d   :  { %7406 = vtanh.f32 %v2816_v42  ;;  %v6643_v25 = vpop.f32.mrb[54].mxu1 }
0x205e   :  { %7408 = vtanh.f32 %v6642_v28  ;;  %v2819_v27 = vpop.f32.mrb[55].mxu1 }
0x205f   :  { %7410 = vtanh.f32 %v2819_v27 }
0x2060   :  { %7412 = vtanh.f32 %v6643_v25 }
0x2067   :  { %v7407_v45 = vpop.eup %7406 }
0x2068   :  { %v7409_v31 = vpop.eup %7408  ;;  %v2835_v32 = vmul.f32 %v7407_v45, %v8206_v38 }
0x2069   :  { %v7411_v29 = vpop.eup %7410  ;;  %v2837_v35 = vmul.f32 %v7409_v31, %v8212_v46 }
0x206a   :  { %v2836_v30 = vmul.f32 %v7411_v29, %v8208_v40  ;;  %v7413_v36 = vpop.eup %7412 }
0x206b   :  { %v2838_v37 = vmul.f32 %v7413_v36, %v8215_v49 }
0x206c   :  { %v2839_v34 = vadd.f32 %v2836_v30, %v2835_v32 }
0x206e   :  { %v2840_v39 = vadd.f32 %v2839_v34, %v2837_v35 }
0x2070   :  { %v2841_v41 = vadd.f32 %v2840_v39, %v2838_v37 }
0x2072   :  { %v2842_v43 = vrot.slane %v2841_v41, 4 }
0x2074   :  { %v2843_v48 = vadd.f32 %v2842_v43, %v2841_v41 }
0x2076   :  { %v2844_v60 = vrot.slane %v2843_v48, 2 }
0x2078   :  { %v2845_v44 = vadd.f32 %v2844_v60, %v2843_v48 }
0x207a   :  { %v2846_v47 = vrot.slane %v2845_v44, 1 }
0x207c   :  { %v2847_v1 = vadd.f32 %v2846_v47, %v2845_v44 }
0x207e   :  { %7414 = vtanh.f32 %v2847_v1 }
0x2088   :  { %v7415_v55 = vpop.eup %7414 }
0x2089   :  { %v2849_v57 = vmul.f32 %v7415_v55, %v8227_v2 }
0x208b   :  { %v2850_v58 = vadd.f32 %v2849_v57, %v2765_v54 }
0x208d   :  { %v2855_v61 = vadd.f32 %v2854_v8, %v2850_v58 }
0x208f   :  { %v2857_v4 = vmul.f32 %v2856_v59, %v2855_v61 }
0x2091   :  { %v8833_v12 = vadd.f32 %v2857_v4, %v8743_v26 }
0x2093   :  { %2865 = vrot.lane.b32.xlu1 %v8833_v12, %s8071_s7  ;;  %2859 = vst [vmem:[#allocation7 + $0x7] sm:$0x1] %v8833_v12  ;;  %2863 = vrot.lane.b32.xlu0 %v8833_v12, %s8072_s18  ;;  %v2875_v0 = vrot.slane %v8833_v12, %v8178_v15  ;;  %v2868_v1 = vmul.f32 %v8833_v12, %v8218_v62 }
0x2095   :  { %v2877_v23 = vmul.f32 %v2875_v0, %v8184_v18  ;;  %v2878_v5 = vmul.f32 %v2875_v0, %v8190_v22  ;;  %v2879_v8 = vmul.f32 %v2875_v0, %v8182_v17  ;;  %v2880_v26 = vmul.f32 %v2875_v0, %v8188_v21 }
0x2097   :  { %7416 = vtanh.f32 %v2877_v23 }
0x2098   :  { %7418 = vtanh.f32 %v2878_v5 }
0x2099   :  { %7420 = vtanh.f32 %v2879_v8 }
0x209a   :  { %7422 = vtanh.f32 %v2880_v26 }
0x20a1   :  { %v7417_v10 = vpop.eup %7416 }
0x20a2   :  { %v7419_v3 = vpop.eup %7418 }
0x20a3   :  { %v7421_v7 = vpop.eup %7420  ;;  %v2885_v9 = vpack.c.bf16 %v7419_v3, %v7417_v10 }
0x20a4   :  { %v7423_v14 = vpop.eup %7422 }
0x20a5   :  { %6644 = vmatprep.subr.bf16.mxu0 %v2885_v9  ;;  %v2886_v13 = vpack.c.bf16 %v7423_v14, %v7421_v7 }
0x20a6   :  { %6645 = vmatpush3.bf16.msra.mxu0 %v2885_v9 }
0x20a7   :  { %6646 = vmatprep.subr.bf16.mxu0 %v2886_v13 }
0x20aa   :  { %6647 = vmatpush3.bf16.msra.mxu0 %v2886_v13 }
0x20ad   :  { %6649 = vmatmul.mubr.msk.bf16.vlgmr.msra.gmra.mrb[56].mxu0 %vm135_vm0, %v8200_v33 }
0x20ae   :  { %6664 = vmatprep.mubr.msk.bf16.mxu0 %vm135_vm0, %v8163_v11 }
0x2105   :  { %v2866_v48 = vpop.permute.xlu1 %2865  ;;  %v2864_v60 = vpop.permute.xlu0 %2863 }
0x2106   :  { %v2867_v44 = vadd.f32 %v2866_v48, %v2864_v60 }
0x2108   :  { %v2869_v47 = vmul.f32 %v2867_v44, %v8220_v63 }
0x210a   :  { %v2870_v50 = vadd.f32 %v2869_v47, %v2868_v1 }
0x2180   :  { %v6650_v6 = vpop.f32.mrb[56].mxu0 }
0x2181   :  { %v2921_v16 = vpop.f32.mrb[57].mxu0 }
0x2182   :  { %7424 = vtanh.f32 %v2921_v16  ;;  %v6651_v19 = vpop.f32.mrb[58].mxu0 }
0x2183   :  { %7426 = vtanh.f32 %v6650_v6  ;;  %v2924_v20 = vpop.f32.mrb[59].mxu0 }
0x2184   :  { %7428 = vtanh.f32 %v2924_v20 }
0x2185   :  { %7430 = vtanh.f32 %v6651_v19 }
0x218c   :  { %v7425_v24 = vpop.eup %7424 }
0x218d   :  { %v7427_v28 = vpop.eup %7426  ;;  %v2940_v25 = vmul.f32 %v7425_v24, %v8206_v38 }
0x218e   :  { %v7429_v42 = vpop.eup %7428  ;;  %v2942_v31 = vmul.f32 %v7427_v28, %v8212_v46 }
0x218f   :  { %v2941_v27 = vmul.f32 %v7429_v42, %v8208_v40  ;;  %v7431_v45 = vpop.eup %7430 }
0x2190   :  { %v2943_v32 = vmul.f32 %v7431_v45, %v8215_v49 }
0x2191   :  { %v2944_v29 = vadd.f32 %v2941_v27, %v2940_v25 }
0x2193   :  { %v2945_v30 = vadd.f32 %v2944_v29, %v2942_v31 }
0x2195   :  { %v2946_v36 = vadd.f32 %v2945_v30, %v2943_v32 }
0x2197   :  { %v2947_v35 = vrot.slane %v2946_v36, 4 }
0x2199   :  { %v2948_v34 = vadd.f32 %v2947_v35, %v2946_v36 }
0x219b   :  { %v2949_v37 = vrot.slane %v2948_v34, 2 }
0x219d   :  { %v2950_v39 = vadd.f32 %v2949_v37, %v2948_v34 }
0x219f   :  { %v2951_v41 = vrot.slane %v2950_v39, 1 }
0x21a1   :  { %v2952_v43 = vadd.f32 %v2951_v41, %v2950_v39 }
0x21a3   :  { %7432 = vtanh.f32 %v2952_v43 }
0x21ad   :  { %v7433_v52 = vpop.eup %7432 }
0x21ae   :  { %v2954_v53 = vmul.f32 %v7433_v52, %v8227_v2 }
0x21b0   :  { %v8861_v56 = vadd.f32 %v2954_v53, %v2870_v50 }
0x21b2   :  { %v2957_v55 = vmul.f32 %v2956_v51, %v8861_v56 }
0x21b4   :  { %v2958_v54 = vadd.f32 %v2957_v55, %v8833_v12 }
0x21b6   :  { %2961 = vrot.lane.b32.xlu1 %v2958_v54, %s8071_s7  ;;  %v2971_v57 = vrot.slane %v2958_v54, %v8178_v15  ;;  %2959 = vrot.lane.b32.xlu0 %v2958_v54, %s8072_s18  ;;  %v2964_v43 = vmul.f32 %v2958_v54, %v8218_v62 }
0x21b8   :  { %v2973_v58 = vmul.f32 %v2971_v57, %v8184_v18  ;;  %v2974_v59 = vmul.f32 %v2971_v57, %v8190_v22  ;;  %v2975_v61 = vmul.f32 %v2971_v57, %v8182_v17  ;;  %v2976_v4 = vmul.f32 %v2971_v57, %v8188_v21 }
0x21ba   :  { %7434 = vtanh.f32 %v2973_v58 }
0x21bb   :  { %7436 = vtanh.f32 %v2974_v59 }
0x21bc   :  { %7438 = vtanh.f32 %v2975_v61 }
0x21bd   :  { %7440 = vtanh.f32 %v2976_v4 }
0x21c4   :  { %v7435_v0 = vpop.eup %7434 }
0x21c5   :  { %v7437_v23 = vpop.eup %7436 }
0x21c6   :  { %v7439_v5 = vpop.eup %7438  ;;  %v2981_v8 = vpack.c.bf16 %v7437_v23, %v7435_v0 }
0x21c7   :  { %v7441_v26 = vpop.eup %7440 }
0x21c8   :  { %6652 = vmatprep.subr.bf16.mxu1 %v2981_v8  ;;  %v2982_v10 = vpack.c.bf16 %v7441_v26, %v7439_v5 }
0x21c9   :  { %6653 = vmatpush3.bf16.msra.mxu1 %v2981_v8 }
0x21ca   :  { %6654 = vmatprep.subr.bf16.mxu1 %v2982_v10 }
0x21cd   :  { %6655 = vmatpush3.bf16.msra.mxu1 %v2982_v10 }
0x21d0   :  { %6657 = vmatmul.mubr.msk.bf16.vlgmr.msra.gmra.mrb[56].mxu1 %vm135_vm0, %v8200_v33 }
0x21d1   :  { %6672 = vmatprep.mubr.msk.bf16.mxu1 %vm135_vm0, %v8163_v11 }
0x2228   :  { %v2962_v34 = vpop.permute.xlu1 %2961  ;;  %v2960_v37 = vpop.permute.xlu0 %2959 }
0x2229   :  { %v2963_v39 = vadd.f32 %v2962_v34, %v2960_v37 }
0x222b   :  { %v2965_v41 = vmul.f32 %v2963_v39, %v8220_v63 }
0x222d   :  { %v2966_v60 = vadd.f32 %v2965_v41, %v2964_v43  ;;  %v3147_v43 = vstv %s6092_s23 }
0x22a3   :  { %v6658_v3 = vpop.f32.mrb[56].mxu1 }
0x22a4   :  { %v3017_v7 = vpop.f32.mrb[57].mxu1 }
0x22a5   :  { %7442 = vtanh.f32 %v3017_v7  ;;  %v6659_v9 = vpop.f32.mrb[58].mxu1 }
0x22a6   :  { %7444 = vtanh.f32 %v6658_v3  ;;  %v3020_v14 = vpop.f32.mrb[59].mxu1 }
0x22a7   :  { %7446 = vtanh.f32 %v3020_v14 }
0x22a8   :  { %7448 = vtanh.f32 %v6659_v9 }
0x22af   :  { %v7443_v13 = vpop.eup %7442 }
0x22b0   :  { %v7445_v6 = vpop.eup %7444  ;;  %v3036_v19 = vmul.f32 %v7443_v13, %v8206_v38 }
0x22b1   :  { %v7447_v16 = vpop.eup %7446  ;;  %v3038_v28 = vmul.f32 %v7445_v6, %v8212_v46 }
0x22b2   :  { %v3037_v20 = vmul.f32 %v7447_v16, %v8208_v40  ;;  %v7449_v24 = vpop.eup %7448 }
0x22b3   :  { %v3039_v25 = vmul.f32 %v7449_v24, %v8215_v49 }
0x22b4   :  { %v3040_v42 = vadd.f32 %v3037_v20, %v3036_v19 }
0x22b6   :  { %v3041_v27 = vadd.f32 %v3040_v42, %v3038_v28 }
0x22b8   :  { %v3042_v45 = vadd.f32 %v3041_v27, %v3039_v25 }
0x22ba   :  { %v3043_v31 = vrot.slane %v3042_v45, 4 }
0x22bc   :  { %v3044_v29 = vadd.f32 %v3043_v31, %v3042_v45 }
0x22be   :  { %v3045_v32 = vrot.slane %v3044_v29, 2 }
0x22c0   :  { %v3046_v30 = vadd.f32 %v3045_v32, %v3044_v29 }
0x22c2   :  { %v3047_v36 = vrot.slane %v3046_v30, 1 }
0x22c4   :  { %v3048_v35 = vadd.f32 %v3047_v36, %v3046_v30 }
0x22c6   :  { %7450 = vtanh.f32 %v3048_v35 }
0x22d0   :  { %v7451_v48 = vpop.eup %7450 }
0x22d1   :  { %v3050_v44 = vmul.f32 %v7451_v48, %v8227_v2 }
0x22d3   :  { %v3051_v47 = vadd.f32 %v3050_v44, %v2966_v60 }
0x22d5   :  { %v3052_v1 = vmul.f32 %v3051_v47, %v2956_v51  ;;  %v3243_v37 = vmul.f32 2.0, %v3051_v47 }
0x22d7   :  { %v3053_v52 = vadd.f32 %v3052_v1, %v8833_v12  ;;  %v3244_v60 = vadd.f32 %v3243_v37, %v8861_v56 }
0x22d9   :  { %3056 = vrot.lane.b32.xlu1 %v3053_v52, %s8071_s7  ;;  %v3066_v50 = vrot.slane %v3053_v52, %v8178_v15  ;;  %3054 = vrot.lane.b32.xlu0 %v3053_v52, %s8072_s18  ;;  %v3059_v35 = vmul.f32 %v3053_v52, %v8218_v62 }
0x22db   :  { %v3068_v53 = vmul.f32 %v3066_v50, %v8184_v18  ;;  %v3069_v55 = vmul.f32 %v3066_v50, %v8190_v22  ;;  %v3070_v54 = vmul.f32 %v3066_v50, %v8182_v17  ;;  %v3071_v57 = vmul.f32 %v3066_v50, %v8188_v21 }
0x22dd   :  { %7452 = vtanh.f32 %v3068_v53 }
0x22de   :  { %7454 = vtanh.f32 %v3069_v55 }
0x22df   :  { %7456 = vtanh.f32 %v3070_v54 }
0x22e0   :  { %7458 = vtanh.f32 %v3071_v57 }
0x22e7   :  { %v7453_v51 = vpop.eup %7452 }
0x22e8   :  { %v7455_v58 = vpop.eup %7454 }
0x22e9   :  { %v7457_v59 = vpop.eup %7456  ;;  %v3076_v61 = vpack.c.bf16 %v7455_v58, %v7453_v51 }
0x22ea   :  { %v7459_v4 = vpop.eup %7458 }
0x22eb   :  { %6660 = vmatprep.subr.bf16.mxu0 %v3076_v61  ;;  %v3077_v0 = vpack.c.bf16 %v7459_v4, %v7457_v59 }
0x22ec   :  { %6661 = vmatpush3.bf16.msra.mxu0 %v3076_v61 }
0x22ed   :  { %6662 = vmatprep.subr.bf16.mxu0 %v3077_v0 }
0x22f0   :  { %6663 = vmatpush3.bf16.msra.mxu0 %v3077_v0 }
0x22f3   :  { %6665 = vmatmul.mubr.msk.bf16.vlgmr.msra.gmra.mrb[60].mxu0 %vm135_vm0, %v8200_v33 }
0x22f4   :  { %6680 = vmatprep.mubr.msk.bf16.mxu0 %vm135_vm0, %v8163_v11 }
0x234b   :  { %v3057_v29 = vpop.permute.xlu1 %3056  ;;  %v3055_v32 = vpop.permute.xlu0 %3054 }
0x234c   :  { %v3058_v30 = vadd.f32 %v3057_v29, %v3055_v32 }
0x234e   :  { %v3060_v36 = vmul.f32 %v3058_v30, %v8220_v63 }
0x2350   :  { %v3061_v39 = vadd.f32 %v3060_v36, %v3059_v35 }
0x23c6   :  { %v6666_v23 = vpop.f32.mrb[60].mxu0 }
0x23c7   :  { %v3112_v5 = vpop.f32.mrb[61].mxu0 }
0x23c8   :  { %7460 = vtanh.f32 %v3112_v5  ;;  %v6667_v8 = vpop.f32.mrb[62].mxu0 }
0x23c9   :  { %7462 = vtanh.f32 %v6666_v23  ;;  %v3115_v26 = vpop.f32.mrb[63].mxu0 }
0x23ca   :  { %7464 = vtanh.f32 %v3115_v26 }
0x23cb   :  { %7466 = vtanh.f32 %v6667_v8 }
0x23d2   :  { %v7461_v10 = vpop.eup %7460 }
0x23d3   :  { %v7463_v3 = vpop.eup %7462  ;;  %v3131_v9 = vmul.f32 %v7461_v10, %v8206_v38 }
0x23d4   :  { %v7465_v7 = vpop.eup %7464  ;;  %v3133_v6 = vmul.f32 %v7463_v3, %v8212_v46 }
0x23d5   :  { %v3132_v14 = vmul.f32 %v7465_v7, %v8208_v40  ;;  %v7467_v13 = vpop.eup %7466 }
0x23d6   :  { %v3134_v19 = vmul.f32 %v7467_v13, %v8215_v49 }
0x23d7   :  { %v3135_v16 = vadd.f32 %v3132_v14, %v3131_v9 }
0x23d9   :  { %v3136_v20 = vadd.f32 %v3135_v16, %v3133_v6 }
0x23db   :  { %v3137_v24 = vadd.f32 %v3136_v20, %v3134_v19 }
0x23dd   :  { %v3138_v28 = vrot.slane %v3137_v24, 4 }
0x23df   :  { %v3139_v42 = vadd.f32 %v3138_v28, %v3137_v24 }
0x23e1   :  { %v3140_v25 = vrot.slane %v3139_v42, 2 }
0x23e3   :  { %v3141_v27 = vadd.f32 %v3140_v25, %v3139_v42 }
0x23e5   :  { %v3142_v45 = vrot.slane %v3141_v27, 1 }
0x23e7   :  { %v3143_v31 = vadd.f32 %v3142_v45, %v3141_v27 }
0x23e9   :  { %7468 = vtanh.f32 %v3143_v31 }
0x23f3   :  { %v7469_v34 = vpop.eup %7468 }
0x23f4   :  { %v3145_v41 = vmul.f32 %v7469_v34, %v8227_v2 }
0x23f6   :  { %v3146_v48 = vadd.f32 %v3145_v41, %v3061_v39  ;;  %v3248_v41 = vstv %s6094_s24 }
0x23f8   :  { %v3148_v44 = vmul.f32 %v3147_v43, %v3146_v48  ;;  %v3245_v1 = vmul.f32 2.0, %v3146_v48 }
0x23fa   :  { %v3149_v50 = vadd.f32 %v3148_v44, %v8833_v12  ;;  %v3246_v53 = vadd.f32 %v3245_v1, %v3244_v60 }
0x23fc   :  { %3152 = vrot.lane.b32.xlu1 %v3149_v50, %s8071_s7  ;;  %v3162_v55 = vrot.slane %v3149_v50, %v8178_v15  ;;  %3150 = vrot.lane.b32.xlu0 %v3149_v50, %s8072_s18  ;;  %v3155_v36 = vmul.f32 %v3149_v50, %v8218_v62 }
0x23fe   :  { %v3164_v47 = vmul.f32 %v3162_v55, %v8184_v18  ;;  %v3165_v52 = vmul.f32 %v3162_v55, %v8190_v22  ;;  %v3166_v54 = vmul.f32 %v3162_v55, %v8182_v17  ;;  %v3167_v57 = vmul.f32 %v3162_v55, %v8188_v21 }
0x2400   :  { %7470 = vtanh.f32 %v3164_v47 }
0x2401   :  { %7472 = vtanh.f32 %v3165_v52 }
0x2402   :  { %7474 = vtanh.f32 %v3166_v54 }
0x2403   :  { %7476 = vtanh.f32 %v3167_v57 }
0x240a   :  { %v7471_v56 = vpop.eup %7470 }
0x240b   :  { %v7473_v51 = vpop.eup %7472 }
0x240c   :  { %v7475_v58 = vpop.eup %7474  ;;  %v3172_v59 = vpack.c.bf16 %v7473_v51, %v7471_v56 }
0x240d   :  { %v7477_v61 = vpop.eup %7476 }
0x240e   :  { %6668 = vmatprep.subr.bf16.mxu1 %v3172_v59  ;;  %v3173_v4 = vpack.c.bf16 %v7477_v61, %v7475_v58 }
0x240f   :  { %6669 = vmatpush3.bf16.msra.mxu1 %v3172_v59 }
0x2410   :  { %6670 = vmatprep.subr.bf16.mxu1 %v3173_v4 }
0x2413   :  { %6671 = vmatpush3.bf16.msra.mxu1 %v3173_v4 }
0x2416   :  { %6673 = vmatmul.mubr.msk.bf16.vlgmr.msra.gmra.mrb[60].mxu1 %vm135_vm0, %v8200_v33 }
0x2417   :  { %6688 = vmatprep.mubr.msk.bf16.mxu1 %vm135_vm0, %v8163_v11 }
0x246e   :  { %v3153_v31 = vpop.permute.xlu1 %3152  ;;  %v3151_v29 = vpop.permute.xlu0 %3150 }
0x246f   :  { %v3154_v32 = vadd.f32 %v3153_v31, %v3151_v29 }
0x2471   :  { %v3156_v30 = vmul.f32 %v3154_v32, %v8220_v63 }
0x2473   :  { %v3157_v34 = vadd.f32 %v3156_v30, %v3155_v36  ;;  %v3348_v30 = vstv %s8944_s25 }
0x24e9   :  { %v6674_v0 = vpop.f32.mrb[60].mxu1 }
0x24ea   :  { %v3208_v23 = vpop.f32.mrb[61].mxu1 }
0x24eb   :  { %7478 = vtanh.f32 %v3208_v23  ;;  %v6675_v5 = vpop.f32.mrb[62].mxu1 }
0x24ec   :  { %7480 = vtanh.f32 %v6674_v0  ;;  %v3211_v8 = vpop.f32.mrb[63].mxu1 }
0x24ed   :  { %7482 = vtanh.f32 %v3211_v8 }
0x24ee   :  { %7484 = vtanh.f32 %v6675_v5 }
0x24f5   :  { %v7479_v26 = vpop.eup %7478 }
0x24f6   :  { %v7481_v10 = vpop.eup %7480  ;;  %v3227_v7 = vmul.f32 %v7479_v26, %v8206_v38 }
0x24f7   :  { %v7483_v3 = vpop.eup %7482  ;;  %v3229_v13 = vmul.f32 %v7481_v10, %v8212_v46 }
0x24f8   :  { %v3228_v9 = vmul.f32 %v7483_v3, %v8208_v40  ;;  %v7485_v14 = vpop.eup %7484 }
0x24f9   :  { %v3230_v16 = vmul.f32 %v7485_v14, %v8215_v49 }
0x24fa   :  { %v3231_v6 = vadd.f32 %v3228_v9, %v3227_v7 }
0x24fc   :  { %v3232_v19 = vadd.f32 %v3231_v6, %v3229_v13 }
0x24fe   :  { %v3233_v20 = vadd.f32 %v3232_v19, %v3230_v16 }
0x2500   :  { %v3234_v24 = vrot.slane %v3233_v20, 4 }
0x2502   :  { %v3235_v28 = vadd.f32 %v3234_v24, %v3233_v20 }
0x2504   :  { %v3236_v42 = vrot.slane %v3235_v28, 2 }
0x2506   :  { %v3237_v25 = vadd.f32 %v3236_v42, %v3235_v28 }
0x2508   :  { %v3238_v27 = vrot.slane %v3237_v25, 1 }
0x250a   :  { %v3239_v45 = vadd.f32 %v3238_v27, %v3237_v25 }
0x250c   :  { %7486 = vtanh.f32 %v3239_v45 }
0x2516   :  { %v7487_v35 = vpop.eup %7486 }
0x2517   :  { %v3241_v37 = vmul.f32 %v7487_v35, %v8227_v2 }
0x2519   :  { %v3242_v39 = vadd.f32 %v3241_v37, %v3157_v34 }
0x251b   :  { %v3247_v43 = vadd.f32 %v3246_v53, %v3242_v39 }
0x251d   :  { %v3249_v48 = vmul.f32 %v3248_v41, %v3247_v43 }
0x251f   :  { %v8923_v60 = vadd.f32 %v3249_v48, %v8833_v12 }
0x2521   :  { %3257 = vrot.lane.b32.xlu1 %v8923_v60, %s8071_s7  ;;  %3251 = vst [vmem:[#allocation7 + $0x8] sm:$0x1] %v8923_v60  ;;  %3255 = vrot.lane.b32.xlu0 %v8923_v60, %s8072_s18  ;;  %v3267_v44 = vrot.slane %v8923_v60, %v8178_v15  ;;  %v3260_v45 = vmul.f32 %v8923_v60, %v8218_v62 }
0x2523   :  { %v3269_v1 = vmul.f32 %v3267_v44, %v8184_v18  ;;  %v3270_v50 = vmul.f32 %v3267_v44, %v8190_v22  ;;  %v3271_v53 = vmul.f32 %v3267_v44, %v8182_v17  ;;  %v3272_v12 = vmul.f32 %v3267_v44, %v8188_v21 }
0x2525   :  { %7488 = vtanh.f32 %v3269_v1 }
0x2526   :  { %7490 = vtanh.f32 %v3270_v50 }
0x2527   :  { %7492 = vtanh.f32 %v3271_v53 }
0x2528   :  { %7494 = vtanh.f32 %v3272_v12 }
0x252f   :  { %v7489_v55 = vpop.eup %7488 }
0x2530   :  { %v7491_v47 = vpop.eup %7490 }
0x2531   :  { %v7493_v52 = vpop.eup %7492  ;;  %v3277_v54 = vpack.c.bf16 %v7491_v47, %v7489_v55 }
0x2532   :  { %v7495_v57 = vpop.eup %7494 }
0x2533   :  { %6676 = vmatprep.subr.bf16.mxu0 %v3277_v54  ;;  %v3278_v56 = vpack.c.bf16 %v7495_v57, %v7493_v52 }
0x2534   :  { %6677 = vmatpush3.bf16.msra.mxu0 %v3277_v54 }
0x2535   :  { %6678 = vmatprep.subr.bf16.mxu0 %v3278_v56 }
0x2538   :  { %6679 = vmatpush3.bf16.msra.mxu0 %v3278_v56 }
0x253b   :  { %6681 = vmatmul.mubr.msk.bf16.vlgmr.msra.gmra.mrb[64].mxu0 %vm135_vm0, %v8200_v33 }
0x253c   :  { %6696 = vmatprep.mubr.msk.bf16.mxu0 %vm135_vm0, %v8163_v11 }
0x2593   :  { %v3258_v28 = vpop.permute.xlu1 %3257  ;;  %v3256_v42 = vpop.permute.xlu0 %3255 }
0x2594   :  { %v3259_v25 = vadd.f32 %v3258_v28, %v3256_v42 }
0x2596   :  { %v3261_v27 = vmul.f32 %v3259_v25, %v8220_v63 }
0x2598   :  { %v3262_v29 = vadd.f32 %v3261_v27, %v3260_v45 }
0x260e   :  { %v6682_v51 = vpop.f32.mrb[64].mxu0 }
0x260f   :  { %v3313_v58 = vpop.f32.mrb[65].mxu0 }
0x2610   :  { %7496 = vtanh.f32 %v3313_v58  ;;  %v6683_v59 = vpop.f32.mrb[66].mxu0 }
0x2611   :  { %7498 = vtanh.f32 %v6682_v51  ;;  %v3316_v61 = vpop.f32.mrb[67].mxu0 }
0x2612   :  { %7500 = vtanh.f32 %v3316_v61 }
0x2613   :  { %7502 = vtanh.f32 %v6683_v59 }
0x261a   :  { %v7497_v4 = vpop.eup %7496 }
0x261b   :  { %v7499_v0 = vpop.eup %7498  ;;  %v3332_v5 = vmul.f32 %v7497_v4, %v8206_v38 }
0x261c   :  { %v7501_v23 = vpop.eup %7500  ;;  %v3334_v10 = vmul.f32 %v7499_v0, %v8212_v46 }
0x261d   :  { %v3333_v8 = vmul.f32 %v7501_v23, %v8208_v40  ;;  %v7503_v26 = vpop.eup %7502 }
0x261e   :  { %v3335_v7 = vmul.f32 %v7503_v26, %v8215_v49 }
0x261f   :  { %v3336_v3 = vadd.f32 %v3333_v8, %v3332_v5 }
0x2621   :  { %v3337_v9 = vadd.f32 %v3336_v3, %v3334_v10 }
0x2623   :  { %v3338_v14 = vadd.f32 %v3337_v9, %v3335_v7 }
0x2625   :  { %v3339_v13 = vrot.slane %v3338_v14, 4 }
0x2627   :  { %v3340_v6 = vadd.f32 %v3339_v13, %v3338_v14 }
0x2629   :  { %v3341_v16 = vrot.slane %v3340_v6, 2 }
0x262b   :  { %v3342_v19 = vadd.f32 %v3341_v16, %v3340_v6 }
0x262d   :  { %v3343_v20 = vrot.slane %v3342_v19, 1 }
0x262f   :  { %v3344_v24 = vadd.f32 %v3343_v20, %v3342_v19 }
0x2631   :  { %7504 = vtanh.f32 %v3344_v24 }
0x263b   :  { %v7505_v31 = vpop.eup %7504 }
0x263c   :  { %v3346_v32 = vmul.f32 %v7505_v31, %v8227_v2 }
0x263e   :  { %v8951_v36 = vadd.f32 %v3346_v32, %v3262_v29 }
0x2640   :  { %v3349_v35 = vmul.f32 %v3348_v30, %v8951_v36 }
0x2642   :  { %v3350_v34 = vadd.f32 %v3349_v35, %v8923_v60 }
0x2644   :  { %3353 = vrot.lane.b32.xlu1 %v3350_v34, %s8071_s7  ;;  %v3363_v37 = vrot.slane %v3350_v34, %v8178_v15  ;;  %3351 = vrot.lane.b32.xlu0 %v3350_v34, %s8072_s18  ;;  %v3356_v24 = vmul.f32 %v3350_v34, %v8218_v62 }
0x2646   :  { %v3365_v39 = vmul.f32 %v3363_v37, %v8184_v18  ;;  %v3366_v41 = vmul.f32 %v3363_v37, %v8190_v22  ;;  %v3367_v43 = vmul.f32 %v3363_v37, %v8182_v17  ;;  %v3368_v48 = vmul.f32 %v3363_v37, %v8188_v21 }
0x2648   :  { %7506 = vtanh.f32 %v3365_v39 }
0x2649   :  { %7508 = vtanh.f32 %v3366_v41 }
0x264a   :  { %7510 = vtanh.f32 %v3367_v43 }
0x264b   :  { %7512 = vtanh.f32 %v3368_v48 }
0x2652   :  { %v7507_v44 = vpop.eup %7506 }
0x2653   :  { %v7509_v1 = vpop.eup %7508 }
0x2654   :  { %v7511_v50 = vpop.eup %7510  ;;  %v3373_v53 = vpack.c.bf16 %v7509_v1, %v7507_v44 }
0x2655   :  { %v7513_v12 = vpop.eup %7512 }
0x2656   :  { %6684 = vmatprep.subr.bf16.mxu1 %v3373_v53  ;;  %v3374_v55 = vpack.c.bf16 %v7513_v12, %v7511_v50 }
0x2657   :  { %6685 = vmatpush3.bf16.msra.mxu1 %v3373_v53 }
0x2658   :  { %6686 = vmatprep.subr.bf16.mxu1 %v3374_v55 }
0x265b   :  { %6687 = vmatpush3.bf16.msra.mxu1 %v3374_v55 }
0x265e   :  { %6689 = vmatmul.mubr.msk.bf16.vlgmr.msra.gmra.mrb[64].mxu1 %vm135_vm0, %v8200_v33 }
0x265f   :  { %6704 = vmatprep.mubr.msk.bf16.mxu1 %vm135_vm0, %v8163_v11 }
0x26b6   :  { %v3354_v6 = vpop.permute.xlu1 %3353  ;;  %v3352_v16 = vpop.permute.xlu0 %3351 }
0x26b7   :  { %v3355_v19 = vadd.f32 %v3354_v6, %v3352_v16 }
0x26b9   :  { %v3357_v20 = vmul.f32 %v3355_v19, %v8220_v63 }
0x26bb   :  { %v3358_v42 = vadd.f32 %v3357_v20, %v3356_v24  ;;  %v3539_v24 = vstv %s6103_s26 }
0x2731   :  { %v6690_v47 = vpop.f32.mrb[64].mxu1 }
0x2732   :  { %v3409_v52 = vpop.f32.mrb[65].mxu1 }
0x2733   :  { %7514 = vtanh.f32 %v3409_v52  ;;  %v6691_v54 = vpop.f32.mrb[66].mxu1 }
0x2734   :  { %7516 = vtanh.f32 %v6690_v47  ;;  %v3412_v57 = vpop.f32.mrb[67].mxu1 }
0x2735   :  { %7518 = vtanh.f32 %v3412_v57 }
0x2736   :  { %7520 = vtanh.f32 %v6691_v54 }
0x273d   :  { %v7515_v56 = vpop.eup %7514 }
0x273e   :  { %v7517_v51 = vpop.eup %7516  ;;  %v3428_v59 = vmul.f32 %v7515_v56, %v8206_v38 }
0x273f   :  { %v7519_v58 = vpop.eup %7518  ;;  %v3430_v0 = vmul.f32 %v7517_v51, %v8212_v46 }
0x2740   :  { %v3429_v61 = vmul.f32 %v7519_v58, %v8208_v40  ;;  %v7521_v4 = vpop.eup %7520 }
0x2741   :  { %v3431_v5 = vmul.f32 %v7521_v4, %v8215_v49 }
0x2742   :  { %v3432_v23 = vadd.f32 %v3429_v61, %v3428_v59 }
0x2744   :  { %v3433_v8 = vadd.f32 %v3432_v23, %v3430_v0 }
0x2746   :  { %v3434_v26 = vadd.f32 %v3433_v8, %v3431_v5 }
0x2748   :  { %v3435_v10 = vrot.slane %v3434_v26, 4 }
0x274a   :  { %v3436_v3 = vadd.f32 %v3435_v10, %v3434_v26 }
0x274c   :  { %v3437_v7 = vrot.slane %v3436_v3, 2 }
0x274e   :  { %v3438_v9 = vadd.f32 %v3437_v7, %v3436_v3 }
0x2750   :  { %v3439_v14 = vrot.slane %v3438_v9, 1 }
0x2752   :  { %v3440_v13 = vadd.f32 %v3439_v14, %v3438_v9 }
0x2754   :  { %7522 = vtanh.f32 %v3440_v13 }
0x275e   :  { %v7523_v28 = vpop.eup %7522 }
0x275f   :  { %v3442_v25 = vmul.f32 %v7523_v28, %v8227_v2 }
0x2761   :  { %v3443_v27 = vadd.f32 %v3442_v25, %v3358_v42 }
0x2763   :  { %v3444_v45 = vmul.f32 %v3443_v27, %v3348_v30  ;;  %v3635_v16 = vmul.f32 2.0, %v3443_v27 }
0x2765   :  { %v3445_v31 = vadd.f32 %v3444_v45, %v8923_v60  ;;  %v3636_v42 = vadd.f32 %v3635_v16, %v8951_v36 }
0x2767   :  { %3448 = vrot.lane.b32.xlu1 %v3445_v31, %s8071_s7  ;;  %v3458_v29 = vrot.slane %v3445_v31, %v8178_v15  ;;  %3446 = vrot.lane.b32.xlu0 %v3445_v31, %s8072_s18  ;;  %v3451_v13 = vmul.f32 %v3445_v31, %v8218_v62 }
0x2769   :  { %v3460_v32 = vmul.f32 %v3458_v29, %v8184_v18  ;;  %v3461_v35 = vmul.f32 %v3458_v29, %v8190_v22  ;;  %v3462_v34 = vmul.f32 %v3458_v29, %v8182_v17  ;;  %v3463_v37 = vmul.f32 %v3458_v29, %v8188_v21 }
0x276b   :  { %7524 = vtanh.f32 %v3460_v32 }
0x276c   :  { %7526 = vtanh.f32 %v3461_v35 }
0x276d   :  { %7528 = vtanh.f32 %v3462_v34 }
0x276e   :  { %7530 = vtanh.f32 %v3463_v37 }
0x2775   :  { %v7525_v30 = vpop.eup %7524 }
0x2776   :  { %v7527_v39 = vpop.eup %7526 }
0x2777   :  { %v7529_v41 = vpop.eup %7528  ;;  %v3468_v43 = vpack.c.bf16 %v7527_v39, %v7525_v30 }
0x2778   :  { %v7531_v48 = vpop.eup %7530 }
0x2779   :  { %6692 = vmatprep.subr.bf16.mxu0 %v3468_v43  ;;  %v3469_v44 = vpack.c.bf16 %v7531_v48, %v7529_v41 }
0x277a   :  { %6693 = vmatpush3.bf16.msra.mxu0 %v3468_v43 }
0x277b   :  { %6694 = vmatprep.subr.bf16.mxu0 %v3469_v44 }
0x277e   :  { %6695 = vmatpush3.bf16.msra.mxu0 %v3469_v44 }
0x2781   :  { %6697 = vmatmul.mubr.msk.bf16.vlgmr.msra.gmra.mrb[68].mxu0 %vm135_vm0, %v8200_v33 }
0x2782   :  { %6712 = vmatprep.mubr.msk.bf16.mxu0 %vm135_vm0, %v8163_v11 }
0x27d9   :  { %v3449_v3 = vpop.permute.xlu1 %3448  ;;  %v3447_v7 = vpop.permute.xlu0 %3446 }
0x27da   :  { %v3450_v9 = vadd.f32 %v3449_v3, %v3447_v7 }
0x27dc   :  { %v3452_v14 = vmul.f32 %v3450_v9, %v8220_v63 }
0x27de   :  { %v3453_v19 = vadd.f32 %v3452_v14, %v3451_v13 }
0x2854   :  { %v6698_v1 = vpop.f32.mrb[68].mxu0 }
0x2855   :  { %v3504_v50 = vpop.f32.mrb[69].mxu0 }
0x2856   :  { %7532 = vtanh.f32 %v3504_v50  ;;  %v6699_v53 = vpop.f32.mrb[70].mxu0 }
0x2857   :  { %7534 = vtanh.f32 %v6698_v1  ;;  %v3507_v12 = vpop.f32.mrb[71].mxu0 }
0x2858   :  { %7536 = vtanh.f32 %v3507_v12 }
0x2859   :  { %7538 = vtanh.f32 %v6699_v53 }
0x2860   :  { %v7533_v55 = vpop.eup %7532 }
0x2861   :  { %v7535_v47 = vpop.eup %7534  ;;  %v3523_v54 = vmul.f32 %v7533_v55, %v8206_v38 }
0x2862   :  { %v7537_v52 = vpop.eup %7536  ;;  %v3525_v51 = vmul.f32 %v7535_v47, %v8212_v46 }
0x2863   :  { %v3524_v57 = vmul.f32 %v7537_v52, %v8208_v40  ;;  %v7539_v56 = vpop.eup %7538 }
0x2864   :  { %v3526_v59 = vmul.f32 %v7539_v56, %v8215_v49 }
0x2865   :  { %v3527_v58 = vadd.f32 %v3524_v57, %v3523_v54 }
0x2867   :  { %v3528_v61 = vadd.f32 %v3527_v58, %v3525_v51 }
0x2869   :  { %v3529_v4 = vadd.f32 %v3528_v61, %v3526_v59 }
0x286b   :  { %v3530_v0 = vrot.slane %v3529_v4, 4 }
0x286d   :  { %v3531_v23 = vadd.f32 %v3530_v0, %v3529_v4 }
0x286f   :  { %v3532_v5 = vrot.slane %v3531_v23, 2 }
0x2871   :  { %v3533_v8 = vadd.f32 %v3532_v5, %v3531_v23 }
0x2873   :  { %v3534_v26 = vrot.slane %v3533_v8, 1 }
0x2875   :  { %v3535_v10 = vadd.f32 %v3534_v26, %v3533_v8 }
0x2877   :  { %7540 = vtanh.f32 %v3535_v10 }
0x2881   :  { %v7541_v6 = vpop.eup %7540 }
0x2882   :  { %v3537_v20 = vmul.f32 %v7541_v6, %v8227_v2 }
0x2884   :  { %v3538_v28 = vadd.f32 %v3537_v20, %v3453_v19  ;;  %v3640_v20 = vstv %s6105_s27 }
0x2886   :  { %v3540_v25 = vmul.f32 %v3539_v24, %v3538_v28  ;;  %v3637_v45 = vmul.f32 2.0, %v3538_v28 }
0x2888   :  { %v3541_v29 = vadd.f32 %v3540_v25, %v8923_v60  ;;  %v3638_v32 = vadd.f32 %v3637_v45, %v3636_v42 }
0x288a   :  { %3544 = vrot.lane.b32.xlu1 %v3541_v29, %s8071_s7  ;;  %v3554_v35 = vrot.slane %v3541_v29, %v8178_v15  ;;  %3542 = vrot.lane.b32.xlu0 %v3541_v29, %s8072_s18  ;;  %v3547_v14 = vmul.f32 %v3541_v29, %v8218_v62 }
0x288c   :  { %v3556_v27 = vmul.f32 %v3554_v35, %v8184_v18  ;;  %v3557_v31 = vmul.f32 %v3554_v35, %v8190_v22  ;;  %v3558_v34 = vmul.f32 %v3554_v35, %v8182_v17  ;;  %v3559_v37 = vmul.f32 %v3554_v35, %v8188_v21 }
0x288e   :  { %7542 = vtanh.f32 %v3556_v27 }
0x288f   :  { %7544 = vtanh.f32 %v3557_v31 }
0x2890   :  { %7546 = vtanh.f32 %v3558_v34 }
0x2891   :  { %7548 = vtanh.f32 %v3559_v37 }
0x2898   :  { %v7543_v36 = vpop.eup %7542 }
0x2899   :  { %v7545_v30 = vpop.eup %7544 }
0x289a   :  { %v7547_v39 = vpop.eup %7546  ;;  %v3564_v41 = vpack.c.bf16 %v7545_v30, %v7543_v36 }
0x289b   :  { %v7549_v43 = vpop.eup %7548 }
0x289c   :  { %6700 = vmatprep.subr.bf16.mxu1 %v3564_v41  ;;  %v3565_v48 = vpack.c.bf16 %v7549_v43, %v7547_v39 }
0x289d   :  { %6701 = vmatpush3.bf16.msra.mxu1 %v3564_v41 }
0x289e   :  { %6702 = vmatprep.subr.bf16.mxu1 %v3565_v48 }
0x28a1   :  { %6703 = vmatpush3.bf16.msra.mxu1 %v3565_v48 }
0x28a4   :  { %6705 = vmatmul.mubr.msk.bf16.vlgmr.msra.gmra.mrb[68].mxu1 %vm135_vm0, %v8200_v33 }
0x28a5   :  { %6720 = vmatprep.mubr.msk.bf16.mxu1 %vm135_vm0, %v8163_v11 }
0x28fc   :  { %v3545_v10 = vpop.permute.xlu1 %3544  ;;  %v3543_v3 = vpop.permute.xlu0 %3542 }
0x28fd   :  { %v3546_v7 = vadd.f32 %v3545_v10, %v3543_v3 }
0x28ff   :  { %v3548_v9 = vmul.f32 %v3546_v7, %v8220_v63 }
0x2901   :  { %v3549_v6 = vadd.f32 %v3548_v9, %v3547_v14  ;;  %v3740_v9 = vstv %s9034_s28 }
0x2977   :  { %v6706_v44 = vpop.f32.mrb[68].mxu1 }
0x2978   :  { %v3600_v1 = vpop.f32.mrb[69].mxu1 }
0x2979   :  { %7550 = vtanh.f32 %v3600_v1  ;;  %v6707_v50 = vpop.f32.mrb[70].mxu1 }
0x297a   :  { %7552 = vtanh.f32 %v6706_v44  ;;  %v3603_v53 = vpop.f32.mrb[71].mxu1 }
0x297b   :  { %7554 = vtanh.f32 %v3603_v53 }
0x297c   :  { %7556 = vtanh.f32 %v6707_v50 }
0x2983   :  { %v7551_v12 = vpop.eup %7550 }
0x2984   :  { %v7553_v55 = vpop.eup %7552  ;;  %v3619_v52 = vmul.f32 %v7551_v12, %v8206_v38 }
0x2985   :  { %v7555_v47 = vpop.eup %7554  ;;  %v3621_v56 = vmul.f32 %v7553_v55, %v8212_v46 }
0x2986   :  { %v3620_v54 = vmul.f32 %v7555_v47, %v8208_v40  ;;  %v7557_v57 = vpop.eup %7556 }
0x2987   :  { %v3622_v58 = vmul.f32 %v7557_v57, %v8215_v49 }
0x2988   :  { %v3623_v51 = vadd.f32 %v3620_v54, %v3619_v52 }
0x298a   :  { %v3624_v59 = vadd.f32 %v3623_v51, %v3621_v56 }
0x298c   :  { %v3625_v61 = vadd.f32 %v3624_v59, %v3622_v58 }
0x298e   :  { %v3626_v4 = vrot.slane %v3625_v61, 4 }
0x2990   :  { %v3627_v0 = vadd.f32 %v3626_v4, %v3625_v61 }
0x2992   :  { %v3628_v23 = vrot.slane %v3627_v0, 2 }
0x2994   :  { %v3629_v5 = vadd.f32 %v3628_v23, %v3627_v0 }
0x2996   :  { %v3630_v8 = vrot.slane %v3629_v5, 1 }
0x2998   :  { %v3631_v26 = vadd.f32 %v3630_v8, %v3629_v5 }
0x299a   :  { %7558 = vtanh.f32 %v3631_v26 }
0x29a4   :  { %v7559_v13 = vpop.eup %7558 }
0x29a5   :  { %v3633_v16 = vmul.f32 %v7559_v13, %v8227_v2 }
0x29a7   :  { %v3634_v19 = vadd.f32 %v3633_v16, %v3549_v6 }
0x29a9   :  { %v3639_v24 = vadd.f32 %v3638_v32, %v3634_v19 }
0x29ab   :  { %v3641_v28 = vmul.f32 %v3640_v20, %v3639_v24 }
0x29ad   :  { %v9013_v42 = vadd.f32 %v3641_v28, %v8923_v60 }
0x29af   :  { %3649 = vrot.lane.b32.xlu1 %v9013_v42, %s8071_s7  ;;  %3643 = vst [vmem:[#allocation7 + $0x9] sm:$0x1] %v9013_v42  ;;  %3647 = vrot.lane.b32.xlu0 %v9013_v42, %s8072_s18  ;;  %v3659_v25 = vrot.slane %v9013_v42, %v8178_v15  ;;  %v3652_v26 = vmul.f32 %v9013_v42, %v8218_v62 }
0x29b1   :  { %v3661_v45 = vmul.f32 %v3659_v25, %v8184_v18  ;;  %v3662_v29 = vmul.f32 %v3659_v25, %v8190_v22  ;;  %v3663_v32 = vmul.f32 %v3659_v25, %v8182_v17  ;;  %v3664_v60 = vmul.f32 %v3659_v25, %v8188_v21 }
0x29b3   :  { %7560 = vtanh.f32 %v3661_v45 }
0x29b4   :  { %7562 = vtanh.f32 %v3662_v29 }
0x29b5   :  { %7564 = vtanh.f32 %v3663_v32 }
0x29b6   :  { %7566 = vtanh.f32 %v3664_v60 }
0x29bd   :  { %v7561_v35 = vpop.eup %7560 }
0x29be   :  { %v7563_v27 = vpop.eup %7562 }
0x29bf   :  { %v7565_v31 = vpop.eup %7564  ;;  %v3669_v34 = vpack.c.bf16 %v7563_v27, %v7561_v35 }
0x29c0   :  { %v7567_v37 = vpop.eup %7566 }
0x29c1   :  { %6708 = vmatprep.subr.bf16.mxu0 %v3669_v34  ;;  %v3670_v36 = vpack.c.bf16 %v7567_v37, %v7565_v31 }
0x29c2   :  { %6709 = vmatpush3.bf16.msra.mxu0 %v3669_v34 }
0x29c3   :  { %6710 = vmatprep.subr.bf16.mxu0 %v3670_v36 }
0x29c6   :  { %6711 = vmatpush3.bf16.msra.mxu0 %v3670_v36 }
0x29c9   :  { %6713 = vmatmul.mubr.msk.bf16.vlgmr.msra.gmra.mrb[72].mxu0 %vm135_vm0, %v8200_v33 }
0x29ca   :  { %6728 = vmatprep.mubr.msk.bf16.mxu0 %vm135_vm0, %v8163_v11 }
0x2a21   :  { %v3650_v0 = vpop.permute.xlu1 %3649  ;;  %v3648_v23 = vpop.permute.xlu0 %3647 }
0x2a22   :  { %v3651_v5 = vadd.f32 %v3650_v0, %v3648_v23 }
0x2a24   :  { %v3653_v8 = vmul.f32 %v3651_v5, %v8220_v63 }
0x2a26   :  { %v3654_v3 = vadd.f32 %v3653_v8, %v3652_v26 }
0x2a9c   :  { %v6714_v30 = vpop.f32.mrb[72].mxu0 }
0x2a9d   :  { %v3705_v39 = vpop.f32.mrb[73].mxu0 }
0x2a9e   :  { %7568 = vtanh.f32 %v3705_v39  ;;  %v6715_v41 = vpop.f32.mrb[74].mxu0 }
0x2a9f   :  { %7570 = vtanh.f32 %v6714_v30  ;;  %v3708_v43 = vpop.f32.mrb[75].mxu0 }
0x2aa0   :  { %7572 = vtanh.f32 %v3708_v43 }
0x2aa1   :  { %7574 = vtanh.f32 %v6715_v41 }
0x2aa8   :  { %v7569_v48 = vpop.eup %7568 }
0x2aa9   :  { %v7571_v44 = vpop.eup %7570  ;;  %v3724_v50 = vmul.f32 %v7569_v48, %v8206_v38 }
0x2aaa   :  { %v7573_v1 = vpop.eup %7572  ;;  %v3726_v55 = vmul.f32 %v7571_v44, %v8212_v46 }
0x2aab   :  { %v3725_v53 = vmul.f32 %v7573_v1, %v8208_v40  ;;  %v7575_v12 = vpop.eup %7574 }
0x2aac   :  { %v3727_v52 = vmul.f32 %v7575_v12, %v8215_v49 }
0x2aad   :  { %v3728_v47 = vadd.f32 %v3725_v53, %v3724_v50 }
0x2aaf   :  { %v3729_v54 = vadd.f32 %v3728_v47, %v3726_v55 }
0x2ab1   :  { %v3730_v57 = vadd.f32 %v3729_v54, %v3727_v52 }
0x2ab3   :  { %v3731_v56 = vrot.slane %v3730_v57, 4 }
0x2ab5   :  { %v3732_v51 = vadd.f32 %v3731_v56, %v3730_v57 }
0x2ab7   :  { %v3733_v58 = vrot.slane %v3732_v51, 2 }
0x2ab9   :  { %v3734_v59 = vadd.f32 %v3733_v58, %v3732_v51 }
0x2abb   :  { %v3735_v61 = vrot.slane %v3734_v59, 1 }
0x2abd   :  { %v3736_v4 = vadd.f32 %v3735_v61, %v3734_v59 }
0x2abf   :  { %7576 = vtanh.f32 %v3736_v4 }
0x2ac9   :  { %v7577_v10 = vpop.eup %7576 }
0x2aca   :  { %v3738_v7 = vmul.f32 %v7577_v10, %v8227_v2 }
0x2acc   :  { %v9041_v14 = vadd.f32 %v3738_v7, %v3654_v3 }
0x2ace   :  { %v3741_v13 = vmul.f32 %v3740_v9, %v9041_v14 }
0x2ad0   :  { %v3742_v6 = vadd.f32 %v3741_v13, %v9013_v42 }
0x2ad2   :  { %3745 = vrot.lane.b32.xlu1 %v3742_v6, %s8071_s7  ;;  %v3755_v16 = vrot.slane %v3742_v6, %v8178_v15  ;;  %3743 = vrot.lane.b32.xlu0 %v3742_v6, %s8072_s18  ;;  %v3748_v4 = vmul.f32 %v3742_v6, %v8218_v62 }
0x2ad4   :  { %v3757_v19 = vmul.f32 %v3755_v16, %v8184_v18  ;;  %v3758_v20 = vmul.f32 %v3755_v16, %v8190_v22  ;;  %v3759_v24 = vmul.f32 %v3755_v16, %v8182_v17  ;;  %v3760_v28 = vmul.f32 %v3755_v16, %v8188_v21 }
0x2ad6   :  { %7578 = vtanh.f32 %v3757_v19 }
0x2ad7   :  { %7580 = vtanh.f32 %v3758_v20 }
0x2ad8   :  { %7582 = vtanh.f32 %v3759_v24 }
0x2ad9   :  { %7584 = vtanh.f32 %v3760_v28 }
0x2ae0   :  { %v7579_v25 = vpop.eup %7578 }
0x2ae1   :  { %v7581_v45 = vpop.eup %7580 }
0x2ae2   :  { %v7583_v29 = vpop.eup %7582  ;;  %v3765_v32 = vpack.c.bf16 %v7581_v45, %v7579_v25 }
0x2ae3   :  { %v7585_v60 = vpop.eup %7584 }
0x2ae4   :  { %6716 = vmatprep.subr.bf16.mxu1 %v3765_v32  ;;  %v3766_v35 = vpack.c.bf16 %v7585_v60, %v7583_v29 }
0x2ae5   :  { %6717 = vmatpush3.bf16.msra.mxu1 %v3765_v32 }
0x2ae6   :  { %6718 = vmatprep.subr.bf16.mxu1 %v3766_v35 }
0x2ae9   :  { %6719 = vmatpush3.bf16.msra.mxu1 %v3766_v35 }
0x2aec   :  { %6721 = vmatmul.mubr.msk.bf16.vlgmr.msra.gmra.mrb[72].mxu1 %vm135_vm0, %v8200_v33 }
0x2aed   :  { %6736 = vmatprep.mubr.msk.bf16.mxu1 %vm135_vm0, %v8163_v11 }
0x2b44   :  { %v3746_v51 = vpop.permute.xlu1 %3745  ;;  %v3744_v58 = vpop.permute.xlu0 %3743 }
0x2b45   :  { %v3747_v59 = vadd.f32 %v3746_v51, %v3744_v58 }
0x2b47   :  { %v3749_v61 = vmul.f32 %v3747_v59, %v8220_v63 }
0x2b49   :  { %v3750_v23 = vadd.f32 %v3749_v61, %v3748_v4  ;;  %v3931_v4 = vstv %s6114_s29 }
0x2bbf   :  { %v6722_v27 = vpop.f32.mrb[72].mxu1 }
0x2bc0   :  { %v3801_v31 = vpop.f32.mrb[73].mxu1 }
0x2bc1   :  { %7586 = vtanh.f32 %v3801_v31  ;;  %v6723_v34 = vpop.f32.mrb[74].mxu1 }
0x2bc2   :  { %7588 = vtanh.f32 %v6722_v27  ;;  %v3804_v37 = vpop.f32.mrb[75].mxu1 }
0x2bc3   :  { %7590 = vtanh.f32 %v3804_v37 }
0x2bc4   :  { %7592 = vtanh.f32 %v6723_v34 }
0x2bcb   :  { %v7587_v36 = vpop.eup %7586 }
0x2bcc   :  { %v7589_v30 = vpop.eup %7588  ;;  %v3820_v41 = vmul.f32 %v7587_v36, %v8206_v38 }
0x2bcd   :  { %v7591_v39 = vpop.eup %7590  ;;  %v3822_v44 = vmul.f32 %v7589_v30, %v8212_v46 }
0x2bce   :  { %v3821_v43 = vmul.f32 %v7591_v39, %v8208_v40  ;;  %v7593_v48 = vpop.eup %7592 }
0x2bcf   :  { %v3823_v50 = vmul.f32 %v7593_v48, %v8215_v49 }
0x2bd0   :  { %v3824_v1 = vadd.f32 %v3821_v43, %v3820_v41 }
0x2bd2   :  { %v3825_v53 = vadd.f32 %v3824_v1, %v3822_v44 }
0x2bd4   :  { %v3826_v12 = vadd.f32 %v3825_v53, %v3823_v50 }
0x2bd6   :  { %v3827_v55 = vrot.slane %v3826_v12, 4 }
0x2bd8   :  { %v3828_v47 = vadd.f32 %v3827_v55, %v3826_v12 }
0x2bda   :  { %v3829_v52 = vrot.slane %v3828_v47, 2 }
0x2bdc   :  { %v3830_v54 = vadd.f32 %v3829_v52, %v3828_v47 }
0x2bde   :  { %v3831_v57 = vrot.slane %v3830_v54, 1 }
0x2be0   :  { %v3832_v56 = vadd.f32 %v3831_v57, %v3830_v54 }
0x2be2   :  { %7594 = vtanh.f32 %v3832_v56 }
0x2bec   :  { %v7595_v0 = vpop.eup %7594 }
0x2bed   :  { %v3834_v5 = vmul.f32 %v7595_v0, %v8227_v2 }
0x2bef   :  { %v3835_v8 = vadd.f32 %v3834_v5, %v3750_v23 }
0x2bf1   :  { %v3836_v26 = vmul.f32 %v3835_v8, %v3740_v9  ;;  %v4027_v58 = vmul.f32 2.0, %v3835_v8 }
0x2bf3   :  { %v3837_v10 = vadd.f32 %v3836_v26, %v9013_v42  ;;  %v4028_v23 = vadd.f32 %v4027_v58, %v9041_v14 }
0x2bf5   :  { %3840 = vrot.lane.b32.xlu1 %v3837_v10, %s8071_s7  ;;  %v3850_v3 = vrot.slane %v3837_v10, %v8178_v15  ;;  %3838 = vrot.lane.b32.xlu0 %v3837_v10, %s8072_s18  ;;  %v3843_v56 = vmul.f32 %v3837_v10, %v8218_v62 }
0x2bf7   :  { %v3852_v7 = vmul.f32 %v3850_v3, %v8184_v18  ;;  %v3853_v13 = vmul.f32 %v3850_v3, %v8190_v22  ;;  %v3854_v6 = vmul.f32 %v3850_v3, %v8182_v17  ;;  %v3855_v16 = vmul.f32 %v3850_v3, %v8188_v21 }
0x2bf9   :  { %7596 = vtanh.f32 %v3852_v7 }
0x2bfa   :  { %7598 = vtanh.f32 %v3853_v13 }
0x2bfb   :  { %7600 = vtanh.f32 %v3854_v6 }
0x2bfc   :  { %7602 = vtanh.f32 %v3855_v16 }
0x2c03   :  { %v7597_v9 = vpop.eup %7596 }
0x2c04   :  { %v7599_v19 = vpop.eup %7598 }
0x2c05   :  { %v7601_v20 = vpop.eup %7600  ;;  %v3860_v24 = vpack.c.bf16 %v7599_v19, %v7597_v9 }
0x2c06   :  { %v7603_v28 = vpop.eup %7602 }
0x2c07   :  { %6724 = vmatprep.subr.bf16.mxu0 %v3860_v24  ;;  %v3861_v25 = vpack.c.bf16 %v7603_v28, %v7601_v20 }
0x2c08   :  { %6725 = vmatpush3.bf16.msra.mxu0 %v3860_v24 }
0x2c09   :  { %6726 = vmatprep.subr.bf16.mxu0 %v3861_v25 }
0x2c0c   :  { %6727 = vmatpush3.bf16.msra.mxu0 %v3861_v25 }
0x2c0f   :  { %6729 = vmatmul.mubr.msk.bf16.vlgmr.msra.gmra.mrb[76].mxu0 %vm135_vm0, %v8200_v33 }
0x2c10   :  { %6744 = vmatprep.mubr.msk.bf16.mxu0 %vm135_vm0, %v8163_v11 }
0x2c67   :  { %v3841_v47 = vpop.permute.xlu1 %3840  ;;  %v3839_v52 = vpop.permute.xlu0 %3838 }
0x2c68   :  { %v3842_v54 = vadd.f32 %v3841_v47, %v3839_v52 }
0x2c6a   :  { %v3844_v57 = vmul.f32 %v3842_v54, %v8220_v63 }
0x2c6c   :  { %v3845_v59 = vadd.f32 %v3844_v57, %v3843_v56 }
0x2ce2   :  { %v6730_v45 = vpop.f32.mrb[76].mxu0 }
0x2ce3   :  { %v3896_v29 = vpop.f32.mrb[77].mxu0 }
0x2ce4   :  { %7604 = vtanh.f32 %v3896_v29  ;;  %v6731_v32 = vpop.f32.mrb[78].mxu0 }
0x2ce5   :  { %7606 = vtanh.f32 %v6730_v45  ;;  %v3899_v60 = vpop.f32.mrb[79].mxu0 }
0x2ce6   :  { %7608 = vtanh.f32 %v3899_v60 }
0x2ce7   :  { %7610 = vtanh.f32 %v6731_v32 }
0x2cee   :  { %v7605_v35 = vpop.eup %7604 }
0x2cef   :  { %v7607_v27 = vpop.eup %7606  ;;  %v3915_v34 = vmul.f32 %v7605_v35, %v8206_v38 }
0x2cf0   :  { %v7609_v31 = vpop.eup %7608  ;;  %v3917_v30 = vmul.f32 %v7607_v27, %v8212_v46 }
0x2cf1   :  { %v3916_v37 = vmul.f32 %v7609_v31, %v8208_v40  ;;  %v7611_v36 = vpop.eup %7610 }
0x2cf2   :  { %v3918_v41 = vmul.f32 %v7611_v36, %v8215_v49 }
0x2cf3   :  { %v3919_v39 = vadd.f32 %v3916_v37, %v3915_v34 }
0x2cf5   :  { %v3920_v43 = vadd.f32 %v3919_v39, %v3917_v30 }
0x2cf7   :  { %v3921_v48 = vadd.f32 %v3920_v43, %v3918_v41 }
0x2cf9   :  { %v3922_v44 = vrot.slane %v3921_v48, 4 }
0x2cfb   :  { %v3923_v1 = vadd.f32 %v3922_v44, %v3921_v48 }
0x2cfd   :  { %v3924_v50 = vrot.slane %v3923_v1, 2 }
0x2cff   :  { %v3925_v53 = vadd.f32 %v3924_v50, %v3923_v1 }
0x2d01   :  { %v3926_v12 = vrot.slane %v3925_v53, 1 }
0x2d03   :  { %v3927_v55 = vadd.f32 %v3926_v12, %v3925_v53 }
0x2d05   :  { %7612 = vtanh.f32 %v3927_v55 }
0x2d0f   :  { %v7613_v51 = vpop.eup %7612 }
0x2d10   :  { %v3929_v61 = vmul.f32 %v7613_v51, %v8227_v2 }
0x2d12   :  { %v3930_v0 = vadd.f32 %v3929_v61, %v3845_v59  ;;  %v4032_v61 = vstv %s6116_s30 }
0x2d14   :  { %v3932_v5 = vmul.f32 %v3931_v4, %v3930_v0  ;;  %v4029_v26 = vmul.f32 2.0, %v3930_v0 }
0x2d16   :  { %v3933_v3 = vadd.f32 %v3932_v5, %v9013_v42  ;;  %v4030_v7 = vadd.f32 %v4029_v26, %v4028_v23 }
0x2d18   :  { %3936 = vrot.lane.b32.xlu1 %v3933_v3, %s8071_s7  ;;  %v3946_v13 = vrot.slane %v3933_v3, %v8178_v15  ;;  %3934 = vrot.lane.b32.xlu0 %v3933_v3, %s8072_s18  ;;  %v3939_v57 = vmul.f32 %v3933_v3, %v8218_v62 }
0x2d1a   :  { %v3948_v8 = vmul.f32 %v3946_v13, %v8184_v18  ;;  %v3949_v10 = vmul.f32 %v3946_v13, %v8190_v22  ;;  %v3950_v6 = vmul.f32 %v3946_v13, %v8182_v17  ;;  %v3951_v16 = vmul.f32 %v3946_v13, %v8188_v21 }
0x2d1c   :  { %7614 = vtanh.f32 %v3948_v8 }
0x2d1d   :  { %7616 = vtanh.f32 %v3949_v10 }
0x2d1e   :  { %7618 = vtanh.f32 %v3950_v6 }
0x2d1f   :  { %7620 = vtanh.f32 %v3951_v16 }
0x2d26   :  { %v7615_v14 = vpop.eup %7614 }
0x2d27   :  { %v7617_v9 = vpop.eup %7616 }
0x2d28   :  { %v7619_v19 = vpop.eup %7618  ;;  %v3956_v20 = vpack.c.bf16 %v7617_v9, %v7615_v14 }
0x2d29   :  { %v7621_v24 = vpop.eup %7620 }
0x2d2a   :  { %6732 = vmatprep.subr.bf16.mxu1 %v3956_v20  ;;  %v3957_v28 = vpack.c.bf16 %v7621_v24, %v7619_v19 }
0x2d2b   :  { %6733 = vmatpush3.bf16.msra.mxu1 %v3956_v20 }
0x2d2c   :  { %6734 = vmatprep.subr.bf16.mxu1 %v3957_v28 }
0x2d2f   :  { %6735 = vmatpush3.bf16.msra.mxu1 %v3957_v28 }
0x2d32   :  { %6737 = vmatmul.mubr.msk.bf16.vlgmr.msra.gmra.mrb[76].mxu1 %vm135_vm0, %v8200_v33 }
0x2d33   :  { %6752 = vmatprep.mubr.msk.bf16.mxu1 %vm135_vm0, %v8163_v11 }
0x2d8a   :  { %v3937_v55 = vpop.permute.xlu1 %3936  ;;  %v3935_v47 = vpop.permute.xlu0 %3934 }
0x2d8b   :  { %v3938_v52 = vadd.f32 %v3937_v55, %v3935_v47 }
0x2d8d   :  { %v3940_v54 = vmul.f32 %v3938_v52, %v8220_v63 }
0x2d8f   :  { %v3941_v51 = vadd.f32 %v3940_v54, %v3939_v57  ;;  %v4132_v54 = vstv %s9124_s9 }
0x2e05   :  { %v6738_v25 = vpop.f32.mrb[76].mxu1 }
0x2e06   :  { %v3992_v45 = vpop.f32.mrb[77].mxu1 }
0x2e07   :  { %7622 = vtanh.f32 %v3992_v45  ;;  %v6739_v29 = vpop.f32.mrb[78].mxu1 }
0x2e08   :  { %7624 = vtanh.f32 %v6738_v25  ;;  %v3995_v32 = vpop.f32.mrb[79].mxu1 }
0x2e09   :  { %7626 = vtanh.f32 %v3995_v32 }
0x2e0a   :  { %7628 = vtanh.f32 %v6739_v29 }
0x2e11   :  { %v7623_v60 = vpop.eup %7622 }
0x2e12   :  { %v7625_v35 = vpop.eup %7624  ;;  %v4011_v31 = vmul.f32 %v7623_v60, %v8206_v38 }
0x2e13   :  { %v7627_v27 = vpop.eup %7626  ;;  %v4013_v36 = vmul.f32 %v7625_v35, %v8212_v46 }
0x2e14   :  { %v4012_v34 = vmul.f32 %v7627_v27, %v8208_v40  ;;  %v7629_v37 = vpop.eup %7628 }
0x2e15   :  { %v4014_v39 = vmul.f32 %v7629_v37, %v8215_v49 }
0x2e16   :  { %v4015_v30 = vadd.f32 %v4012_v34, %v4011_v31 }
0x2e18   :  { %v4016_v41 = vadd.f32 %v4015_v30, %v4013_v36 }
0x2e1a   :  { %v4017_v43 = vadd.f32 %v4016_v41, %v4014_v39 }
0x2e1c   :  { %v4018_v48 = vrot.slane %v4017_v43, 4 }
0x2e1e   :  { %v4019_v44 = vadd.f32 %v4018_v48, %v4017_v43 }
0x2e20   :  { %v4020_v1 = vrot.slane %v4019_v44, 2 }
0x2e22   :  { %v4021_v50 = vadd.f32 %v4020_v1, %v4019_v44 }
0x2e24   :  { %v4022_v53 = vrot.slane %v4021_v50, 1 }
0x2e26   :  { %v4023_v12 = vadd.f32 %v4022_v53, %v4021_v50 }
0x2e28   :  { %7630 = vtanh.f32 %v4023_v12 }
0x2e32   :  { %v7631_v56 = vpop.eup %7630 }
0x2e33   :  { %v4025_v58 = vmul.f32 %v7631_v56, %v8227_v2 }
0x2e35   :  { %v4026_v59 = vadd.f32 %v4025_v58, %v3941_v51 }
0x2e37   :  { %v4031_v4 = vadd.f32 %v4030_v7, %v4026_v59 }
0x2e39   :  { %v4033_v0 = vmul.f32 %v4032_v61, %v4031_v4 }
0x2e3b   :  { %v9103_v23 = vadd.f32 %v4033_v0, %v9013_v42 }
0x2e3d   :  { %4041 = vrot.lane.b32.xlu1 %v9103_v23, %s8071_s7  ;;  %4035 = vst [vmem:[#allocation7 + $0xa] sm:$0x1] %v9103_v23  ;;  %4039 = vrot.lane.b32.xlu0 %v9103_v23, %s8072_s18  ;;  %v4051_v5 = vrot.slane %v9103_v23, %v8178_v15  ;;  %v4044_v12 = vmul.f32 %v9103_v23, %v8218_v62 }
0x2e3f   :  { %v4053_v26 = vmul.f32 %v4051_v5, %v8184_v18  ;;  %v4054_v3 = vmul.f32 %v4051_v5, %v8190_v22  ;;  %v4055_v7 = vmul.f32 %v4051_v5, %v8182_v17  ;;  %v4056_v42 = vmul.f32 %v4051_v5, %v8188_v21 }
0x2e41   :  { %7632 = vtanh.f32 %v4053_v26 }
0x2e42   :  { %7634 = vtanh.f32 %v4054_v3 }
0x2e43   :  { %7636 = vtanh.f32 %v4055_v7 }
0x2e44   :  { %7638 = vtanh.f32 %v4056_v42 }
0x2e4b   :  { %v7633_v13 = vpop.eup %7632 }
0x2e4c   :  { %v7635_v8 = vpop.eup %7634 }
0x2e4d   :  { %v7637_v10 = vpop.eup %7636  ;;  %v4061_v6 = vpack.c.bf16 %v7635_v8, %v7633_v13 }
0x2e4e   :  { %v7639_v16 = vpop.eup %7638 }
0x2e4f   :  { %6740 = vmatprep.subr.bf16.mxu0 %v4061_v6  ;;  %v4062_v14 = vpack.c.bf16 %v7639_v16, %v7637_v10 }
0x2e50   :  { %6741 = vmatpush3.bf16.msra.mxu0 %v4061_v6 }
0x2e51   :  { %6742 = vmatprep.subr.bf16.mxu0 %v4062_v14 }
0x2e54   :  { %6743 = vmatpush3.bf16.msra.mxu0 %v4062_v14 }
0x2e57   :  { %6745 = vmatmul.mubr.msk.bf16.vlgmr.msra.gmra.mrb[80].mxu0 %vm135_vm0, %v8200_v33 }
0x2e58   :  { %6760 = vmatprep.mubr.msk.bf16.mxu0 %vm135_vm0, %v8163_v11 }
0x2eaf   :  { %v4042_v44 = vpop.permute.xlu1 %4041  ;;  %v4040_v1 = vpop.permute.xlu0 %4039 }
0x2eb0   :  { %v4043_v50 = vadd.f32 %v4042_v44, %v4040_v1 }
0x2eb2   :  { %v4045_v53 = vmul.f32 %v4043_v50, %v8220_v63 }
0x2eb4   :  { %v4046_v47 = vadd.f32 %v4045_v53, %v4044_v12 }
0x2f2a   :  { %v6746_v9 = vpop.f32.mrb[80].mxu0 }
0x2f2b   :  { %v4097_v19 = vpop.f32.mrb[81].mxu0 }
0x2f2c   :  { %7640 = vtanh.f32 %v4097_v19  ;;  %v6747_v20 = vpop.f32.mrb[82].mxu0 }
0x2f2d   :  { %7642 = vtanh.f32 %v6746_v9  ;;  %v4100_v24 = vpop.f32.mrb[83].mxu0 }
0x2f2e   :  { %7644 = vtanh.f32 %v4100_v24 }
0x2f2f   :  { %7646 = vtanh.f32 %v6747_v20 }
0x2f36   :  { %v7641_v28 = vpop.eup %7640 }
0x2f37   :  { %v7643_v25 = vpop.eup %7642  ;;  %v4116_v29 = vmul.f32 %v7641_v28, %v8206_v38 }
0x2f38   :  { %v7645_v45 = vpop.eup %7644  ;;  %v4118_v35 = vmul.f32 %v7643_v25, %v8212_v46 }
0x2f39   :  { %v4117_v32 = vmul.f32 %v7645_v45, %v8208_v40  ;;  %v7647_v60 = vpop.eup %7646 }
0x2f3a   :  { %v4119_v31 = vmul.f32 %v7647_v60, %v8215_v49 }
0x2f3b   :  { %v4120_v27 = vadd.f32 %v4117_v32, %v4116_v29 }
0x2f3d   :  { %v4121_v34 = vadd.f32 %v4120_v27, %v4118_v35 }
0x2f3f   :  { %v4122_v37 = vadd.f32 %v4121_v34, %v4119_v31 }
0x2f41   :  { %v4123_v36 = vrot.slane %v4122_v37, 4 }
0x2f43   :  { %v4124_v30 = vadd.f32 %v4123_v36, %v4122_v37 }
0x2f45   :  { %v4125_v39 = vrot.slane %v4124_v30, 2 }
0x2f47   :  { %v4126_v41 = vadd.f32 %v4125_v39, %v4124_v30 }
0x2f49   :  { %v4127_v43 = vrot.slane %v4126_v41, 1 }
0x2f4b   :  { %v4128_v48 = vadd.f32 %v4127_v43, %v4126_v41 }
0x2f4d   :  { %7648 = vtanh.f32 %v4128_v48 }
0x2f57   :  { %v7649_v55 = vpop.eup %7648 }
0x2f58   :  { %v4130_v52 = vmul.f32 %v7649_v55, %v8227_v2 }
0x2f5a   :  { %v9131_v57 = vadd.f32 %v4130_v52, %v4046_v47 }
0x2f5c   :  { %v4133_v56 = vmul.f32 %v4132_v54, %v9131_v57 }
0x2f5e   :  { %v4134_v51 = vadd.f32 %v4133_v56, %v9103_v23 }
0x2f60   :  { %4137 = vrot.lane.b32.xlu1 %v4134_v51, %s8071_s7  ;;  %v4147_v58 = vrot.slane %v4134_v51, %v8178_v15  ;;  %4135 = vrot.lane.b32.xlu0 %v4134_v51, %s8072_s18  ;;  %v4140_v48 = vmul.f32 %v4134_v51, %v8218_v62 }
0x2f62   :  { %v4149_v59 = vmul.f32 %v4147_v58, %v8184_v18  ;;  %v4150_v61 = vmul.f32 %v4147_v58, %v8190_v22  ;;  %v4151_v4 = vmul.f32 %v4147_v58, %v8182_v17  ;;  %v4152_v0 = vmul.f32 %v4147_v58, %v8188_v21 }
0x2f64   :  { %7650 = vtanh.f32 %v4149_v59 }
0x2f65   :  { %7652 = vtanh.f32 %v4150_v61 }
0x2f66   :  { %7654 = vtanh.f32 %v4151_v4 }
0x2f67   :  { %7656 = vtanh.f32 %v4152_v0 }
0x2f6e   :  { %v7651_v5 = vpop.eup %7650 }
0x2f6f   :  { %v7653_v26 = vpop.eup %7652 }
0x2f70   :  { %v7655_v3 = vpop.eup %7654  ;;  %v4157_v7 = vpack.c.bf16 %v7653_v26, %v7651_v5 }
0x2f71   :  { %v7657_v42 = vpop.eup %7656 }
0x2f72   :  { %6748 = vmatprep.subr.bf16.mxu1 %v4157_v7  ;;  %v4158_v13 = vpack.c.bf16 %v7657_v42, %v7655_v3 }
0x2f73   :  { %6749 = vmatpush3.bf16.msra.mxu1 %v4157_v7 }
0x2f74   :  { %6750 = vmatprep.subr.bf16.mxu1 %v4158_v13 }
0x2f77   :  { %6751 = vmatpush3.bf16.msra.mxu1 %v4158_v13 }
0x2f7a   :  { %6753 = vmatmul.mubr.msk.bf16.vlgmr.msra.gmra.mrb[80].mxu1 %vm135_vm0, %v8200_v33 }
0x2f7b   :  { %6768 = vmatprep.mubr.msk.bf16.mxu1 %vm135_vm0, %v8163_v11 }
0x2fd2   :  { %v4138_v30 = vpop.permute.xlu1 %4137  ;;  %v4136_v39 = vpop.permute.xlu0 %4135 }
0x2fd3   :  { %v4139_v41 = vadd.f32 %v4138_v30, %v4136_v39 }
0x2fd5   :  { %v4141_v43 = vmul.f32 %v4139_v41, %v8220_v63 }
0x2fd7   :  { %v4142_v1 = vadd.f32 %v4141_v43, %v4140_v48  ;;  %v4323_v48 = vstv %s6125_s10 }
0x304d   :  { %v6754_v8 = vpop.f32.mrb[80].mxu1 }
0x304e   :  { %v4193_v10 = vpop.f32.mrb[81].mxu1 }
0x304f   :  { %7658 = vtanh.f32 %v4193_v10  ;;  %v6755_v6 = vpop.f32.mrb[82].mxu1 }
0x3050   :  { %7660 = vtanh.f32 %v6754_v8  ;;  %v4196_v16 = vpop.f32.mrb[83].mxu1 }
0x3051   :  { %7662 = vtanh.f32 %v4196_v16 }
0x3052   :  { %7664 = vtanh.f32 %v6755_v6 }
0x3059   :  { %v7659_v14 = vpop.eup %7658 }
0x305a   :  { %v7661_v9 = vpop.eup %7660  ;;  %v4212_v20 = vmul.f32 %v7659_v14, %v8206_v38 }
0x305b   :  { %v7663_v19 = vpop.eup %7662  ;;  %v4214_v25 = vmul.f32 %v7661_v9, %v8212_v46 }
0x305c   :  { %v4213_v24 = vmul.f32 %v7663_v19, %v8208_v40  ;;  %v7665_v28 = vpop.eup %7664 }
0x305d   :  { %v4215_v29 = vmul.f32 %v7665_v28, %v8215_v49 }
0x305e   :  { %v4216_v45 = vadd.f32 %v4213_v24, %v4212_v20 }
0x3060   :  { %v4217_v32 = vadd.f32 %v4216_v45, %v4214_v25 }
0x3062   :  { %v4218_v60 = vadd.f32 %v4217_v32, %v4215_v29 }
0x3064   :  { %v4219_v35 = vrot.slane %v4218_v60, 4 }
0x3066   :  { %v4220_v27 = vadd.f32 %v4219_v35, %v4218_v60 }
0x3068   :  { %v4221_v31 = vrot.slane %v4220_v27, 2 }
0x306a   :  { %v4222_v34 = vadd.f32 %v4221_v31, %v4220_v27 }
0x306c   :  { %v4223_v37 = vrot.slane %v4222_v34, 1 }
0x306e   :  { %v4224_v36 = vadd.f32 %v4223_v37, %v4222_v34 }
0x3070   :  { %7666 = vtanh.f32 %v4224_v36 }
0x307a   :  { %v7667_v44 = vpop.eup %7666 }
0x307b   :  { %v4226_v50 = vmul.f32 %v7667_v44, %v8227_v2 }
0x307d   :  { %v4227_v53 = vadd.f32 %v4226_v50, %v4142_v1 }
0x307f   :  { %v4228_v12 = vmul.f32 %v4227_v53, %v4132_v54  ;;  %v4419_v39 = vmul.f32 2.0, %v4227_v53 }
0x3081   :  { %v4229_v55 = vadd.f32 %v4228_v12, %v9103_v23  ;;  %v4420_v1 = vadd.f32 %v4419_v39, %v9131_v57 }
0x3083   :  { %4232 = vrot.lane.b32.xlu1 %v4229_v55, %s8071_s7  ;;  %v4242_v47 = vrot.slane %v4229_v55, %v8178_v15  ;;  %4230 = vrot.lane.b32.xlu0 %v4229_v55, %s8072_s18  ;;  %v4235_v36 = vmul.f32 %v4229_v55, %v8218_v62 }
0x3085   :  { %v4244_v52 = vmul.f32 %v4242_v47, %v8184_v18  ;;  %v4245_v56 = vmul.f32 %v4242_v47, %v8190_v22  ;;  %v4246_v51 = vmul.f32 %v4242_v47, %v8182_v17  ;;  %v4247_v58 = vmul.f32 %v4242_v47, %v8188_v21 }
0x3087   :  { %7668 = vtanh.f32 %v4244_v52 }
0x3088   :  { %7670 = vtanh.f32 %v4245_v56 }
0x3089   :  { %7672 = vtanh.f32 %v4246_v51 }
0x308a   :  { %7674 = vtanh.f32 %v4247_v58 }
0x3091   :  { %v7669_v54 = vpop.eup %7668 }
0x3092   :  { %v7671_v59 = vpop.eup %7670 }
0x3093   :  { %v7673_v61 = vpop.eup %7672  ;;  %v4252_v4 = vpack.c.bf16 %v7671_v59, %v7669_v54 }
0x3094   :  { %v7675_v0 = vpop.eup %7674 }
0x3095   :  { %6756 = vmatprep.subr.bf16.mxu0 %v4252_v4  ;;  %v4253_v5 = vpack.c.bf16 %v7675_v0, %v7673_v61 }
0x3096   :  { %6757 = vmatpush3.bf16.msra.mxu0 %v4252_v4 }
0x3097   :  { %6758 = vmatprep.subr.bf16.mxu0 %v4253_v5 }
0x309a   :  { %6759 = vmatpush3.bf16.msra.mxu0 %v4253_v5 }
0x309d   :  { %6761 = vmatmul.mubr.msk.bf16.vlgmr.msra.gmra.mrb[84].mxu0 %vm135_vm0, %v8200_v33 }
0x309e   :  { %6776 = vmatprep.mubr.msk.bf16.mxu0 %vm135_vm0, %v8163_v11 }
0x30f5   :  { %v4233_v27 = vpop.permute.xlu1 %4232  ;;  %v4231_v31 = vpop.permute.xlu0 %4230 }
0x30f6   :  { %v4234_v34 = vadd.f32 %v4233_v27, %v4231_v31 }
0x30f8   :  { %v4236_v37 = vmul.f32 %v4234_v34, %v8220_v63 }
0x30fa   :  { %v4237_v41 = vadd.f32 %v4236_v37, %v4235_v36 }
0x3170   :  { %v6762_v26 = vpop.f32.mrb[84].mxu0 }
0x3171   :  { %v4288_v3 = vpop.f32.mrb[85].mxu0 }
0x3172   :  { %7676 = vtanh.f32 %v4288_v3  ;;  %v6763_v7 = vpop.f32.mrb[86].mxu0 }
0x3173   :  { %7678 = vtanh.f32 %v6762_v26  ;;  %v4291_v42 = vpop.f32.mrb[87].mxu0 }
0x3174   :  { %7680 = vtanh.f32 %v4291_v42 }
0x3175   :  { %7682 = vtanh.f32 %v6763_v7 }
0x317c   :  { %v7677_v13 = vpop.eup %7676 }
0x317d   :  { %v7679_v8 = vpop.eup %7678  ;;  %v4307_v6 = vmul.f32 %v7677_v13, %v8206_v38 }
0x317e   :  { %v7681_v10 = vpop.eup %7680  ;;  %v4309_v9 = vmul.f32 %v7679_v8, %v8212_v46 }
0x317f   :  { %v4308_v16 = vmul.f32 %v7681_v10, %v8208_v40  ;;  %v7683_v14 = vpop.eup %7682 }
0x3180   :  { %v4310_v20 = vmul.f32 %v7683_v14, %v8215_v49 }
0x3181   :  { %v4311_v19 = vadd.f32 %v4308_v16, %v4307_v6 }
0x3183   :  { %v4312_v24 = vadd.f32 %v4311_v19, %v4309_v9 }
0x3185   :  { %v4313_v28 = vadd.f32 %v4312_v24, %v4310_v20 }
0x3187   :  { %v4314_v25 = vrot.slane %v4313_v28, 4 }
0x3189   :  { %v4315_v45 = vadd.f32 %v4314_v25, %v4313_v28 }
0x318b   :  { %v4316_v29 = vrot.slane %v4315_v45, 2 }
0x318d   :  { %v4317_v32 = vadd.f32 %v4316_v29, %v4315_v45 }
0x318f   :  { %v4318_v60 = vrot.slane %v4317_v32, 1 }
0x3191   :  { %v4319_v35 = vadd.f32 %v4318_v60, %v4317_v32 }
0x3193   :  { %7684 = vtanh.f32 %v4319_v35 }
0x319d   :  { %v7685_v30 = vpop.eup %7684 }
0x319e   :  { %v4321_v43 = vmul.f32 %v7685_v30, %v8227_v2 }
0x31a0   :  { %v4322_v44 = vadd.f32 %v4321_v43, %v4237_v41  ;;  %v4424_v43 = vstv %s6127_s11 }
0x31a2   :  { %v4324_v50 = vmul.f32 %v4323_v48, %v4322_v44  ;;  %v4421_v12 = vmul.f32 2.0, %v4322_v44 }
0x31a4   :  { %v4325_v47 = vadd.f32 %v4324_v50, %v9103_v23  ;;  %v4422_v52 = vadd.f32 %v4421_v12, %v4420_v1 }
0x31a6   :  { %4328 = vrot.lane.b32.xlu1 %v4325_v47, %s8071_s7  ;;  %v4338_v56 = vrot.slane %v4325_v47, %v8178_v15  ;;  %4326 = vrot.lane.b32.xlu0 %v4325_v47, %s8072_s18  ;;  %v4331_v37 = vmul.f32 %v4325_v47, %v8218_v62 }
0x31a8   :  { %v4340_v53 = vmul.f32 %v4338_v56, %v8184_v18  ;;  %v4341_v55 = vmul.f32 %v4338_v56, %v8190_v22  ;;  %v4342_v51 = vmul.f32 %v4338_v56, %v8182_v17  ;;  %v4343_v58 = vmul.f32 %v4338_v56, %v8188_v21 }
0x31aa   :  { %7686 = vtanh.f32 %v4340_v53 }
0x31ab   :  { %7688 = vtanh.f32 %v4341_v55 }
0x31ac   :  { %7690 = vtanh.f32 %v4342_v51 }
0x31ad   :  { %7692 = vtanh.f32 %v4343_v58 }
0x31b4   :  { %v7687_v57 = vpop.eup %7686 }
0x31b5   :  { %v7689_v54 = vpop.eup %7688 }
0x31b6   :  { %v7691_v59 = vpop.eup %7690  ;;  %v4348_v61 = vpack.c.bf16 %v7689_v54, %v7687_v57 }
0x31b7   :  { %v7693_v4 = vpop.eup %7692 }
0x31b8   :  { %6764 = vmatprep.subr.bf16.mxu1 %v4348_v61  ;;  %v4349_v0 = vpack.c.bf16 %v7693_v4, %v7691_v59 }
0x31b9   :  { %6765 = vmatpush3.bf16.msra.mxu1 %v4348_v61 }
0x31ba   :  { %6766 = vmatprep.subr.bf16.mxu1 %v4349_v0 }
0x31bd   :  { %6767 = vmatpush3.bf16.msra.mxu1 %v4349_v0 }
0x31c0   :  { %6769 = vmatmul.mubr.msk.bf16.vlgmr.msra.gmra.mrb[84].mxu1 %vm135_vm0, %v8200_v33 }
0x31c1   :  { %6784 = vmatprep.mubr.msk.bf16.mxu1 %vm135_vm0, %v8163_v11 }
0x3218   :  { %v4329_v35 = vpop.permute.xlu1 %4328  ;;  %v4327_v27 = vpop.permute.xlu0 %4326 }
0x3219   :  { %v4330_v31 = vadd.f32 %v4329_v35, %v4327_v27 }
0x321b   :  { %v4332_v34 = vmul.f32 %v4330_v31, %v8220_v63 }
0x321d   :  { %v4333_v30 = vadd.f32 %v4332_v34, %v4331_v37  ;;  %v4524_v34 = vstv %s9214_s12 }
0x3293   :  { %v6770_v5 = vpop.f32.mrb[84].mxu1 }
0x3294   :  { %v4384_v26 = vpop.f32.mrb[85].mxu1 }
0x3295   :  { %7694 = vtanh.f32 %v4384_v26  ;;  %v6771_v3 = vpop.f32.mrb[86].mxu1 }
0x3296   :  { %7696 = vtanh.f32 %v6770_v5  ;;  %v4387_v7 = vpop.f32.mrb[87].mxu1 }
0x3297   :  { %7698 = vtanh.f32 %v4387_v7 }
0x3298   :  { %7700 = vtanh.f32 %v6771_v3 }
0x329f   :  { %v7695_v42 = vpop.eup %7694 }
0x32a0   :  { %v7697_v13 = vpop.eup %7696  ;;  %v4403_v10 = vmul.f32 %v7695_v42, %v8206_v38 }
0x32a1   :  { %v7699_v8 = vpop.eup %7698  ;;  %v4405_v14 = vmul.f32 %v7697_v13, %v8212_v46 }
0x32a2   :  { %v4404_v6 = vmul.f32 %v7699_v8, %v8208_v40  ;;  %v7701_v16 = vpop.eup %7700 }
0x32a3   :  { %v4406_v19 = vmul.f32 %v7701_v16, %v8215_v49 }
0x32a4   :  { %v4407_v9 = vadd.f32 %v4404_v6, %v4403_v10 }
0x32a6   :  { %v4408_v20 = vadd.f32 %v4407_v9, %v4405_v14 }
0x32a8   :  { %v4409_v24 = vadd.f32 %v4408_v20, %v4406_v19 }
0x32aa   :  { %v4410_v28 = vrot.slane %v4409_v24, 4 }
0x32ac   :  { %v4411_v25 = vadd.f32 %v4410_v28, %v4409_v24 }
0x32ae   :  { %v4412_v45 = vrot.slane %v4411_v25, 2 }
0x32b0   :  { %v4413_v29 = vadd.f32 %v4412_v45, %v4411_v25 }
0x32b2   :  { %v4414_v32 = vrot.slane %v4413_v29, 1 }
0x32b4   :  { %v4415_v60 = vadd.f32 %v4414_v32, %v4413_v29 }
0x32b6   :  { %7702 = vtanh.f32 %v4415_v60 }
0x32c0   :  { %v7703_v36 = vpop.eup %7702 }
0x32c1   :  { %v4417_v39 = vmul.f32 %v7703_v36, %v8227_v2 }
0x32c3   :  { %v4418_v41 = vadd.f32 %v4417_v39, %v4333_v30 }
0x32c5   :  { %v4423_v48 = vadd.f32 %v4422_v52, %v4418_v41 }
0x32c7   :  { %v4425_v44 = vmul.f32 %v4424_v43, %v4423_v48 }
0x32c9   :  { %v9193_v1 = vadd.f32 %v4425_v44, %v9103_v23 }
0x32cb   :  { %4433 = vrot.lane.b32.xlu1 %v9193_v1, %s8071_s7  ;;  %4427 = vst [vmem:[#allocation7 + $0xb] sm:$0x1] %v9193_v1  ;;  %4431 = vrot.lane.b32.xlu0 %v9193_v1, %s8072_s18  ;;  %v4443_v50 = vrot.slane %v9193_v1, %v8178_v15  ;;  %v4436_v60 = vmul.f32 %v9193_v1, %v8218_v62 }
0x32cd   :  { %v4445_v12 = vmul.f32 %v4443_v50, %v8184_v18  ;;  %v4446_v47 = vmul.f32 %v4443_v50, %v8190_v22  ;;  %v4447_v52 = vmul.f32 %v4443_v50, %v8182_v17  ;;  %v4448_v23 = vmul.f32 %v4443_v50, %v8188_v21 }
0x32cf   :  { %7704 = vtanh.f32 %v4445_v12 }
0x32d0   :  { %7706 = vtanh.f32 %v4446_v47 }
0x32d1   :  { %7708 = vtanh.f32 %v4447_v52 }
0x32d2   :  { %7710 = vtanh.f32 %v4448_v23 }
0x32d9   :  { %v7705_v56 = vpop.eup %7704 }
0x32da   :  { %v7707_v53 = vpop.eup %7706 }
0x32db   :  { %v7709_v55 = vpop.eup %7708  ;;  %v4453_v51 = vpack.c.bf16 %v7707_v53, %v7705_v56 }
0x32dc   :  { %v7711_v58 = vpop.eup %7710 }
0x32dd   :  { %6772 = vmatprep.subr.bf16.mxu0 %v4453_v51  ;;  %v4454_v57 = vpack.c.bf16 %v7711_v58, %v7709_v55 }
0x32de   :  { %6773 = vmatpush3.bf16.msra.mxu0 %v4453_v51 }
0x32df   :  { %6774 = vmatprep.subr.bf16.mxu0 %v4454_v57 }
0x32e2   :  { %6775 = vmatpush3.bf16.msra.mxu0 %v4454_v57 }
0x32e5   :  { %6777 = vmatmul.mubr.msk.bf16.vlgmr.msra.gmra.mrb[88].mxu0 %vm135_vm0, %v8200_v33 }
0x32e6   :  { %6792 = vmatprep.mubr.msk.bf16.mxu0 %vm135_vm0, %v8163_v11 }
0x333d   :  { %v4434_v25 = vpop.permute.xlu1 %4433  ;;  %v4432_v45 = vpop.permute.xlu0 %4431 }
0x333e   :  { %v4435_v29 = vadd.f32 %v4434_v25, %v4432_v45 }
0x3340   :  { %v4437_v32 = vmul.f32 %v4435_v29, %v8220_v63 }
0x3342   :  { %v4438_v27 = vadd.f32 %v4437_v32, %v4436_v60 }
0x33b8   :  { %v6778_v54 = vpop.f32.mrb[88].mxu0 }
0x33b9   :  { %v4489_v59 = vpop.f32.mrb[89].mxu0 }
0x33ba   :  { %7712 = vtanh.f32 %v4489_v59  ;;  %v6779_v61 = vpop.f32.mrb[90].mxu0 }
0x33bb   :  { %7714 = vtanh.f32 %v6778_v54  ;;  %v4492_v4 = vpop.f32.mrb[91].mxu0 }
0x33bc   :  { %7716 = vtanh.f32 %v4492_v4 }
0x33bd   :  { %7718 = vtanh.f32 %v6779_v61 }
0x33c4   :  { %v7713_v0 = vpop.eup %7712 }
0x33c5   :  { %v7715_v5 = vpop.eup %7714  ;;  %v4508_v3 = vmul.f32 %v7713_v0, %v8206_v38 }
0x33c6   :  { %v7717_v26 = vpop.eup %7716  ;;  %v4510_v13 = vmul.f32 %v7715_v5, %v8212_v46 }
0x33c7   :  { %v4509_v7 = vmul.f32 %v7717_v26, %v8208_v40  ;;  %v7719_v42 = vpop.eup %7718 }
0x33c8   :  { %v4511_v10 = vmul.f32 %v7719_v42, %v8215_v49 }
0x33c9   :  { %v4512_v8 = vadd.f32 %v4509_v7, %v4508_v3 }
0x33cb   :  { %v4513_v6 = vadd.f32 %v4512_v8, %v4510_v13 }
0x33cd   :  { %v4514_v16 = vadd.f32 %v4513_v6, %v4511_v10 }
0x33cf   :  { %v4515_v14 = vrot.slane %v4514_v16, 4 }
0x33d1   :  { %v4516_v9 = vadd.f32 %v4515_v14, %v4514_v16 }
0x33d3   :  { %v4517_v19 = vrot.slane %v4516_v9, 2 }
0x33d5   :  { %v4518_v20 = vadd.f32 %v4517_v19, %v4516_v9 }
0x33d7   :  { %v4519_v24 = vrot.slane %v4518_v20, 1 }
0x33d9   :  { %v4520_v28 = vadd.f32 %v4519_v24, %v4518_v20 }
0x33db   :  { %7720 = vtanh.f32 %v4520_v28 }
0x33e5   :  { %v7721_v35 = vpop.eup %7720 }
0x33e6   :  { %v4522_v31 = vmul.f32 %v7721_v35, %v8227_v2 }
0x33e8   :  { %v9221_v37 = vadd.f32 %v4522_v31, %v4438_v27 }
0x33ea   :  { %v4525_v36 = vmul.f32 %v4524_v34, %v9221_v37 }
0x33ec   :  { %v4526_v30 = vadd.f32 %v4525_v36, %v9193_v1 }
0x33ee   :  { %4529 = vrot.lane.b32.xlu1 %v4526_v30, %s8071_s7  ;;  %v4539_v39 = vrot.slane %v4526_v30, %v8178_v15  ;;  %4527 = vrot.lane.b32.xlu0 %v4526_v30, %s8072_s18  ;;  %v4532_v28 = vmul.f32 %v4526_v30, %v8218_v62 }
0x33f0   :  { %v4541_v41 = vmul.f32 %v4539_v39, %v8184_v18  ;;  %v4542_v43 = vmul.f32 %v4539_v39, %v8190_v22  ;;  %v4543_v48 = vmul.f32 %v4539_v39, %v8182_v17  ;;  %v4544_v44 = vmul.f32 %v4539_v39, %v8188_v21 }
0x33f2   :  { %7722 = vtanh.f32 %v4541_v41 }
0x33f3   :  { %7724 = vtanh.f32 %v4542_v43 }
0x33f4   :  { %7726 = vtanh.f32 %v4543_v48 }
0x33f5   :  { %7728 = vtanh.f32 %v4544_v44 }
0x33fc   :  { %v7723_v50 = vpop.eup %7722 }
0x33fd   :  { %v7725_v12 = vpop.eup %7724 }
0x33fe   :  { %v7727_v47 = vpop.eup %7726  ;;  %v4549_v52 = vpack.c.bf16 %v7725_v12, %v7723_v50 }
0x33ff   :  { %v7729_v23 = vpop.eup %7728 }
0x3400   :  { %6780 = vmatprep.subr.bf16.mxu1 %v4549_v52  ;;  %v4550_v56 = vpack.c.bf16 %v7729_v23, %v7727_v47 }
0x3401   :  { %6781 = vmatpush3.bf16.msra.mxu1 %v4549_v52 }
0x3402   :  { %6782 = vmatprep.subr.bf16.mxu1 %v4550_v56 }
0x3405   :  { %6783 = vmatpush3.bf16.msra.mxu1 %v4550_v56 }
0x3408   :  { %6785 = vmatmul.mubr.msk.bf16.vlgmr.msra.gmra.mrb[88].mxu1 %vm135_vm0, %v8200_v33 }
0x3409   :  { %6800 = vmatprep.mubr.msk.bf16.mxu1 %vm135_vm0, %v8163_v11 }
0x3460   :  { %v4530_v9 = vpop.permute.xlu1 %4529  ;;  %v4528_v19 = vpop.permute.xlu0 %4527 }
0x3461   :  { %v4531_v20 = vadd.f32 %v4530_v9, %v4528_v19 }
0x3463   :  { %v4533_v24 = vmul.f32 %v4531_v20, %v8220_v63 }
0x3465   :  { %v4534_v45 = vadd.f32 %v4533_v24, %v4532_v28  ;;  %v4715_v28 = vstv %s6136_s13 }
0x34db   :  { %v6786_v53 = vpop.f32.mrb[88].mxu1 }
0x34dc   :  { %v4585_v55 = vpop.f32.mrb[89].mxu1 }
0x34dd   :  { %7730 = vtanh.f32 %v4585_v55  ;;  %v6787_v51 = vpop.f32.mrb[90].mxu1 }
0x34de   :  { %7732 = vtanh.f32 %v6786_v53  ;;  %v4588_v58 = vpop.f32.mrb[91].mxu1 }
0x34df   :  { %7734 = vtanh.f32 %v4588_v58 }
0x34e0   :  { %7736 = vtanh.f32 %v6787_v51 }
0x34e7   :  { %v7731_v57 = vpop.eup %7730 }
0x34e8   :  { %v7733_v54 = vpop.eup %7732  ;;  %v4604_v61 = vmul.f32 %v7731_v57, %v8206_v38 }
0x34e9   :  { %v7735_v59 = vpop.eup %7734  ;;  %v4606_v5 = vmul.f32 %v7733_v54, %v8212_v46 }
0x34ea   :  { %v4605_v4 = vmul.f32 %v7735_v59, %v8208_v40  ;;  %v7737_v0 = vpop.eup %7736 }
0x34eb   :  { %v4607_v3 = vmul.f32 %v7737_v0, %v8215_v49 }
0x34ec   :  { %v4608_v26 = vadd.f32 %v4605_v4, %v4604_v61 }
0x34ee   :  { %v4609_v7 = vadd.f32 %v4608_v26, %v4606_v5 }
0x34f0   :  { %v4610_v42 = vadd.f32 %v4609_v7, %v4607_v3 }
0x34f2   :  { %v4611_v13 = vrot.slane %v4610_v42, 4 }
0x34f4   :  { %v4612_v8 = vadd.f32 %v4611_v13, %v4610_v42 }
0x34f6   :  { %v4613_v10 = vrot.slane %v4612_v8, 2 }
0x34f8   :  { %v4614_v6 = vadd.f32 %v4613_v10, %v4612_v8 }
0x34fa   :  { %v4615_v16 = vrot.slane %v4614_v6, 1 }
0x34fc   :  { %v4616_v14 = vadd.f32 %v4615_v16, %v4614_v6 }
0x34fe   :  { %7738 = vtanh.f32 %v4616_v14 }
0x3508   :  { %v7739_v25 = vpop.eup %7738 }
0x3509   :  { %v4618_v29 = vmul.f32 %v7739_v25, %v8227_v2 }
0x350b   :  { %v4619_v32 = vadd.f32 %v4618_v29, %v4534_v45 }
0x350d   :  { %v4620_v60 = vmul.f32 %v4619_v32, %v4524_v34  ;;  %v4811_v19 = vmul.f32 2.0, %v4619_v32 }
0x350f   :  { %v4621_v35 = vadd.f32 %v4620_v60, %v9193_v1  ;;  %v4812_v45 = vadd.f32 %v4811_v19, %v9221_v37 }
0x3511   :  { %4624 = vrot.lane.b32.xlu1 %v4621_v35, %s8071_s7  ;;  %v4634_v27 = vrot.slane %v4621_v35, %v8178_v15  ;;  %4622 = vrot.lane.b32.xlu0 %v4621_v35, %s8072_s18  ;;  %v4627_v14 = vmul.f32 %v4621_v35, %v8218_v62 }
0x3513   :  { %v4636_v31 = vmul.f32 %v4634_v27, %v8184_v18  ;;  %v4637_v36 = vmul.f32 %v4634_v27, %v8190_v22  ;;  %v4638_v30 = vmul.f32 %v4634_v27, %v8182_v17  ;;  %v4639_v39 = vmul.f32 %v4634_v27, %v8188_v21 }
0x3515   :  { %7740 = vtanh.f32 %v4636_v31 }
0x3516   :  { %7742 = vtanh.f32 %v4637_v36 }
0x3517   :  { %7744 = vtanh.f32 %v4638_v30 }
0x3518   :  { %7746 = vtanh.f32 %v4639_v39 }
0x351f   :  { %v7741_v34 = vpop.eup %7740 }
0x3520   :  { %v7743_v41 = vpop.eup %7742 }
0x3521   :  { %v7745_v43 = vpop.eup %7744  ;;  %v4644_v48 = vpack.c.bf16 %v7743_v41, %v7741_v34 }
0x3522   :  { %v7747_v44 = vpop.eup %7746 }
0x3523   :  { %6788 = vmatprep.subr.bf16.mxu0 %v4644_v48  ;;  %v4645_v50 = vpack.c.bf16 %v7747_v44, %v7745_v43 }
0x3524   :  { %6789 = vmatpush3.bf16.msra.mxu0 %v4644_v48 }
0x3525   :  { %6790 = vmatprep.subr.bf16.mxu0 %v4645_v50 }
0x3528   :  { %6791 = vmatpush3.bf16.msra.mxu0 %v4645_v50 }
0x352b   :  { %6793 = vmatmul.mubr.msk.bf16.vlgmr.msra.gmra.mrb[92].mxu0 %vm135_vm0, %v8200_v33 }
0x352c   :  { %6808 = vmatprep.mubr.msk.bf16.mxu0 %vm135_vm0, %v8163_v11 }
0x3583   :  { %v4625_v8 = vpop.permute.xlu1 %4624  ;;  %v4623_v10 = vpop.permute.xlu0 %4622 }
0x3584   :  { %v4626_v6 = vadd.f32 %v4625_v8, %v4623_v10 }
0x3586   :  { %v4628_v16 = vmul.f32 %v4626_v6, %v8220_v63 }
0x3588   :  { %v4629_v20 = vadd.f32 %v4628_v16, %v4627_v14 }
0x35fe   :  { %v6794_v12 = vpop.f32.mrb[92].mxu0 }
0x35ff   :  { %v4680_v47 = vpop.f32.mrb[93].mxu0 }
0x3600   :  { %7748 = vtanh.f32 %v4680_v47  ;;  %v6795_v52 = vpop.f32.mrb[94].mxu0 }
0x3601   :  { %7750 = vtanh.f32 %v6794_v12  ;;  %v4683_v23 = vpop.f32.mrb[95].mxu0 }
0x3602   :  { %7752 = vtanh.f32 %v4683_v23 }
0x3603   :  { %7754 = vtanh.f32 %v6795_v52 }
0x360a   :  { %v7749_v56 = vpop.eup %7748 }
0x360b   :  { %v7751_v53 = vpop.eup %7750  ;;  %v4699_v51 = vmul.f32 %v7749_v56, %v8206_v38 }
0x360c   :  { %v7753_v55 = vpop.eup %7752  ;;  %v4701_v54 = vmul.f32 %v7751_v53, %v8212_v46 }
0x360d   :  { %v4700_v58 = vmul.f32 %v7753_v55, %v8208_v40  ;;  %v7755_v57 = vpop.eup %7754 }
0x360e   :  { %v4702_v61 = vmul.f32 %v7755_v57, %v8215_v49 }
0x360f   :  { %v4703_v59 = vadd.f32 %v4700_v58, %v4699_v51 }
0x3611   :  { %v4704_v4 = vadd.f32 %v4703_v59, %v4701_v54 }
0x3613   :  { %v4705_v0 = vadd.f32 %v4704_v4, %v4702_v61 }
0x3615   :  { %v4706_v5 = vrot.slane %v4705_v0, 4 }
0x3617   :  { %v4707_v26 = vadd.f32 %v4706_v5, %v4705_v0 }
0x3619   :  { %v4708_v3 = vrot.slane %v4707_v26, 2 }
0x361b   :  { %v4709_v7 = vadd.f32 %v4708_v3, %v4707_v26 }
0x361d   :  { %v4710_v42 = vrot.slane %v4709_v7, 1 }
0x361f   :  { %v4711_v13 = vadd.f32 %v4710_v42, %v4709_v7 }
0x3621   :  { %7756 = vtanh.f32 %v4711_v13 }
0x362b   :  { %v7757_v9 = vpop.eup %7756 }
0x362c   :  { %v4713_v24 = vmul.f32 %v7757_v9, %v8227_v2 }
0x362e   :  { %v4714_v25 = vadd.f32 %v4713_v24, %v4629_v20  ;;  %v4816_v24 = vstv %s6138_s0 }
0x3630   :  { %v4716_v29 = vmul.f32 %v4715_v28, %v4714_v25  ;;  %v4813_v60 = vmul.f32 2.0, %v4714_v25 }
0x3632   :  { %v4717_v27 = vadd.f32 %v4716_v29, %v9193_v1  ;;  %v4814_v31 = vadd.f32 %v4813_v60, %v4812_v45 }
0x3634   :  { %4720 = vrot.lane.b32.xlu1 %v4717_v27, %s8071_s7  ;;  %v4730_v36 = vrot.slane %v4717_v27, %v8178_v15  ;;  %4718 = vrot.lane.b32.xlu0 %v4717_v27, %s8072_s18  ;;  %v4723_v16 = vmul.f32 %v4717_v27, %v8218_v62 }
0x3636   :  { %v4732_v32 = vmul.f32 %v4730_v36, %v8184_v18  ;;  %v4733_v35 = vmul.f32 %v4730_v36, %v8190_v22  ;;  %v4734_v30 = vmul.f32 %v4730_v36, %v8182_v17  ;;  %v4735_v39 = vmul.f32 %v4730_v36, %v8188_v21 }
0x3638   :  { %7758 = vtanh.f32 %v4732_v32 }
0x3639   :  { %7760 = vtanh.f32 %v4733_v35 }
0x363a   :  { %7762 = vtanh.f32 %v4734_v30 }
0x363b   :  { %7764 = vtanh.f32 %v4735_v39 }
0x3642   :  { %v7759_v37 = vpop.eup %7758 }
0x3643   :  { %v7761_v34 = vpop.eup %7760 }
0x3644   :  { %v7763_v41 = vpop.eup %7762  ;;  %v4740_v43 = vpack.c.bf16 %v7761_v34, %v7759_v37 }
0x3645   :  { %v7765_v48 = vpop.eup %7764 }
0x3646   :  { %6796 = vmatprep.subr.bf16.mxu1 %v4740_v43  ;;  %v4741_v44 = vpack.c.bf16 %v7765_v48, %v7763_v41 }
0x3647   :  { %6797 = vmatpush3.bf16.msra.mxu1 %v4740_v43 }
0x3648   :  { %6798 = vmatprep.subr.bf16.mxu1 %v4741_v44 }
0x364b   :  { %6799 = vmatpush3.bf16.msra.mxu1 %v4741_v44 }
0x364e   :  { %6801 = vmatmul.mubr.msk.bf16.vlgmr.msra.gmra.mrb[92].mxu1 %vm135_vm0, %v8200_v33 }
0x364f   :  { %6816 = vmatprep.mubr.msk.bf16.mxu1 %vm135_vm0, %v8163_v11 }
0x36a6   :  { %v4721_v13 = vpop.permute.xlu1 %4720  ;;  %v4719_v8 = vpop.permute.xlu0 %4718 }
0x36a7   :  { %v4722_v10 = vadd.f32 %v4721_v13, %v4719_v8 }
0x36a9   :  { %v4724_v6 = vmul.f32 %v4722_v10, %v8220_v63 }
0x36ab   :  { %v4725_v9 = vadd.f32 %v4724_v6, %v4723_v16  ;;  %v4916_v6 = vstv %s9304_s5 }
0x3721   :  { %v6802_v50 = vpop.f32.mrb[92].mxu1 }
0x3722   :  { %v4776_v12 = vpop.f32.mrb[93].mxu1 }
0x3723   :  { %7766 = vtanh.f32 %v4776_v12  ;;  %v6803_v47 = vpop.f32.mrb[94].mxu1 }
0x3724   :  { %7768 = vtanh.f32 %v6802_v50  ;;  %v4779_v52 = vpop.f32.mrb[95].mxu1 }
0x3725   :  { %7770 = vtanh.f32 %v4779_v52 }
0x3726   :  { %7772 = vtanh.f32 %v6803_v47 }
0x372d   :  { %v7767_v23 = vpop.eup %7766 }
0x372e   :  { %v7769_v56 = vpop.eup %7768  ;;  %v4795_v55 = vmul.f32 %v7767_v23, %v8206_v38 }
0x372f   :  { %v7771_v53 = vpop.eup %7770  ;;  %v4797_v57 = vmul.f32 %v7769_v56, %v8212_v46 }
0x3730   :  { %v4796_v51 = vmul.f32 %v7771_v53, %v8208_v40  ;;  %v7773_v58 = vpop.eup %7772 }
0x3731   :  { %v4798_v59 = vmul.f32 %v7773_v58, %v8215_v49 }
0x3732   :  { %v4799_v54 = vadd.f32 %v4796_v51, %v4795_v55 }
0x3734   :  { %v4800_v61 = vadd.f32 %v4799_v54, %v4797_v57 }
0x3736   :  { %v4801_v4 = vadd.f32 %v4800_v61, %v4798_v59 }
0x3738   :  { %v4802_v0 = vrot.slane %v4801_v4, 4 }
0x373a   :  { %v4803_v5 = vadd.f32 %v4802_v0, %v4801_v4 }
0x373c   :  { %v4804_v26 = vrot.slane %v4803_v5, 2 }
0x373e   :  { %v4805_v3 = vadd.f32 %v4804_v26, %v4803_v5 }
0x3740   :  { %v4806_v7 = vrot.slane %v4805_v3, 1 }
0x3742   :  { %v4807_v42 = vadd.f32 %v4806_v7, %v4805_v3 }
0x3744   :  { %7774 = vtanh.f32 %v4807_v42 }
0x374e   :  { %v7775_v14 = vpop.eup %7774 }
0x374f   :  { %v4809_v19 = vmul.f32 %v7775_v14, %v8227_v2 }
0x3751   :  { %v4810_v20 = vadd.f32 %v4809_v19, %v4725_v9 }
0x3753   :  { %v4815_v28 = vadd.f32 %v4814_v31, %v4810_v20 }
0x3755   :  { %v4817_v25 = vmul.f32 %v4816_v24, %v4815_v28 }
0x3757   :  { %v9283_v45 = vadd.f32 %v4817_v25, %v9193_v1 }
0x3759   :  { %4825 = vrot.lane.b32.xlu1 %v9283_v45, %s8071_s7  ;;  %4819 = vst [vmem:[#allocation7 + $0xc] sm:$0x1] %v9283_v45  ;;  %4823 = vrot.lane.b32.xlu0 %v9283_v45, %s8072_s18  ;;  %v4835_v29 = vrot.slane %v9283_v45, %v8178_v15  ;;  %v4828_v42 = vmul.f32 %v9283_v45, %v8218_v62 }
0x375b   :  { %v4837_v60 = vmul.f32 %v4835_v29, %v8184_v18  ;;  %v4838_v27 = vmul.f32 %v4835_v29, %v8190_v22  ;;  %v4839_v31 = vmul.f32 %v4835_v29, %v8182_v17  ;;  %v4840_v1 = vmul.f32 %v4835_v29, %v8188_v21 }
0x375d   :  { %7776 = vtanh.f32 %v4837_v60 }
0x375e   :  { %7778 = vtanh.f32 %v4838_v27 }
0x375f   :  { %7780 = vtanh.f32 %v4839_v31 }
0x3760   :  { %7782 = vtanh.f32 %v4840_v1 }
0x3767   :  { %v7777_v36 = vpop.eup %7776 }
0x3768   :  { %v7779_v32 = vpop.eup %7778 }
0x3769   :  { %v7781_v35 = vpop.eup %7780  ;;  %v4845_v30 = vpack.c.bf16 %v7779_v32, %v7777_v36 }
0x376a   :  { %v7783_v39 = vpop.eup %7782 }
0x376b   :  { %6804 = vmatprep.subr.bf16.mxu0 %v4845_v30  ;;  %v4846_v37 = vpack.c.bf16 %v7783_v39, %v7781_v35 }
0x376c   :  { %6805 = vmatpush3.bf16.msra.mxu0 %v4845_v30 }
0x376d   :  { %6806 = vmatprep.subr.bf16.mxu0 %v4846_v37 }
0x3770   :  { %6807 = vmatpush3.bf16.msra.mxu0 %v4846_v37 }
0x3773   :  { %6809 = vmatmul.mubr.msk.bf16.vlgmr.msra.gmra.mrb[96].mxu0 %vm135_vm0, %v8200_v33 }
0x3774   :  { %6824 = vmatprep.mubr.msk.bf16.mxu0 %vm135_vm0, %v8163_v11 }
0x37cb   :  { %v4826_v5 = vpop.permute.xlu1 %4825  ;;  %v4824_v26 = vpop.permute.xlu0 %4823 }
0x37cc   :  { %v4827_v3 = vadd.f32 %v4826_v5, %v4824_v26 }
0x37ce   :  { %v4829_v7 = vmul.f32 %v4827_v3, %v8220_v63 }
0x37d0   :  { %v4830_v8 = vadd.f32 %v4829_v7, %v4828_v42 }
0x3846   :  { %v6810_v34 = vpop.f32.mrb[96].mxu0 }
0x3847   :  { %v4881_v41 = vpop.f32.mrb[97].mxu0 }
0x3848   :  { %7784 = vtanh.f32 %v4881_v41  ;;  %v6811_v43 = vpop.f32.mrb[98].mxu0 }
0x3849   :  { %7786 = vtanh.f32 %v6810_v34  ;;  %v4884_v48 = vpop.f32.mrb[99].mxu0 }
0x384a   :  { %7788 = vtanh.f32 %v4884_v48 }
0x384b   :  { %7790 = vtanh.f32 %v6811_v43 }
0x3852   :  { %v7785_v44 = vpop.eup %7784 }
0x3853   :  { %v7787_v50 = vpop.eup %7786  ;;  %v4900_v47 = vmul.f32 %v7785_v44, %v8206_v38 }
0x3854   :  { %v7789_v12 = vpop.eup %7788  ;;  %v4902_v56 = vmul.f32 %v7787_v50, %v8212_v46 }
0x3855   :  { %v4901_v52 = vmul.f32 %v7789_v12, %v8208_v40  ;;  %v7791_v23 = vpop.eup %7790 }
0x3856   :  { %v4903_v55 = vmul.f32 %v7791_v23, %v8215_v49 }
0x3857   :  { %v4904_v53 = vadd.f32 %v4901_v52, %v4900_v47 }
0x3859   :  { %v4905_v51 = vadd.f32 %v4904_v53, %v4902_v56 }
0x385b   :  { %v4906_v58 = vadd.f32 %v4905_v51, %v4903_v55 }
0x385d   :  { %v4907_v57 = vrot.slane %v4906_v58, 4 }
0x385f   :  { %v4908_v54 = vadd.f32 %v4907_v57, %v4906_v58 }
0x3861   :  { %v4909_v59 = vrot.slane %v4908_v54, 2 }
0x3863   :  { %v4910_v61 = vadd.f32 %v4909_v59, %v4908_v54 }
0x3865   :  { %v4911_v4 = vrot.slane %v4910_v61, 1 }
0x3867   :  { %v4912_v0 = vadd.f32 %v4911_v4, %v4910_v61 }
0x3869   :  { %7792 = vtanh.f32 %v4912_v0 }
0x3873   :  { %v7793_v13 = vpop.eup %7792 }
0x3874   :  { %v4914_v10 = vmul.f32 %v7793_v13, %v8227_v2 }
0x3876   :  { %v9311_v16 = vadd.f32 %v4914_v10, %v4830_v8 }
0x3878   :  { %v4917_v14 = vmul.f32 %v4916_v6, %v9311_v16 }
0x387a   :  { %v4918_v9 = vadd.f32 %v4917_v14, %v9283_v45 }
0x387c   :  { %4921 = vrot.lane.b32.xlu1 %v4918_v9, %s8071_s7  ;;  %v4931_v19 = vrot.slane %v4918_v9, %v8178_v15  ;;  %4919 = vrot.lane.b32.xlu0 %v4918_v9, %s8072_s18  ;;  %v4924_v0 = vmul.f32 %v4918_v9, %v8218_v62 }
0x387e   :  { %v4933_v20 = vmul.f32 %v4931_v19, %v8184_v18  ;;  %v4934_v24 = vmul.f32 %v4931_v19, %v8190_v22  ;;  %v4935_v28 = vmul.f32 %v4931_v19, %v8182_v17  ;;  %v4936_v25 = vmul.f32 %v4931_v19, %v8188_v21 }
0x3880   :  { %7794 = vtanh.f32 %v4933_v20 }
0x3881   :  { %7796 = vtanh.f32 %v4934_v24 }
0x3882   :  { %7798 = vtanh.f32 %v4935_v28 }
0x3883   :  { %7800 = vtanh.f32 %v4936_v25 }
0x388a   :  { %v7795_v29 = vpop.eup %7794 }
0x388b   :  { %v7797_v60 = vpop.eup %7796 }
0x388c   :  { %v7799_v27 = vpop.eup %7798  ;;  %v4941_v31 = vpack.c.bf16 %v7797_v60, %v7795_v29 }
0x388d   :  { %v7801_v1 = vpop.eup %7800 }
0x388e   :  { %6812 = vmatprep.subr.bf16.mxu1 %v4941_v31  ;;  %v4942_v36 = vpack.c.bf16 %v7801_v1, %v7799_v27 }
0x388f   :  { %6813 = vmatpush3.bf16.msra.mxu1 %v4941_v31 }
0x3890   :  { %6814 = vmatprep.subr.bf16.mxu1 %v4942_v36 }
0x3893   :  { %6815 = vmatpush3.bf16.msra.mxu1 %v4942_v36 }
0x3896   :  { %6817 = vmatmul.mubr.msk.bf16.vlgmr.msra.gmra.mrb[96].mxu1 %vm135_vm0, %v8200_v33 }
0x3897   :  { %6832 = vmatprep.mubr.msk.bf16.mxu1 %vm135_vm0, %v8163_v11 }
0x38ee   :  { %v4922_v54 = vpop.permute.xlu1 %4921  ;;  %v4920_v59 = vpop.permute.xlu0 %4919 }
0x38ef   :  { %v4923_v61 = vadd.f32 %v4922_v54, %v4920_v59 }
0x38f1   :  { %v4925_v4 = vmul.f32 %v4923_v61, %v8220_v63 }
0x38f3   :  { %v4926_v26 = vadd.f32 %v4925_v4, %v4924_v0  ;;  %v5107_v0 = vstv %s6147_s1 }
0x3969   :  { %v6818_v32 = vpop.f32.mrb[96].mxu1 }
0x396a   :  { %v4977_v35 = vpop.f32.mrb[97].mxu1 }
0x396b   :  { %7802 = vtanh.f32 %v4977_v35  ;;  %v6819_v30 = vpop.f32.mrb[98].mxu1 }
0x396c   :  { %7804 = vtanh.f32 %v6818_v32  ;;  %v4980_v39 = vpop.f32.mrb[99].mxu1 }
0x396d   :  { %7806 = vtanh.f32 %v4980_v39 }
0x396e   :  { %7808 = vtanh.f32 %v6819_v30 }
0x3975   :  { %v7803_v37 = vpop.eup %7802 }
0x3976   :  { %v7805_v34 = vpop.eup %7804  ;;  %v4996_v43 = vmul.f32 %v7803_v37, %v8206_v38 }
0x3977   :  { %v7807_v41 = vpop.eup %7806  ;;  %v4998_v50 = vmul.f32 %v7805_v34, %v8212_v46 }
0x3978   :  { %v4997_v48 = vmul.f32 %v7807_v41, %v8208_v40  ;;  %v7809_v44 = vpop.eup %7808 }
0x3979   :  { %v4999_v47 = vmul.f32 %v7809_v44, %v8215_v49 }
0x397a   :  { %v5000_v12 = vadd.f32 %v4997_v48, %v4996_v43 }
0x397c   :  { %v5001_v52 = vadd.f32 %v5000_v12, %v4998_v50 }
0x397e   :  { %v5002_v23 = vadd.f32 %v5001_v52, %v4999_v47 }
0x3980   :  { %v5003_v56 = vrot.slane %v5002_v23, 4 }
0x3982   :  { %v5004_v53 = vadd.f32 %v5003_v56, %v5002_v23 }
0x3984   :  { %v5005_v55 = vrot.slane %v5004_v53, 2 }
0x3986   :  { %v5006_v51 = vadd.f32 %v5005_v55, %v5004_v53 }
0x3988   :  { %v5007_v58 = vrot.slane %v5006_v51, 1 }
0x398a   :  { %v5008_v57 = vadd.f32 %v5007_v58, %v5006_v51 }
0x398c   :  { %7810 = vtanh.f32 %v5008_v57 }
0x3996   :  { %v7811_v5 = vpop.eup %7810 }
0x3997   :  { %v5010_v3 = vmul.f32 %v7811_v5, %v8227_v2 }
0x3999   :  { %v5011_v7 = vadd.f32 %v5010_v3, %v4926_v26 }
0x399b   :  { %v5012_v42 = vmul.f32 %v5011_v7, %v4916_v6  ;;  %v5203_v59 = vmul.f32 2.0, %v5011_v7 }
0x399d   :  { %v5013_v13 = vadd.f32 %v5012_v42, %v9283_v45  ;;  %v5204_v26 = vadd.f32 %v5203_v59, %v9311_v16 }
0x399f   :  { %5016 = vrot.lane.b32.xlu1 %v5013_v13, %s8071_s7  ;;  %v5026_v8 = vrot.slane %v5013_v13, %v8178_v15  ;;  %5014 = vrot.lane.b32.xlu0 %v5013_v13, %s8072_s18  ;;  %v5019_v57 = vmul.f32 %v5013_v13, %v8218_v62 }
0x39a1   :  { %v5028_v10 = vmul.f32 %v5026_v8, %v8184_v18  ;;  %v5029_v14 = vmul.f32 %v5026_v8, %v8190_v22  ;;  %v5030_v9 = vmul.f32 %v5026_v8, %v8182_v17  ;;  %v5031_v19 = vmul.f32 %v5026_v8, %v8188_v21 }
0x39a3   :  { %7812 = vtanh.f32 %v5028_v10 }
0x39a4   :  { %7814 = vtanh.f32 %v5029_v14 }
0x39a5   :  { %7816 = vtanh.f32 %v5030_v9 }
0x39a6   :  { %7818 = vtanh.f32 %v5031_v19 }
0x39ad   :  { %v7813_v6 = vpop.eup %7812 }
0x39ae   :  { %v7815_v20 = vpop.eup %7814 }
0x39af   :  { %v7817_v24 = vpop.eup %7816  ;;  %v5036_v28 = vpack.c.bf16 %v7815_v20, %v7813_v6 }
0x39b0   :  { %v7819_v25 = vpop.eup %7818 }
0x39b1   :  { %6820 = vmatprep.subr.bf16.mxu0 %v5036_v28  ;;  %v5037_v29 = vpack.c.bf16 %v7819_v25, %v7817_v24 }
0x39b2   :  { %6821 = vmatpush3.bf16.msra.mxu0 %v5036_v28 }
0x39b3   :  { %6822 = vmatprep.subr.bf16.mxu0 %v5037_v29 }
0x39b6   :  { %6823 = vmatpush3.bf16.msra.mxu0 %v5037_v29 }
0x39b9   :  { %6825 = vmatmul.mubr.msk.bf16.vlgmr.msra.gmra.mrb[100].mxu0 %vm135_vm0, %v8200_v33 }
0x39ba   :  { %6840 = vmatprep.mubr.msk.bf16.mxu0 %vm135_vm0, %v8163_v11 }
0x3a11   :  { %v5017_v53 = vpop.permute.xlu1 %5016  ;;  %v5015_v55 = vpop.permute.xlu0 %5014 }
0x3a12   :  { %v5018_v51 = vadd.f32 %v5017_v53, %v5015_v55 }
0x3a14   :  { %v5020_v58 = vmul.f32 %v5018_v51, %v8220_v63 }
0x3a16   :  { %v5021_v61 = vadd.f32 %v5020_v58, %v5019_v57 }
0x3a8c   :  { %v6826_v60 = vpop.f32.mrb[100].mxu0 }
0x3a8d   :  { %v5072_v27 = vpop.f32.mrb[101].mxu0 }
0x3a8e   :  { %7820 = vtanh.f32 %v5072_v27  ;;  %v6827_v31 = vpop.f32.mrb[102].mxu0 }
0x3a8f   :  { %7822 = vtanh.f32 %v6826_v60  ;;  %v5075_v1 = vpop.f32.mrb[103].mxu0 }
0x3a90   :  { %7824 = vtanh.f32 %v5075_v1 }
0x3a91   :  { %7826 = vtanh.f32 %v6827_v31 }
0x3a98   :  { %v7821_v36 = vpop.eup %7820 }
0x3a99   :  { %v7823_v32 = vpop.eup %7822  ;;  %v5091_v30 = vmul.f32 %v7821_v36, %v8206_v38 }
0x3a9a   :  { %v7825_v35 = vpop.eup %7824  ;;  %v5093_v34 = vmul.f32 %v7823_v32, %v8212_v46 }
0x3a9b   :  { %v5092_v39 = vmul.f32 %v7825_v35, %v8208_v40  ;;  %v7827_v37 = vpop.eup %7826 }
0x3a9c   :  { %v5094_v43 = vmul.f32 %v7827_v37, %v8215_v49 }
0x3a9d   :  { %v5095_v41 = vadd.f32 %v5092_v39, %v5091_v30 }
0x3a9f   :  { %v5096_v48 = vadd.f32 %v5095_v41, %v5093_v34 }
0x3aa1   :  { %v5097_v44 = vadd.f32 %v5096_v48, %v5094_v43 }
0x3aa3   :  { %v5098_v50 = vrot.slane %v5097_v44, 4 }
0x3aa5   :  { %v5099_v12 = vadd.f32 %v5098_v50, %v5097_v44 }
0x3aa7   :  { %v5100_v47 = vrot.slane %v5099_v12, 2 }
0x3aa9   :  { %v5101_v52 = vadd.f32 %v5100_v47, %v5099_v12 }
0x3aab   :  { %v5102_v23 = vrot.slane %v5101_v52, 1 }
0x3aad   :  { %v5103_v56 = vadd.f32 %v5102_v23, %v5101_v52 }
0x3aaf   :  { %7828 = vtanh.f32 %v5103_v56 }
0x3ab9   :  { %v7829_v54 = vpop.eup %7828 }
0x3aba   :  { %v5105_v4 = vmul.f32 %v7829_v54, %v8227_v2 }
0x3abc   :  { %v5106_v5 = vadd.f32 %v5105_v4, %v5021_v61  ;;  %v5208_v4 = vstv %s6149_s14 }
0x3abe   :  { %v5108_v3 = vmul.f32 %v5107_v0, %v5106_v5  ;;  %v5205_v42 = vmul.f32 2.0, %v5106_v5 }
0x3ac0   :  { %v5109_v8 = vadd.f32 %v5108_v3, %v9283_v45  ;;  %v5206_v10 = vadd.f32 %v5205_v42, %v5204_v26 }
0x3ac2   :  { %5112 = vrot.lane.b32.xlu1 %v5109_v8, %s8071_s7  ;;  %v5122_v14 = vrot.slane %v5109_v8, %v8178_v15  ;;  %5110 = vrot.lane.b32.xlu0 %v5109_v8, %s8072_s18  ;;  %v5115_v58 = vmul.f32 %v5109_v8, %v8218_v62 }
0x3ac4   :  { %v5124_v7 = vmul.f32 %v5122_v14, %v8184_v18  ;;  %v5125_v13 = vmul.f32 %v5122_v14, %v8190_v22  ;;  %v5126_v9 = vmul.f32 %v5122_v14, %v8182_v17  ;;  %v5127_v19 = vmul.f32 %v5122_v14, %v8188_v21 }
0x3ac6   :  { %7830 = vtanh.f32 %v5124_v7 }
0x3ac7   :  { %7832 = vtanh.f32 %v5125_v13 }
0x3ac8   :  { %7834 = vtanh.f32 %v5126_v9 }
0x3ac9   :  { %7836 = vtanh.f32 %v5127_v19 }
0x3ad0   :  { %v7831_v16 = vpop.eup %7830 }
0x3ad1   :  { %v7833_v6 = vpop.eup %7832 }
0x3ad2   :  { %v7835_v20 = vpop.eup %7834  ;;  %v5132_v24 = vpack.c.bf16 %v7833_v6, %v7831_v16 }
0x3ad3   :  { %v7837_v28 = vpop.eup %7836 }
0x3ad4   :  { %6828 = vmatprep.subr.bf16.mxu1 %v5132_v24  ;;  %v5133_v25 = vpack.c.bf16 %v7837_v28, %v7835_v20 }
0x3ad5   :  { %6829 = vmatpush3.bf16.msra.mxu1 %v5132_v24 }
0x3ad6   :  { %6830 = vmatprep.subr.bf16.mxu1 %v5133_v25 }
0x3ad9   :  { %6831 = vmatpush3.bf16.msra.mxu1 %v5133_v25 }
0x3adc   :  { %6833 = vmatmul.mubr.msk.bf16.vlgmr.msra.gmra.mrb[100].mxu1 %vm135_vm0, %v8200_v33 }
0x3add   :  { %6848 = vmatprep.mubr.msk.bf16.mxu1 %vm135_vm0, %v8163_v11 }
0x3b34   :  { %v5113_v56 = vpop.permute.xlu1 %5112  ;;  %v5111_v53 = vpop.permute.xlu0 %5110 }
0x3b35   :  { %v5114_v55 = vadd.f32 %v5113_v56, %v5111_v53 }
0x3b37   :  { %v5116_v51 = vmul.f32 %v5114_v55, %v8220_v63 }
0x3b39   :  { %v5117_v54 = vadd.f32 %v5116_v51, %v5115_v58  ;;  %v5308_v51 = vstv %s9394_s15 }
0x3baf   :  { %v6834_v29 = vpop.f32.mrb[100].mxu1 }
0x3bb0   :  { %v5168_v60 = vpop.f32.mrb[101].mxu1 }
0x3bb1   :  { %7838 = vtanh.f32 %v5168_v60  ;;  %v6835_v27 = vpop.f32.mrb[102].mxu1 }
0x3bb2   :  { %7840 = vtanh.f32 %v6834_v29  ;;  %v5171_v31 = vpop.f32.mrb[103].mxu1 }
0x3bb3   :  { %7842 = vtanh.f32 %v5171_v31 }
0x3bb4   :  { %7844 = vtanh.f32 %v6835_v27 }
0x3bbb   :  { %v7839_v1 = vpop.eup %7838 }
0x3bbc   :  { %v7841_v36 = vpop.eup %7840  ;;  %v5187_v35 = vmul.f32 %v7839_v1, %v8206_v38 }
0x3bbd   :  { %v7843_v32 = vpop.eup %7842  ;;  %v5189_v37 = vmul.f32 %v7841_v36, %v8212_v46 }
0x3bbe   :  { %v5188_v30 = vmul.f32 %v7843_v32, %v8208_v40  ;;  %v7845_v39 = vpop.eup %7844 }
0x3bbf   :  { %v5190_v41 = vmul.f32 %v7845_v39, %v8215_v49 }
0x3bc0   :  { %v5191_v34 = vadd.f32 %v5188_v30, %v5187_v35 }
0x3bc2   :  { %v5192_v43 = vadd.f32 %v5191_v34, %v5189_v37 }
0x3bc4   :  { %v5193_v48 = vadd.f32 %v5192_v43, %v5190_v41 }
0x3bc6   :  { %v5194_v44 = vrot.slane %v5193_v48, 4 }
0x3bc8   :  { %v5195_v50 = vadd.f32 %v5194_v44, %v5193_v48 }
0x3bca   :  { %v5196_v12 = vrot.slane %v5195_v50, 2 }
0x3bcc   :  { %v5197_v47 = vadd.f32 %v5196_v12, %v5195_v50 }
0x3bce   :  { %v5198_v52 = vrot.slane %v5197_v47, 1 }
0x3bd0   :  { %v5199_v23 = vadd.f32 %v5198_v52, %v5197_v47 }
0x3bd2   :  { %7846 = vtanh.f32 %v5199_v23 }
0x3bdc   :  { %v7847_v57 = vpop.eup %7846 }
0x3bdd   :  { %v5201_v59 = vmul.f32 %v7847_v57, %v8227_v2 }
0x3bdf   :  { %v5202_v61 = vadd.f32 %v5201_v59, %v5117_v54 }
0x3be1   :  { %v5207_v0 = vadd.f32 %v5206_v10, %v5202_v61 }
0x3be3   :  { %v5209_v5 = vmul.f32 %v5208_v4, %v5207_v0 }
0x3be5   :  { %v9373_v26 = vadd.f32 %v5209_v5, %v9283_v45 }
0x3be7   :  { %5217 = vrot.lane.b32.xlu1 %v9373_v26, %s8071_s7  ;;  %5211 = vst [vmem:[#allocation7 + $0xd] sm:$0x1] %v9373_v26  ;;  %5215 = vrot.lane.b32.xlu0 %v9373_v26, %s8072_s18  ;;  %v5227_v3 = vrot.slane %v9373_v26, %v8178_v15  ;;  %v5220_v23 = vmul.f32 %v9373_v26, %v8218_v62 }
0x3be9   :  { %v5229_v42 = vmul.f32 %v5227_v3, %v8184_v18  ;;  %v5230_v8 = vmul.f32 %v5227_v3, %v8190_v22  ;;  %v5231_v10 = vmul.f32 %v5227_v3, %v8182_v17  ;;  %v5232_v45 = vmul.f32 %v5227_v3, %v8188_v21 }
0x3beb   :  { %7848 = vtanh.f32 %v5229_v42 }
0x3bec   :  { %7850 = vtanh.f32 %v5230_v8 }
0x3bed   :  { %7852 = vtanh.f32 %v5231_v10 }
0x3bee   :  { %7854 = vtanh.f32 %v5232_v45 }
0x3bf5   :  { %v7849_v14 = vpop.eup %7848 }
0x3bf6   :  { %v7851_v7 = vpop.eup %7850 }
0x3bf7   :  { %v7853_v13 = vpop.eup %7852  ;;  %v5237_v9 = vpack.c.bf16 %v7851_v7, %v7849_v14 }
0x3bf8   :  { %v7855_v19 = vpop.eup %7854 }
0x3bf9   :  { %6836 = vmatprep.subr.bf16.mxu0 %v5237_v9  ;;  %v5238_v16 = vpack.c.bf16 %v7855_v19, %v7853_v13 }
0x3bfa   :  { %6837 = vmatpush3.bf16.msra.mxu0 %v5237_v9 }
0x3bfb   :  { %6838 = vmatprep.subr.bf16.mxu0 %v5238_v16 }
0x3bfe   :  { %6839 = vmatpush3.bf16.msra.mxu0 %v5238_v16 }
0x3c01   :  { %6841 = vmatmul.mubr.msk.bf16.vlgmr.msra.gmra.mrb[104].mxu0 %vm135_vm0, %v8200_v33 }
0x3c02   :  { %6856 = vmatprep.mubr.msk.bf16.mxu0 %vm135_vm0, %v8163_v11 }
0x3c59   :  { %v5218_v50 = vpop.permute.xlu1 %5217  ;;  %v5216_v12 = vpop.permute.xlu0 %5215 }
0x3c5a   :  { %v5219_v47 = vadd.f32 %v5218_v50, %v5216_v12 }
0x3c5c   :  { %v5221_v52 = vmul.f32 %v5219_v47, %v8220_v63 }
0x3c5e   :  { %v5222_v53 = vadd.f32 %v5221_v52, %v5220_v23 }
0x3cd4   :  { %v6842_v6 = vpop.f32.mrb[104].mxu0 }
0x3cd5   :  { %v5273_v20 = vpop.f32.mrb[105].mxu0 }
0x3cd6   :  { %7856 = vtanh.f32 %v5273_v20  ;;  %v6843_v24 = vpop.f32.mrb[106].mxu0 }
0x3cd7   :  { %7858 = vtanh.f32 %v6842_v6  ;;  %v5276_v28 = vpop.f32.mrb[107].mxu0 }
0x3cd8   :  { %7860 = vtanh.f32 %v5276_v28 }
0x3cd9   :  { %7862 = vtanh.f32 %v6843_v24 }
0x3ce0   :  { %v7857_v25 = vpop.eup %7856 }
0x3ce1   :  { %v7859_v29 = vpop.eup %7858  ;;  %v5292_v27 = vmul.f32 %v7857_v25, %v8206_v38 }
0x3ce2   :  { %v7861_v60 = vpop.eup %7860  ;;  %v5294_v36 = vmul.f32 %v7859_v29, %v8212_v46 }
0x3ce3   :  { %v5293_v31 = vmul.f32 %v7861_v60, %v8208_v40  ;;  %v7863_v1 = vpop.eup %7862 }
0x3ce4   :  { %v5295_v35 = vmul.f32 %v7863_v1, %v8215_v49 }
0x3ce5   :  { %v5296_v32 = vadd.f32 %v5293_v31, %v5292_v27 }
0x3ce7   :  { %v5297_v30 = vadd.f32 %v5296_v32, %v5294_v36 }
0x3ce9   :  { %v5298_v39 = vadd.f32 %v5297_v30, %v5295_v35 }
0x3ceb   :  { %v5299_v37 = vrot.slane %v5298_v39, 4 }
0x3ced   :  { %v5300_v34 = vadd.f32 %v5299_v37, %v5298_v39 }
0x3cef   :  { %v5301_v41 = vrot.slane %v5300_v34, 2 }
0x3cf1   :  { %v5302_v43 = vadd.f32 %v5301_v41, %v5300_v34 }
0x3cf3   :  { %v5303_v48 = vrot.slane %v5302_v43, 1 }
0x3cf5   :  { %v5304_v44 = vadd.f32 %v5303_v48, %v5302_v43 }
0x3cf7   :  { %7864 = vtanh.f32 %v5304_v44 }
0x3d01   :  { %v7865_v56 = vpop.eup %7864 }
0x3d02   :  { %v5306_v55 = vmul.f32 %v7865_v56, %v8227_v2 }
0x3d04   :  { %v9401_v58 = vadd.f32 %v5306_v55, %v5222_v53 }
0x3d06   :  { %v5309_v57 = vmul.f32 %v5308_v51, %v9401_v58 }
0x3d08   :  { %v5310_v54 = vadd.f32 %v5309_v57, %v9373_v26 }
0x3d0a   :  { %5313 = vrot.lane.b32.xlu1 %v5310_v54, %s8071_s7  ;;  %v5323_v59 = vrot.slane %v5310_v54, %v8178_v15  ;;  %5311 = vrot.lane.b32.xlu0 %v5310_v54, %s8072_s18  ;;  %v5316_v44 = vmul.f32 %v5310_v54, %v8218_v62 }
0x3d0c   :  { %v5325_v61 = vmul.f32 %v5323_v59, %v8184_v18  ;;  %v5326_v4 = vmul.f32 %v5323_v59, %v8190_v22  ;;  %v5327_v0 = vmul.f32 %v5323_v59, %v8182_v17  ;;  %v5328_v5 = vmul.f32 %v5323_v59, %v8188_v21 }
0x3d0e   :  { %7866 = vtanh.f32 %v5325_v61 }
0x3d0f   :  { %7868 = vtanh.f32 %v5326_v4 }
0x3d10   :  { %7870 = vtanh.f32 %v5327_v0 }
0x3d11   :  { %7872 = vtanh.f32 %v5328_v5 }
0x3d18   :  { %v7867_v3 = vpop.eup %7866 }
0x3d19   :  { %v7869_v42 = vpop.eup %7868 }
0x3d1a   :  { %v7871_v8 = vpop.eup %7870  ;;  %v5333_v10 = vpack.c.bf16 %v7869_v42, %v7867_v3 }
0x3d1b   :  { %v7873_v45 = vpop.eup %7872 }
0x3d1c   :  { %6844 = vmatprep.subr.bf16.mxu1 %v5333_v10  ;;  %v5334_v14 = vpack.c.bf16 %v7873_v45, %v7871_v8 }
0x3d1d   :  { %6845 = vmatpush3.bf16.msra.mxu1 %v5333_v10 }
0x3d1e   :  { %6846 = vmatprep.subr.bf16.mxu1 %v5334_v14 }
0x3d21   :  { %6847 = vmatpush3.bf16.msra.mxu1 %v5334_v14 }
0x3d24   :  { %6849 = vmatmul.mubr.msk.bf16.vlgmr.msra.gmra.mrb[104].mxu1 %vm135_vm0, %v8200_v33 }
0x3d25   :  { %6864 = vmatprep.mubr.msk.bf16.mxu1 %vm135_vm0, %v8163_v11 }
0x3d7c   :  { %v5314_v34 = vpop.permute.xlu1 %5313  ;;  %v5312_v41 = vpop.permute.xlu0 %5311 }
0x3d7d   :  { %v5315_v43 = vadd.f32 %v5314_v34, %v5312_v41 }
0x3d7f   :  { %v5317_v48 = vmul.f32 %v5315_v43, %v8220_v63 }
0x3d81   :  { %v5318_v12 = vadd.f32 %v5317_v48, %v5316_v44  ;;  %v5499_v44 = vstv %s6158_s16 }
0x3df7   :  { %v6850_v7 = vpop.f32.mrb[104].mxu1 }
0x3df8   :  { %v5369_v13 = vpop.f32.mrb[105].mxu1 }
0x3df9   :  { %7874 = vtanh.f32 %v5369_v13  ;;  %v6851_v9 = vpop.f32.mrb[106].mxu1 }
0x3dfa   :  { %7876 = vtanh.f32 %v6850_v7  ;;  %v5372_v19 = vpop.f32.mrb[107].mxu1 }
0x3dfb   :  { %7878 = vtanh.f32 %v5372_v19 }
0x3dfc   :  { %7880 = vtanh.f32 %v6851_v9 }
0x3e03   :  { %v7875_v16 = vpop.eup %7874 }
0x3e04   :  { %v7877_v6 = vpop.eup %7876  ;;  %v5388_v24 = vmul.f32 %v7875_v16, %v8206_v38 }
0x3e05   :  { %v7879_v20 = vpop.eup %7878  ;;  %v5390_v29 = vmul.f32 %v7877_v6, %v8212_v46 }
0x3e06   :  { %v5389_v28 = vmul.f32 %v7879_v20, %v8208_v40  ;;  %v7881_v25 = vpop.eup %7880 }
0x3e07   :  { %v5391_v27 = vmul.f32 %v7881_v25, %v8215_v49 }
0x3e08   :  { %v5392_v60 = vadd.f32 %v5389_v28, %v5388_v24 }
0x3e0a   :  { %v5393_v31 = vadd.f32 %v5392_v60, %v5390_v29 }
0x3e0c   :  { %v5394_v1 = vadd.f32 %v5393_v31, %v5391_v27 }
0x3e0e   :  { %v5395_v36 = vrot.slane %v5394_v1, 4 }
0x3e10   :  { %v5396_v32 = vadd.f32 %v5395_v36, %v5394_v1 }
0x3e12   :  { %v5397_v35 = vrot.slane %v5396_v32, 2 }
0x3e14   :  { %v5398_v30 = vadd.f32 %v5397_v35, %v5396_v32 }
0x3e16   :  { %v5399_v39 = vrot.slane %v5398_v30, 1 }
0x3e18   :  { %v5400_v37 = vadd.f32 %v5399_v39, %v5398_v30 }
0x3e1a   :  { %7882 = vtanh.f32 %v5400_v37 }
0x3e24   :  { %v7883_v50 = vpop.eup %7882 }
0x3e25   :  { %v5402_v47 = vmul.f32 %v7883_v50, %v8227_v2 }
0x3e27   :  { %v5403_v52 = vadd.f32 %v5402_v47, %v5318_v12 }
0x3e29   :  { %v5404_v23 = vmul.f32 %v5403_v52, %v5308_v51  ;;  %v5595_v41 = vmul.f32 2.0, %v5403_v52 }
0x3e2b   :  { %v5405_v56 = vadd.f32 %v5404_v23, %v9373_v26  ;;  %v5596_v12 = vadd.f32 %v5595_v41, %v9401_v58 }
0x3e2d   :  { %5408 = vrot.lane.b32.xlu1 %v5405_v56, %s8071_s7  ;;  %v5418_v53 = vrot.slane %v5405_v56, %v8178_v15  ;;  %5406 = vrot.lane.b32.xlu0 %v5405_v56, %s8072_s18  ;;  %v5411_v37 = vmul.f32 %v5405_v56, %v8218_v62 }
0x3e2f   :  { %v5420_v55 = vmul.f32 %v5418_v53, %v8184_v18  ;;  %v5421_v57 = vmul.f32 %v5418_v53, %v8190_v22  ;;  %v5422_v54 = vmul.f32 %v5418_v53, %v8182_v17  ;;  %v5423_v59 = vmul.f32 %v5418_v53, %v8188_v21 }
0x3e31   :  { %7884 = vtanh.f32 %v5420_v55 }
0x3e32   :  { %7886 = vtanh.f32 %v5421_v57 }
0x3e33   :  { %7888 = vtanh.f32 %v5422_v54 }
0x3e34   :  { %7890 = vtanh.f32 %v5423_v59 }
0x3e3b   :  { %v7885_v51 = vpop.eup %7884 }
0x3e3c   :  { %v7887_v61 = vpop.eup %7886 }
0x3e3d   :  { %v7889_v4 = vpop.eup %7888  ;;  %v5428_v0 = vpack.c.bf16 %v7887_v61, %v7885_v51 }
0x3e3e   :  { %v7891_v5 = vpop.eup %7890 }
0x3e3f   :  { %6852 = vmatprep.subr.bf16.mxu0 %v5428_v0  ;;  %v5429_v3 = vpack.c.bf16 %v7891_v5, %v7889_v4 }
0x3e40   :  { %6853 = vmatpush3.bf16.msra.mxu0 %v5428_v0 }
0x3e41   :  { %6854 = vmatprep.subr.bf16.mxu0 %v5429_v3 }
0x3e44   :  { %6855 = vmatpush3.bf16.msra.mxu0 %v5429_v3 }
0x3e47   :  { %6857 = vmatmul.mubr.msk.bf16.vlgmr.msra.gmra.mrb[108].mxu0 %vm135_vm0, %v8200_v33 }
0x3e48   :  { %6872 = vmatprep.mubr.msk.bf16.mxu0 %vm135_vm0, %v8163_v11 }
0x3e9f   :  { %v5409_v32 = vpop.permute.xlu1 %5408  ;;  %v5407_v35 = vpop.permute.xlu0 %5406 }
0x3ea0   :  { %v5410_v30 = vadd.f32 %v5409_v32, %v5407_v35 }
0x3ea2   :  { %v5412_v39 = vmul.f32 %v5410_v30, %v8220_v63 }
0x3ea4   :  { %v5413_v43 = vadd.f32 %v5412_v39, %v5411_v37 }
0x3f1a   :  { %v6858_v42 = vpop.f32.mrb[108].mxu0 }
0x3f1b   :  { %v5464_v8 = vpop.f32.mrb[109].mxu0 }
0x3f1c   :  { %7892 = vtanh.f32 %v5464_v8  ;;  %v6859_v10 = vpop.f32.mrb[110].mxu0 }
0x3f1d   :  { %7894 = vtanh.f32 %v6858_v42  ;;  %v5467_v45 = vpop.f32.mrb[111].mxu0 }
0x3f1e   :  { %7896 = vtanh.f32 %v5467_v45 }
0x3f1f   :  { %7898 = vtanh.f32 %v6859_v10 }
0x3f26   :  { %v7893_v14 = vpop.eup %7892 }
0x3f27   :  { %v7895_v7 = vpop.eup %7894  ;;  %v5483_v9 = vmul.f32 %v7893_v14, %v8206_v38 }
0x3f28   :  { %v7897_v13 = vpop.eup %7896  ;;  %v5485_v6 = vmul.f32 %v7895_v7, %v8212_v46 }
0x3f29   :  { %v5484_v19 = vmul.f32 %v7897_v13, %v8208_v40  ;;  %v7899_v16 = vpop.eup %7898 }
0x3f2a   :  { %v5486_v24 = vmul.f32 %v7899_v16, %v8215_v49 }
0x3f2b   :  { %v5487_v20 = vadd.f32 %v5484_v19, %v5483_v9 }
0x3f2d   :  { %v5488_v28 = vadd.f32 %v5487_v20, %v5485_v6 }
0x3f2f   :  { %v5489_v25 = vadd.f32 %v5488_v28, %v5486_v24 }
0x3f31   :  { %v5490_v29 = vrot.slane %v5489_v25, 4 }
0x3f33   :  { %v5491_v60 = vadd.f32 %v5490_v29, %v5489_v25 }
0x3f35   :  { %v5492_v27 = vrot.slane %v5491_v60, 2 }
0x3f37   :  { %v5493_v31 = vadd.f32 %v5492_v27, %v5491_v60 }
0x3f39   :  { %v5494_v1 = vrot.slane %v5493_v31, 1 }
0x3f3b   :  { %v5495_v36 = vadd.f32 %v5494_v1, %v5493_v31 }
0x3f3d   :  { %7900 = vtanh.f32 %v5495_v36 }
0x3f47   :  { %v7901_v34 = vpop.eup %7900 }
0x3f48   :  { %v5497_v48 = vmul.f32 %v7901_v34, %v8227_v2 }
0x3f4a   :  { %v5498_v50 = vadd.f32 %v5497_v48, %v5413_v43  ;;  %v5600_v48 = vstv %s6160_s17 }
0x3f4c   :  { %v5500_v47 = vmul.f32 %v5499_v44, %v5498_v50  ;;  %v5597_v23 = vmul.f32 2.0, %v5498_v50 }
0x3f4e   :  { %v5501_v53 = vadd.f32 %v5500_v47, %v9373_v26  ;;  %v5598_v55 = vadd.f32 %v5597_v23, %v5596_v12 }
0x3f50   :  { %5504 = vrot.lane.b32.xlu1 %v5501_v53, %s8071_s7  ;;  %v5514_v57 = vrot.slane %v5501_v53, %v8178_v15  ;;  %5502 = vrot.lane.b32.xlu0 %v5501_v53, %s8072_s18  ;;  %v5507_v39 = vmul.f32 %v5501_v53, %v8218_v62 }
0x3f52   :  { %v5516_v52 = vmul.f32 %v5514_v57, %v8184_v18  ;;  %v5517_v56 = vmul.f32 %v5514_v57, %v8190_v22  ;;  %v5518_v54 = vmul.f32 %v5514_v57, %v8182_v17  ;;  %v5519_v59 = vmul.f32 %v5514_v57, %v8188_v21 }
0x3f54   :  { %7902 = vtanh.f32 %v5516_v52 }
0x3f55   :  { %7904 = vtanh.f32 %v5517_v56 }
0x3f56   :  { %7906 = vtanh.f32 %v5518_v54 }
0x3f57   :  { %7908 = vtanh.f32 %v5519_v59 }
0x3f5e   :  { %v7903_v58 = vpop.eup %7902 }
0x3f5f   :  { %v7905_v51 = vpop.eup %7904 }
0x3f60   :  { %v7907_v61 = vpop.eup %7906  ;;  %v5524_v4 = vpack.c.bf16 %v7905_v51, %v7903_v58 }
0x3f61   :  { %v7909_v0 = vpop.eup %7908 }
0x3f62   :  { %6860 = vmatprep.subr.bf16.mxu1 %v5524_v4  ;;  %v5525_v5 = vpack.c.bf16 %v7909_v0, %v7907_v61 }
0x3f63   :  { %6861 = vmatpush3.bf16.msra.mxu1 %v5524_v4 }
0x3f64   :  { %6862 = vmatprep.subr.bf16.mxu1 %v5525_v5 }
0x3f67   :  { %6863 = vmatpush3.bf16.msra.mxu1 %v5525_v5 }
0x3f6a   :  { %6865 = vmatmul.mubr.msk.bf16.vlgmr.msra.gmra.mrb[108].mxu1 %vm135_vm0, %v8200_v33 }
0x3f6b   :  { %6880 = vmatprep.mubr.msk.bf16.mxu1 %vm135_vm0, %v8163_v11 }
0x3fc2   :  { %v5505_v36 = vpop.permute.xlu1 %5504  ;;  %v5503_v32 = vpop.permute.xlu0 %5502 }
0x3fc3   :  { %v5506_v35 = vadd.f32 %v5505_v36, %v5503_v32 }
0x3fc5   :  { %v5508_v30 = vmul.f32 %v5506_v35, %v8220_v63 }
0x3fc7   :  { %v5509_v34 = vadd.f32 %v5508_v30, %v5507_v39  ;;  %v5700_v30 = vstv %s9484_s19 }
0x403d   :  { %v6866_v3 = vpop.f32.mrb[108].mxu1 }
0x403e   :  { %v5560_v42 = vpop.f32.mrb[109].mxu1 }
0x403f   :  { %7910 = vtanh.f32 %v5560_v42  ;;  %v6867_v8 = vpop.f32.mrb[110].mxu1 }
0x4040   :  { %7912 = vtanh.f32 %v6866_v3  ;;  %v5563_v10 = vpop.f32.mrb[111].mxu1 }
0x4041   :  { %7914 = vtanh.f32 %v5563_v10 }
0x4042   :  { %7916 = vtanh.f32 %v6867_v8 }
0x4049   :  { %v7911_v45 = vpop.eup %7910 }
0x404a   :  { %v7913_v14 = vpop.eup %7912  ;;  %v5579_v13 = vmul.f32 %v7911_v45, %v8206_v38 }
0x404b   :  { %v7915_v7 = vpop.eup %7914  ;;  %v5581_v16 = vmul.f32 %v7913_v14, %v8212_v46 }
0x404c   :  { %v5580_v9 = vmul.f32 %v7915_v7, %v8208_v40  ;;  %v7917_v19 = vpop.eup %7916 }
0x404d   :  { %v5582_v20 = vmul.f32 %v7917_v19, %v8215_v49 }
0x404e   :  { %v5583_v6 = vadd.f32 %v5580_v9, %v5579_v13 }
0x4050   :  { %v5584_v24 = vadd.f32 %v5583_v6, %v5581_v16 }
0x4052   :  { %v5585_v28 = vadd.f32 %v5584_v24, %v5582_v20 }
0x4054   :  { %v5586_v25 = vrot.slane %v5585_v28, 4 }
0x4056   :  { %v5587_v29 = vadd.f32 %v5586_v25, %v5585_v28 }
0x4058   :  { %v5588_v60 = vrot.slane %v5587_v29, 2 }
0x405a   :  { %v5589_v27 = vadd.f32 %v5588_v60, %v5587_v29 }
0x405c   :  { %v5590_v31 = vrot.slane %v5589_v27, 1 }
0x405e   :  { %v5591_v1 = vadd.f32 %v5590_v31, %v5589_v27 }
0x4060   :  { %7918 = vtanh.f32 %v5591_v1 }
0x406a   :  { %v7919_v37 = vpop.eup %7918 }
0x406b   :  { %v5593_v41 = vmul.f32 %v7919_v37, %v8227_v2 }
0x406d   :  { %v5594_v43 = vadd.f32 %v5593_v41, %v5509_v34 }
0x406f   :  { %v5599_v44 = vadd.f32 %v5598_v55, %v5594_v43 }
0x4071   :  { %v5601_v50 = vmul.f32 %v5600_v48, %v5599_v44 }
0x4073   :  { %v9463_v12 = vadd.f32 %v5601_v50, %v9373_v26 }
0x4075   :  { %5609 = vrot.lane.b32.xlu1 %v9463_v12, %s8071_s7  ;;  %5603 = vst [vmem:[#allocation7 + $0xe] sm:$0x1] %v9463_v12  ;;  %5607 = vrot.lane.b32.xlu0 %v9463_v12, %s8072_s18  ;;  %v5619_v47 = vrot.slane %v9463_v12, %v8178_v15  ;;  %v5612_v1 = vmul.f32 %v9463_v12, %v8218_v62 }
0x4077   :  { %v5621_v23 = vmul.f32 %v5619_v47, %v8184_v18  ;;  %v5622_v53 = vmul.f32 %v5619_v47, %v8190_v22  ;;  %v5623_v55 = vmul.f32 %v5619_v47, %v8182_v17  ;;  %v5624_v26 = vmul.f32 %v5619_v47, %v8188_v21 }
0x4079   :  { %7920 = vtanh.f32 %v5621_v23 }
0x407a   :  { %7922 = vtanh.f32 %v5622_v53 }
0x407b   :  { %7924 = vtanh.f32 %v5623_v55 }
0x407c   :  { %7926 = vtanh.f32 %v5624_v26 }
0x4083   :  { %v7921_v57 = vpop.eup %7920 }
0x4084   :  { %v7923_v52 = vpop.eup %7922 }
0x4085   :  { %v7925_v56 = vpop.eup %7924  ;;  %v5629_v54 = vpack.c.bf16 %v7923_v52, %v7921_v57 }
0x4086   :  { %v7927_v59 = vpop.eup %7926 }
0x4087   :  { %6868 = vmatprep.subr.bf16.mxu0 %v5629_v54  ;;  %v5630_v58 = vpack.c.bf16 %v7927_v59, %v7925_v56 }
0x4088   :  { %6869 = vmatpush3.bf16.msra.mxu0 %v5629_v54 }
0x4089   :  { %6870 = vmatprep.subr.bf16.mxu0 %v5630_v58 }
0x408c   :  { %6871 = vmatpush3.bf16.msra.mxu0 %v5630_v58 }
0x408f   :  { %6873 = vmatmul.mubr.msk.bf16.vlgmr.msra.gmra.mrb[112].mxu0 %vm135_vm0, %v8200_v33 }
0x4090   :  { %6888 = vmatprep.mubr.msk.bf16.mxu0 %vm135_vm0, %v8163_v11 }
0x40e7   :  { %v5610_v29 = vpop.permute.xlu1 %5609  ;;  %v5608_v60 = vpop.permute.xlu0 %5607 }
0x40e8   :  { %v5611_v27 = vadd.f32 %v5610_v29, %v5608_v60 }
0x40ea   :  { %v5613_v31 = vmul.f32 %v5611_v27, %v8220_v63 }
0x40ec   :  { %v5614_v32 = vadd.f32 %v5613_v31, %v5612_v1 }
0x4162   :  { %v6874_v51 = vpop.f32.mrb[112].mxu0 }
0x4163   :  { %v5665_v61 = vpop.f32.mrb[113].mxu0 }
0x4164   :  { %7928 = vtanh.f32 %v5665_v61  ;;  %v6875_v4 = vpop.f32.mrb[114].mxu0 }
0x4165   :  { %7930 = vtanh.f32 %v6874_v51  ;;  %v5668_v0 = vpop.f32.mrb[115].mxu0 }
0x4166   :  { %7932 = vtanh.f32 %v5668_v0 }
0x4167   :  { %7934 = vtanh.f32 %v6875_v4 }
0x416e   :  { %v7929_v5 = vpop.eup %7928 }
0x416f   :  { %v7931_v3 = vpop.eup %7930  ;;  %v5684_v8 = vmul.f32 %v7929_v5, %v8206_v38 }
0x4170   :  { %v7933_v42 = vpop.eup %7932  ;;  %v5686_v14 = vmul.f32 %v7931_v3, %v8212_v46 }
0x4171   :  { %v5685_v10 = vmul.f32 %v7933_v42, %v8208_v40  ;;  %v7935_v45 = vpop.eup %7934 }
0x4172   :  { %v5687_v13 = vmul.f32 %v7935_v45, %v8215_v49 }
0x4173   :  { %v5688_v7 = vadd.f32 %v5685_v10, %v5684_v8 }
0x4175   :  { %v5689_v9 = vadd.f32 %v5688_v7, %v5686_v14 }
0x4177   :  { %v5690_v19 = vadd.f32 %v5689_v9, %v5687_v13 }
0x4179   :  { %v5691_v16 = vrot.slane %v5690_v19, 4 }
0x417b   :  { %v5692_v6 = vadd.f32 %v5691_v16, %v5690_v19 }
0x417d   :  { %v5693_v20 = vrot.slane %v5692_v6, 2 }
0x417f   :  { %v5694_v24 = vadd.f32 %v5693_v20, %v5692_v6 }
0x4181   :  { %v5695_v28 = vrot.slane %v5694_v24, 1 }
0x4183   :  { %v5696_v25 = vadd.f32 %v5695_v28, %v5694_v24 }
0x4185   :  { %7936 = vtanh.f32 %v5696_v25 }
0x418f   :  { %v7937_v36 = vpop.eup %7936 }
0x4190   :  { %v5698_v35 = vmul.f32 %v7937_v36, %v8227_v2 }
0x4192   :  { %v9491_v39 = vadd.f32 %v5698_v35, %v5614_v32 }
0x4194   :  { %v5701_v37 = vmul.f32 %v5700_v30, %v9491_v39 }
0x4196   :  { %v5702_v34 = vadd.f32 %v5701_v37, %v9463_v12 }
0x4198   :  { %5705 = vrot.lane.b32.xlu1 %v5702_v34, %s8071_s7  ;;  %v5715_v41 = vrot.slane %v5702_v34, %v8178_v15  ;;  %5703 = vrot.lane.b32.xlu0 %v5702_v34, %s8072_s18  ;;  %v5708_v28 = vmul.f32 %v5702_v34, %v8218_v62 }
0x419a   :  { %v5717_v43 = vmul.f32 %v5715_v41, %v8184_v18  ;;  %v5718_v48 = vmul.f32 %v5715_v41, %v8190_v22  ;;  %v5719_v44 = vmul.f32 %v5715_v41, %v8182_v17  ;;  %v5720_v50 = vmul.f32 %v5715_v41, %v8188_v21 }
0x419c   :  { %7938 = vtanh.f32 %v5717_v43 }
0x419d   :  { %7940 = vtanh.f32 %v5718_v48 }
0x419e   :  { %7942 = vtanh.f32 %v5719_v44 }
0x419f   :  { %7944 = vtanh.f32 %v5720_v50 }
0x41a6   :  { %v7939_v47 = vpop.eup %7938 }
0x41a7   :  { %v7941_v23 = vpop.eup %7940 }
0x41a8   :  { %v7943_v53 = vpop.eup %7942  ;;  %v5725_v55 = vpack.c.bf16 %v7941_v23, %v7939_v47 }
0x41a9   :  { %v7945_v26 = vpop.eup %7944 }
0x41aa   :  { %6876 = vmatprep.subr.bf16.mxu1 %v5725_v55  ;;  %v5726_v57 = vpack.c.bf16 %v7945_v26, %v7943_v53 }
0x41ab   :  { %6877 = vmatpush3.bf16.msra.mxu1 %v5725_v55 }
0x41ac   :  { %6878 = vmatprep.subr.bf16.mxu1 %v5726_v57 }
0x41af   :  { %6879 = vmatpush3.bf16.msra.mxu1 %v5726_v57 }
0x41b2   :  { %6881 = vmatmul.mubr.msk.bf16.vlgmr.msra.gmra.mrb[112].mxu1 %vm135_vm0, %v8200_v33 }
0x41b3   :  { %6896 = vmatprep.mubr.msk.bf16.mxu1 %vm135_vm0, %v8163_v11 }
0x420a   :  { %v5706_v16 = vpop.permute.xlu1 %5705  ;;  %v5704_v6 = vpop.permute.xlu0 %5703 }
0x420b   :  { %v5707_v20 = vadd.f32 %v5706_v16, %v5704_v6 }
0x420d   :  { %v5709_v24 = vmul.f32 %v5707_v20, %v8220_v63 }
0x420f   :  { %v5710_v29 = vadd.f32 %v5709_v24, %v5708_v28  ;;  %v5891_v24 = vstv %s6169_s20 }
0x4285   :  { %v6882_v52 = vpop.f32.mrb[112].mxu1 }
0x4286   :  { %v5761_v56 = vpop.f32.mrb[113].mxu1 }
0x4287   :  { %7946 = vtanh.f32 %v5761_v56  ;;  %v6883_v54 = vpop.f32.mrb[114].mxu1 }
0x4288   :  { %7948 = vtanh.f32 %v6882_v52  ;;  %v5764_v59 = vpop.f32.mrb[115].mxu1 }
0x4289   :  { %7950 = vtanh.f32 %v5764_v59 }
0x428a   :  { %7952 = vtanh.f32 %v6883_v54 }
0x4291   :  { %v7947_v58 = vpop.eup %7946 }
0x4292   :  { %v7949_v51 = vpop.eup %7948  ;;  %v5780_v4 = vmul.f32 %v7947_v58, %v8206_v38 }
0x4293   :  { %v7951_v61 = vpop.eup %7950  ;;  %v5782_v3 = vmul.f32 %v7949_v51, %v8212_v46 }
0x4294   :  { %v5781_v0 = vmul.f32 %v7951_v61, %v8208_v40  ;;  %v7953_v5 = vpop.eup %7952 }
0x4295   :  { %v5783_v11 = vmul.f32 %v7953_v5, %v8215_v49 }
0x4296   :  { %v5784_v42 = vadd.f32 %v5781_v0, %v5780_v4 }
0x4298   :  { %v5785_v8 = vadd.f32 %v5784_v42, %v5782_v3 }
0x429a   :  { %v5786_v10 = vadd.f32 %v5785_v8, %v5783_v11 }
0x429c   :  { %v5787_v45 = vrot.slane %v5786_v10, 4 }
0x429e   :  { %v5788_v14 = vadd.f32 %v5787_v45, %v5786_v10 }
0x42a0   :  { %v5789_v7 = vrot.slane %v5788_v14, 2 }
0x42a2   :  { %v5790_v13 = vadd.f32 %v5789_v7, %v5788_v14 }
0x42a4   :  { %v5791_v9 = vrot.slane %v5790_v13, 1 }
0x42a6   :  { %v5792_v19 = vadd.f32 %v5791_v9, %v5790_v13 }
0x42a8   :  { %7954 = vtanh.f32 %v5792_v19 }
0x42b2   :  { %v7955_v25 = vpop.eup %7954 }
0x42b3   :  { %v5794_v60 = vmul.f32 %v7955_v25, %v8227_v2 }
0x42b5   :  { %v5795_v27 = vadd.f32 %v5794_v60, %v5710_v29 }
0x42b7   :  { %v5796_v31 = vmul.f32 %v5795_v27, %v5700_v30  ;;  %v5987_v16 = vmul.f32 2.0, %v5795_v27 }
0x42b9   :  { %v5797_v1 = vadd.f32 %v5796_v31, %v9463_v12  ;;  %v5988_v25 = vadd.f32 %v5987_v16, %v9491_v39 }
0x42bb   :  { %5800 = vrot.lane.b32.xlu1 %v5797_v1, %s8071_s7  ;;  %v5810_v36 = vrot.slane %v5797_v1, %v8178_v15  ;;  %5798 = vrot.lane.b32.xlu0 %v5797_v1, %s8072_s18  ;;  %v5803_v9 = vmul.f32 %v5797_v1, %v8218_v62 }
0x42bd   :  { %v5812_v32 = vmul.f32 %v5810_v36, %v8184_v18  ;;  %v5813_v35 = vmul.f32 %v5810_v36, %v8190_v22  ;;  %v5814_v37 = vmul.f32 %v5810_v36, %v8182_v17  ;;  %v5815_v34 = vmul.f32 %v5810_v36, %v8188_v21 }
0x42bf   :  { %7956 = vtanh.f32 %v5812_v32 }
0x42c0   :  { %7958 = vtanh.f32 %v5813_v35 }
0x42c1   :  { %7960 = vtanh.f32 %v5814_v37 }
0x42c2   :  { %7962 = vtanh.f32 %v5815_v34 }
0x42c9   :  { %v7957_v30 = vpop.eup %7956 }
0x42ca   :  { %v7959_v41 = vpop.eup %7958 }
0x42cb   :  { %v7961_v43 = vpop.eup %7960  ;;  %v5820_v48 = vpack.c.bf16 %v7959_v41, %v7957_v30 }
0x42cc   :  { %v7963_v44 = vpop.eup %7962 }
0x42cd   :  { %6884 = vmatprep.subr.bf16.mxu0 %v5820_v48  ;;  %v5821_v50 = vpack.c.bf16 %v7963_v44, %v7961_v43 }
0x42ce   :  { %6885 = vmatpush3.bf16.msra.mxu0 %v5820_v48 }
0x42cf   :  { %6886 = vmatprep.subr.bf16.mxu0 %v5821_v50 }
0x42d2   :  { %6887 = vmatpush3.bf16.msra.mxu0 %v5821_v50 }
0x42d5   :  { %6889 = vmatmul.mubr.msk.bf16.vlgmr.msra.gmra.mrb[116].mxu0 %vm135_vm0, %v8200_v33 }
0x432d   :  { %v5801_v45 = vpop.permute.xlu1 %5800  ;;  %v5799_v14 = vpop.permute.xlu0 %5798 }
0x432e   :  { %v5802_v7 = vadd.f32 %v5801_v45, %v5799_v14 }
0x4330   :  { %v5804_v13 = vmul.f32 %v5802_v7, %v8220_v63 }
0x4332   :  { %v5805_v6 = vadd.f32 %v5804_v13, %v5803_v9 }
0x43a8   :  { %v6890_v47 = vpop.f32.mrb[116].mxu0 }
0x43a9   :  { %v5856_v23 = vpop.f32.mrb[117].mxu0 }
0x43aa   :  { %7964 = vtanh.f32 %v5856_v23  ;;  %v6891_v53 = vpop.f32.mrb[118].mxu0 }
0x43ab   :  { %7966 = vtanh.f32 %v6890_v47  ;;  %v5859_v55 = vpop.f32.mrb[119].mxu0 }
0x43ac   :  { %7968 = vtanh.f32 %v5859_v55 }
0x43ad   :  { %7970 = vtanh.f32 %v6891_v53 }
0x43b4   :  { %v7965_v26 = vpop.eup %7964 }
0x43b5   :  { %v7967_v57 = vpop.eup %7966  ;;  %v5875_v56 = vmul.f32 %v7965_v26, %v8206_v38 }
0x43b6   :  { %v7969_v52 = vpop.eup %7968  ;;  %v5877_v58 = vmul.f32 %v7967_v57, %v8212_v46 }
0x43b7   :  { %v5876_v54 = vmul.f32 %v7969_v52, %v8208_v40  ;;  %v7971_v59 = vpop.eup %7970 }
0x43b8   :  { %v5878_v61 = vmul.f32 %v7971_v59, %v8215_v49 }
0x43b9   :  { %v5879_v51 = vadd.f32 %v5876_v54, %v5875_v56 }
0x43bb   :  { %v5880_v4 = vadd.f32 %v5879_v51, %v5877_v58 }
0x43bd   :  { %v5881_v0 = vadd.f32 %v5880_v4, %v5878_v61 }
0x43bf   :  { %v5882_v5 = vrot.slane %v5881_v0, 4 }
0x43c1   :  { %v5883_v3 = vadd.f32 %v5882_v5, %v5881_v0 }
0x43c3   :  { %v5884_v42 = vrot.slane %v5883_v3, 2 }
0x43c5   :  { %v5885_v11 = vadd.f32 %v5884_v42, %v5883_v3 }
0x43c7   :  { %v5886_v8 = vrot.slane %v5885_v11, 1 }
0x43c9   :  { %v5887_v10 = vadd.f32 %v5886_v8, %v5885_v11 }
0x43cb   :  { %7972 = vtanh.f32 %v5887_v10 }
0x43d5   :  { %v7973_v19 = vpop.eup %7972 }
0x43d6   :  { %v5889_v20 = vmul.f32 %v7973_v19, %v8227_v2 }
0x43d8   :  { %v5890_v28 = vadd.f32 %v5889_v20, %v5805_v6 }
0x43da   :  { %v5892_v29 = vmul.f32 %v5891_v24, %v5890_v28  ;;  %v5989_v60 = vmul.f32 2.0, %v5890_v28 }
0x43dc   :  { %v5893_v31 = vadd.f32 %v5892_v29, %v9463_v12  ;;  %v5990_v36 = vadd.f32 %v5989_v60, %v5988_v25 }
0x43de   :  { %5896 = vrot.lane.b32.xlu1 %v5893_v31, %s8071_s7  ;;  %v5906_v32 = vrot.slane %v5893_v31, %v8178_v15  ;;  %5894 = vrot.lane.b32.xlu0 %v5893_v31, %s8072_s18 }
0x43e0   :  { %v5908_v27 = vmul.f32 %v5906_v32, %v8184_v18  ;;  %v5909_v1 = vmul.f32 %v5906_v32, %v8190_v22  ;;  %v5910_v35 = vmul.f32 %v5906_v32, %v8182_v17  ;;  %v5911_v37 = vmul.f32 %v5906_v32, %v8188_v21  ;;  %v103_v17 = vld [vmem:[%s9565_s4] sm:$0x1]  ;;  %s6171_s4 = sld [smem:[#allocation6 + $0xf]] }
0x43e1   :  { %104 = vst [vmem:[#allocation7] sm:$0x1] %v103_v17 }
0x43e2   :  { %7974 = vtanh.f32 %v5908_v27 }
0x43e3   :  { %7976 = vtanh.f32 %v5909_v1 }
0x43e4   :  { %7978 = vtanh.f32 %v5910_v35 }
0x43e5   :  { %7980 = vtanh.f32 %v5911_v37 }
0x43e6   :  { %v5992_v8 = vstv %s6171_s4 }
0x43ec   :  { %v7975_v39 = vpop.eup %7974 }
0x43ed   :  { %v7977_v34 = vpop.eup %7976 }
0x43ee   :  { %v7979_v30 = vpop.eup %7978  ;;  %v5916_v41 = vpack.c.bf16 %v7977_v34, %v7975_v39 }
0x43ef   :  { %v7981_v43 = vpop.eup %7980 }
0x43f0   :  { %6892 = vmatprep.subr.bf16.mxu1 %v5916_v41  ;;  %v5917_v15 = vpack.c.bf16 %v7981_v43, %v7979_v30 }
0x43f1   :  { %6893 = vmatpush3.bf16.msra.mxu1 %v5916_v41 }
0x43f2   :  { %6894 = vmatprep.subr.bf16.mxu1 %v5917_v15 }
0x43f5   :  { %6895 = vmatpush3.bf16.msra.mxu1 %v5917_v15 }
0x43f8   :  { %6897 = vmatmul.mubr.msk.bf16.vlgmr.msra.gmra.mrb[116].mxu1 %vm135_vm0, %v8200_v33 }
0x4450   :  { %v5897_v0 = vpop.permute.xlu1 %5896  ;;  %v5895_v5 = vpop.permute.xlu0 %5894 }
0x44cb   :  { %v6898_v18 = vpop.f32.mrb[116].mxu1 }
0x44cc   :  { %v5952_v21 = vpop.f32.mrb[117].mxu1 }
0x44cd   :  { %7982 = vtanh.f32 %v5952_v21  ;;  %v6899_v22 = vpop.f32.mrb[118].mxu1 }
0x44ce   :  { %7984 = vtanh.f32 %v6898_v18  ;;  %v5955_v48 = vpop.f32.mrb[119].mxu1 }
0x44cf   :  { %7986 = vtanh.f32 %v5955_v48 }
0x44d0   :  { %7988 = vtanh.f32 %v6899_v22 }
0x44d7   :  { %v7983_v44 = vpop.eup %7982 }
0x44d8   :  { %v7985_v50 = vpop.eup %7984  ;;  %v5971_v23 = vmul.f32 %v7983_v44, %v8206_v38  ;;  %v5898_v38 = vadd.f32 %v5897_v0, %v5895_v5 }
0x44d9   :  { %v7987_v47 = vpop.eup %7986  ;;  %v5973_v55 = vmul.f32 %v7985_v50, %v8212_v46  ;;  %v5899_v46 = vmul.f32 %v5893_v31, %v8218_v62 }
0x44da   :  { %v5972_v33 = vmul.f32 %v7987_v47, %v8208_v40  ;;  %v7989_v53 = vpop.eup %7988  ;;  %v5900_v40 = vmul.f32 %v5898_v38, %v8220_v63 }
0x44db   :  { %v5974_v57 = vmul.f32 %v7989_v53, %v8215_v49 }
0x44dc   :  { %v5975_v26 = vadd.f32 %v5972_v33, %v5971_v23  ;;  %v5901_v42 = vadd.f32 %v5900_v40, %v5899_v46 }
0x44de   :  { %v5976_v52 = vadd.f32 %v5975_v26, %v5973_v55 }
0x44e0   :  { %v5977_v56 = vadd.f32 %v5976_v52, %v5974_v57 }
0x44e2   :  { %v5978_v54 = vrot.slane %v5977_v56, 4 }
0x44e4   :  { %v5979_v59 = vadd.f32 %v5978_v54, %v5977_v56 }
0x44e6   :  { %v5980_v58 = vrot.slane %v5979_v59, 2 }
0x44e8   :  { %v5981_v51 = vadd.f32 %v5980_v58, %v5979_v59 }
0x44ea   :  { %v5982_v61 = vrot.slane %v5981_v51, 1 }
0x44ec   :  { %v5983_v4 = vadd.f32 %v5982_v61, %v5981_v51 }
0x44ee   :  { %7990 = vtanh.f32 %v5983_v4 }
0x44f8   :  { %v7991_v3 = vpop.eup %7990 }
0x44f9   :  { %v5985_v49 = vmul.f32 %v7991_v3, %v8227_v2 }
0x44fb   :  { %v5986_v11 = vadd.f32 %v5985_v49, %v5901_v42 }
0x44fd   :  { %v5991_v10 = vadd.f32 %v5990_v36, %v5986_v11 }
0x44ff   :  { %v5993_v45 = vmul.f32 %v5992_v8, %v5991_v10 }
0x4501   :  { %v5994_v14 = vadd.f32 %v5993_v45, %v9463_v12 }
0x4503   :  { %5995 = vst [vmem:[#allocation7 + $0xf] sm:$0x1] %v5994_v14 }
0x4504   :  { %8051 = shalt.err (!%p8048_p10)
}
0x4505   :  { %s8052_s23 = scalar_lea.hbm %s9569_s8, 256 }
0x4506   :  { %p8053_p11 = scmp.ne.s32.totalorder %s9569_s8, %s8052_s23  ;;  %p8056_p12 = scmp.lt.u32.totalorder %s8052_s23, %s9569_s8 }
0x4508   :  { %p8058_p13 = pnand %p8056_p12, %p8053_p11 }
0x450a   :  { %8061 = shalt.err (!%p8058_p13)
}
0x450b   :  { %s8074_s28 = smov 128   ;;  %s8075_s29 = smov 8  }
0x450c   :  { %6007 = dma.vmem_to_hbm [thread:$0]  %s6002_s2, 256, %s9569_s8, [#allocation8], %s8074_s28, %s8074_s28, %s8075_s29  }
0x450d   :  { %8064 = dma.done.wait [#allocation8], 256  }
0x450e   :  { %8065 = vsyncadd [#allocation8], 4294967040 }
0x450f   :  { %6011 = vsyncpa [#allocation8], 1 }

</bundles_post_ra>
